<compile_context>
chip_gen: v5e
topology: v5e:2x2
jax: 0.10.0
libtpu: 0.0.40
codegen_flags: <defaults>
</compile_context>

<pallas_src>
import jax
import jax.numpy as jnp
from jax.experimental import pallas as pl
from jax.experimental.pallas import tpu as pltpu

# layers[0] is fixed to 18 by basis_function (3 coordinates x 6 Hermite wavelets)
LAYERS = (18, 32, 32, 2)


def _round_up(a, b):
    return ((a + b - 1) // b) * b


def _erf(x):
    # TODO(synk): lax.erf_p has no Mosaic lowering rule; use Abramowitz-Stegun
    # 7.1.26 polynomial (max abs err ~1.5e-7, far below the 1e-4 tolerance).
    # Exact divide kept (approx reciprocal would risk the tolerance).
    a1, a2, a3, a4, a5 = (0.254829592, -0.284496736, 1.421413741,
                          -1.453152027, 1.061405429)
    p = 0.3275911
    ax = jnp.abs(x)
    t = 1.0 / (1.0 + p * ax)
    poly = ((((a5 * t + a4) * t + a3) * t + a2) * t + a1) * t
    y = 1.0 - poly * jnp.exp(-ax * ax)
    return jnp.where(x < 0.0, -y, y)


def _net_kernel(xt_ref, *refs):
    o_ref = refs[-1]
    params = refs[:-1]                       # (w0, b0, w1, b1, ..., wL, bL)
    n_lin = len(params) // 2

    # Wavelet basis, computed once per coordinate (3 rows, batch on lanes).
    X = xt_ref[...]                          # (3, TM) f32
    X2 = X * X
    X3 = X2 * X
    X4 = X2 * X2
    X5 = X4 * X
    X6 = X4 * X2
    E = jnp.exp(-0.5 * X2)
    t1 = -X * E
    t2 = (1.0 - X2) * E
    t3 = (3.0 * X - X3) * E
    t4 = (6.0 * X2 - X4 - 3.0) * E
    t5 = (-X5 + 10.0 * X3 - 15.0 * X) * E
    t6 = (-X6 + 15.0 * X4 - 45.0 * X2 + 15.0) * E
    # Wavelet-major row order (row r = wavelet r//3 of coord r%3); the wrapper
    # permutes the first-layer weight columns to match, so no in-kernel shuffle.
    h = jnp.concatenate([t1, t2, t3, t4, t5, t6], axis=0)   # (18, TM)

    for i in range(n_lin):                   # statically unrolled MLP
        w = params[2 * i][...]               # (d_out, d_in)  (PyTorch layout)
        b = params[2 * i + 1][...]           # (d_out, 1)
        h = jnp.dot(w, h, preferred_element_type=jnp.float32) + b
        if i < n_lin - 1:                    # erf activation on all but last
            h = _erf(h)
    o_ref[...] = h                           # (d_out, TM) lane-dense store


def net_forward(x, weights, biases, *, tile_m=2048):
    """Pallas forward of Net: wavelet basis + erf-MLP fused in one kernel.

    weights[i] is PyTorch-layout (out_features, in_features); biases[i] is (out,).
    """
    assert tile_m % 128 == 0
    n = x.shape[0]
    d_out = weights[-1].shape[0]

    # Keep tiles large (amortize ~0.35us/step) but never larger than needed;
    # with the default 2048 a real workload still gets >=2 grid steps so the
    # "parallel" axis can shard across v7x's two TensorCores.
    tm = min(tile_m, _round_up(max(n, 1), 128))
    n_pad = _round_up(n, tm)

    # [3, N] transposed input: batch on the lane axis.
    xt = jnp.pad(x.astype(jnp.float32).T, ((0, 0), (0, n_pad - n)))

    # Permute first-layer input columns from PyTorch's coord-major basis order
    # (col f = coord f//6, wavelet f%6) to the kernel's wavelet-major order
    # (row r = wavelet r//3, coord r%3).
    perm = jnp.array([(r % 3) * 6 + (r // 3) for r in range(18)], dtype=jnp.int32)
    ws = [weights[0][:, perm].astype(jnp.float32)]
    ws += [w.astype(jnp.float32) for w in weights[1:]]
    bs = [b.astype(jnp.float32).reshape(-1, 1) for b in biases]

    in_specs = [pl.BlockSpec((3, tm), lambda i: (0, i))]     # x tile
    flat_params = []
    for w, b in zip(ws, bs):
        in_specs.append(pl.BlockSpec(w.shape, lambda i: (0, 0)))   # full weight
        in_specs.append(pl.BlockSpec(b.shape, lambda i: (0, 0)))   # full bias
        flat_params += [w, b]

    # Advisory cost estimate so XLA can schedule around the kernel.
    matmul_flops = 2 * sum(int(w.shape[0]) * int(w.shape[1]) for w in ws)
    erf_width = sum(int(w.shape[0]) for w in ws[:-1])        # hidden widths
    param_bytes = sum(int(p.size) * 4 for p in flat_params)
    cost = pl.CostEstimate(
        flops=n_pad * (matmul_flops + 40 + 14 * erf_width),
        transcendentals=n_pad * (3 + erf_width),
        bytes_accessed=n_pad * 4 * (3 + d_out) + param_bytes,
    )

    out_t = pl.pallas_call(
        _net_kernel,
        out_shape=jax.ShapeDtypeStruct((d_out, n_pad), jnp.float32),
        grid_spec=pltpu.PrefetchScalarGridSpec(
            num_scalar_prefetch=0,
            grid=(n_pad // tm,),
            in_specs=in_specs,
            out_specs=pl.BlockSpec((d_out, tm), lambda i: (0, i)),
        ),
        compiler_params=pltpu.CompilerParams(
            dimension_semantics=("parallel",)),
        cost_estimate=cost,
    )(xt, *flat_params)

    return out_t[:, :n].T                                    # (n, d_out)


def init_params(key, layers):
    """Deterministic xavier_normal_(gain=1.0) weights (out, in), zero biases."""
    weights, biases = [], []
    for i in range(len(layers) - 1):
        key, sub = jax.random.split(key)
        fan_in, fan_out = layers[i], layers[i + 1]
        std = (2.0 / (fan_in + fan_out)) ** 0.5
        weights.append(std * jax.random.normal(sub, (fan_out, fan_in), jnp.float32))
        biases.append(jnp.zeros((fan_out,), jnp.float32))
    return weights, biases


def ref_forward(x, weights, biases):
    """Pure-JAX reference mirroring the PyTorch forward exactly."""
    X = x.reshape(-1, 3, 1).astype(jnp.float32)
    E = jnp.exp(-X * X / 2)
    t1 = -X * E
    t2 = (1 - X * X) * E
    t3 = (3 * X - X ** 3) * E
    t4 = (6 * X * X - X ** 4 - 3) * E
    t5 = (-X ** 5 + 10 * X ** 3 - 15 * X) * E
    t6 = (-X ** 6 + 15 * X ** 4 - 45 * X * X + 15) * E
    h = jnp.concatenate([t1, t2, t3, t4, t5, t6], axis=2).reshape(-1, 18)
    for i, (w, b) in enumerate(zip(weights, biases)):
        h = h @ w.T + b
        if i < len(weights) - 1:
            h = jax.scipy.special.erf(h)
    return h


if __name__ == "__main__":
    key = jax.random.PRNGKey(0)
    kx, kp = jax.random.split(key)

    N = 4096                                   # 2 grid steps at tile_m=2048
    x = jax.random.normal(kx, (N, 3), dtype=jnp.float32)   # (x, y, t) points
    weights, biases = init_params(kp, LAYERS)

    out = net_forward(x, weights, biases)
    out = jax.block_until_ready(out)

    ref = ref_forward(x, weights, biases)
    assert out.shape == (N, LAYERS[-1])
    max_err = float(jnp.max(jnp.abs(out - ref)))
    if max_err < 1e-4:
        print("KERNEL_OK")
    else:
        print(f"MAX_ERR={max_err}")
</pallas_src>

<mosaic_0001>
module attributes {stable_mosaic.version = 11 : i64} {
  func.func @_net_kernel(%arg0: i32, %arg1: memref<3x2048xf32, #tpu.memory_space<vmem>>, %arg2: memref<32x18xf32, #tpu.memory_space<vmem>>, %arg3: memref<32x1xf32, #tpu.memory_space<vmem>>, %arg4: memref<32x32xf32, #tpu.memory_space<vmem>>, %arg5: memref<32x1xf32, #tpu.memory_space<vmem>>, %arg6: memref<2x32xf32, #tpu.memory_space<vmem>>, %arg7: memref<2x1xf32, #tpu.memory_space<vmem>>, %arg8: memref<2x2048xf32, #tpu.memory_space<vmem>>) attributes {dimension_semantics = [#tpu.dimension_semantics<parallel>], iteration_bounds = array<i64: 2>, scalar_prefetch = 0 : i64, scratch_operands = 0 : i64, tpu.core_type = #tpu.core_type<tc>, window_params = [{transform_indices = @transform_0, window_bounds = array<i64: 3, 2048>}, {pipeline_mode = #tpu.pipeline_mode<synchronous>, transform_indices = @transform_1, window_bounds = array<i64: 32, 18>}, {pipeline_mode = #tpu.pipeline_mode<synchronous>, transform_indices = @transform_2, window_bounds = array<i64: 32, 1>}, {pipeline_mode = #tpu.pipeline_mode<synchronous>, transform_indices = @transform_3, window_bounds = array<i64: 32, 32>}, {pipeline_mode = #tpu.pipeline_mode<synchronous>, transform_indices = @transform_4, window_bounds = array<i64: 32, 1>}, {pipeline_mode = #tpu.pipeline_mode<synchronous>, transform_indices = @transform_5, window_bounds = array<i64: 2, 32>}, {pipeline_mode = #tpu.pipeline_mode<synchronous>, transform_indices = @transform_6, window_bounds = array<i64: 2, 1>}, {transform_indices = @transform_7, window_bounds = array<i64: 2, 2048>}]} {
    %c0 = arith.constant 0 : index
    %c0_0 = arith.constant 0 : index
    %0 = vector.load %arg1[%c0, %c0_0] : memref<3x2048xf32, #tpu.memory_space<vmem>>, vector<3x2048xf32>
    %1 = arith.mulf %0, %0 : vector<3x2048xf32>
    %2 = arith.mulf %1, %0 : vector<3x2048xf32>
    %3 = arith.mulf %1, %1 : vector<3x2048xf32>
    %4 = arith.mulf %3, %0 : vector<3x2048xf32>
    %5 = arith.mulf %3, %1 : vector<3x2048xf32>
    %cst = arith.constant -5.000000e-01 : f32
    %6 = vector.broadcast %cst : f32 to vector<3x2048xf32>
    %7 = arith.mulf %6, %1 : vector<3x2048xf32>
    %8 = math.exp %7 : vector<3x2048xf32>
    %cst_1 = arith.constant 0.000000e+00 : f32
    %9 = vector.broadcast %cst_1 : f32 to vector<3x2048xf32>
    %10 = arith.subf %9, %0 : vector<3x2048xf32>
    %11 = arith.mulf %10, %8 : vector<3x2048xf32>
    %cst_2 = arith.constant 1.000000e+00 : f32
    %12 = vector.broadcast %cst_2 : f32 to vector<3x2048xf32>
    %13 = arith.subf %12, %1 : vector<3x2048xf32>
    %14 = arith.mulf %13, %8 : vector<3x2048xf32>
    %cst_3 = arith.constant 3.000000e+00 : f32
    %15 = vector.broadcast %cst_3 : f32 to vector<3x2048xf32>
    %16 = arith.mulf %15, %0 : vector<3x2048xf32>
    %17 = arith.subf %16, %2 : vector<3x2048xf32>
    %18 = arith.mulf %17, %8 : vector<3x2048xf32>
    %cst_4 = arith.constant 6.000000e+00 : f32
    %19 = vector.broadcast %cst_4 : f32 to vector<3x2048xf32>
    %20 = arith.mulf %19, %1 : vector<3x2048xf32>
    %21 = arith.subf %20, %3 : vector<3x2048xf32>
    %cst_5 = arith.constant 3.000000e+00 : f32
    %22 = vector.broadcast %cst_5 : f32 to vector<3x2048xf32>
    %23 = arith.subf %21, %22 : vector<3x2048xf32>
    %24 = arith.mulf %23, %8 : vector<3x2048xf32>
    %cst_6 = arith.constant 0.000000e+00 : f32
    %25 = vector.broadcast %cst_6 : f32 to vector<3x2048xf32>
    %26 = arith.subf %25, %4 : vector<3x2048xf32>
    %cst_7 = arith.constant 1.000000e+01 : f32
    %27 = vector.broadcast %cst_7 : f32 to vector<3x2048xf32>
    %28 = arith.mulf %27, %2 : vector<3x2048xf32>
    %29 = arith.addf %26, %28 : vector<3x2048xf32>
    %cst_8 = arith.constant 1.500000e+01 : f32
    %30 = vector.broadcast %cst_8 : f32 to vector<3x2048xf32>
    %31 = arith.mulf %30, %0 : vector<3x2048xf32>
    %32 = arith.subf %29, %31 : vector<3x2048xf32>
    %33 = arith.mulf %32, %8 : vector<3x2048xf32>
    %cst_9 = arith.constant 0.000000e+00 : f32
    %34 = vector.broadcast %cst_9 : f32 to vector<3x2048xf32>
    %35 = arith.subf %34, %5 : vector<3x2048xf32>
    %cst_10 = arith.constant 1.500000e+01 : f32
    %36 = vector.broadcast %cst_10 : f32 to vector<3x2048xf32>
    %37 = arith.mulf %36, %3 : vector<3x2048xf32>
    %38 = arith.addf %35, %37 : vector<3x2048xf32>
    %cst_11 = arith.constant 4.500000e+01 : f32
    %39 = vector.broadcast %cst_11 : f32 to vector<3x2048xf32>
    %40 = arith.mulf %39, %1 : vector<3x2048xf32>
    %41 = arith.subf %38, %40 : vector<3x2048xf32>
    %cst_12 = arith.constant 1.500000e+01 : f32
    %42 = vector.broadcast %cst_12 : f32 to vector<3x2048xf32>
    %43 = arith.addf %41, %42 : vector<3x2048xf32>
    %44 = arith.mulf %43, %8 : vector<3x2048xf32>
    %45 = tpu.concatenate %11, %14, %18, %24, %33, %44 in 0 : vector<3x2048xf32>, vector<3x2048xf32>, vector<3x2048xf32>, vector<3x2048xf32>, vector<3x2048xf32>, vector<3x2048xf32> -> vector<18x2048xf32>
    %c0_13 = arith.constant 0 : index
    %c0_14 = arith.constant 0 : index
    %46 = vector.load %arg2[%c0_13, %c0_14] : memref<32x18xf32, #tpu.memory_space<vmem>>, vector<32x18xf32>
    %c0_15 = arith.constant 0 : index
    %c0_16 = arith.constant 0 : index
    %47 = vector.load %arg3[%c0_15, %c0_16] : memref<32x1xf32, #tpu.memory_space<vmem>>, vector<32x1xf32>
    %cst_17 = arith.constant dense<0.000000e+00> : vector<32x2048xf32>
    %48 = tpu.matmul %46, %45, %cst_17 {dimension_numbers = #tpu.dot_dimension_numbers<[1], [0], [0], [1], [0, 0, 1, 1], [], []>} : vector<32x18xf32>, vector<18x2048xf32>, vector<32x2048xf32> -> vector<32x2048xf32>
    %49 = vector.broadcast %47 : vector<32x1xf32> to vector<32x2048xf32>
    %50 = arith.addf %48, %49 : vector<32x2048xf32>
    %51 = math.absf %50 : vector<32x2048xf32>
    %cst_18 = arith.constant 0.327591091 : f32
    %52 = vector.broadcast %cst_18 : f32 to vector<32x2048xf32>
    %53 = arith.mulf %52, %51 : vector<32x2048xf32>
    %cst_19 = arith.constant 1.000000e+00 : f32
    %54 = vector.broadcast %cst_19 : f32 to vector<32x2048xf32>
    %55 = arith.addf %54, %53 : vector<32x2048xf32>
    %cst_20 = arith.constant 1.000000e+00 : f32
    %56 = vector.broadcast %cst_20 : f32 to vector<32x2048xf32>
    %57 = arith.divf %56, %55 : vector<32x2048xf32>
    %cst_21 = arith.constant 1.06140542 : f32
    %58 = vector.broadcast %cst_21 : f32 to vector<32x2048xf32>
    %59 = arith.mulf %58, %57 : vector<32x2048xf32>
    %cst_22 = arith.constant -1.45315206 : f32
    %60 = vector.broadcast %cst_22 : f32 to vector<32x2048xf32>
    %61 = arith.addf %59, %60 : vector<32x2048xf32>
    %62 = arith.mulf %61, %57 : vector<32x2048xf32>
    %cst_23 = arith.constant 1.42141378 : f32
    %63 = vector.broadcast %cst_23 : f32 to vector<32x2048xf32>
    %64 = arith.addf %62, %63 : vector<32x2048xf32>
    %65 = arith.mulf %64, %57 : vector<32x2048xf32>
    %cst_24 = arith.constant -0.284496725 : f32
    %66 = vector.broadcast %cst_24 : f32 to vector<32x2048xf32>
    %67 = arith.addf %65, %66 : vector<32x2048xf32>
    %68 = arith.mulf %67, %57 : vector<32x2048xf32>
    %cst_25 = arith.constant 0.254829586 : f32
    %69 = vector.broadcast %cst_25 : f32 to vector<32x2048xf32>
    %70 = arith.addf %68, %69 : vector<32x2048xf32>
    %71 = arith.mulf %70, %57 : vector<32x2048xf32>
    %cst_26 = arith.constant 0.000000e+00 : f32
    %72 = vector.broadcast %cst_26 : f32 to vector<32x2048xf32>
    %73 = arith.subf %72, %51 : vector<32x2048xf32>
    %74 = arith.mulf %73, %51 : vector<32x2048xf32>
    %75 = math.exp %74 : vector<32x2048xf32>
    %76 = arith.mulf %71, %75 : vector<32x2048xf32>
    %cst_27 = arith.constant 1.000000e+00 : f32
    %77 = vector.broadcast %cst_27 : f32 to vector<32x2048xf32>
    %78 = arith.subf %77, %76 : vector<32x2048xf32>
    %cst_28 = arith.constant 0.000000e+00 : f32
    %79 = vector.broadcast %cst_28 : f32 to vector<32x2048xf32>
    %80 = arith.cmpf olt, %50, %79 : vector<32x2048xf32>
    %cst_29 = arith.constant 0.000000e+00 : f32
    %81 = vector.broadcast %cst_29 : f32 to vector<32x2048xf32>
    %82 = arith.subf %81, %78 : vector<32x2048xf32>
    %83 = arith.select %80, %82, %78 : vector<32x2048xi1>, vector<32x2048xf32>
    %c0_30 = arith.constant 0 : index
    %c0_31 = arith.constant 0 : index
    %84 = vector.load %arg4[%c0_30, %c0_31] : memref<32x32xf32, #tpu.memory_space<vmem>>, vector<32x32xf32>
    %c0_32 = arith.constant 0 : index
    %c0_33 = arith.constant 0 : index
    %85 = vector.load %arg5[%c0_32, %c0_33] : memref<32x1xf32, #tpu.memory_space<vmem>>, vector<32x1xf32>
    %cst_34 = arith.constant dense<0.000000e+00> : vector<32x2048xf32>
    %86 = tpu.matmul %84, %83, %cst_34 {dimension_numbers = #tpu.dot_dimension_numbers<[1], [0], [0], [1], [0, 0, 1, 1], [], []>} : vector<32x32xf32>, vector<32x2048xf32>, vector<32x2048xf32> -> vector<32x2048xf32>
    %87 = vector.broadcast %85 : vector<32x1xf32> to vector<32x2048xf32>
    %88 = arith.addf %86, %87 : vector<32x2048xf32>
    %89 = math.absf %88 : vector<32x2048xf32>
    %cst_35 = arith.constant 0.327591091 : f32
    %90 = vector.broadcast %cst_35 : f32 to vector<32x2048xf32>
    %91 = arith.mulf %90, %89 : vector<32x2048xf32>
    %cst_36 = arith.constant 1.000000e+00 : f32
    %92 = vector.broadcast %cst_36 : f32 to vector<32x2048xf32>
    %93 = arith.addf %92, %91 : vector<32x2048xf32>
    %cst_37 = arith.constant 1.000000e+00 : f32
    %94 = vector.broadcast %cst_37 : f32 to vector<32x2048xf32>
    %95 = arith.divf %94, %93 : vector<32x2048xf32>
    %cst_38 = arith.constant 1.06140542 : f32
    %96 = vector.broadcast %cst_38 : f32 to vector<32x2048xf32>
    %97 = arith.mulf %96, %95 : vector<32x2048xf32>
    %cst_39 = arith.constant -1.45315206 : f32
    %98 = vector.broadcast %cst_39 : f32 to vector<32x2048xf32>
    %99 = arith.addf %97, %98 : vector<32x2048xf32>
    %100 = arith.mulf %99, %95 : vector<32x2048xf32>
    %cst_40 = arith.constant 1.42141378 : f32
    %101 = vector.broadcast %cst_40 : f32 to vector<32x2048xf32>
    %102 = arith.addf %100, %101 : vector<32x2048xf32>
    %103 = arith.mulf %102, %95 : vector<32x2048xf32>
    %cst_41 = arith.constant -0.284496725 : f32
    %104 = vector.broadcast %cst_41 : f32 to vector<32x2048xf32>
    %105 = arith.addf %103, %104 : vector<32x2048xf32>
    %106 = arith.mulf %105, %95 : vector<32x2048xf32>
    %cst_42 = arith.constant 0.254829586 : f32
    %107 = vector.broadcast %cst_42 : f32 to vector<32x2048xf32>
    %108 = arith.addf %106, %107 : vector<32x2048xf32>
    %109 = arith.mulf %108, %95 : vector<32x2048xf32>
    %cst_43 = arith.constant 0.000000e+00 : f32
    %110 = vector.broadcast %cst_43 : f32 to vector<32x2048xf32>
    %111 = arith.subf %110, %89 : vector<32x2048xf32>
    %112 = arith.mulf %111, %89 : vector<32x2048xf32>
    %113 = math.exp %112 : vector<32x2048xf32>
    %114 = arith.mulf %109, %113 : vector<32x2048xf32>
    %cst_44 = arith.constant 1.000000e+00 : f32
    %115 = vector.broadcast %cst_44 : f32 to vector<32x2048xf32>
    %116 = arith.subf %115, %114 : vector<32x2048xf32>
    %cst_45 = arith.constant 0.000000e+00 : f32
    %117 = vector.broadcast %cst_45 : f32 to vector<32x2048xf32>
    %118 = arith.cmpf olt, %88, %117 : vector<32x2048xf32>
    %cst_46 = arith.constant 0.000000e+00 : f32
    %119 = vector.broadcast %cst_46 : f32 to vector<32x2048xf32>
    %120 = arith.subf %119, %116 : vector<32x2048xf32>
    %121 = arith.select %118, %120, %116 : vector<32x2048xi1>, vector<32x2048xf32>
    %c0_47 = arith.constant 0 : index
    %c0_48 = arith.constant 0 : index
    %122 = vector.load %arg6[%c0_47, %c0_48] : memref<2x32xf32, #tpu.memory_space<vmem>>, vector<2x32xf32>
    %c0_49 = arith.constant 0 : index
    %c0_50 = arith.constant 0 : index
    %123 = vector.load %arg7[%c0_49, %c0_50] : memref<2x1xf32, #tpu.memory_space<vmem>>, vector<2x1xf32>
    %cst_51 = arith.constant dense<0.000000e+00> : vector<2x2048xf32>
    %124 = tpu.matmul %122, %121, %cst_51 {dimension_numbers = #tpu.dot_dimension_numbers<[1], [0], [0], [1], [0, 0, 1, 1], [], []>} : vector<2x32xf32>, vector<32x2048xf32>, vector<2x2048xf32> -> vector<2x2048xf32>
    %125 = vector.broadcast %123 : vector<2x1xf32> to vector<2x2048xf32>
    %126 = arith.addf %124, %125 : vector<2x2048xf32>
    %c0_52 = arith.constant 0 : index
    %c0_53 = arith.constant 0 : index
    %127 = vector.load %arg8[%c0_52, %c0_53] : memref<2x2048xf32, #tpu.memory_space<vmem>>, vector<2x2048xf32>
    tpu.vector_store %arg8[%c0_52, %c0_53], %126 {strides = array<i32>} : memref<2x2048xf32, #tpu.memory_space<vmem>>, vector<2x2048xf32>,
    return
  }
  func.func @transform_0(%arg0: i32) -> (i32, i32) {
    %c0_i32 = arith.constant 0 : i32
    %c0_i32_0 = arith.constant 0 : i32
    return %c0_i32, %arg0 : i32, i32
  }
  func.func @transform_1(%arg0: i32) -> (i32, i32) {
    %c0_i32 = arith.constant 0 : i32
    %c0_i32_0 = arith.constant 0 : i32
    %c0_i32_1 = arith.constant 0 : i32
    return %c0_i32, %c0_i32_0 : i32, i32
  }
  func.func @transform_2(%arg0: i32) -> (i32, i32) {
    %c0_i32 = arith.constant 0 : i32
    %c0_i32_0 = arith.constant 0 : i32
    %c0_i32_1 = arith.constant 0 : i32
    return %c0_i32, %c0_i32_0 : i32, i32
  }
  func.func @transform_3(%arg0: i32) -> (i32, i32) {
    %c0_i32 = arith.constant 0 : i32
    %c0_i32_0 = arith.constant 0 : i32
    %c0_i32_1 = arith.constant 0 : i32
    return %c0_i32, %c0_i32_0 : i32, i32
  }
  func.func @transform_4(%arg0: i32) -> (i32, i32) {
    %c0_i32 = arith.constant 0 : i32
    %c0_i32_0 = arith.constant 0 : i32
    %c0_i32_1 = arith.constant 0 : i32
    return %c0_i32, %c0_i32_0 : i32, i32
  }
  func.func @transform_5(%arg0: i32) -> (i32, i32) {
    %c0_i32 = arith.constant 0 : i32
    %c0_i32_0 = arith.constant 0 : i32
    %c0_i32_1 = arith.constant 0 : i32
    return %c0_i32, %c0_i32_0 : i32, i32
  }
  func.func @transform_6(%arg0: i32) -> (i32, i32) {
    %c0_i32 = arith.constant 0 : i32
    %c0_i32_0 = arith.constant 0 : i32
    %c0_i32_1 = arith.constant 0 : i32
    return %c0_i32, %c0_i32_0 : i32, i32
  }
  func.func @transform_7(%arg0: i32) -> (i32, i32) {
    %c0_i32 = arith.constant 0 : i32
    %c0_i32_0 = arith.constant 0 : i32
    return %c0_i32, %arg0 : i32, i32
  }
}

</mosaic_0001>

<bundles_post_ra>
// kernel: tpu_custom_call.1
= control target key start
LH: loop header
LB: loop body
LE: loop exit
PB: predicated region body
PF: predicated region fallthrough
CT: control target
= control target key end

     0   :  { %12 = vsyncpa [#allocation3], 0  ;;  %s15354_s0 = inlined_call_operand.hbm [shape: f32[3,4096], index: 0, kind: input, shape index: {}]   ;;  %s15355_s1 = inlined_call_operand.vmem [shape: f32[32,18], index: 1, kind: input, shape index: {}]   ;;  %s15356_s2 = inlined_call_operand.vmem [shape: f32[32,1], index: 2, kind: input, shape index: {}]   ;;  %s15357_s3 = inlined_call_operand.vmem [shape: f32[32,32], index: 3, kind: input, shape index: {}]   ;;  %s15358_s4 = inlined_call_operand.vmem [shape: f32[32,1], index: 4, kind: input, shape index: {}]   ;;  %s15359_s5 = inlined_call_operand.vmem [shape: f32[2,32], index: 5, kind: input, shape index: {}]   ;;  %s15360_s6 = inlined_call_operand.vmem [shape: f32[2,1], index: 6, kind: input, shape index: {}]   ;;  %s15361_s7 = inlined_call_operand.hbm [shape: f32[2,4096], index: 7, kind: output, shape index: {}]  }
   0x1   :  { %14 = vsyncpa [#allocation3 + $0x1], 0 }
   0x2   :  { %15 = vsyncpa [#allocation4], 0 }
   0x3   :  { %17 = vsyncpa [#allocation4 + $0x1], 0  ;;  %s8050_s24 = smov 0   ;;  %s8052_s25 = smov 0  }
   0x4   :  { %s8054_s26 = smov 0   ;;  %s8056_s27 = smov 0  }
   0x5 LB: > { %s8071_s28 = sadd.s32 4294967295, %s8007_s27   ;;  %s7136_s29 = sadd.s32 4294967294, %s8007_s27   ;;  %s8007_s27 = sphi %s8056_s27, %s17430_s27   ;;  %s8003_s26 = sphi %s8054_s26, %s17429_s26   ;;  %s7999_s25 = sphi %s8052_s25, %s17428_s25   ;;  %s7995_s24 = sphi %s8050_s24, %s17427_s24  }
   0x6   : > { %s8075_s30 = sadd.s32 1, %s8007_s27   ;;  %s30_s8 = sadd.s32 1, %s8003_s26 }
   0x7   : > { %s27_s9 = ssub.s32 %s8007_s27, %s8075_s30  ;;  %p37_p0 = scmp.ne.s32.totalorder %s8003_s26, %s7999_s25 }
   0x8   : > { %p28_p1 = scmp.eq.s32.totalorder %s27_s9, 0  ;;  %p38_p2 = scmp.eq.s32.totalorder %s8007_s27, 0 }
   0x9   : > { %p43_p3 = scmp.ne.s32.totalorder %s7999_s25, %s7995_s24  ;;  %p44_p4 = scmp.eq.s32.totalorder %s8071_s28, 0 }
   0xa   : > { %s8087_s10 = scalar_select %p28_p1, %s8003_s26, %s30_s8  }
   0xb   : > { %p8089_p5 = por %p38_p2, %p37_p0  ;;  %p8093_p6 = por %p44_p4, %p43_p3 }
   0xc   : > { %15966 = sst [smem:[#allocation8_spill]] %s8087_s10  ;;  %p193_p7 = scmp.eq.s32.totalorder %s8071_s28, 1 }
   0xd   : > { %p199_p8 = scmp.eq.s32.totalorder %s7136_s29, 1  ;;  %p7332_p10 = scmp.lt.s32.totalorder %s8007_s27, 2 }
   0xe   : > { %p8100_p11 = por %p193_p7, %p37_p0  ;;  %s237_s15 = sand.u32 1, %s8003_s26  }
   0xf   : > { %p8104_p12 = por %p199_p8, %p43_p3  ;;  %s7318_s16 = sshll.u32 %s8007_s27, 6 }
  0x10   : > { %s7139_s17 = sshll.u32 %s237_s15, 6  ;;  %s246_s20 = scalar_lea.hbm %s15354_s0, %s7318_s16 }
  0x11   : > { %s248_s21 = sshll.u32 %s246_s20, 4  ;;  %s241_s22 = scalar_lea.vmem [#allocation2], %s7139_s17  ;;  %s249_s21 = int_to_ptr.hbm [resolvable:$true] %s248_s21 }
  0x12   : > { %s250_s23 = sshll.u32 %s241_s22, 4  ;;  %p8115_p13 = pnand %p7332_p10, %p8089_p5  ;;  %s251_s23 = int_to_ptr.vmem [resolvable:$true] %s250_s23 }
  0x13   : > { %p7142_p0 = scmp.ge.s32.totalorder %s8007_s27, 1  ;;  %p255_p1 = scmp.lt.s32.totalorder %s8007_s27, 3 }
  0x14   : > { %s238_s8 = scalar_lea.sflag [#allocation3], %s237_s15  ;;  %s7911_s9 = sshra.s32 %s249_s21, 4  ;;  %s7912_s9 = int_to_ptr.hbm [resolvable:$true] %s7911_s9 }
  0x15   : > { %s7913_s10 = scalar_lea.hbm %s7912_s9, 64  ;;  %p7915_p3 = pneg %p8115_p13 }
  0x16   : > { %p7914_p2 = scmp.ne.s32.totalorder %s7912_s9, %s7913_s10  ;;  %s7918_s11 = scalar_lea.hbm %s15354_s0, 128 }
  0x17   : > { %p7919_p5 = scmp.lt.s32.totalorder %s7912_s9, %s15354_s0  ;;  %p7920_p8 = scmp.lt.s32.totalorder %s7918_s11, %s7913_s10 }
  0x18   : > { %p7916_p4 = pnand %p7915_p3, %p7914_p2 }
  0x19   : > { %p7921_p10 = por %p7920_p8, %p7919_p5 }
  0x1a   : > { %p7917_p7 = pneg %p7916_p4 }
  0x1c   : > { %p7922_p9 = pnand %p7921_p10, %p7917_p7 }
  0x1e   : > { %7925 = shalt.err (!%p7922_p9)
}
  0x1f   : > { %7327 = dma.hbm_to_vmem [thread:$0]  (!%p8115_p13), %s249_s21, 1024, %s251_s23, %s238_s8  }
  0x20   : > { %p256_p2 = pnand %p7142_p0, %p255_p1 }
  0x22   : > { %259 = sbr.rel (%p256_p2) target bundleno = 1652 (0x674), region = 48 }
  0x27   : > { %s8136_s15 = sand.u32 1, %s7999_s25  }
  0x28   : > { %s7143_s20 = sshll.u32 %s8136_s15, 6  ;;  %s262_s10 = scalar_lea.sflag [#allocation3], %s8136_s15 }
  0x29   : > { %s8140_s22 = scalar_lea.vmem [#allocation2], %s7143_s20 }
  0x2a   : > { %7986 = dma.done.wait (%p8093_p6), %s262_s10, 1024  }
  0x2b   : > { %7988 = vsyncadd (%p8093_p6), %s262_s10, 4294966272  ;;  %v8147_v0 = vld [vmem:[%s8140_s22] sm:$0x77]  ;;  %v8193_v28 = vld [vmem:[%s8140_s22 + $0x8] sm:$0x77]  ;;  %vm968_vm0 = vcmask 1040384  }
  0x2c   : > { %v8150_v1 = vld [vmem:[%s8140_s22 + $0x20] sm:$0x77]  ;;  %v8154_v2 = vmul.f32 %v8147_v0, %v8147_v0  ;;  %v483_v21 = vmul.f32 15.0, %v8147_v0  ;;  %v371_v29 = vsub.f32 0.0, %v8147_v0  ;;  %v8199_v32 = vld [vmem:[%s8140_s22 + $0x28] sm:$0x77]  ;;  %v8205_v40 = vmul.f32 %v8193_v28, %v8193_v28 }
  0x2d   : > { %v8158_v3 = vmul.f32 %v8150_v1, %v8150_v1  ;;  %v487_v22 = vmul.f32 15.0, %v8150_v1  ;;  %v8209_v41 = vmul.f32 %v8199_v32, %v8199_v32  ;;  %v8215_v44 = vld [vmem:[%s8140_s22 + $0x18] sm:$0x77]  ;;  %v375_v45 = vsub.f32 0.0, %v8150_v1  ;;  %v8219_v46 = vld [vmem:[%s8140_s22 + $0x10] sm:$0x77] }
  0x2e   : > { %v8162_v4 = vmul.f32 %v8154_v2, %v8154_v2  ;;  %v347_v6 = vmul.f32 -0.5, %v8154_v2  ;;  %v8180_v12 = vmul.f32 %v8154_v2, %v8147_v0  ;;  %v531_v30 = vmul.f32 45.0, %v8154_v2  ;;  %v8247_v63 = vld [vmem:[%s8140_s22 + $0x38] sm:$0x77]  ;;  %s7144_s8 = sshll.u32 %s8136_s15, 5  ;;  %s7319_s11 = sshll.u32 %s8071_s28, 5 }
  0x2f   : > { %v8166_v5 = vmul.f32 %v8158_v3, %v8158_v3  ;;  %v351_v7 = vmul.f32 -0.5, %v8158_v3  ;;  %v8184_v13 = vmul.f32 %v8158_v3, %v8150_v1  ;;  %v535_v31 = vmul.f32 45.0, %v8158_v3  ;;  %s15280_s9 = scalar_lea.vmem [#allocation5], %s7144_s8  ;;  %s7061_s20 = scalar_lea.hbm %s15361_s7, %s7319_s11 }
  0x30   : > { %v331_v8 = vmul.f32 %v8162_v4, %v8147_v0  ;;  %v339_v10 = vmul.f32 %v8162_v4, %v8154_v2  ;;  %v355_v14 = vmul.f32 1.442695, %v347_v6  ;;  %v467_v18 = vmul.f32 10.0, %v8180_v12  ;;  %v8250_v6 = vld [vmem:[%s8140_s22 + $0x30] sm:$0x77]  ;;  %s7063_s10 = sshll.u32 %s15280_s9, 4  ;;  %s7064_s10 = int_to_ptr.vmem [resolvable:$true] %s7063_s10 }
  0x31   : > { %v335_v9 = vmul.f32 %v8166_v5, %v8150_v1  ;;  %v343_v11 = vmul.f32 %v8166_v5, %v8158_v3  ;;  %v363_v15 = vmul.f32 1.442695, %v351_v7  ;;  %v471_v19 = vmul.f32 10.0, %v8184_v13  ;;  %s7065_s22 = sshll.u32 %s7061_s20, 4  ;;  %s7050_s28 = scalar_lea.sflag [#allocation4], %s8136_s15  ;;  %s7066_s22 = int_to_ptr.hbm [resolvable:$true] %s7065_s22 }
  0x32   : > { %v459_v16 = vsub.f32 0.0, %v331_v8  ;;  %7370 = vpow2.f32 %v355_v14  ;;  %v507_v20 = vsub.f32 0.0, %v339_v10  ;;  %v515_v26 = vmul.f32 15.0, %v8162_v4  ;;  %s7955_s12 = sshra.s32 %s7066_s22, 4  ;;  %s7961_s8 = scalar_lea.hbm %s15361_s7, 64  ;;  %s7956_s12 = int_to_ptr.hbm [resolvable:$true] %s7955_s12 }
  0x33   : > { %v463_v17 = vsub.f32 0.0, %v335_v9  ;;  %7372 = vpow2.f32 %v363_v15  ;;  %v511_v23 = vsub.f32 0.0, %v343_v11  ;;  %v519_v27 = vmul.f32 15.0, %v8166_v5  ;;  %s7957_s21 = scalar_lea.hbm %s7956_s12, 32  ;;  %p7962_p0 = scmp.lt.s32.totalorder %s7956_s12, %s15361_s7 }
  0x34   : > { %v475_v24 = vadd.f32 %v467_v18, %v459_v16  ;;  %v523_v33 = vadd.f32 %v515_v26, %v507_v20  ;;  %v348_v51 = vmul.f32 -0.5, %v8205_v40  ;;  %v352_v52 = vmul.f32 -0.5, %v8209_v41  ;;  %p7958_p6 = scmp.ne.s32.totalorder %s7956_s12, %s7957_s21  ;;  %p7963_p1 = scmp.lt.s32.totalorder %s7961_s8, %s7957_s21 }
  0x35   : > { %v479_v25 = vadd.f32 %v471_v19, %v463_v17  ;;  %v527_v34 = vadd.f32 %v519_v27, %v511_v23  ;;  %v8231_v53 = vmul.f32 %v8215_v44, %v8215_v44  ;;  %v8241_v56 = vmul.f32 %v8219_v46, %v8219_v46 }
  0x36   : > { %v491_v35 = vsub.f32 %v475_v24, %v483_v21  ;;  %v539_v38 = vsub.f32 %v523_v33, %v531_v30  ;;  %v357_v57 = vmul.f32 1.442695, %v348_v51  ;;  %v365_v61 = vmul.f32 1.442695, %v352_v52  ;;  %p7959_p9 = pnand %p7958_p6, %p8100_p11  ;;  %p7964_p3 = por %p7963_p1, %p7962_p0 }
  0x37   : > { %v495_v36 = vsub.f32 %v479_v25, %v487_v22  ;;  %v543_v39 = vsub.f32 %v527_v34, %v535_v31  ;;  %v350_v58 = vmul.f32 -0.5, %v8231_v53  ;;  %v349_v60 = vmul.f32 -0.5, %v8241_v56 }
  0x38   : > { %v8201_v37 = vpop.eup %7370  ;;  %v547_v49 = vadd.f32 15.0, %v539_v38  ;;  %7374 = vpow2.f32 %v357_v57  ;;  %v8258_v10 = vmul.f32 %v8247_v63, %v8247_v63  ;;  %v8262_v11 = vmul.f32 %v8250_v6, %v8250_v6  ;;  %p7960_p13 = pneg %p7959_p9 }
  0x39   : > { %v8211_v42 = vpop.eup %7372  ;;  %v379_v43 = vmul.f32 %v8201_v37, %v371_v29  ;;  %v8222_v47 = vmul.f32 %v8201_v37, %v491_v35  ;;  %v551_v50 = vadd.f32 15.0, %v543_v39  ;;  %v361_v62 = vmul.f32 1.442695, %v350_v58 }
  0x3a   : > { %v8225_v48 = vmul.f32 %v8211_v42, %v495_v36  ;;  %v8234_v54 = vmul.f32 %v8201_v37, %v547_v49  ;;  %v383_v59 = vmul.f32 %v8211_v42, %v375_v45  ;;  %v359_v7 = vmul.f32 1.442695, %v349_v60  ;;  %p7965_p4 = pnand %p7964_p3, %p7960_p13 }
  0x3b   : > { %571 = vst [vmem:[#allocation1] ss:$2 sm:$0xff] %v379_v43  ;;  %v8237_v55 = vmul.f32 %v8211_v42, %v551_v50  ;;  %7376 = vpow2.f32 %v361_v62  ;;  %v387_v14 = vsub.f32 1.0, %v8154_v2  ;;  %v372_v15 = vsub.f32 0.0, %v8193_v28 }
  0x3c   : > { %7378 = vpow2.f32 %v359_v7  ;;  %v354_v16 = vmul.f32 -0.5, %v8258_v10  ;;  %v353_v17 = vmul.f32 -0.5, %v8262_v11  ;;  %v374_v18 = vsub.f32 0.0, %v8215_v44 }
  0x3d   : > { %7380 = vpow2.f32 %v365_v61  ;;  %v373_v22 = vsub.f32 0.0, %v8219_v46  ;;  %v395_v23 = vmul.f32 %v8201_v37, %v387_v14  ;;  %v376_v27 = vsub.f32 0.0, %v8199_v32 }
  0x3e   : > { %v8269_v19 = vpop.eup %7374  ;;  %v369_v20 = vmul.f32 1.442695, %v354_v16  ;;  %v367_v21 = vmul.f32 1.442695, %v353_v17  ;;  %v391_v35 = vsub.f32 1.0, %v8158_v3  ;;  %v378_v38 = vsub.f32 0.0, %v8247_v63 }
  0x3f   : > { %v380_v24 = vmul.f32 %v8269_v19, %v372_v15  ;;  %v403_v45 = vmul.f32 3.0, %v8147_v0  ;;  %v377_v49 = vsub.f32 0.0, %v8250_v6  ;;  %v388_v57 = vsub.f32 1.0, %v8205_v40 }
  0x40   : > { %7382 = vpow2.f32 %v369_v20  ;;  %v399_v43 = vmul.f32 %v8211_v42, %v391_v35  ;;  %v390_v16 = vsub.f32 1.0, %v8231_v53  ;;  %v407_v17 = vmul.f32 3.0, %v8150_v1 }
  0x41   : > { %v8274_v25 = vpop.eup %7376  ;;  %573 = vst [vmem:[#allocation1 + $0x10] ss:$2 sm:$0xff] %v380_v24  ;;  %7384 = vpow2.f32 %v367_v21  ;;  %v411_v61 = vsub.f32 %v403_v45, %v8180_v12  ;;  %v396_v15 = vmul.f32 %v8269_v19, %v388_v57  ;;  %v427_v20 = vmul.f32 6.0, %v8154_v2 }
  0x42   : > { %v8252_v8 = vld.sshfl [vmem:[#allocation1] sm:$0xff pattern:$0x75316420]  ;;  %v8254_v9 = vld.sshfl [vmem:[#allocation1 + $0x8] sm:$0xff pattern:$0x75316420]  ;;  %v8276_v26 = vpop.eup %7378  ;;  %v382_v29 = vmul.f32 %v8274_v25, %v374_v18  ;;  %v398_v1 = vmul.f32 %v8274_v25, %v390_v16 }
  0x43   : > { %586 = vst [vmem:[#allocation1] ss:$2 sm:$0xff] %v383_v59  ;;  %v8280_v30 = vpop.eup %7380  ;;  %v381_v34 = vmul.f32 %v8276_v26, %v373_v22  ;;  %v419_v12 = vmul.f32 %v8201_v37, %v411_v61  ;;  %v389_v21 = vsub.f32 1.0, %v8241_v56  ;;  %v431_v24 = vmul.f32 6.0, %v8158_v3 }
  0x44   : > { %577 = vst [vmem:[#allocation1 + $0x30] ss:$2 sm:$0xff] %v382_v29  ;;  %v384_v36 = vmul.f32 %v8280_v30, %v376_v27  ;;  %v392_v27 = vsub.f32 1.0, %v8209_v41  ;;  %v415_v29 = vsub.f32 %v407_v17, %v8184_v13  ;;  %v435_v2 = vsub.f32 %v427_v20, %v8162_v4 }
  0x45   : > { %575 = vst [vmem:[#allocation1 + $0x20] ss:$2 sm:$0xff] %v381_v34  ;;  %v404_v3 = vmul.f32 3.0, %v8193_v28  ;;  %v394_v57 = vsub.f32 1.0, %v8258_v10  ;;  %v408_v17 = vmul.f32 3.0, %v8199_v32  ;;  %vm15675_vm1 = vcmask 1043456  }
  0x46   : > { %v8290_v39 = vpop.eup %7382  ;;  %v400_v4 = vmul.f32 %v8280_v30, %v392_v27  ;;  %v7145_v16 = vadd.f32 -3.0, %v435_v2  ;;  %v428_v27 = vmul.f32 6.0, %v8205_v40  ;;  %v8372_v2 = vmul.f32 %v8209_v41, %v8209_v41 }
  0x47   : > { %v8295_v50 = vpop.eup %7384  ;;  %v386_v58 = vmul.f32 %v8290_v39, %v378_v38  ;;  %v397_v38 = vmul.f32 %v8276_v26, %v389_v21  ;;  %vm15676_vm2 = vcmask 1041408   ;;  %vm1002_vm3 = vcmask 1046528  }
  0x48   : > { %v8297_v51 = vld.sshfl [vmem:[#allocation1 + $0x10] sm:$0xff pattern:$0x75316420]  ;;  %v8299_v52 = vld.sshfl [vmem:[#allocation1 + $0x18] sm:$0xff pattern:$0x75316420]  ;;  %v385_v62 = vmul.f32 %v8295_v50, %v377_v49 }
  0x49   : > { %587 = vst [vmem:[#allocation1 + $0x10] ss:$2 sm:$0xff] %v384_v36  ;;  %v8338_v36 = vmul.f32 %v8205_v40, %v8205_v40  ;;  %vm934_vm4 = vcmask 1042432   ;;  %vm951_vm5 = vcmask 1045504   ;;  %vm1047_vm6 = vcmask 146432  }
  0x4a   : > { %v8282_v31 = vld.sshfl [vmem:[#allocation1] sm:$0xff pattern:$0x75316420]  ;;  %v8284_v33 = vld.sshfl [vmem:[#allocation1 + $0x8] sm:$0xff pattern:$0x75316420] }
  0x4b   : > { %15972 = vst [vmem:[#allocation9_spill] sm:$0xff] %v8282_v31  ;;  %v8308_v0 = vld.sshfl [vmem:[#allocation1 + $0x30] sm:$0xff pattern:$0x75316420]  ;;  %v332_v49 = vmul.f32 %v8338_v36, %v8193_v28  ;;  %v451_v31 = vmul.f32 %v8201_v37, %v7145_v16  ;;  %v340_v16 = vmul.f32 %v8338_v36, %v8205_v40 }
  0x4c   : > { %15973 = vst [vmem:[#allocation10_spill] sm:$0xff] %v8284_v33  ;;  %v8311_v7 = vld.sshfl [vmem:[#allocation1 + $0x38] sm:$0xff pattern:$0x75316420] }
  0x4d   : > { %622 = vst [vmem:[#allocation1] ss:$2 sm:$0xff] %v395_v23  ;;  %v8313_v14 = vld.sshfl [vmem:[#allocation1 + $0x20] sm:$0xff pattern:$0x75316420] }
  0x4e   : > { %15974 = vst [vmem:[#allocation11_spill] sm:$0xff] %v8308_v0  ;;  %v8318_v18 = vld.sshfl [vmem:[#allocation1 + $0x28] sm:$0xff pattern:$0x75316420] }
  0x4f   : > { %15975 = vst [vmem:[#allocation12_spill] sm:$0xff] %v8311_v7 }
  0x50   : > { %15976 = vst [vmem:[#allocation13_spill] sm:$0xff] %v8313_v14  ;;  %v8323_v22 = vld.sshfl [vmem:[#allocation1 + $0x10] sm:$0xff pattern:$0x75316420] }
  0x51   : > { %589 = vst [vmem:[#allocation1 + $0x30] ss:$2 sm:$0xff] %v386_v58  ;;  %v8325_v23 = vld.sshfl [vmem:[#allocation1 + $0x18] sm:$0xff pattern:$0x75316420]  ;;  %v393_v58 = vsub.f32 1.0, %v8262_v11 }
  0x52   : > { %15977 = vst [vmem:[#allocation14_spill] sm:$0xff] %v8318_v18 }
  0x53   : > { %588 = vst [vmem:[#allocation1 + $0x20] ss:$2 sm:$0xff] %v385_v62 }
  0x54   : > { %v8303_v59 = vld.sshfl [vmem:[#allocation1] sm:$0xff pattern:$0x75316420]  ;;  %v8305_v60 = vld.sshfl [vmem:[#allocation1 + $0x8] sm:$0xff pattern:$0x75316420] }
  0x55   : > { %637 = vst [vmem:[#allocation1] ss:$2 sm:$0xff] %v399_v43  ;;  %v316_v43 = vmul.f32 %v8205_v40, %v8193_v28 }
  0x56   : > { %15978 = vst [vmem:[#allocation15_spill] sm:$0xff] %v8323_v22 }
  0x57   : > { %15979 = vst [vmem:[#allocation16_spill] sm:$0xff] %v8325_v23 }
  0x58   : > { %624 = vst [vmem:[#allocation1 + $0x10] ss:$2 sm:$0xff] %v396_v15  ;;  %v8344_v45 = vld.sshfl [vmem:[#allocation1 + $0x30] sm:$0xff pattern:$0x75316420]  ;;  %v423_v15 = vmul.f32 %v8211_v42, %v415_v29 }
  0x59   : > { %15982 = vst [vmem:[#allocation19_spill] sm:$0xff] %v8344_v45  ;;  %v8346_v13 = vld.sshfl [vmem:[#allocation1 + $0x38] sm:$0xff pattern:$0x75316420]  ;;  %v402_v45 = vmul.f32 %v8290_v39, %v394_v57 }
  0x5a   : > { %15983 = vst [vmem:[#allocation20_spill] sm:$0xff] %v8346_v13  ;;  %v8353_v61 = vld.sshfl [vmem:[#allocation1 + $0x20] sm:$0xff pattern:$0x75316420]  ;;  %v468_v13 = vmul.f32 10.0, %v316_v43 }
  0x5b   : > { %628 = vst [vmem:[#allocation1 + $0x30] ss:$2 sm:$0xff] %v398_v1  ;;  %v8355_v62 = vld.sshfl [vmem:[#allocation1 + $0x28] sm:$0xff pattern:$0x75316420]  ;;  %v460_v1 = vsub.f32 0.0, %v332_v49 }
  0x5c   : > { %v8331_v34 = vld.sshfl [vmem:[#allocation1] sm:$0xff pattern:$0x75316420]  ;;  %v8333_v35 = vld.sshfl [vmem:[#allocation1 + $0x8] sm:$0xff pattern:$0x75316420] }
  0x5d   : > { %15980 = vst [vmem:[#allocation17_spill] sm:$0xff] %v8331_v34  ;;  %v484_v49 = vmul.f32 15.0, %v8193_v28  ;;  %v336_v28 = vmul.f32 %v8372_v2, %v8199_v32 }
  0x5e   : > { %15981 = vst [vmem:[#allocation18_spill] sm:$0xff] %v8333_v35 }
  0x5f   : > { %689 = vst [vmem:[#allocation1] ss:$2 sm:$0xff] %v419_v12  ;;  %v412_v12 = vsub.f32 %v404_v3, %v316_v43  ;;  %v8359_v20 = vld.sshfl [vmem:[#allocation1 + $0x10] sm:$0xff pattern:$0x75316420]  ;;  %v401_v3 = vmul.f32 %v8295_v50, %v393_v58  ;;  %v8378_v43 = vmul.f32 %v8231_v53, %v8215_v44 }
  0x60   : > { %15984 = vst [vmem:[#allocation21_spill] sm:$0xff] %v8353_v61  ;;  %v8361_v21 = vld.sshfl [vmem:[#allocation1 + $0x18] sm:$0xff pattern:$0x75316420] }
  0x61   : > { %15985 = vst [vmem:[#allocation22_spill] sm:$0xff] %v8355_v62  ;;  %v439_v62 = vsub.f32 %v431_v24, %v8166_v5  ;;  %v406_v5 = vmul.f32 3.0, %v8215_v44  ;;  %v320_v24 = vmul.f32 %v8209_v41, %v8199_v32 }
  0x62   : > { %626 = vst [vmem:[#allocation1 + $0x20] ss:$2 sm:$0xff] %v397_v38  ;;  %v476_v38 = vadd.f32 %v468_v13, %v460_v1  ;;  %v8384_v57 = vld.sshfl [vmem:[#allocation1 + $0x30] sm:$0xff pattern:$0x75316420]  ;;  %v8390_v13 = vmul.f32 %v8241_v56, %v8219_v46  ;;  %v405_v1 = vmul.f32 3.0, %v8219_v46 }
  0x63   : > { %638 = vst [vmem:[#allocation1 + $0x10] ss:$2 sm:$0xff] %v400_v4  ;;  %v420_v4 = vmul.f32 %v8269_v19, %v412_v12  ;;  %v8386_v23 = vld.sshfl [vmem:[#allocation1 + $0x38] sm:$0xff pattern:$0x75316420]  ;;  %v7149_v33 = vadd.f32 -3.0, %v439_v62  ;;  %v416_v18 = vsub.f32 %v408_v17, %v320_v24 }
  0x64   : > { %15986 = vst [vmem:[#allocation23_spill] sm:$0xff] %v8384_v57  ;;  %v492_v58 = vsub.f32 %v476_v38, %v484_v49  ;;  %v413_v34 = vsub.f32 %v405_v1, %v8390_v13  ;;  %v472_v14 = vmul.f32 10.0, %v320_v24  ;;  %v410_v24 = vmul.f32 3.0, %v8247_v63 }
  0x65   : > { %15987 = vst [vmem:[#allocation24_spill] sm:$0xff] %v8386_v23  ;;  %v432_v1 = vmul.f32 6.0, %v8209_v41 }
  0x66   : > { %v8366_v61 = vld.sshfl [vmem:[#allocation1] sm:$0xff pattern:$0x75316420]  ;;  %v8368_v29 = vld.sshfl [vmem:[#allocation1 + $0x8] sm:$0xff pattern:$0x75316420]  ;;  %v8402_v35 = vmul.f32 %v8269_v19, %v492_v58  ;;  %v421_v17 = vmul.f32 %v8276_v26, %v413_v34 }
  0x67   : > { %704 = vst [vmem:[#allocation1] ss:$2 sm:$0xff] %v423_v15  ;;  %v414_v15 = vsub.f32 %v406_v5, %v8378_v43  ;;  %v464_v5 = vsub.f32 0.0, %v336_v28  ;;  %v488_v58 = vmul.f32 15.0, %v8199_v32  ;;  %v455_v32 = vmul.f32 %v8211_v42, %v7149_v33 }
  0x68   : > { %640 = vst [vmem:[#allocation1 + $0x30] ss:$2 sm:$0xff] %v402_v45  ;;  %v436_v45 = vsub.f32 %v428_v27, %v8338_v36  ;;  %v8421_v27 = vmul.f32 %v8258_v10, %v8247_v63  ;;  %v532_v33 = vmul.f32 45.0, %v8205_v40 }
  0x69   : > { %v8396_v22 = vld.sshfl [vmem:[#allocation1 + $0x20] sm:$0xff pattern:$0x75316420]  ;;  %v8398_v12 = vld.sshfl [vmem:[#allocation1 + $0x28] sm:$0xff pattern:$0x75316420]  ;;  %v422_v62 = vmul.f32 %v8274_v25, %v414_v15 }
  0x6a   : > { %15988 = vst [vmem:[#allocation25_spill] sm:$0xff] %v8396_v22  ;;  %v8405_v38 = vld.sshfl [vmem:[#allocation1 + $0x10] sm:$0xff pattern:$0x75316420]  ;;  %v474_v23 = vmul.f32 10.0, %v8421_v27 }
  0x6b   : > { %15989 = vst [vmem:[#allocation26_spill] sm:$0xff] %v8398_v12  ;;  %v8407_v49 = vld.sshfl [vmem:[#allocation1 + $0x18] sm:$0xff pattern:$0x75316420] }
  0x6c   : > { %639 = vst [vmem:[#allocation1 + $0x20] ss:$2 sm:$0xff] %v401_v3  ;;  %v480_v3 = vadd.f32 %v472_v14, %v464_v5 }
  0x6d   : > { %15990 = vst [vmem:[#allocation27_spill] sm:$0xff] %v8405_v38 }
  0x6e   : > { %15991 = vst [vmem:[#allocation28_spill] sm:$0xff] %v8407_v49  ;;  %v8411_v12 = vld.sshfl [vmem:[#allocation1] sm:$0xff pattern:$0x75316420]  ;;  %v7146_v49 = vadd.f32 -3.0, %v436_v45  ;;  %v496_v34 = vsub.f32 %v480_v3, %v488_v58  ;;  %v8449_v58 = vmul.f32 %v8231_v53, %v8231_v53 }
  0x6f   : > { %691 = vst [vmem:[#allocation1 + $0x10] ss:$2 sm:$0xff] %v420_v4  ;;  %v8413_v37 = vld.sshfl [vmem:[#allocation1 + $0x8] sm:$0xff pattern:$0x75316420]  ;;  %v424_v4 = vmul.f32 %v8280_v30, %v416_v18  ;;  %v508_v18 = vsub.f32 0.0, %v340_v16 }
  0x70   : > { %15992 = vst [vmem:[#allocation29_spill] sm:$0xff] %v8411_v12  ;;  %v8425_v28 = vld.sshfl [vmem:[#allocation1 + $0x30] sm:$0xff pattern:$0x75316420]  ;;  %v8437_v38 = vmul.f32 %v8280_v30, %v496_v34  ;;  %v430_v16 = vmul.f32 6.0, %v8231_v53 }
  0x71   : > { %15993 = vst [vmem:[#allocation30_spill] sm:$0xff] %v8413_v37  ;;  %v8427_v15 = vld.sshfl [vmem:[#allocation1 + $0x38] sm:$0xff pattern:$0x75316420] }
  0x72   : > { %756 = vst [vmem:[#allocation1] ss:$2 sm:$0xff] %v451_v31  ;;  %v418_v31 = vsub.f32 %v410_v24, %v8421_v27  ;;  %v438_v40 = vsub.f32 %v430_v16, %v8449_v58 }
  0x73   : > { %15994 = vst [vmem:[#allocation31_spill] sm:$0xff] %v8425_v28  ;;  %v8432_v14 = vld.sshfl [vmem:[#allocation1 + $0x20] sm:$0xff pattern:$0x75316420]  ;;  %v516_v28 = vmul.f32 15.0, %v8338_v36 }
  0x74   : > { %15995 = vst [vmem:[#allocation32_spill] sm:$0xff] %v8427_v15  ;;  %v8434_v5 = vld.sshfl [vmem:[#allocation1 + $0x28] sm:$0xff pattern:$0x75316420]  ;;  %v409_v15 = vmul.f32 3.0, %v8250_v6  ;;  %v7148_v12 = vadd.f32 -3.0, %v438_v40 }
  0x75   : > { %695 = vst [vmem:[#allocation1 + $0x30] ss:$2 sm:$0xff] %v422_v62  ;;  %v426_v62 = vmul.f32 %v8290_v39, %v418_v31  ;;  %v524_v42 = vadd.f32 %v516_v28, %v508_v18  ;;  %v440_v28 = vsub.f32 %v432_v1, %v8372_v2  ;;  %v344_v18 = vmul.f32 %v8372_v2, %v8209_v41 }
  0x76   : > { %15996 = vst [vmem:[#allocation33_spill] sm:$0xff] %v8432_v14  ;;  %v8441_v45 = vld.sshfl [vmem:[#allocation1 + $0x10] sm:$0xff pattern:$0x75316420]  ;;  %v520_v14 = vmul.f32 15.0, %v8372_v2  ;;  %v8481_v2 = vmul.f32 %v8258_v10, %v8258_v10 }
  0x77   : > { %15997 = vst [vmem:[#allocation34_spill] sm:$0xff] %v8434_v5  ;;  %v8443_v3 = vld.sshfl [vmem:[#allocation1 + $0x18] sm:$0xff pattern:$0x75316420]  ;;  %v540_v34 = vsub.f32 %v524_v42, %v532_v33  ;;  %v452_v5 = vmul.f32 %v8269_v19, %v7146_v49  ;;  %v7150_v1 = vadd.f32 -3.0, %v440_v28  ;;  %v512_v42 = vsub.f32 0.0, %v344_v18 }
  0x78   : > { %693 = vst [vmem:[#allocation1 + $0x20] ss:$2 sm:$0xff] %v421_v17  ;;  %v8458_v17 = vmul.f32 %v8262_v11, %v8250_v6  ;;  %v536_v33 = vmul.f32 45.0, %v8209_v41  ;;  %v434_v49 = vmul.f32 6.0, %v8258_v10 }
  0x79   : > { %705 = vst [vmem:[#allocation1 + $0x10] ss:$2 sm:$0xff] %v424_v4  ;;  %v8452_v36 = vld.sshfl [vmem:[#allocation1] sm:$0xff pattern:$0x75316420]  ;;  %v548_v37 = vadd.f32 15.0, %v540_v34  ;;  %v528_v0 = vadd.f32 %v520_v14, %v512_v42 }
  0x7a   : > { %v8454_v24 = vld.sshfl [vmem:[#allocation1 + $0x8] sm:$0xff pattern:$0x75316420] }
  0x7b   : > { %771 = vst [vmem:[#allocation1] ss:$2 sm:$0xff] %v455_v32  ;;  %v417_v32 = vsub.f32 %v409_v15, %v8458_v17  ;;  %v8473_v16 = vmul.f32 %v8269_v19, %v548_v37  ;;  %v454_v15 = vmul.f32 %v8274_v25, %v7148_v12  ;;  %v544_v14 = vsub.f32 %v528_v0, %v536_v33 }
  0x7c   : > { %v8462_v4 = vld.sshfl [vmem:[#allocation1 + $0x30] sm:$0xff pattern:$0x75316420]  ;;  %v8464_v31 = vld.sshfl [vmem:[#allocation1 + $0x38] sm:$0xff pattern:$0x75316420]  ;;  %v456_v12 = vmul.f32 %v8280_v30, %v7150_v1 }
  0x7d   : > { %707 = vst [vmem:[#allocation1 + $0x30] ss:$2 sm:$0xff] %v426_v62  ;;  %v425_v37 = vmul.f32 %v8295_v50, %v417_v32  ;;  %v552_v18 = vadd.f32 15.0, %v544_v14 }
  0x7f   : > { %v8485_v62 = vld.sshfl [vmem:[#allocation1 + $0x20] sm:$0xff pattern:$0x75316420]  ;;  %v8494_v28 = vld.sshfl [vmem:[#allocation1 + $0x28] sm:$0xff pattern:$0x75316420]  ;;  %v8507_v0 = vmul.f32 %v8280_v30, %v552_v18  ;;  %v8526_v30 = vmul.f32 %v8262_v11, %v8262_v11  ;;  %v334_v18 = vmul.f32 %v8449_v58, %v8215_v44 }
  0x80   : > { %v8475_v22 = vld.sshfl [vmem:[#allocation1 + $0x10] sm:$0xff pattern:$0x75316420]  ;;  %v8477_v7 = vld.sshfl [vmem:[#allocation1 + $0x18] sm:$0xff pattern:$0x75316420] }
  0x81   : > { %15998 = vst [vmem:[#allocation35_spill] sm:$0xff] %v8475_v22 }
  0x82   : > { %15999 = vst [vmem:[#allocation36_spill] sm:$0xff] %v8477_v7  ;;  %v8487_v41 = vld.sshfl [vmem:[#allocation1] sm:$0xff pattern:$0x75316420]  ;;  %v8503_v7 = vmul.f32 %v8241_v56, %v8241_v56 }
  0x83   : > { %758 = vst [vmem:[#allocation1 + $0x10] ss:$2 sm:$0xff] %v452_v5  ;;  %v8489_v19 = vld.sshfl [vmem:[#allocation1 + $0x8] sm:$0xff pattern:$0x75316420]  ;;  %v442_v5 = vsub.f32 %v434_v49, %v8481_v2 }
  0x84   : > { %16000 = vst [vmem:[#allocation37_spill] sm:$0xff] %v8485_v62  ;;  %v8496_v34 = vld.sshfl [vmem:[#allocation1 + $0x30] sm:$0xff pattern:$0x75316420] }
  0x85   : > { %16001 = vst [vmem:[#allocation38_spill] sm:$0xff] %v8487_v41  ;;  %v8498_v40 = vld.sshfl [vmem:[#allocation1 + $0x38] sm:$0xff pattern:$0x75316420]  ;;  %v7152_v42 = vadd.f32 -3.0, %v442_v5  ;;  %v470_v41 = vmul.f32 10.0, %v8378_v43 }
  0x86   : > { %16002 = vst [vmem:[#allocation39_spill] sm:$0xff] %v8489_v19  ;;  %v649_v19 = vrot.slane %v8303_v59, 5  ;;  %v342_v59 = vmul.f32 %v8449_v58, %v8231_v53 }
  0x87   : > { %824 = vst [vmem:[#allocation1 + $0x1] ss:$2 sm:$0xff] %v8222_v47  ;;  %v429_v47 = vmul.f32 6.0, %v8241_v56 }
  0x88   : > { %16003 = vst [vmem:[#allocation40_spill] sm:$0xff] %v8494_v28  ;;  %v8009_v28 = vmov 0   ;;  %v510_v57 = vsub.f32 0.0, %v342_v59 }
  0x89   : > { %16004 = vst [vmem:[#allocation41_spill] sm:$0xff] %v8496_v34  ;;  %v437_v14 = vsub.f32 %v429_v47, %v8503_v7  ;;  %v783_v47 = vrot.slane %v8452_v36, 7  ;;  %v1024_v36 = vld [vmem:[%s15356_s2 + $0x8] sm:$0xff]  ;;  %7368 = vset.pattern.permute.xlu1 %v8009_v28  ;;  %7367 = vset.pattern.permute.xlu0 %v8009_v28 }
  0x8a   : > { %16005 = vst [vmem:[#allocation42_spill] sm:$0xff] %v8498_v40  ;;  %v8509_v32 = vld.sshfl [vmem:[#allocation1 + $0x10] sm:$0xff pattern:$0x75316420]  ;;  %1034 = vperm.xlu1 %7368, %v1024_v36   ;;  %7369 = vset.pattern.permute.xlu2 %v8009_v28 }
  0x8b   : > { %762 = vst [vmem:[#allocation1 + $0x30] ss:$2 sm:$0xff] %v454_v15  ;;  %v8511_v33 = vld.sshfl [vmem:[#allocation1 + $0x18] sm:$0xff pattern:$0x75316420]  ;;  %v458_v15 = vmul.f32 %v8290_v39, %v7152_v42  ;;  %v433_v42 = vmul.f32 6.0, %v8262_v11 }
  0x8c   : > { %706 = vst [vmem:[#allocation1 + $0x20] ss:$2 sm:$0xff] %v425_v37  ;;  %v7147_v40 = vadd.f32 -3.0, %v437_v14  ;;  %v462_v14 = vsub.f32 0.0, %v334_v18  ;;  %v16013_v18 = vrot.slane %v8368_v29, 2 }
  0x8d   : > { %772 = vst [vmem:[#allocation1 + $0x10] ss:$2 sm:$0xff] %v456_v12  ;;  %v338_v12 = vmul.f32 %v8481_v2, %v8247_v63 }
  0x8e   : > { %v8513_v49 = vld.sshfl [vmem:[#allocation1] sm:$0xff pattern:$0x75316420]  ;;  %v8515_v1 = vld.sshfl [vmem:[#allocation1 + $0x8] sm:$0xff pattern:$0x75316420]  ;;  %v478_v43 = vadd.f32 %v470_v41, %v462_v14 }
  0x8f   : > { %839 = vst [vmem:[#allocation1 + $0x1] ss:$2 sm:$0xff] %v8225_v48  ;;  %v466_v62 = vsub.f32 0.0, %v338_v12  ;;  %v490_v12 = vmul.f32 15.0, %v8247_v63 }
  0x92   : > { %v8520_v5 = vld.sshfl [vmem:[#allocation1 + $0x30] sm:$0xff pattern:$0x75316420]  ;;  %v8522_v37 = vld.sshfl [vmem:[#allocation1 + $0x38] sm:$0xff pattern:$0x75316420] }
  0x93   : > { %16006 = vst [vmem:[#allocation43_spill] sm:$0xff] %v8522_v37  ;;  %v469_v37 = vmul.f32 10.0, %v8390_v13 }
  0x94   : > { %774 = vst [vmem:[#allocation1 + $0x30] ss:$2 sm:$0xff] %v458_v15  ;;  %v8534_v34 = vld.sshfl [vmem:[#allocation1 + $0x10] sm:$0xff pattern:$0x75316420]  ;;  %v784_v15 = vrot.slane %v8454_v24, 7  ;;  %v453_v24 = vmul.f32 %v8276_v26, %v7147_v40 }
  0x95   : > { %16007 = vst [vmem:[#allocation44_spill] sm:$0xff] %v8534_v34  ;;  %v8536_v22 = vld.sshfl [vmem:[#allocation1 + $0x18] sm:$0xff pattern:$0x75316420] }
  0x96   : > { %16008 = vst [vmem:[#allocation45_spill] sm:$0xff] %v8536_v22  ;;  %v8547_v48 = vld.sshfl [vmem:[#allocation1] sm:$0xff pattern:$0x75316420]  ;;  %v333_v22 = vmul.f32 %v8503_v7, %v8219_v46 }
  0x97   : > { %826 = vst [vmem:[#allocation1 + $0x11] ss:$2 sm:$0xff] %v8402_v35  ;;  %v8549_v34 = vld.sshfl [vmem:[#allocation1 + $0x8] sm:$0xff pattern:$0x75316420]  ;;  %v441_v35 = vsub.f32 %v433_v42, %v8526_v30  ;;  %v486_v42 = vmul.f32 15.0, %v8215_v44 }
  0x98   : > { %16009 = vst [vmem:[#allocation46_spill] sm:$0xff] %v8547_v48  ;;  %v16011_v48 = vrot.slane %v8366_v61, 2  ;;  %v8563_v40 = vld.sshfl [vmem:[#allocation1 + $0x20] sm:$0xff pattern:$0x75316420] }
  0x99   : > { %16010 = vst [vmem:[#allocation47_spill] sm:$0xff] %v8549_v34  ;;  %v7151_v27 = vadd.f32 -3.0, %v441_v35  ;;  %v8572_v44 = vld.sshfl [vmem:[#allocation1 + $0x28] sm:$0xff pattern:$0x75316420] }
  0x9a   : > { %875 = vst [vmem:[#allocation1] ss:$2 sm:$0xff] %v8234_v54  ;;  %v969_v34 = vsel %vm968_vm0, %v16011_v48, %v783_v47  ;;  %v650_v54 = vrot.slane %v8305_v60, 5  ;;  %v970_v47 = vsel %vm968_vm0, %v16013_v18, %v784_v15  ;;  %v461_v48 = vsub.f32 0.0, %v333_v22 }
  0x9b   : > { %16012 = vst [vmem:[#allocation48_spill] sm:$0xff] %v8563_v40  ;;  %v494_v40 = vsub.f32 %v478_v43, %v486_v42  ;;  %v518_v60 = vmul.f32 15.0, %v8449_v58  ;;  %v8575_v36 = vld.sshfl [vmem:[#allocation1 + $0x30] sm:$0xff pattern:$0x75316420]  ;;  %v482_v15 = vadd.f32 %v474_v23, %v466_v62  ;;  %v986_v63 = vsel %vm15675_vm1, %v969_v34, %v8513_v49  ;;  %v1023_v49 = vld [vmem:[%s15356_s2] sm:$0xff] }
  0x9c   : > { %760 = vst [vmem:[#allocation1 + $0x20] ss:$2 sm:$0xff] %v453_v24  ;;  %v8586_v14 = vld.sshfl [vmem:[#allocation1 + $0x38] sm:$0xff pattern:$0x75316420]  ;;  %v987_v13 = vsel %vm15675_vm1, %v970_v47, %v8515_v1  ;;  %v935_v24 = vsel %vm934_vm4, %v8252_v8, %v649_v19  ;;  %v936_v23 = vsel %vm934_vm4, %v8254_v9, %v650_v54  ;;  %v457_v42 = vmul.f32 %v8295_v50, %v7151_v27 }
  0x9d   : > { %v502_v22 = vmul.f32 %v8274_v25, %v494_v40  ;;  %v477_v1 = vadd.f32 %v469_v37, %v461_v48  ;;  %v498_v40 = vsub.f32 %v482_v15, %v490_v12  ;;  %v526_v59 = vadd.f32 %v518_v60, %v510_v57  ;;  %1029 = vperm.xlu1 %7368, %v1023_v49   ;;  %v8623_v12 = vld [vmem:[%s15355_s1] sm:$0xff] }
  0x9e   : > { %v8578_v41 = vld.sshfl [vmem:[#allocation1 + $0x10] sm:$0xff pattern:$0x75316420]  ;;  %v8580_v28 = vld.sshfl [vmem:[#allocation1 + $0x18] sm:$0xff pattern:$0x75316420]  ;;  %v341_v37 = vmul.f32 %v8503_v7, %v8241_v56  ;;  %v16015_v43 = vmov %v16013_v18 }
  0x9f   : > { %840 = vst [vmem:[#allocation1 + $0x11] ss:$2 sm:$0xff] %v8437_v38  ;;  %v337_v38 = vmul.f32 %v8526_v30, %v8250_v6  ;;  %v534_v8 = vmul.f32 45.0, %v8231_v53  ;;  %v485_v9 = vmul.f32 15.0, %v8219_v46  ;;  %v719_v54 = vrot.slane %v8443_v3, 2 }
  0xa0   : > { %830 = vst [vmem:[#allocation1 + $0x31] ss:$2 sm:$0xff] %v502_v22  ;;  %v16014_v57 = vrot.slane %v8366_v61, 2  ;;  %v953_v46 = vsel %vm951_vm5, %v936_v23, %v16015_v43  ;;  %v473_v27 = vmul.f32 10.0, %v8458_v17  ;;  %v506_v15 = vmul.f32 %v8290_v39, %v498_v40 }
  0xa1   : > { %v882_v58 = vld.sshfl [vmem:[#allocation1] sm:$0xff pattern:$0x75316420]  ;;  %v883_v35 = vld.sshfl [vmem:[#allocation1 + $0x8] sm:$0xff pattern:$0x75316420]  ;;  %v493_v48 = vsub.f32 %v477_v1, %v485_v9 }
  0xa2   : > { %v902_v62 = vrot.slane %v882_v58, 1  ;;  %v903_v34 = vrot.slane %v883_v35, 1  ;;  %890 = vst [vmem:[#allocation1] ss:$2 sm:$0xff] %v8237_v55  ;;  %v952_v53 = vsel %vm951_vm5, %v935_v24, %v16014_v57  ;;  %v465_v61 = vsub.f32 0.0, %v337_v38  ;;  %v1026_v58 = vld [vmem:[%s15356_s2 + $0x18] sm:$0xff] }
  0xa3   : > { %v8616_v18 = vld.sshfl [vmem:[#allocation1 + $0x20] sm:$0xff pattern:$0x75316420]  ;;  %v8618_v47 = vld.sshfl [vmem:[#allocation1 + $0x28] sm:$0xff pattern:$0x75316420]  ;;  %1044 = vperm.xlu0 %7367, %v1026_v58  }
  0xa4   : > { %7153 = vmatpush.msk.msra.mxu0 %vm15676_vm2, %v902_v62  ;;  %7158 = vmatpush.msk.msra.mxu1 %vm15676_vm2, %v903_v34  ;;  %v1003_v55 = vsel %vm1002_vm3, %v986_v63, %v902_v62  ;;  %v1004_v19 = vsel %vm1002_vm3, %v987_v13, %v903_v34  ;;  %773 = vst [vmem:[#allocation1 + $0x20] ss:$2 sm:$0xff] %v457_v42  ;;  %v786_v22 = vrot.slane %v8511_v33, 7  ;;  %v509_v17 = vsub.f32 0.0, %v341_v37  ;;  %v8671_v9 = vld [vmem:[%s15355_s1 + $0x8] sm:$0xff] }
  0xa5   : > { %v542_v63 = vsub.f32 %v526_v59, %v534_v8  ;;  %v517_v35 = vmul.f32 15.0, %v8503_v7  ;;  %v651_v13 = vrot.slane %v8359_v20, 5  ;;  %v652_v24 = vrot.slane %v8361_v21, 5 }
  0xa6   : > { %1107 = vmatpush.msra.mxu0 %v1003_v55  ;;  %1136 = vmatpush.msra.mxu1 %v1004_v19  ;;  %v8626_v29 = vld.sshfl [vmem:[#allocation1 + $0x10] sm:$0xff pattern:$0x75316420]  ;;  %v8628_v60 = vld.sshfl [vmem:[#allocation1 + $0x18] sm:$0xff pattern:$0x75316420]  ;;  %v481_v38 = vadd.f32 %v473_v27, %v465_v61  ;;  %v501_v7 = vmul.f32 %v8276_v26, %v493_v48 }
  0xa7   : > { %877 = vst [vmem:[#allocation1 + $0x10] ss:$2 sm:$0xff] %v8473_v16  ;;  %v489_v16 = vmul.f32 15.0, %v8250_v6  ;;  %v8644_v33 = vld.sshfl [vmem:[#allocation1 + $0x30] sm:$0xff pattern:$0x75316420]  ;;  %v972_v6 = vsel %vm968_vm0, %v719_v54, %v786_v22  ;;  %v525_v49 = vadd.f32 %v517_v35, %v509_v17  ;;  %v937_v59 = vsel %vm934_vm4, %v8297_v51, %v651_v13 }
  0xa8   : > { %1108 = vmatpush.msra.mxu0 %v952_v53  ;;  %1137 = vmatpush.msra.mxu1 %v953_v46  ;;  %v8646_v23 = vld.sshfl [vmem:[#allocation1 + $0x38] sm:$0xff pattern:$0x75316420]  ;;  %v16016_v20 = vrot.slane %v8509_v32, 7  ;;  %v16017_v21 = vrot.slane %v8441_v45, 2  ;;  %v550_v34 = vadd.f32 15.0, %v542_v63  ;;  %v938_v8 = vsel %vm934_vm4, %v8299_v52, %v652_v24 }
  0xa9   : > { %7154 = vmatmul.msk.f32.vlgmr.msra.gmra.mxu0 %vm1047_vm6, %v8623_v12  ;;  %7159 = vmatmul.msk.f32.vlgmr.msra.gmra.mxu1 %vm1047_vm6, %v8623_v12  ;;  %842 = vst [vmem:[#allocation1 + $0x31] ss:$2 sm:$0xff] %v506_v15  ;;  %v533_v42 = vmul.f32 45.0, %v8241_v56  ;;  %v497_v55 = vsub.f32 %v481_v38, %v489_v16  ;;  %v989_v37 = vsel %vm15675_vm1, %v972_v6, %v8580_v28  ;;  %v522_v43 = vmul.f32 15.0, %v8481_v2  ;;  %v8715_v45 = vld [vmem:[%s15355_s1 + $0x10] sm:$0xff] }
  0xaa   : > { %v971_v62 = vsel %vm968_vm0, %v16017_v21, %v16016_v20  ;;  %v558_v51 = vmul.f32 %v8274_v25, %v550_v34  ;;  %v345_v52 = vmul.f32 %v8526_v30, %v8262_v11  ;;  %v538_v61 = vmul.f32 45.0, %v8258_v10  ;;  %v1025_v25 = vld [vmem:[%s15356_s2 + $0x10] sm:$0xff]  ;;  %v16020_v34 = vld [vmem:[#allocation23_spill] sm:$0xff] }
  0xab   : > { %v8658_v1 = vld.sshfl [vmem:[#allocation1 + $0x20] sm:$0xff pattern:$0x75316420]  ;;  %v8660_v40 = vld.sshfl [vmem:[#allocation1 + $0x28] sm:$0xff pattern:$0x75316420]  ;;  %v988_v32 = vsel %vm15675_vm1, %v971_v62, %v8578_v41  ;;  %v346_v41 = vmul.f32 %v8481_v2, %v8258_v10  ;;  %v541_v46 = vsub.f32 %v525_v49, %v533_v42  ;;  %v505_v10 = vmul.f32 %v8295_v50, %v497_v55  ;;  %1039 = vperm.xlu0 %7367, %v1025_v25  }
  0xac   : > { %828 = vst [vmem:[#allocation1 + $0x21] ss:$2 sm:$0xff] %v501_v7  ;;  %v513_v27 = vsub.f32 0.0, %v345_v52  ;;  %v521_v48 = vmul.f32 15.0, %v8526_v30  ;;  %v16018_v22 = vmov %v16017_v21  ;;  %v955_v30 = vsel %vm951_vm5, %v938_v8, %v719_v54  ;;  %v16019_v21 = vld [vmem:[#allocation43_spill] sm:$0xff]  ;;  %v16021_v49 = vld [vmem:[#allocation24_spill] sm:$0xff] }
  0xad   : > { %v514_v28 = vsub.f32 0.0, %v346_v41  ;;  %v954_v58 = vsel %vm951_vm5, %v937_v59, %v16018_v22  ;;  %v722_v35 = vrot.slane %v8462_v4, 2  ;;  %v789_v13 = vrot.slane %v8520_v5, 7  ;;  %v3865_v22 = vld [vmem:[%s15358_s4] sm:$0xff] }
  0xae   : > { %v884_v56 = vld.sshfl [vmem:[#allocation1 + $0x10] sm:$0xff pattern:$0x75316420]  ;;  %v885_v19 = vld.sshfl [vmem:[#allocation1 + $0x18] sm:$0xff pattern:$0x75316420]  ;;  %v529_v3 = vadd.f32 %v521_v48, %v513_v27  ;;  %3871 = vperm.xlu1 %7368, %v3865_v22  }
  0xaf   : > { %v904_v57 = vrot.slane %v884_v56, 1  ;;  %v905_v53 = vrot.slane %v885_v19, 1  ;;  %891 = vst [vmem:[#allocation1 + $0x10] ss:$2 sm:$0xff] %v8507_v0  ;;  %v530_v17 = vadd.f32 %v522_v43, %v514_v28  ;;  %v537_v54 = vmul.f32 45.0, %v8262_v11  ;;  %v16025_v27 = vld [vmem:[#allocation40_spill] sm:$0xff] }
  0xb0   : > { %v8695_v15 = vld.sshfl [vmem:[#allocation1 + $0x30] sm:$0xff pattern:$0x75316420]  ;;  %v8697_v63 = vld.sshfl [vmem:[#allocation1 + $0x38] sm:$0xff pattern:$0x75316420]  ;;  %v975_v5 = vsel %vm968_vm0, %v722_v35, %v789_v13 }
  0xb1   : > { %7155 = vmatmul.msk.f32.gmra.mxu0 %vm1047_vm6, %v8671_v9  ;;  %7160 = vmatmul.msk.f32.gmra.mxu1 %vm1047_vm6, %v8671_v9  ;;  %v1005_v2 = vsel %vm1002_vm3, %v988_v32, %v904_v57  ;;  %v1006_v0 = vsel %vm1002_vm3, %v989_v37, %v905_v53  ;;  %881 = vst [vmem:[#allocation1 + $0x30] ss:$2 sm:$0xff] %v558_v51  ;;  %v549_v7 = vadd.f32 15.0, %v541_v46  ;;  %v723_v20 = vrot.slane %v8464_v31, 2  ;;  %v3866_v32 = vld [vmem:[%s15358_s4 + $0x8] sm:$0xff]  ;;  %v16027_v13 = vld [vmem:[#allocation26_spill] sm:$0xff] }
  0xb2   : > { %7163 = vmatpush.msk.msra.mxu2 %vm15676_vm2, %v904_v57  ;;  %7168 = vmatpush.msk.msra.mxu3 %vm15676_vm2, %v905_v53  ;;  %v546_v24 = vsub.f32 %v530_v17, %v538_v61  ;;  %v790_v62 = vrot.slane %v16019_v21, 7  ;;  %v655_v6 = vrot.slane %v16020_v34, 5  ;;  %v656_v42 = vrot.slane %v16021_v49, 5  ;;  %v16022_v51 = vld [vmem:[#allocation37_spill] sm:$0xff]  ;;  %v16023_v53 = vld [vmem:[#allocation11_spill] sm:$0xff]  ;;  %v16039_v22 = vld [vmem:[#allocation46_spill] sm:$0xff] }
  0xb3   : > { %v8708_v16 = vld.sshfl [vmem:[#allocation1 + $0x20] sm:$0xff pattern:$0x75316420]  ;;  %v8710_v38 = vld.sshfl [vmem:[#allocation1 + $0x28] sm:$0xff pattern:$0x75316420]  ;;  %v545_v8 = vsub.f32 %v529_v3, %v537_v54  ;;  %v557_v55 = vmul.f32 %v8276_v26, %v549_v7  ;;  %v992_v56 = vsel %vm15675_vm1, %v975_v5, %v8644_v33  ;;  %3876 = vperm.xlu0 %7367, %v3866_v32  }
  0xb4   : > { %1165 = vmatpush.msra.mxu2 %v1005_v2  ;;  %1194 = vmatpush.msra.mxu3 %v1006_v0  ;;  %841 = vst [vmem:[#allocation1 + $0x21] ss:$2 sm:$0xff] %v505_v10  ;;  %v554_v4 = vadd.f32 15.0, %v546_v24  ;;  %v976_v19 = vsel %vm968_vm0, %v723_v20, %v790_v62  ;;  %v720_v52 = vrot.slane %v16022_v51, 2  ;;  %v787_v57 = vrot.slane %v8616_v18, 7  ;;  %v16024_v26 = vld [vmem:[#allocation12_spill] sm:$0xff] }
  0xb5   : > { %v993_v41 = vsel %vm15675_vm1, %v976_v19, %v8646_v23  ;;  %v941_v43 = vsel %vm934_vm4, %v16023_v53, %v655_v6  ;;  %v942_v46 = vsel %vm934_vm4, %v16024_v26, %v656_v42  ;;  %v8758_v18 = vld [vmem:[%s15355_s1 + $0x18] sm:$0xff]  ;;  %v553_v25 = vadd.f32 15.0, %v545_v8  ;;  %v16026_v17 = vld [vmem:[#allocation25_spill] sm:$0xff]  ;;  %v16029_v62 = vld [vmem:[#allocation14_spill] sm:$0xff] }
  0xb6   : > { %1166 = vmatpush.msra.mxu2 %v954_v58  ;;  %1195 = vmatpush.msra.mxu3 %v955_v30  ;;  %v562_v11 = vmul.f32 %v8290_v39, %v554_v4  ;;  %v721_v48 = vrot.slane %v16025_v27, 2  ;;  %v788_v2 = vrot.slane %v8618_v47, 7  ;;  %v958_v0 = vsel %vm951_vm5, %v941_v43, %v722_v35  ;;  %v896_v49 = vld.sshfl [vmem:[#allocation1 + $0x10] sm:$0xff pattern:$0x75316420]  ;;  %v16030_v8 = vld [vmem:[#allocation29_spill] sm:$0xff] }
  0xb7   : > { %7164 = vmatmul.msk.f32.vlgmr.msra.gmra.mxu2 %vm1047_vm6, %v8623_v12  ;;  %7169 = vmatmul.msk.f32.vlgmr.msra.gmra.mxu3 %vm1047_vm6, %v8623_v12  ;;  %v959_v10 = vsel %vm951_vm5, %v942_v46, %v723_v20  ;;  %v973_v47 = vsel %vm968_vm0, %v720_v52, %v787_v57  ;;  %v561_v58 = vmul.f32 %v8295_v50, %v553_v25  ;;  %v653_v35 = vrot.slane %v16026_v17, 5  ;;  %v16028_v50 = vld [vmem:[#allocation13_spill] sm:$0xff]  ;;  %v897_v42 = vld.sshfl [vmem:[#allocation1 + $0x18] sm:$0xff pattern:$0x75316420]  ;;  %v16035_v46 = vld [vmem:[#allocation44_spill] sm:$0xff] }
  0xb8   : > { %v888_v59 = vld.sshfl [vmem:[#allocation1 + $0x30] sm:$0xff pattern:$0x75316420]  ;;  %v889_v31 = vld.sshfl [vmem:[#allocation1 + $0x38] sm:$0xff pattern:$0x75316420]  ;;  %v974_v30 = vsel %vm968_vm0, %v721_v48, %v788_v2  ;;  %v990_v7 = vsel %vm15675_vm1, %v973_v47, %v8708_v16 }
  0xb9   : > { %7156 = vmatmul.msk.f32.gmra.mxu0 %vm1047_vm6, %v8715_v45  ;;  %7161 = vmatmul.msk.f32.gmra.mxu1 %vm1047_vm6, %v8715_v45  ;;  %v908_v37 = vrot.slane %v888_v59, 1  ;;  %v909_v39 = vrot.slane %v889_v31, 1  ;;  %893 = vst [vmem:[#allocation1 + $0x30] ss:$2 sm:$0xff] %v562_v11  ;;  %v654_v24 = vrot.slane %v16027_v13, 5  ;;  %v991_v4 = vsel %vm15675_vm1, %v974_v30, %v8710_v38  ;;  %v16033_v57 = vld [vmem:[#allocation39_spill] sm:$0xff] }
  0xba   : > { %v939_v21 = vsel %vm934_vm4, %v16028_v50, %v653_v35  ;;  %v912_v32 = vrot.slane %v896_v49, 1  ;;  %v913_v59 = vrot.slane %v897_v42, 1  ;;  %v894_v31 = vld.sshfl [vmem:[#allocation1] sm:$0xff pattern:$0x75316420]  ;;  %v792_v53 = vrot.slane %v16033_v57, 7 }
  0xbb   : > { %7183 = vmatpush.msk.msrb.mxu2 %vm15676_vm2, %v908_v37  ;;  %7188 = vmatpush.msk.msrb.mxu3 %vm15676_vm2, %v909_v39  ;;  %v8749_v33 = vld.sshfl [vmem:[#allocation1 + $0x20] sm:$0xff pattern:$0x75316420]  ;;  %v8751_v28 = vld.sshfl [vmem:[#allocation1 + $0x28] sm:$0xff pattern:$0x75316420]  ;;  %v1009_v23 = vsel %vm1002_vm3, %v992_v56, %v908_v37  ;;  %v1010_v61 = vsel %vm1002_vm3, %v993_v41, %v909_v39  ;;  %v940_v11 = vsel %vm934_vm4, %v16029_v62, %v654_v24 }
  0xbc   : > { %879 = vst [vmem:[#allocation1 + $0x20] ss:$2 sm:$0xff] %v557_v55  ;;  %v956_v34 = vsel %vm951_vm5, %v939_v21, %v720_v52  ;;  %v957_v6 = vsel %vm951_vm5, %v940_v11, %v721_v48  ;;  %v724_v55 = vrot.slane %v16030_v8, 2  ;;  %v910_v56 = vrot.slane %v894_v31, 1  ;;  %v16031_v37 = vld [vmem:[#allocation38_spill] sm:$0xff]  ;;  %v16034_v43 = vld [vmem:[#allocation35_spill] sm:$0xff] }
  0xbd   : > { %1281 = vmatpush.msrb.mxu2 %v1009_v23  ;;  %1310 = vmatpush.msrb.mxu3 %v1010_v61  ;;  %v895_v19 = vld.sshfl [vmem:[#allocation1 + $0x8] sm:$0xff pattern:$0x75316420]  ;;  %v791_v39 = vrot.slane %v16031_v37, 7  ;;  %v16032_v41 = vld [vmem:[#allocation30_spill] sm:$0xff]  ;;  %v726_v26 = vrot.slane %v16034_v43, 2 }
  0xbe   : > { %v725_v51 = vrot.slane %v16032_v41, 2  ;;  %v911_v52 = vrot.slane %v895_v19, 1  ;;  %v793_v23 = vrot.slane %v16035_v46, 7  ;;  %v16036_v25 = vld [vmem:[#allocation36_spill] sm:$0xff]  ;;  %v16037_v48 = vld [vmem:[#allocation45_spill] sm:$0xff]  ;;  %v16040_v17 = vld [vmem:[#allocation18_spill] sm:$0xff] }
  0xbf   : > { %7165 = vmatmul.msk.f32.gmra.mxu2 %vm1047_vm6, %v8671_v9  ;;  %7170 = vmatmul.msk.f32.gmra.mxu3 %vm1047_vm6, %v8671_v9  ;;  %v977_v61 = vsel %vm968_vm0, %v724_v55, %v791_v39  ;;  %v727_v27 = vrot.slane %v16036_v25, 2  ;;  %v794_v2 = vrot.slane %v16037_v48, 7  ;;  %v658_v35 = vrot.slane %v16040_v17, 5  ;;  %v16041_v24 = vld [vmem:[#allocation47_spill] sm:$0xff]  ;;  %v16043_v21 = vld [vmem:[#allocation9_spill] sm:$0xff]  ;;  %v16047_v8 = vld [vmem:[#allocation16_spill] sm:$0xff] }
  0xc0   : > { %1282 = vmatpush.msrb.mxu2 %v958_v0  ;;  %1311 = vmatpush.msrb.mxu3 %v959_v10  ;;  %v16038_v0 = vld [vmem:[#allocation17_spill] sm:$0xff]  ;;  %v994_v47 = vsel %vm15675_vm1, %v977_v61, %v16039_v22  ;;  %v979_v30 = vsel %vm968_vm0, %v726_v26, %v793_v23  ;;  %v901_v19 = vld.sshfl [vmem:[#allocation1 + $0x38] sm:$0xff pattern:$0x75316420]  ;;  %v795_v43 = vrot.slane %v8658_v1, 7  ;;  %v796_v23 = vrot.slane %v8660_v40, 7 }
  0xc1   : > { %7157 = vmatmul.msk.f32.gmra.mxu0 %vm1047_vm6, %v8758_v18  ;;  %7162 = vmatmul.msk.f32.gmra.mxu1 %vm1047_vm6, %v8758_v18  ;;  %v657_v10 = vrot.slane %v16038_v0, 5  ;;  %v1011_v13 = vsel %vm1002_vm3, %v994_v47, %v910_v56  ;;  %v980_v50 = vsel %vm968_vm0, %v727_v27, %v794_v2  ;;  %v917_v39 = vrot.slane %v901_v19, 1  ;;  %v16049_v61 = vld [vmem:[#allocation41_spill] sm:$0xff]  ;;  %v16050_v2 = vld [vmem:[#allocation42_spill] sm:$0xff]  ;;  %v16053_v17 = vld [vmem:[#allocation31_spill] sm:$0xff] }
  0xc2   : > { %7203 = vmatpush.msk.msra.mxu2 %vm15676_vm2, %v912_v32  ;;  %7208 = vmatpush.msk.msra.mxu3 %vm15676_vm2, %v913_v59  ;;  %v730_v25 = vrot.slane %v16049_v61, 2  ;;  %v731_v0 = vrot.slane %v16050_v2, 2  ;;  %v798_v1 = vrot.slane %v8586_v14, 7 }
  0xc3   : > { %v886_v3 = vld.sshfl [vmem:[#allocation1 + $0x20] sm:$0xff pattern:$0x75316420]  ;;  %v887_v54 = vld.sshfl [vmem:[#allocation1 + $0x28] sm:$0xff pattern:$0x75316420]  ;;  %v943_v62 = vsel %vm934_vm4, %v16043_v21, %v657_v10 }
  0xc4   : > { %v906_v5 = vrot.slane %v886_v3, 1  ;;  %v907_v20 = vrot.slane %v887_v54, 1  ;;  %892 = vst [vmem:[#allocation1 + $0x20] ss:$2 sm:$0xff] %v561_v58  ;;  %v978_v58 = vsel %vm968_vm0, %v725_v51, %v792_v53  ;;  %v996_v54 = vsel %vm15675_vm1, %v979_v30, %v8626_v29 }
  0xc5   : > { %v995_v3 = vsel %vm15675_vm1, %v978_v58, %v16041_v24  ;;  %v997_v29 = vsel %vm15675_vm1, %v980_v50, %v8628_v60  ;;  %v960_v11 = vsel %vm951_vm5, %v943_v62, %v724_v55 }
  0xc6   : > { %7173 = vmatpush.msk.msrb.mxu0 %vm15676_vm2, %v906_v5  ;;  %7178 = vmatpush.msk.msrb.mxu1 %vm15676_vm2, %v907_v20  ;;  %v1007_v16 = vsel %vm1002_vm3, %v990_v7, %v906_v5  ;;  %v1008_v38 = vsel %vm1002_vm3, %v991_v4, %v907_v20  ;;  %v16042_v7 = vld [vmem:[#allocation27_spill] sm:$0xff]  ;;  %v1012_v5 = vsel %vm1002_vm3, %v995_v3, %v911_v52 }
  0xc7   : > { %7166 = vmatmul.msk.f32.gmra.mxu2 %vm1047_vm6, %v8715_v45  ;;  %7171 = vmatmul.msk.f32.gmra.mxu3 %vm1047_vm6, %v8715_v45  ;;  %v659_v4 = vrot.slane %v16042_v7, 5  ;;  %v1013_v20 = vsel %vm1002_vm3, %v996_v54, %v912_v32  ;;  %v1014_v49 = vsel %vm1002_vm3, %v997_v29, %v913_v59  ;;  %v16046_v32 = vld [vmem:[#allocation15_spill] sm:$0xff]  ;;  %v900_v59 = vld.sshfl [vmem:[#allocation1 + $0x30] sm:$0xff pattern:$0x75316420]  ;;  %v984_v3 = vsel %vm968_vm0, %v731_v0, %v798_v1  ;;  %v16054_v54 = vld [vmem:[#allocation21_spill] sm:$0xff] }
  0xc8   : > { %1223 = vmatpush.msrb.mxu0 %v1007_v16  ;;  %1252 = vmatpush.msrb.mxu1 %v1008_v38  ;;  %v16044_v16 = vld [vmem:[#allocation10_spill] sm:$0xff]  ;;  %v916_v37 = vrot.slane %v900_v59, 1  ;;  %v16057_v29 = vld [vmem:[#allocation19_spill] sm:$0xff] }
  0xc9   : > { %v944_v38 = vsel %vm934_vm4, %v16044_v16, %v658_v35  ;;  %1397 = vmatpush.msra.mxu2 %v1013_v20  ;;  %v945_v31 = vsel %vm934_vm4, %v16046_v32, %v659_v4  ;;  %1426 = vmatpush.msra.mxu3 %v1014_v49  ;;  %v663_v35 = vrot.slane %v16053_v17, 5  ;;  %v16055_v4 = vld [vmem:[#allocation22_spill] sm:$0xff]  ;;  %v16056_v20 = vld [vmem:[#allocation32_spill] sm:$0xff] }
  0xca   : > { %1224 = vmatpush.msrb.mxu0 %v956_v34  ;;  %1253 = vmatpush.msrb.mxu1 %v957_v6  ;;  %v16045_v34 = vld [vmem:[#allocation28_spill] sm:$0xff]  ;;  %v961_v42 = vsel %vm951_vm5, %v944_v38, %v725_v51  ;;  %v962_v60 = vsel %vm951_vm5, %v945_v31, %v726_v26  ;;  %v729_v26 = vrot.slane %v8572_v44, 2  ;;  %v16051_v44 = vld [vmem:[#allocation33_spill] sm:$0xff]  ;;  %v664_v50 = vrot.slane %v16056_v20, 5 }
  0xcb   : > { %7174 = vmatmul.msk.f32.vlgmr.msrb.gmra.mxu0 %vm1047_vm6, %v8623_v12  ;;  %7179 = vmatmul.msk.f32.vlgmr.msrb.gmra.mxu1 %vm1047_vm6, %v8623_v12  ;;  %v660_v6 = vrot.slane %v16045_v34, 5  ;;  %v898_v41 = vld.sshfl [vmem:[#allocation1 + $0x20] sm:$0xff pattern:$0x75316420]  ;;  %v661_v10 = vrot.slane %v16051_v44, 5 }
  0xcc   : > { %7193 = vmatpush.msk.msra.mxu0 %vm15676_vm2, %v910_v56  ;;  %7198 = vmatpush.msk.msra.mxu1 %vm15676_vm2, %v911_v52  ;;  %v16048_v51 = vld [vmem:[#allocation48_spill] sm:$0xff]  ;;  %v914_v57 = vrot.slane %v898_v41, 1  ;;  %v899_v53 = vld.sshfl [vmem:[#allocation1 + $0x28] sm:$0xff pattern:$0x75316420]  ;;  %v982_v40 = vsel %vm968_vm0, %v729_v26, %v796_v23 }
  0xcd   : > { %v946_v55 = vsel %vm934_vm4, %v16047_v8, %v660_v6  ;;  %1398 = vmatpush.msra.mxu2 %v962_v60  ;;  %v728_v52 = vrot.slane %v16048_v51, 2  ;;  %v915_v46 = vrot.slane %v899_v53, 1  ;;  %v999_v30 = vsel %vm15675_vm1, %v982_v40, %v8751_v28  ;;  %v16058_v16 = vld [vmem:[#allocation20_spill] sm:$0xff] }
  0xce   : > { %1339 = vmatpush.msra.mxu0 %v1011_v13  ;;  %1368 = vmatpush.msra.mxu1 %v1012_v5  ;;  %v963_v56 = vsel %vm951_vm5, %v946_v55, %v727_v27  ;;  %v797_v27 = vrot.slane %v8575_v36, 7  ;;  %v16052_v36 = vld [vmem:[#allocation34_spill] sm:$0xff]  ;;  %v947_v7 = vsel %vm934_vm4, %v16054_v54, %v661_v10  ;;  %v950_v38 = vsel %vm934_vm4, %v16058_v16, %v664_v50 }
  0xcf   : > { %7167 = vmatmul.msk.f32.gmra.mxu2 %vm1047_vm6, %v8758_v18  ;;  %7172 = vmatmul.msk.f32.gmra.mxu3 %vm1047_vm6, %v8758_v18  ;;  %v981_v48 = vsel %vm968_vm0, %v728_v52, %v795_v43  ;;  %v662_v58 = vrot.slane %v16052_v36, 5  ;;  %v1016_v13 = vsel %vm1002_vm3, %v999_v30, %v915_v46  ;;  %v964_v28 = vsel %vm951_vm5, %v947_v7, %v728_v52 }
  0xd0   : > { %1340 = vmatpush.msra.mxu0 %v960_v11  ;;  %1369 = vmatpush.msra.mxu1 %v961_v42  ;;  %v998_v22 = vsel %vm15675_vm1, %v981_v48, %v8749_v33  ;;  %v983_v47 = vsel %vm968_vm0, %v730_v25, %v797_v27  ;;  %v949_v11 = vsel %vm934_vm4, %v16057_v29, %v663_v35 }
  0xd1   : > { %1427 = vmatpush.msra.mxu3 %v963_v56  ;;  %v1015_v14 = vsel %vm1002_vm3, %v998_v22, %v914_v57  ;;  %v1000_v33 = vsel %vm15675_vm1, %v983_v47, %v8695_v15  ;;  %v1001_v15 = vsel %vm15675_vm1, %v984_v3, %v8697_v63  ;;  %v948_v5 = vsel %vm934_vm4, %v16055_v4, %v662_v58 }
  0xd2   : > { %7213 = vmatpush.msk.msrb.mxu0 %vm15676_vm2, %v914_v57  ;;  %7218 = vmatpush.msk.msrb.mxu1 %vm15676_vm2, %v915_v46  ;;  %v1017_v24 = vsel %vm1002_vm3, %v1000_v33, %v916_v37  ;;  %v1018_v21 = vsel %vm1002_vm3, %v1001_v15, %v917_v39  ;;  %v965_v62 = vsel %vm951_vm5, %v948_v5, %v729_v26 }
  0xd3   : > { %7175 = vmatmul.msk.f32.gmra.mxu0 %vm1047_vm6, %v8671_v9  ;;  %7180 = vmatmul.msk.f32.gmra.mxu1 %vm1047_vm6, %v8671_v9  ;;  %v966_v63 = vsel %vm951_vm5, %v949_v11, %v730_v25  ;;  %v967_v34 = vsel %vm951_vm5, %v950_v38, %v731_v0 }
  0xd4   : > { %1455 = vmatpush.msrb.mxu0 %v1015_v14  ;;  %1484 = vmatpush.msrb.mxu1 %v1016_v13 }
  0xd6   : > { %1456 = vmatpush.msrb.mxu0 %v964_v28  ;;  %1485 = vmatpush.msrb.mxu1 %v965_v62 }
  0xd7   : > { %7184 = vmatmul.msk.f32.vlgmr.msrb.gmra.mxu2 %vm1047_vm6, %v8623_v12  ;;  %7189 = vmatmul.msk.f32.vlgmr.msrb.gmra.mxu3 %vm1047_vm6, %v8623_v12 }
  0xd8   : > { %7223 = vmatpush.msk.msrb.mxu2 %vm15676_vm2, %v916_v37  ;;  %7228 = vmatpush.msk.msrb.mxu3 %vm15676_vm2, %v917_v39 }
  0xda   : > { %1513 = vmatpush.msrb.mxu2 %v1017_v24  ;;  %1542 = vmatpush.msrb.mxu3 %v1018_v21 }
  0xdb   : > { %7176 = vmatmul.msk.f32.gmra.mxu0 %vm1047_vm6, %v8715_v45  ;;  %7181 = vmatmul.msk.f32.gmra.mxu1 %vm1047_vm6, %v8715_v45 }
  0xdc   : > { %1514 = vmatpush.msrb.mxu2 %v966_v63  ;;  %1543 = vmatpush.msrb.mxu3 %v967_v34 }
  0xdf   : > { %7185 = vmatmul.msk.f32.gmra.mxu2 %vm1047_vm6, %v8671_v9  ;;  %7190 = vmatmul.msk.f32.gmra.mxu3 %vm1047_vm6, %v8671_v9 }
  0xe3   : > { %7177 = vmatmul.msk.f32.gmra.mxu0 %vm1047_vm6, %v8758_v18  ;;  %7182 = vmatmul.msk.f32.gmra.mxu1 %vm1047_vm6, %v8758_v18 }
  0xe7   : > { %7186 = vmatmul.msk.f32.gmra.mxu2 %vm1047_vm6, %v8715_v45  ;;  %7191 = vmatmul.msk.f32.gmra.mxu3 %vm1047_vm6, %v8715_v45 }
  0xeb   : > { %7194 = vmatmul.msk.f32.vlgmr.msra.gmra.mxu0 %vm1047_vm6, %v8623_v12  ;;  %7199 = vmatmul.msk.f32.vlgmr.msra.gmra.mxu1 %vm1047_vm6, %v8623_v12 }
  0xef   : > { %7187 = vmatmul.msk.f32.gmra.mxu2 %vm1047_vm6, %v8758_v18  ;;  %7192 = vmatmul.msk.f32.gmra.mxu3 %vm1047_vm6, %v8758_v18 }
  0xf3   : > { %7195 = vmatmul.msk.f32.gmra.mxu0 %vm1047_vm6, %v8671_v9  ;;  %7200 = vmatmul.msk.f32.gmra.mxu1 %vm1047_vm6, %v8671_v9 }
  0xf7   : > { %7204 = vmatmul.msk.f32.vlgmr.msra.gmra.mxu2 %vm1047_vm6, %v8623_v12  ;;  %7209 = vmatmul.msk.f32.vlgmr.msra.gmra.mxu3 %vm1047_vm6, %v8623_v12 }
  0xfb   : > { %7196 = vmatmul.msk.f32.gmra.mxu0 %vm1047_vm6, %v8715_v45  ;;  %7201 = vmatmul.msk.f32.gmra.mxu1 %vm1047_vm6, %v8715_v45 }
  0xff   : > { %7205 = vmatmul.msk.f32.gmra.mxu2 %vm1047_vm6, %v8671_v9  ;;  %7210 = vmatmul.msk.f32.gmra.mxu3 %vm1047_vm6, %v8671_v9 }
 0x103   : > { %7197 = vmatmul.msk.f32.gmra.mxu0 %vm1047_vm6, %v8758_v18  ;;  %7202 = vmatmul.msk.f32.gmra.mxu1 %vm1047_vm6, %v8758_v18 }
 0x107   : > { %7206 = vmatmul.msk.f32.gmra.mxu2 %vm1047_vm6, %v8715_v45  ;;  %7211 = vmatmul.msk.f32.gmra.mxu3 %vm1047_vm6, %v8715_v45 }
 0x10b   : > { %7214 = vmatmul.msk.f32.vlgmr.msrb.gmra.mxu0 %vm1047_vm6, %v8623_v12  ;;  %7219 = vmatmul.msk.f32.vlgmr.msrb.gmra.mxu1 %vm1047_vm6, %v8623_v12 }
 0x10f   : > { %7207 = vmatmul.msk.f32.gmra.mxu2 %vm1047_vm6, %v8758_v18  ;;  %7212 = vmatmul.msk.f32.gmra.mxu3 %vm1047_vm6, %v8758_v18 }
 0x113   : > { %7215 = vmatmul.msk.f32.gmra.mxu0 %vm1047_vm6, %v8671_v9  ;;  %7220 = vmatmul.msk.f32.gmra.mxu1 %vm1047_vm6, %v8671_v9 }
 0x115   : > { %v8997_v60 = vpop.permute.xlu0 %1044 }
 0x116   : > { %16061 = vst [vmem:[#allocation24_spill] sm:$0xff] %v8997_v60 }
 0x117   : > { %7224 = vmatmul.msk.f32.vlgmr.msrb.gmra.mxu2 %vm1047_vm6, %v8623_v12  ;;  %7229 = vmatmul.msk.f32.vlgmr.msrb.gmra.mxu3 %vm1047_vm6, %v8623_v12  ;;  %v8982_v12 = vpop.permute.xlu1 %1034 }
 0x11b   : > { %7216 = vmatmul.msk.f32.gmra.mxu0 %vm1047_vm6, %v8715_v45  ;;  %7221 = vmatmul.msk.f32.gmra.mxu1 %vm1047_vm6, %v8715_v45 }
 0x11d   : > { %v9010_v53 = vpop.permute.xlu0 %1039 }
 0x11e   : > { %16066 = vst [vmem:[#allocation25_spill] sm:$0xff] %v9010_v53 }
 0x11f   : > { %7225 = vmatmul.msk.f32.gmra.mxu2 %vm1047_vm6, %v8671_v9  ;;  %7230 = vmatmul.msk.f32.gmra.mxu3 %vm1047_vm6, %v8671_v9  ;;  %v8988_v6 = vpop.permute.xlu1 %1029 }
 0x123   : > { %7217 = vmatmul.msk.f32.gmra.mxu0 %vm1047_vm6, %v8758_v18  ;;  %7222 = vmatmul.msk.f32.gmra.mxu1 %vm1047_vm6, %v8758_v18 }
 0x126   : > { %v1110_v9 = vpop.f32.mrf.mxu0  ;;  %v1139_v49 = vpop.f32.mrf.mxu1 }
 0x127   : > { %7226 = vmatmul.msk.f32.gmra.mxu2 %vm1047_vm6, %v8715_v45  ;;  %7231 = vmatmul.msk.f32.gmra.mxu3 %vm1047_vm6, %v8715_v45  ;;  %v8991_v42 = vadd.f32 %v1110_v9, %v8988_v6  ;;  %v8994_v32 = vadd.f32 %v1139_v49, %v8988_v6 }
 0x129   : > { %16059 = vst [vmem:[#allocation43_spill] sm:$0xff] %v8991_v42  ;;  %v1557_v45 = vand.u32 2147483647, %v8991_v42  ;;  %v1558_v8 = vand.u32 2147483647, %v8994_v32 }
 0x12a   : > { %16060 = vst [vmem:[#allocation23_spill] sm:$0xff] %v8994_v32 }
 0x12b   : > { %v1621_v56 = vmul.f32 0.3275911, %v1557_v45  ;;  %v1622_v59 = vmul.f32 0.3275911, %v1558_v8  ;;  %v3285_v52 = vsub.f32 0.0, %v1557_v45  ;;  %v3286_v43 = vsub.f32 0.0, %v1558_v8 }
 0x12d   : > { %v9003_v39 = vadd.f32 1.0, %v1621_v56  ;;  %v9008_v57 = vadd.f32 1.0, %v1622_v59  ;;  %v3349_v61 = vmul.f32 %v3285_v52, %v1557_v45  ;;  %v3350_v48 = vmul.f32 %v3286_v43, %v1558_v8 }
 0x12e   : > { %v1113_v31 = vpop.f32.mrf.mxu0  ;;  %v1142_v19 = vpop.f32.mrf.mxu1 }
 0x12f   : > { %7227 = vmatmul.msk.f32.gmra.mxu2 %vm1047_vm6, %v8758_v18  ;;  %7232 = vmatmul.msk.f32.gmra.mxu3 %vm1047_vm6, %v8758_v18  ;;  %v9001_v37 = vadd.f32 %v1113_v31, %v8982_v12  ;;  %16063 = vst [vmem:[#allocation11_spill] sm:$0xff] %v9003_v39  ;;  %v9006_v41 = vadd.f32 %v1142_v19, %v8982_v12  ;;  %7386 = vrcp.f32 %v9003_v39  ;;  %v3413_v22 = vmul.f32 1.442695, %v3349_v61 }
 0x130   : > { %16065 = vst [vmem:[#allocation40_spill] sm:$0xff] %v9008_v57  ;;  %7388 = vrcp.f32 %v9008_v57  ;;  %v3415_v33 = vmul.f32 1.442695, %v3350_v48 }
 0x131   : > { %16062 = vst [vmem:[#allocation37_spill] sm:$0xff] %v9001_v37  ;;  %v1573_v26 = vand.u32 2147483647, %v9001_v37  ;;  %v1574_v46 = vand.u32 2147483647, %v9006_v41  ;;  %7390 = vpow2.f32 %v3413_v22 }
 0x132   : > { %16064 = vst [vmem:[#allocation12_spill] sm:$0xff] %v9006_v41 }
 0x133   : > { %v1637_v0 = vmul.f32 0.3275911, %v1573_v26  ;;  %v3301_v44 = vsub.f32 0.0, %v1573_v26  ;;  %v1638_v10 = vmul.f32 0.3275911, %v1574_v46  ;;  %v3302_v58 = vsub.f32 0.0, %v1574_v46 }
 0x135   : > { %v9026_v36 = vpop.eup %7386  ;;  %v9031_v35 = vadd.f32 1.0, %v1637_v0  ;;  %v3365_v24 = vmul.f32 %v3301_v44, %v1573_v26  ;;  %v9034_v3 = vadd.f32 1.0, %v1638_v10  ;;  %v3366_v5 = vmul.f32 %v3302_v58, %v1574_v46 }
 0x136   : > { %v1116_v51 = vpop.f32.mrf.mxu0  ;;  %v1145_v47 = vpop.f32.mrf.mxu1  ;;  %16069 = vst [vmem:[#allocation14_spill] sm:$0xff] %v9026_v36  ;;  %v9041_v7 = vmul.f32 %v9026_v36, %v9003_v39 }
 0x137   : > { %v9017_v25 = vadd.f32 %v1116_v51, %v9010_v53  ;;  %v9028_v30 = vpop.eup %7388  ;;  %v9037_v54 = vadd.f32 %v1145_v47, %v9010_v53  ;;  %7392 = vrcp.f32 %v9031_v35  ;;  %v3445_v16 = vmul.f32 1.442695, %v3365_v24 }
 0x138   : > { %16070 = vst [vmem:[#allocation29_spill] sm:$0xff] %v9028_v30  ;;  %v9048_v4 = vmul.f32 %v9028_v30, %v9008_v57  ;;  %7394 = vrcp.f32 %v9034_v3  ;;  %v3447_v45 = vmul.f32 1.442695, %v3366_v5  ;;  %v9066_v56 = vpop.eup %7390 }
 0x139   : > { %v1589_v40 = vand.u32 2147483647, %v9017_v25  ;;  %16071 = vst [vmem:[#allocation38_spill] sm:$0xff] %v9041_v7  ;;  %v1590_v38 = vand.u32 2147483647, %v9037_v54  ;;  %7396 = vpow2.f32 %v3415_v33 }
 0x13a   : > { %v1168_v55 = vpop.f32.mrf.mxu2  ;;  %v1197_v18 = vpop.f32.mrf.mxu3  ;;  %16072 = vst [vmem:[#allocation30_spill] sm:$0xff] %v9048_v4  ;;  %7398 = vpow2.f32 %v3445_v16 }
 0x13b   : > { %v9020_v2 = vadd.f32 %v1168_v55, %v8988_v6  ;;  %v9023_v1 = vadd.f32 %v1197_v18, %v8988_v6  ;;  %v1653_v15 = vmul.f32 0.3275911, %v1589_v40  ;;  %v3317_v50 = vsub.f32 0.0, %v1589_v40  ;;  %16075 = vst [vmem:[#allocation44_spill] sm:$0xff] %v9066_v56 }
 0x13c   : > { %v1654_v43 = vmul.f32 0.3275911, %v1590_v38  ;;  %v3318_v22 = vsub.f32 0.0, %v1590_v38 }
 0x13d   : > { %16067 = vst [vmem:[#allocation26_spill] sm:$0xff] %v9020_v2  ;;  %v1559_v17 = vand.u32 2147483647, %v9020_v2  ;;  %v1560_v13 = vand.u32 2147483647, %v9023_v1  ;;  %v9059_v9 = vadd.f32 1.0, %v1653_v15  ;;  %v3381_v55 = vmul.f32 %v3317_v50, %v1589_v40 }
 0x13e   : > { %16068 = vst [vmem:[#allocation13_spill] sm:$0xff] %v9023_v1  ;;  %v1119_v14 = vpop.f32.mrf.mxu0  ;;  %v1148_v46 = vpop.f32.mrf.mxu1 }
 0x13f   : > { %v9044_v28 = vadd.f32 %v1119_v14, %v8997_v60  ;;  %v1623_v62 = vmul.f32 0.3275911, %v1559_v17  ;;  %v3287_v29 = vsub.f32 0.0, %v1559_v17  ;;  %v1624_v63 = vmul.f32 0.3275911, %v1560_v13 }
 0x140   : > { %v3288_v61 = vsub.f32 0.0, %v1560_v13  ;;  %7400 = vrcp.f32 %v9059_v9  ;;  %v3477_v10 = vmul.f32 1.442695, %v3381_v55  ;;  %v9093_v14 = vadd.f32 %v1148_v46, %v8997_v60 }
 0x141   : > { %v9062_v49 = vand.u32 2147483647, %v9044_v28  ;;  %v9069_v59 = vadd.f32 1.0, %v1623_v62  ;;  %v3351_v19 = vmul.f32 %v3287_v29, %v1559_v17  ;;  %v9074_v52 = vadd.f32 1.0, %v1624_v63 }
 0x142   : > { %v1171_v23 = vpop.f32.mrf.mxu2  ;;  %v1200_v27 = vpop.f32.mrf.mxu3  ;;  %7402 = vpow2.f32 %v3447_v45  ;;  %v9100_v17 = vadd.f32 1.0, %v1654_v43  ;;  %v3352_v5 = vmul.f32 %v3288_v61, %v1560_v13  ;;  %vm2234_vm14 = vweird.f32 %v9059_v9 }
 0x143   : > { %v9051_v20 = vadd.f32 %v1171_v23, %v8982_v12  ;;  %v9055_v11 = vadd.f32 %v1200_v27, %v8982_v12  ;;  %16076 = vst [vmem:[#allocation36_spill] sm:$0xff] %v9069_v59  ;;  %v9079_v23 = vpop.eup %7392  ;;  %v1669_v48 = vmul.f32 0.3275911, %v9062_v49  ;;  %7404 = vrcp.f32 %v9069_v59 }
 0x144   : > { %16077 = vst [vmem:[#allocation45_spill] sm:$0xff] %v9074_v52  ;;  %v9086_v0 = vpop.eup %7394  ;;  %v3417_v47 = vmul.f32 1.442695, %v3351_v19  ;;  %7406 = vrcp.f32 %v9074_v52  ;;  %v9098_v33 = vmul.f32 %v9079_v23, %v9031_v35  ;;  %v9121_v19 = vand.u32 2147483647, %v9093_v14 }
 0x145   : > { %16073 = vst [vmem:[#allocation39_spill] sm:$0xff] %v9051_v20  ;;  %v1575_v8 = vand.u32 2147483647, %v9051_v20  ;;  %v9072_v51 = vand.u32 2147483647, %v9055_v11  ;;  %v9088_v40 = vpop.eup %7396  ;;  %v9105_v50 = vmul.f32 %v9086_v0, %v9034_v3  ;;  %v9110_v62 = vadd.f32 1.0, %v1669_v48 }
 0x146   : > { %16074 = vst [vmem:[#allocation35_spill] sm:$0xff] %v9055_v11  ;;  %v9112_v29 = vpop.eup %7398  ;;  %7408 = vpow2.f32 %v3477_v10  ;;  %v3419_v10 = vmul.f32 1.442695, %v3352_v5  ;;  %v1670_v1 = vmul.f32 0.3275911, %v9121_v19  ;;  %vm2249_vm5 = vweird.f32 %v9100_v17 }
 0x147   : > { %v1639_v44 = vmul.f32 0.3275911, %v1575_v8  ;;  %16080 = vst [vmem:[#allocation18_spill] sm:$0xff] %v9088_v40  ;;  %v1640_v58 = vmul.f32 0.3275911, %v9072_v51  ;;  %v3303_v16 = vsub.f32 0.0, %v1575_v8  ;;  %v9116_v55 = vpop.eup %7400  ;;  %7410 = vpow2.f32 %v3417_v47 }
 0x148   : > { %16081 = vst [vmem:[#allocation47_spill] sm:$0xff] %v9112_v29  ;;  %v9126_v46 = vpop.eup %7402  ;;  %v3304_v48 = vsub.f32 0.0, %v9072_v51  ;;  %7412 = vrcp.f32 %v9100_v17  ;;  %v9143_v18 = vmul.f32 %v9116_v55, %v9059_v9  ;;  %v1226_v61 = vpop.f32.mrf.mxu0  ;;  %vm2474_vm7 = vweird.f32 %v9110_v62 }
 0x149   : > { %v9114_v63 = vadd.f32 1.0, %v1639_v44  ;;  %v9118_v13 = vadd.f32 1.0, %v1640_v58  ;;  %16085 = vst [vmem:[#allocation28_spill] sm:$0xff] %v9126_v46  ;;  %v9131_v44 = vpop.eup %7404  ;;  %7414 = vrcp.f32 %v9110_v62  ;;  %vm2235_vm0 = vweird.f32 %v9116_v55 }
 0x14a   : > { %v1174_v21 = vpop.f32.mrf.mxu2  ;;  %v1203_v34 = vpop.f32.mrf.mxu3  ;;  %16086 = vst [vmem:[#allocation15_spill] sm:$0xff] %v9131_v44  ;;  %vm9586_vm3 = vmor %vm2234_vm14, %vm2235_vm0  ;;  %vm3701_vm14 = vcmp.lt.f32.partialorder %v9017_v25, 0.0  ;;  %vm2009_vm0 = vweird.f32 %v9034_v3 }
 0x14b   : > { %v9077_v26 = vadd.f32 %v1174_v21, %v9010_v53  ;;  %v9083_v27 = vadd.f32 %v1203_v34, %v9010_v53  ;;  %16082 = vst [vmem:[#allocation27_spill] sm:$0xff] %v9114_v63  ;;  %v3382_v34 = vmul.f32 %v3318_v22, %v1590_v38  ;;  %v9138_v58 = vpop.eup %7406  ;;  %7416 = vrcp.f32 %v9114_v63 }
 0x14c   : > { %16083 = vst [vmem:[#allocation9_spill] sm:$0xff] %v9118_v13  ;;  %7418 = vrcp.f32 %v9118_v13  ;;  %v9151_v2 = vpop.eup %7408  ;;  %v9164_v5 = vmul.f32 %v9138_v58, %v9074_v52  ;;  %v9178_v52 = vadd.f32 1.0, %v1670_v1 }
 0x14d   : > { %16078 = vst [vmem:[#allocation17_spill] sm:$0xff] %v9077_v26  ;;  %v1591_v24 = vand.u32 2147483647, %v9077_v26  ;;  %v9108_v21 = vand.u32 2147483647, %v9083_v27  ;;  %v9160_v20 = vpop.eup %7410  ;;  %7420 = vpow2.f32 %v3419_v10 }
 0x14e   : > { %16079 = vst [vmem:[#allocation46_spill] sm:$0xff] %v9083_v27  ;;  %v3479_v31 = vmul.f32 1.442695, %v3382_v34  ;;  %vm2489_vm8 = vweird.f32 %v9178_v52 }
 0x14f   : > { %v1655_v38 = vmul.f32 0.3275911, %v1591_v24  ;;  %v1656_v22 = vmul.f32 0.3275911, %v9108_v21  ;;  %16088 = vst [vmem:[#allocation48_spill] sm:$0xff] %v9138_v58  ;;  %v3319_v34 = vsub.f32 0.0, %v1591_v24  ;;  %v1255_v58 = vpop.f32.mrf.mxu1 }
 0x150   : > { %16091 = vst [vmem:[#allocation33_spill] sm:$0xff] %v9160_v20  ;;  %7422 = vpow2.f32 %v3479_v31  ;;  %v3320_v20 = vsub.f32 0.0, %v9108_v21 }
 0x151   : > { %v9158_v11 = vadd.f32 1.0, %v1655_v38  ;;  %16092 = vst [vmem:[#allocation34_spill] sm:$0xff] %v9164_v5  ;;  %v9166_v27 = vadd.f32 1.0, %v1656_v22  ;;  %v9182_v22 = vadd.f32 %v1226_v61, %v8988_v6  ;;  %v3383_v31 = vmul.f32 %v3319_v34, %v1591_v24 }
 0x152   : > { %v1177_v15 = vpop.f32.mrf.mxu2  ;;  %v1206_v45 = vpop.f32.mrf.mxu3  ;;  %v3334_v24 = vsub.f32 0.0, %v9121_v19  ;;  %v3384_v40 = vmul.f32 %v3320_v20, %v9108_v21 }
 0x153   : > { %v9124_v43 = vadd.f32 %v1177_v15, %v8997_v60  ;;  %v9136_v47 = vadd.f32 %v1206_v45, %v8997_v60  ;;  %v3367_v15 = vmul.f32 %v3303_v16, %v1575_v8  ;;  %v9155_v8 = vmul.f32 %v9131_v44, %v9069_v59  ;;  %16090 = vst [vmem:[#allocation42_spill] sm:$0xff] %v9158_v11  ;;  %v1229_v20 = vpop.f32.mrf.mxu0 }
 0x154   : > { %v3368_v16 = vmul.f32 %v3304_v48, %v9072_v51  ;;  %16093 = vst [vmem:[#allocation31_spill] sm:$0xff] %v9166_v27  ;;  %v3333_v48 = vsub.f32 0.0, %v9062_v49  ;;  %7424 = vrcp.f32 %v9158_v11  ;;  %v3398_v46 = vmul.f32 %v3334_v24, %v9121_v19 }
 0x155   : > { %16084 = vst [vmem:[#allocation10_spill] sm:$0xff] %v9124_v43  ;;  %v9149_v45 = vand.u32 2147483647, %v9124_v43  ;;  %v9169_v26 = vand.u32 2147483647, %v9136_v47  ;;  %v9171_v43 = vpop.eup %7412  ;;  %7426 = vrcp.f32 %v9166_v27 }
 0x156   : > { %16087 = vst [vmem:[#allocation16_spill] sm:$0xff] %v9136_v47  ;;  %v3449_v59 = vmul.f32 1.442695, %v3367_v15  ;;  %v9175_v38 = vpop.eup %7414  ;;  %v3451_v51 = vmul.f32 1.442695, %v3368_v16  ;;  %v9193_v1 = vmul.f32 %v9171_v43, %v9100_v17  ;;  %v3397_v16 = vmul.f32 %v3333_v48, %v9062_v49 }
 0x157   : > { %16089 = vst [vmem:[#allocation41_spill] sm:$0xff] %v9155_v8  ;;  %v1671_v10 = vmul.f32 0.3275911, %v9149_v45  ;;  %v9184_v44 = vpop.eup %7416  ;;  %v1672_v61 = vmul.f32 0.3275911, %v9169_v26  ;;  %v2470_v15 = vmul.f32 %v9175_v38, %v9110_v62  ;;  %vm2475_vm9 = vweird.f32 %v9175_v38 }
 0x158   : > { %16094 = vst [vmem:[#allocation21_spill] sm:$0xff] %v9182_v22  ;;  %v9188_v47 = vpop.eup %7418  ;;  %7428 = vpow2.f32 %v3449_v59  ;;  %v1561_v8 = vand.u32 2147483647, %v9182_v22  ;;  %v9212_v59 = vmul.f32 %v9184_v44, %v9114_v63  ;;  %v3481_v48 = vmul.f32 1.442695, %v3383_v31  ;;  %vm9534_vm10 = vmor %vm2474_vm7, %vm2475_vm9 }
 0x159   : > { %16095 = vst [vmem:[#allocation22_spill] sm:$0xff] %v9184_v44  ;;  %v9201_v34 = vpop.eup %7420  ;;  %7430 = vrcp.f32 %v9178_v52  ;;  %v9205_v5 = vadd.f32 1.0, %v1671_v10  ;;  %v9216_v49 = vmul.f32 %v9188_v47, %v9118_v13  ;;  %v9223_v22 = vadd.f32 %v1255_v58, %v8988_v6 }
 0x15a   : > { %16096 = vst [vmem:[#allocation32_spill] sm:$0xff] %v9188_v47  ;;  %v1284_v32 = vpop.f32.mrf.mxu2  ;;  %v9208_v56 = vpop.eup %7422  ;;  %7432 = vpow2.f32 %v3451_v51  ;;  %v2471_v63 = vsub.f32 1.0, %v2470_v15  ;;  %v3509_v44 = vmul.f32 1.442695, %v3397_v16  ;;  %v3335_v13 = vsub.f32 0.0, %v9149_v45 }
 0x15b   : > { %16097 = vst [vmem:[#allocation19_spill] sm:$0xff] %v9201_v34  ;;  %v9220_v34 = vadd.f32 1.0, %v1672_v61  ;;  %v9225_v42 = vpop.eup %7424  ;;  %v1313_v51 = vpop.f32.mrf.mxu3  ;;  %v3483_v47 = vmul.f32 1.442695, %v3384_v40  ;;  %7434 = vrcp.f32 %v9205_v5  ;;  %v3336_v61 = vsub.f32 0.0, %v9169_v26 }
 0x15c   : > { %16098 = vst [vmem:[#allocation20_spill] sm:$0xff] %v9205_v5  ;;  %v9229_v31 = vpop.eup %7426  ;;  %v1625_v21 = vmul.f32 0.3275911, %v1561_v8  ;;  %7436 = vpow2.f32 %v3481_v48  ;;  %v3289_v16 = vsub.f32 0.0, %v1561_v8  ;;  %v9241_v24 = vmul.f32 %v9225_v42, %v9158_v11 }
 0x15d   : > { %16099 = vst [vmem:[#allocation49_spill] sm:$0xff] %v9208_v56  ;;  %7438 = vrcp.f32 %v9220_v34  ;;  %v1562_v40 = vand.u32 2147483647, %v9223_v22  ;;  %v9246_v41 = vadd.f32 %v1284_v32, %v8988_v6  ;;  %v9252_v48 = vmul.f32 %v9229_v31, %v9166_v27  ;;  %v1232_v27 = vpop.f32.mrf.mxu0 }
 0x15e   : > { %16100 = vst [vmem:[#allocation50_spill] sm:$0xff] %v9212_v59  ;;  %v9233_v10 = vpop.eup %7428  ;;  %v9255_v15 = vmul.f32 %v9175_v38, %v2471_v63  ;;  %v3511_v58 = vmul.f32 1.442695, %v3398_v46  ;;  %7440 = vpow2.f32 %v3483_v47  ;;  %v3400_v59 = vmul.f32 %v3336_v61, %v9169_v26 }
 0x15f   : > { %16101 = vst [vmem:[#allocation51_spill] sm:$0xff] %v9216_v49  ;;  %v9237_v19 = vpop.eup %7430  ;;  %v3399_v49 = vmul.f32 %v3335_v13, %v9149_v45  ;;  %v9262_v32 = vadd.f32 %v1313_v51, %v8988_v6  ;;  %7442 = vpow2.f32 %v3509_v44  ;;  %v3290_v13 = vsub.f32 0.0, %v1562_v40 }
 0x160   : > { %16102 = vst [vmem:[#allocation52_spill] sm:$0xff] %v9220_v34  ;;  %v9248_v29 = vpop.eup %7432  ;;  %v1563_v47 = vand.u32 2147483647, %v9246_v41  ;;  %v9272_v26 = vadd.f32 %v1229_v20, %v8982_v12  ;;  %7444 = vpow2.f32 %v3511_v58  ;;  %v1626_v61 = vmul.f32 0.3275911, %v1562_v40 }
 0x161   : > { %16103 = vst [vmem:[#allocation53_spill] sm:$0xff] %v9223_v22  ;;  %v9259_v22 = vadd.f32 1.0, %v1625_v21  ;;  %v9267_v63 = vpop.eup %7434  ;;  %v3513_v51 = vmul.f32 1.442695, %v3399_v49  ;;  %v3515_v46 = vmul.f32 1.442695, %v3400_v59  ;;  %vm2490_vm12 = vweird.f32 %v9237_v19 }
 0x162   : > { %16104 = vst [vmem:[#allocation54_spill] sm:$0xff] %v9225_v42  ;;  %v1287_v45 = vpop.f32.mrf.mxu2  ;;  %v9274_v21 = vpop.eup %7436  ;;  %v2500_v11 = vmul.f32 %v9267_v63, %v9205_v5  ;;  %v3354_v42 = vmul.f32 %v3290_v13, %v1562_v40  ;;  %v1577_v59 = vand.u32 2147483647, %v9272_v26  ;;  %vm2491_vm13 = vmor %vm2489_vm8, %vm2490_vm12  ;;  %vm2250_vm6 = vweird.f32 %v9171_v43 }
 0x163   : > { %16105 = vst [vmem:[#allocation55_spill] sm:$0xff] %v9229_v31  ;;  %v3353_v31 = vmul.f32 %v3289_v16, %v1561_v8  ;;  %v9277_v8 = vpop.eup %7438  ;;  %7446 = vrcp.f32 %v9259_v22  ;;  %v1316_v49 = vpop.f32.mrf.mxu3  ;;  %v3291_v16 = vsub.f32 0.0, %v1563_v47  ;;  %vm9617_vm7 = vmor %vm2249_vm5, %vm2250_vm6  ;;  %vm3717_vm9 = vcmp.lt.f32.partialorder %v9044_v28, 0.0 }
 0x164   : > { %16106 = vst [vmem:[#allocation56_spill] sm:$0xff] %v9233_v10  ;;  %v1258_v10 = vpop.f32.mrf.mxu1  ;;  %v9287_v58 = vpop.eup %7440  ;;  %7448 = vpow2.f32 %v3513_v51  ;;  %v9309_v30 = vadd.f32 %v1316_v49, %v8982_v12  ;;  %vm1995_vm12 = vweird.f32 %v9079_v23  ;;  %vm3702_vm5 = vcmp.lt.f32.partialorder %v9037_v54, 0.0 }
 0x165   : > { %16107 = vst [vmem:[#allocation57_spill] sm:$0xff] %v9241_v24  ;;  %v9285_v44 = vadd.f32 %v1258_v10, %v8982_v12  ;;  %v9291_v24 = vpop.eup %7442  ;;  %7450 = vpow2.f32 %v3515_v46  ;;  %v3355_v57 = vmul.f32 %v3291_v16, %v1563_v47  ;;  %v3305_v46 = vsub.f32 0.0, %v1577_v59 }
 0x166   : > { %16108 = vst [vmem:[#allocation58_spill] sm:$0xff] %v9246_v41  ;;  %v1564_v41 = vand.u32 2147483647, %v9262_v32  ;;  %v9300_v40 = vpop.eup %7444 }
 0x167   : > { %16109 = vst [vmem:[#allocation59_spill] sm:$0xff] %v9248_v29  ;;  %v2485_v29 = vmul.f32 %v9237_v19, %v9178_v52  ;;  %v1578_v51 = vand.u32 2147483647, %v9285_v44 }
 0x168   : > { %16110 = vst [vmem:[#allocation60_spill] sm:$0xff] %v9252_v48  ;;  %v1628_v10 = vmul.f32 0.3275911, %v1564_v41  ;;  %v3292_v37 = vsub.f32 0.0, %v1564_v41 }
 0x169   : > { %16111 = vst [vmem:[#allocation61_spill] sm:$0xff] %v9259_v22  ;;  %v2486_v20 = vsub.f32 1.0, %v2485_v29  ;;  %v2515_v29 = vmul.f32 %v9277_v8, %v9220_v34  ;;  %v9306_v34 = vpop.eup %7446 }
 0x16a   : > { %16112 = vst [vmem:[#allocation62_spill] sm:$0xff] %v9262_v32  ;;  %v9295_v32 = vadd.f32 1.0, %v1626_v61  ;;  %v3423_v61 = vmul.f32 1.442695, %v3354_v42  ;;  %v9323_v16 = vpop.eup %7448 }
 0x16b   : > { %16113 = vst [vmem:[#allocation63_spill] sm:$0xff] %v9267_v63  ;;  %v9303_v13 = vmul.f32 %v9237_v19, %v2486_v20  ;;  %v9315_v20 = vadd.f32 %v1232_v27, %v9010_v53  ;;  %v1641_v27 = vmul.f32 0.3275911, %v1577_v59  ;;  %v9332_v5 = vpop.eup %7450 }
 0x16c   : > { %16114 = vst [vmem:[#allocation64_spill] sm:$0xff] %v9272_v26  ;;  %v1261_v48 = vpop.f32.mrf.mxu1  ;;  %v2501_v26 = vsub.f32 1.0, %v2500_v11  ;;  %v9317_v11 = vadd.f32 1.0, %v1628_v10  ;;  %v1235_v10 = vpop.f32.mrf.mxu0 }
 0x16d   : > { %16115 = vst [vmem:[#allocation65_spill] sm:$0xff] %v9274_v21  ;;  %v3421_v21 = vmul.f32 1.442695, %v3353_v31  ;;  %v1627_v31 = vmul.f32 0.3275911, %v1563_v47  ;;  %v9321_v42 = vadd.f32 %v1261_v48, %v9010_v53  ;;  %v1290_v47 = vpop.f32.mrf.mxu2 }
 0x16e   : > { %16116 = vst [vmem:[#allocation66_spill] sm:$0xff] %v9277_v8  ;;  %v9326_v49 = vmul.f32 %v9267_v63, %v2501_v26  ;;  %v1580_v48 = vand.u32 2147483647, %v9309_v30  ;;  %v1642_v26 = vmul.f32 0.3275911, %v1578_v51 }
 0x16f   : > { %16117 = vst [vmem:[#allocation67_spill] sm:$0xff] %v9285_v44  ;;  %7452 = vpow2.f32 %v3421_v21  ;;  %v9312_v4 = vadd.f32 1.0, %v1627_v31  ;;  %v3356_v21 = vmul.f32 %v3292_v37, %v1564_v41  ;;  %v3306_v31 = vsub.f32 0.0, %v1578_v51 }
 0x170   : > { %16118 = vst [vmem:[#allocation68_spill] sm:$0xff] %v9287_v58  ;;  %v9298_v58 = vadd.f32 %v1287_v45, %v8982_v12  ;;  %v2516_v45 = vsub.f32 1.0, %v2515_v29  ;;  %7454 = vrcp.f32 %v9295_v32  ;;  %v9330_v29 = vmul.f32 %v9306_v34, %v9259_v22 }
 0x171   : > { %16119 = vst [vmem:[#allocation69_spill] sm:$0xff] %v9295_v32  ;;  %7456 = vpow2.f32 %v3423_v61  ;;  %v3425_v37 = vmul.f32 1.442695, %v3355_v57  ;;  %v3369_v41 = vmul.f32 %v3305_v46, %v1577_v59  ;;  %v9340_v22 = vadd.f32 %v1290_v47, %v9010_v53 }
 0x172   : > { %16120 = vst [vmem:[#allocation70_spill] sm:$0xff] %v9298_v58  ;;  %v1579_v44 = vand.u32 2147483647, %v9298_v58  ;;  %7458 = vrcp.f32 %v9312_v4  ;;  %v3427_v63 = vmul.f32 1.442695, %v3356_v21  ;;  %v9346_v57 = vadd.f32 %v1235_v10, %v8997_v60 }
 0x173   : > { %16121 = vst [vmem:[#allocation71_spill] sm:$0xff] %v9306_v34  ;;  %v1319_v34 = vpop.f32.mrf.mxu3  ;;  %7460 = vrcp.f32 %v9317_v11  ;;  %v9351_v61 = vadd.f32 1.0, %v1641_v27  ;;  %v3370_v46 = vmul.f32 %v3306_v31, %v1578_v51  ;;  %v9354_v47 = vmul.f32 %v9277_v8, %v2516_v45 }
 0x174   : > { %16122 = vst [vmem:[#allocation72_spill] sm:$0xff] %v9309_v30  ;;  %v3307_v30 = vsub.f32 0.0, %v1579_v44  ;;  %v1644_v21 = vmul.f32 0.3275911, %v1580_v48  ;;  %7462 = vpow2.f32 %v3425_v37  ;;  %v9359_v10 = vadd.f32 1.0, %v1642_v26 }
 0x175   : > { %16123 = vst [vmem:[#allocation73_spill] sm:$0xff] %v9312_v4  ;;  %v9335_v58 = vpop.eup %7452  ;;  %v1595_v36 = vand.u32 2147483647, %v9340_v22  ;;  %7464 = vpow2.f32 %v3427_v63  ;;  %v9368_v27 = vand.u32 2147483647, %v9346_v57 }
 0x176   : > { %16124 = vst [vmem:[#allocation74_spill] sm:$0xff] %v9315_v20  ;;  %v9348_v59 = vpop.eup %7454  ;;  %7466 = vrcp.f32 %v9351_v61  ;;  %v3371_v37 = vmul.f32 %v3307_v30, %v1579_v44  ;;  %v9380_v63 = vadd.f32 1.0, %v1644_v21 }
 0x177   : > { %16125 = vst [vmem:[#allocation75_spill] sm:$0xff] %v9317_v11  ;;  %v9362_v7 = vpop.eup %7456  ;;  %v9378_v26 = vmul.f32 %v9348_v59, %v9295_v32  ;;  %v1659_v30 = vmul.f32 0.3275911, %v1595_v36 }
 0x178   : > { %16126 = vst [vmem:[#allocation76_spill] sm:$0xff] %v9321_v42  ;;  %v9370_v31 = vpop.eup %7458 }
 0x179   : > { %16127 = vst [vmem:[#allocation77_spill] sm:$0xff] %v9323_v16  ;;  %v1593_v16 = vand.u32 2147483647, %v9315_v20  ;;  %v9357_v20 = vadd.f32 %v1319_v34, %v9010_v53  ;;  %v3455_v34 = vmul.f32 1.442695, %v3370_v46  ;;  %v9396_v21 = vmul.f32 %v9370_v31, %v9312_v4  ;;  %v1293_v4 = vpop.f32.mrf.mxu2 }
 0x17a   : > { %16128 = vst [vmem:[#allocation78_spill] sm:$0xff] %v9326_v49  ;;  %v1643_v49 = vmul.f32 0.3275911, %v1579_v44  ;;  %v1673_v46 = vmul.f32 0.3275911, %v9368_v27 }
 0x17b   : > { %16129 = vst [vmem:[#allocation79_spill] sm:$0xff] %v9330_v29  ;;  %v1657_v39 = vmul.f32 0.3275911, %v1593_v16  ;;  %v3321_v44 = vsub.f32 0.0, %v1593_v16 }
 0x17c   : > { %16130 = vst [vmem:[#allocation80_spill] sm:$0xff] %v9332_v5  ;;  %v9343_v5 = vand.u32 2147483647, %v9321_v42  ;;  %v1264_v42 = vpop.f32.mrf.mxu1  ;;  %v9364_v51 = vadd.f32 1.0, %v1643_v49  ;;  %v1596_v49 = vand.u32 2147483647, %v9357_v20 }
 0x17d   : > { %16131 = vst [vmem:[#allocation81_spill] sm:$0xff] %v9335_v58  ;;  %v3453_v58 = vmul.f32 1.442695, %v3369_v41  ;;  %v9374_v41 = vadd.f32 %v1264_v42, %v8997_v60 }
 0x17e   : > { %16132 = vst [vmem:[#allocation82_spill] sm:$0xff] %v9340_v22  ;;  %v1658_v45 = vmul.f32 0.3275911, %v9343_v5  ;;  %v9383_v22 = vpop.eup %7460  ;;  %v1660_v53 = vmul.f32 0.3275911, %v1596_v49 }
 0x17f   : > { %16133 = vst [vmem:[#allocation83_spill] sm:$0xff] %v9346_v57  ;;  %7468 = vpow2.f32 %v3453_v58  ;;  %v9386_v57 = vadd.f32 1.0, %v1657_v39  ;;  %v9392_v58 = vpop.eup %7462  ;;  %v1610_v32 = vand.u32 2147483647, %v9374_v41 }
 0x180   : > { %16134 = vst [vmem:[#allocation84_spill] sm:$0xff] %v9348_v59  ;;  %7470 = vrcp.f32 %v9359_v10  ;;  %v9389_v42 = vadd.f32 1.0, %v1658_v45  ;;  %v9399_v39 = vpop.eup %7464  ;;  %v9403_v59 = vmul.f32 %v9383_v22, %v9317_v11  ;;  %v3322_v45 = vsub.f32 0.0, %v9343_v5 }
 0x181   : > { %16135 = vst [vmem:[#allocation85_spill] sm:$0xff] %v9351_v61  ;;  %7472 = vrcp.f32 %v9364_v51  ;;  %v3385_v11 = vmul.f32 %v3321_v44, %v1593_v16  ;;  %v9428_v16 = vadd.f32 %v1293_v4, %v8997_v60  ;;  %v3337_v4 = vsub.f32 0.0, %v9368_v27 }
 0x182   : > { %16136 = vst [vmem:[#allocation86_spill] sm:$0xff] %v9354_v47  ;;  %7474 = vpow2.f32 %v3455_v34  ;;  %v9410_v34 = vadd.f32 1.0, %v1659_v30  ;;  %v3386_v56 = vmul.f32 %v3322_v45, %v9343_v5  ;;  %v1322_v5 = vpop.f32.mrf.mxu3 }
 0x183   : > { %16137 = vst [vmem:[#allocation87_spill] sm:$0xff] %v9357_v20  ;;  %v3457_v20 = vmul.f32 1.442695, %v3371_v37  ;;  %7476 = vrcp.f32 %v9380_v63  ;;  %v3323_v37 = vsub.f32 0.0, %v1595_v36 }
 0x184   : > { %16138 = vst [vmem:[#allocation88_spill] sm:$0xff] %v9359_v10  ;;  %7478 = vrcp.f32 %v9386_v57 }
 0x185   : > { %16139 = vst [vmem:[#allocation89_spill] sm:$0xff] %v9362_v7  ;;  %v3308_v7 = vsub.f32 0.0, %v1580_v48  ;;  %7480 = vrcp.f32 %v9389_v42 }
 0x186   : > { %16140 = vst [vmem:[#allocation90_spill] sm:$0xff] %v9364_v51  ;;  %7482 = vpow2.f32 %v3457_v20 }
 0x187   : > { %16141 = vst [vmem:[#allocation91_spill] sm:$0xff] %v9370_v31  ;;  %v3372_v8 = vmul.f32 %v3308_v7, %v1580_v48  ;;  %v1674_v48 = vmul.f32 0.3275911, %v1610_v32  ;;  %7484 = vrcp.f32 %v9410_v34  ;;  %v3387_v7 = vmul.f32 %v3323_v37, %v1595_v36 }
 0x188   : > { %16142 = vst [vmem:[#allocation92_spill] sm:$0xff] %v9374_v41 }
 0x189   : > { %16143 = vst [vmem:[#allocation93_spill] sm:$0xff] %v9378_v26  ;;  %v3459_v29 = vmul.f32 1.442695, %v3372_v8  ;;  %v9452_v37 = vadd.f32 1.0, %v1674_v48  ;;  %v9465_v48 = vadd.f32 %v1322_v5, %v8997_v60  ;;  %v1342_v5 = vpop.f32.mrf.mxu0 }
 0x18a   : > { %16144 = vst [vmem:[#allocation94_spill] sm:$0xff] %v9380_v63 }
 0x18b   : > { %16145 = vst [vmem:[#allocation95_spill] sm:$0xff] %v9383_v22  ;;  %v9416_v22 = vadd.f32 1.0, %v1673_v46  ;;  %v3338_v46 = vsub.f32 0.0, %v1610_v32 }
 0x18c   : > { %16146 = vst [vmem:[#allocation96_spill] sm:$0xff] %v9392_v58  ;;  %v9407_v58 = vpop.eup %7466 }
 0x18d   : > { %16147 = vst [vmem:[#allocation97_spill] sm:$0xff] %v9396_v21  ;;  %v9412_v31 = vpop.eup %7468  ;;  %v9438_v47 = vmul.f32 %v9407_v58, %v9351_v61  ;;  %7486 = vrcp.f32 %v9416_v22 }
 0x18e   : > { %16148 = vst [vmem:[#allocation98_spill] sm:$0xff] %v9399_v39  ;;  %v9418_v41 = vpop.eup %7470  ;;  %v3324_v39 = vsub.f32 0.0, %v1596_v49 }
 0x18f   : > { %16149 = vst [vmem:[#allocation99_spill] sm:$0xff] %v9403_v59  ;;  %v9422_v30 = vpop.eup %7472  ;;  %v9446_v8 = vmul.f32 %v9418_v41, %v9359_v10 }
 0x190   : > { %16150 = vst [vmem:[#allocation100_spill] sm:$0xff] %v9410_v34  ;;  %v9430_v44 = vpop.eup %7474  ;;  %v9450_v36 = vmul.f32 %v9422_v30, %v9364_v51  ;;  %v3388_v21 = vmul.f32 %v3324_v39, %v1596_v49  ;;  %v3489_v51 = vmul.f32 1.442695, %v3387_v7  ;;  %v3401_v39 = vmul.f32 %v3337_v4, %v9368_v27 }
 0x191   : > { %16151 = vst [vmem:[#allocation101_spill] sm:$0xff] %v9412_v31  ;;  %v9425_v31 = vadd.f32 1.0, %v1660_v53  ;;  %v9434_v20 = vpop.eup %7476  ;;  %v3485_v53 = vmul.f32 1.442695, %v3385_v11  ;;  %v3487_v11 = vmul.f32 1.442695, %v3386_v56  ;;  %v3402_v7 = vmul.f32 %v3338_v46, %v1610_v32 }
 0x192   : > { %16152 = vst [vmem:[#allocation102_spill] sm:$0xff] %v9418_v41  ;;  %v9442_v45 = vpop.eup %7478  ;;  %v9462_v10 = vmul.f32 %v9434_v20, %v9380_v63  ;;  %v1612_v63 = vand.u32 2147483647, %v9465_v48  ;;  %v3517_v46 = vmul.f32 1.442695, %v3401_v39  ;;  %v1371_v39 = vpop.f32.mrf.mxu1 }
 0x193   : > { %16153 = vst [vmem:[#allocation103_spill] sm:$0xff] %v9422_v30  ;;  %v9454_v59 = vpop.eup %7480  ;;  %7488 = vrcp.f32 %v9425_v31  ;;  %v9471_v49 = vmul.f32 %v9442_v45, %v9386_v57 }
 0x194   : > { %16154 = vst [vmem:[#allocation104_spill] sm:$0xff] %v9425_v31  ;;  %v9458_v26 = vpop.eup %7482  ;;  %7490 = vpow2.f32 %v3459_v29  ;;  %v9479_v29 = vmul.f32 %v9454_v59, %v9389_v42 }
 0x195   : > { %16155 = vst [vmem:[#allocation105_spill] sm:$0xff] %v9428_v16  ;;  %7492 = vpow2.f32 %v3485_v53  ;;  %v3491_v53 = vmul.f32 1.442695, %v3388_v21 }
 0x196   : > { %16156 = vst [vmem:[#allocation106_spill] sm:$0xff] %v9430_v44  ;;  %v1611_v44 = vand.u32 2147483647, %v9428_v16  ;;  %7494 = vrcp.f32 %v9452_v37 }
 0x197   : > { %16157 = vst [vmem:[#allocation107_spill] sm:$0xff] %v9434_v20  ;;  %7496 = vpow2.f32 %v3487_v11  ;;  %v9495_v20 = vadd.f32 %v1342_v5, %v8988_v6  ;;  %v2473_v5 = vadd.f32 %v9175_v38, %v9255_v15 }
 0x198   : > { %16158 = vst [vmem:[#allocation108_spill] sm:$0xff] %v9446_v8  ;;  %v3339_v16 = vsub.f32 0.0, %v1611_v44  ;;  %7498 = vpow2.f32 %v3489_v51  ;;  %v1675_v4 = vmul.f32 0.3275911, %v1611_v44 }
 0x199   : > { %16159 = vst [vmem:[#allocation109_spill] sm:$0xff] %v9450_v36  ;;  %7500 = vpow2.f32 %v3491_v53  ;;  %v1400_v36 = vpop.f32.mrf.mxu2  ;;  %v1565_v15 = vand.u32 2147483647, %v9495_v20 }
 0x19a   : > { %16160 = vst [vmem:[#allocation110_spill] sm:$0xff] %v9458_v26  ;;  %v9474_v26 = vpop.eup %7484  ;;  %v3403_v41 = vmul.f32 %v3339_v16, %v1611_v44  ;;  %v9516_v27 = vadd.f32 1.0, %v1675_v4  ;;  %7502 = vpow2.f32 %v3517_v46  ;;  %v3340_v44 = vsub.f32 0.0, %v1612_v63 }
 0x19b   : > { %16161 = vst [vmem:[#allocation111_spill] sm:$0xff] %v9462_v10  ;;  %v9482_v56 = vpop.eup %7486  ;;  %v9492_v32 = vmul.f32 %v9474_v26, %v9410_v34  ;;  %v3519_v10 = vmul.f32 1.442695, %v3402_v7  ;;  %v1676_v34 = vmul.f32 0.3275911, %v1612_v63  ;;  %v9528_v7 = vadd.f32 %v1400_v36, %v8988_v6 }
 0x19c   : > { %16162 = vst [vmem:[#allocation112_spill] sm:$0xff] %v9465_v48  ;;  %v9487_v30 = vpop.eup %7488  ;;  %v2530_v51 = vmul.f32 %v9482_v56, %v9416_v22  ;;  %v3521_v16 = vmul.f32 1.442695, %v3403_v41  ;;  %v3404_v41 = vmul.f32 %v3340_v44, %v1612_v63 }
 0x19d   : > { %16163 = vst [vmem:[#allocation113_spill] sm:$0xff] %v9474_v26  ;;  %v9497_v21 = vpop.eup %7490  ;;  %7504 = vpow2.f32 %v3519_v10  ;;  %v2477_v10 = vsel %vm9534_vm10, %v9175_v38, %v2473_v5  ;;  %v3293_v5 = vsub.f32 0.0, %v1565_v15  ;;  %vm1994_vm10 = vweird.f32 %v9031_v35 }
 0x19e   : > { %16164 = vst [vmem:[#allocation114_spill] sm:$0xff] %v9487_v30  ;;  %v9503_v48 = vpop.eup %7492  ;;  %v2531_v8 = vsub.f32 1.0, %v2530_v51  ;;  %v2478_v51 = vand.u32 2147483647, %v9110_v62  ;;  %7506 = vrcp.f32 %v9516_v27 }
 0x19f   : > { %16165 = vst [vmem:[#allocation115_spill] sm:$0xff] %v9492_v32  ;;  %v9509_v11 = vpop.eup %7494  ;;  %7508 = vpow2.f32 %v3521_v16 }
 0x1a0   : > { %16166 = vst [vmem:[#allocation116_spill] sm:$0xff] %v9495_v20  ;;  %v9518_v53 = vpop.eup %7496  ;;  %v2545_v46 = vmul.f32 %v9509_v11, %v9452_v37  ;;  %v16177_v20 = vand.u32 2147483648, %v9110_v62  ;;  %vm2479_vm11 = vcmp.eq.f32.partialorder %v2478_v51, 8.507059e+37  ;;  %v9554_v38 = vmul.f32 %v9482_v56, %v2531_v8 }
 0x1a1   : > { %16167 = vst [vmem:[#allocation117_spill] sm:$0xff] %v9497_v21  ;;  %v9513_v21 = vmul.f32 %v9487_v30, %v9425_v31  ;;  %v9522_v26 = vpop.eup %7498  ;;  %v9525_v31 = vadd.f32 %v1371_v39, %v8988_v6  ;;  %v9546_v39 = vadd.f32 1.0, %v1676_v34  ;;  %v2488_v34 = vadd.f32 %v9237_v19, %v9303_v13 }
 0x1a2   : > { %16168 = vst [vmem:[#allocation118_spill] sm:$0xff] %v9503_v48  ;;  %v9550_v30 = vpop.eup %7500  ;;  %v2546_v62 = vsub.f32 1.0, %v2545_v46  ;;  %v16180_v13 = vsub.f32 1.0, %v9143_v18 }
 0x1a3   : > { %16169 = vst [vmem:[#allocation119_spill] sm:$0xff] %v9513_v21  ;;  %v9560_v36 = vpop.eup %7502  ;;  %7510 = vrcp.f32 %v9546_v39  ;;  %v2492_v46 = vsel %vm2491_vm13, %v9237_v19, %v2488_v34  ;;  %v16185_v34 = vsub.f32 1.0, %v9193_v1  ;;  %v1429_v1 = vpop.f32.mrf.mxu3  ;;  %v2255_v19 = vand.u32 2147483648, %v9100_v17  ;;  %vm9671_vm13 = vmor %vm1994_vm10, %vm1995_vm12 }
 0x1a4   : > { %16170 = vst [vmem:[#allocation120_spill] sm:$0xff] %v9516_v27  ;;  %v9564_v63 = vpop.eup %7504  ;;  %v2232_v44 = vmul.f32 %v9116_v55, %v16180_v13 }
 0x1a5   : > { %16171 = vst [vmem:[#allocation121_spill] sm:$0xff] %v9518_v53  ;;  %v1629_v53 = vmul.f32 0.3275911, %v1565_v15  ;;  %v9578_v32 = vpop.eup %7506 }
 0x1a6   : > { %16172 = vst [vmem:[#allocation122_spill] sm:$0xff] %v9522_v26  ;;  %v2481_v26 = vor.u32 1.1754944e-38, %v16177_v20  ;;  %v2233_v8 = vadd.f32 %v9116_v55, %v2232_v44 }
 0x1a7   : > { %16173 = vst [vmem:[#allocation123_spill] sm:$0xff] %v9525_v31  ;;  %v9594_v44 = vadd.f32 1.0, %v1629_v53  ;;  %v1566_v53 = vand.u32 2147483647, %v9525_v31 }
 0x1a8   : > { %16174 = vst [vmem:[#allocation124_spill] sm:$0xff] %v9528_v7  ;;  %v9556_v4 = vsel %vm2479_vm11, %v2481_v26, %v2477_v10  ;;  %v2493_v26 = vand.u32 2147483647, %v9178_v52  ;;  %v16181_v10 = vand.u32 2147483648, %v9178_v52  ;;  %v2240_v52 = vand.u32 2147483648, %v9059_v9 }
 0x1a9   : > { %16178 = vst [vmem:[#allocation125_spill] sm:$0xff] %v9550_v30  ;;  %v2757_v20 = vmul.f32 1.0614054, %v9556_v4  ;;  %v2238_v30 = vand.u32 2147483647, %v9059_v9  ;;  %vm3718_vm11 = vcmp.lt.f32.partialorder %v9093_v14, 0.0 }
 0x1aa   : > { %16179 = vst [vmem:[#allocation126_spill] sm:$0xff] %v9564_v63  ;;  %v2496_v51 = vor.u32 1.1754944e-38, %v16181_v10  ;;  %vm2494_vm15 = vcmp.eq.f32.partialorder %v2493_v26, 8.507059e+37  ;;  %v3523_v26 = vmul.f32 1.442695, %v3404_v41  ;;  %v2241_v48 = vor.u32 1.1754944e-38, %v2240_v52 }
 0x1ab   : > { %v2821_v16 = vadd.f32 -1.4531521, %v2757_v20  ;;  %16182 = vst [vmem:[#allocation127_spill] sm:$0xff] %v9578_v32  ;;  %v2247_v20 = vmul.f32 %v9171_v43, %v16185_v34  ;;  %vm2239_vm4 = vcmp.eq.f32.partialorder %v2238_v30, 8.507059e+37  ;;  %v1567_v52 = vand.u32 2147483647, %v9528_v7 }
 0x1ac   : > { %v9584_v13 = vsel %vm2494_vm15, %v2496_v51, %v2492_v46  ;;  %16186 = vst [vmem:[#allocation128_spill] sm:$0xff] %v9594_v44  ;;  %v9600_v46 = vpop.eup %7508  ;;  %v3357_v51 = vmul.f32 %v3293_v5, %v1565_v15  ;;  %v2253_v15 = vand.u32 2147483647, %v9100_v17  ;;  %v9613_v5 = vmul.f32 %v9509_v11, %v2546_v62 }
 0x1ad   : > { %v2885_v18 = vmul.f32 %v2821_v16, %v9556_v4  ;;  %v2758_v10 = vmul.f32 1.0614054, %v9584_v13  ;;  %v2237_v16 = vsel %vm9586_vm3, %v9116_v55, %v2233_v8  ;;  %16187 = vst [vmem:[#allocation129_spill] sm:$0xff] %v9600_v46  ;;  %v2248_v9 = vadd.f32 %v9171_v43, %v2247_v20  ;;  %v9603_v61 = vpop.eup %7510 }
 0x1ae   : > { %16188 = vst [vmem:[#allocation130_spill] sm:$0xff] %v9603_v61  ;;  %v9609_v41 = vsel %vm2239_vm4, %v2241_v48, %v2237_v16  ;;  %v9624_v48 = vadd.f32 %v1429_v1, %v8988_v6  ;;  %v2560_v20 = vmul.f32 %v9578_v32, %v9516_v27  ;;  %v3429_v31 = vmul.f32 1.442695, %v3357_v51 }
 0x1af   : > { %v2949_v21 = vadd.f32 1.4214138, %v2885_v18  ;;  %v2822_v34 = vadd.f32 -1.4531521, %v2758_v10  ;;  %v2741_v18 = vmul.f32 1.0614054, %v9609_v41  ;;  %v2252_v62 = vsel %vm9617_vm7, %v9171_v43, %v2248_v9 }
 0x1b0   : > { %16191 = vst [vmem:[#allocation131_spill] sm:$0xff] %v9624_v48  ;;  %v1630_v46 = vmul.f32 0.3275911, %v1566_v53  ;;  %vm2254_vm8 = vcmp.eq.f32.partialorder %v2253_v15, 8.507059e+37  ;;  %v3294_v7 = vsub.f32 0.0, %v1566_v53  ;;  %7512 = vpow2.f32 %v3523_v26 }
 0x1b1   : > { %v3013_v55 = vmul.f32 %v2949_v21, %v9556_v4  ;;  %v2886_v8 = vmul.f32 %v2822_v34, %v9584_v13  ;;  %v2805_v16 = vadd.f32 -1.4531521, %v2741_v18  ;;  %v2256_v34 = vor.u32 1.1754944e-38, %v2255_v19 }
 0x1b2   : > { %v1631_v43 = vmul.f32 0.3275911, %v1567_v52  ;;  %7514 = vrcp.f32 %v9594_v44  ;;  %v3295_v51 = vsub.f32 0.0, %v1567_v52  ;;  %v9640_v15 = vand.u32 2147483647, %v9624_v48 }
 0x1b3   : > { %v3077_v21 = vadd.f32 -0.28449672, %v3013_v55  ;;  %v2950_v10 = vadd.f32 1.4214138, %v2886_v8  ;;  %v2869_v55 = vmul.f32 %v2805_v16, %v9609_v41  ;;  %v9634_v63 = vsel %vm2254_vm8, %v2256_v34, %v2252_v62 }
 0x1b4   : > { %v2742_v30 = vmul.f32 1.0614054, %v9634_v63  ;;  %v16192_v62 = vsub.f32 1.0, %v9098_v33  ;;  %7516 = vpow2.f32 %v3429_v31  ;;  %v9652_v27 = vadd.f32 1.0, %v1631_v43 }
 0x1b5   : > { %v3141_v17 = vmul.f32 %v3077_v21, %v9556_v4  ;;  %v3014_v1 = vmul.f32 %v2950_v10, %v9584_v13  ;;  %v2933_v18 = vadd.f32 1.4214138, %v2869_v55  ;;  %v2561_v10 = vsub.f32 1.0, %v2560_v20 }
 0x1b6   : > { %v2806_v21 = vadd.f32 -1.4531521, %v2742_v30  ;;  %v1992_v26 = vmul.f32 %v9079_v23, %v16192_v62  ;;  %16194 = vst [vmem:[#allocation133_spill] sm:$0xff] %v9652_v27  ;;  %v9655_v33 = vpop.eup %7512  ;;  %v3359_v31 = vmul.f32 %v3295_v51, %v1567_v52  ;;  %v1998_v51 = vand.u32 2147483647, %v9031_v35 }
 0x1b7   : > { %v3205_v9 = vadd.f32 0.2548296, %v3141_v17  ;;  %v3078_v8 = vadd.f32 -0.28449672, %v3014_v1  ;;  %v2997_v34 = vmul.f32 %v2933_v18, %v9609_v41  ;;  %v9648_v17 = vadd.f32 1.0, %v1630_v46  ;;  %16195 = vst [vmem:[#allocation134_spill] sm:$0xff] %v9655_v33 }
 0x1b8   : > { %v3358_v1 = vmul.f32 %v3294_v7, %v1566_v53  ;;  %v2870_v48 = vmul.f32 %v2806_v21, %v9634_v63  ;;  %v1993_v46 = vadd.f32 %v9079_v23, %v1992_v26  ;;  %v9659_v7 = vpop.eup %7514  ;;  %v2000_v26 = vand.u32 2147483648, %v9031_v35 }
 0x1b9   : > { %v3269_v19 = vmul.f32 %v3205_v9, %v9556_v4  ;;  %v3142_v16 = vmul.f32 %v3078_v8, %v9584_v13  ;;  %16193 = vst [vmem:[#allocation132_spill] sm:$0xff] %v9648_v17  ;;  %v3061_v9 = vadd.f32 -0.28449672, %v2997_v34  ;;  %v9666_v8 = vmul.f32 %v9578_v32, %v2561_v10 }
 0x1ba   : > { %v2934_v30 = vadd.f32 1.4214138, %v2870_v48  ;;  %16196 = vst [vmem:[#allocation135_spill] sm:$0xff] %v9659_v7  ;;  %v1997_v34 = vsel %vm9671_vm13, %v9079_v23, %v1993_v46  ;;  %vm1999_vm15 = vcmp.eq.f32.partialorder %v1998_v51, 8.507059e+37  ;;  %v2001_v35 = vor.u32 1.1754944e-38, %v2000_v26 }
 0x1bb   : > { %v3589_v55 = vmul.f32 %v9291_v24, %v3269_v19  ;;  %v3206_v4 = vadd.f32 0.2548296, %v3142_v16  ;;  %v1632_v24 = vmul.f32 0.3275911, %v9640_v15  ;;  %v3125_v43 = vmul.f32 %v3061_v9, %v9609_v41  ;;  %v9676_v19 = vpop.eup %7516 }
 0x1bc   : > { %v2998_v52 = vmul.f32 %v2934_v30, %v9634_v63  ;;  %16199 = vst [vmem:[#allocation136_spill] sm:$0xff] %v9676_v19  ;;  %7518 = vrcp.f32 %v9648_v17  ;;  %vm2010_vm3 = vweird.f32 %v9086_v0  ;;  %v3296_v23 = vsub.f32 0.0, %v9640_v15  ;;  %v16232_v19 = vld [vmem:[#allocation63_spill] sm:$0xff] }
 0x1bd   : > { %v3653_v20 = vsub.f32 1.0, %v3589_v55  ;;  %v3270_v53 = vmul.f32 %v3206_v4, %v9584_v13  ;;  %v9680_v13 = vmul.f32 %v9603_v61, %v9546_v39  ;;  %v3189_v62 = vadd.f32 0.2548296, %v3125_v43  ;;  %vm9703_vm4 = vmor %vm2009_vm0, %vm2010_vm3 }
 0x1be   : > { %v3062_v16 = vadd.f32 -0.28449672, %v2998_v52  ;;  %v16200_v55 = vsub.f32 1.0, %v9105_v50  ;;  %v9701_v43 = vsel %vm1999_vm15, %v2001_v35, %v1997_v34  ;;  %v2013_v52 = vand.u32 2147483647, %v9034_v3 }
 0x1bf   : > { %v3781_v18 = vsub.f32 0.0, %v3653_v20  ;;  %v3590_v21 = vmul.f32 %v9300_v40, %v3270_v53  ;;  %v3253_v40 = vmul.f32 %v3189_v62, %v9609_v41  ;;  %v3431_v53 = vmul.f32 1.442695, %v3358_v1 }
 0x1c0   : > { %v2007_v4 = vmul.f32 %v9086_v0, %v16200_v55  ;;  %v3126_v28 = vmul.f32 %v3062_v16, %v9634_v63  ;;  %7520 = vrcp.f32 %v9652_v27  ;;  %v2725_v51 = vmul.f32 1.0614054, %v9701_v43 }
 0x1c1   : > { %v3845_v10 = vsel %vm3717_vm9, %v3781_v18, %v3653_v20  ;;  %v3654_v9 = vsub.f32 1.0, %v3590_v21  ;;  %v1345_v20 = vpop.f32.mrf.mxu0  ;;  %v3573_v30 = vmul.f32 %v9151_v2, %v3253_v40  ;;  %v3433_v1 = vmul.f32 1.442695, %v3359_v31 }
 0x1c2   : > { %3914 = vmatpush.msra.mxu0 %v3845_v10  ;;  %v2008_v46 = vadd.f32 %v9086_v0, %v2007_v4  ;;  %v3190_v41 = vadd.f32 0.2548296, %v3126_v28  ;;  %v9714_v21 = vadd.f32 %v1345_v20, %v8982_v12  ;;  %v2015_v26 = vand.u32 2147483648, %v9034_v3  ;;  %v1374_v10 = vpop.f32.mrf.mxu1  ;;  %v9721_v55 = vpop.eup %7518  ;;  %v16207_v20 = vld [vmem:[#allocation38_spill] sm:$0xff] }
 0x1c3   : > { %v3782_v50 = vsub.f32 0.0, %v3654_v9  ;;  %v3637_v2 = vsub.f32 1.0, %v3573_v30  ;;  %v2789_v34 = vadd.f32 -1.4531521, %v2725_v51  ;;  %vm2014_vm6 = vcmp.eq.f32.partialorder %v2013_v52, 8.507059e+37  ;;  %16204 = vst [vmem:[#allocation138_spill] sm:$0xff] %v9721_v55 }
 0x1c4   : > { %16203 = vst [vmem:[#allocation137_spill] sm:$0xff] %v9714_v21  ;;  %v3254_v62 = vmul.f32 %v3190_v41, %v9634_v63  ;;  %v2012_v14 = vsel %vm9703_vm4, %v9086_v0, %v2008_v46  ;;  %v2576_v31 = vsub.f32 1.0, %v9680_v13  ;;  %v3360_v4 = vmul.f32 %v3296_v23, %v9640_v15  ;;  %v16209_v0 = vld [vmem:[#allocation14_spill] sm:$0xff] }
 0x1c5   : > { %v3846_v48 = vsel %vm3718_vm11, %v3782_v50, %v3654_v9  ;;  %v3765_v16 = vsub.f32 0.0, %v3637_v2  ;;  %v16205_v9 = vld [vmem:[#allocation49_spill] sm:$0xff]  ;;  %v2016_v35 = vor.u32 1.1754944e-38, %v2015_v26  ;;  %v9726_v63 = vadd.f32 1.0, %v1632_v24 }
 0x1c6   : > { %3943 = vmatpush.msra.mxu1 %v3846_v48  ;;  %v3574_v40 = vmul.f32 %v16205_v9, %v3254_v62  ;;  %v2853_v28 = vmul.f32 %v2789_v34, %v9701_v43  ;;  %v16208_v50 = vsub.f32 1.0, %v16207_v20  ;;  %v9736_v46 = vmul.f32 %v9659_v7, %v9594_v44  ;;  %v9743_v23 = vpop.eup %7520  ;;  %v16258_v7 = vld [vmem:[#allocation50_spill] sm:$0xff] }
 0x1c7   : > { %16206 = vst [vmem:[#allocation49_spill] sm:$0xff] %v9726_v63  ;;  %v3829_v3 = vsel %vm3701_vm14, %v3765_v16, %v3637_v2  ;;  %v9739_v15 = vadd.f32 %v1374_v10, %v8982_v12  ;;  %v9741_v24 = vsel %vm2014_vm6, %v2016_v35, %v2012_v14  ;;  %7522 = vpow2.f32 %v3431_v53  ;;  %v16214_v10 = vld [vmem:[#allocation11_spill] sm:$0xff]  ;;  %v16227_v35 = vld [vmem:[#allocation52_spill] sm:$0xff] }
 0x1c8   : > { %v1752_v30 = vmul.f32 %v16209_v0, %v16208_v50  ;;  %16210 = vst [vmem:[#allocation38_spill] sm:$0xff] %v9736_v46  ;;  %3915 = vmatpush.msra.mxu0 %v3829_v3  ;;  %v3638_v13 = vsub.f32 1.0, %v3574_v40  ;;  %v1581_v25 = vand.u32 2147483647, %v9714_v21  ;;  %v2917_v41 = vadd.f32 1.4214138, %v2853_v28 }
 0x1c9   : > { %16211 = vst [vmem:[#allocation14_spill] sm:$0xff] %v9739_v15  ;;  %v2726_v18 = vmul.f32 1.0614054, %v9741_v24  ;;  %v9748_v52 = vmul.f32 %v9603_v61, %v2576_v31  ;;  %7524 = vpow2.f32 %v3433_v1  ;;  %v9750_v48 = vmul.f32 1.442695, %v3360_v4  ;;  %v16215_v4 = vld [vmem:[#allocation20_spill] sm:$0xff] }
 0x1ca   : > { %16212 = vst [vmem:[#allocation139_spill] sm:$0xff] %v9743_v23  ;;  %v3766_v2 = vsub.f32 0.0, %v3638_v13  ;;  %v2981_v51 = vmul.f32 %v2917_v41, %v9701_v43  ;;  %v1753_v26 = vadd.f32 %v16209_v0, %v1752_v30  ;;  %vm1754_vm7 = vweird.f32 %v16214_v10 }
 0x1cb   : > { %16213 = vst [vmem:[#allocation140_spill] sm:$0xff] %v9748_v52  ;;  %v2790_v62 = vadd.f32 -1.4531521, %v2726_v18  ;;  %7526 = vrcp.f32 %v9726_v63  ;;  %v9758_v16 = vand.u32 2147483647, %v9739_v15  ;;  %vm1755_vm8 = vweird.f32 %v16209_v0  ;;  %v16222_v18 = vld [vmem:[#allocation29_spill] sm:$0xff] }
 0x1cc   : > { %v3830_v1 = vsel %vm3702_vm5, %v3766_v2, %v3638_v13  ;;  %v1645_v34 = vmul.f32 0.3275911, %v1581_v25  ;;  %v3045_v14 = vadd.f32 -0.28449672, %v2981_v51  ;;  %vm2504_vm9 = vweird.f32 %v16215_v4  ;;  %vm9769_vm10 = vmor %vm1754_vm7, %vm1755_vm8  ;;  %v16220_v13 = vld [vmem:[#allocation30_spill] sm:$0xff]  ;;  %v16324_v52 = vld [vmem:[#allocation19_spill] sm:$0xff] }
 0x1cd   : > { %3944 = vmatpush.msra.mxu1 %v3830_v1  ;;  %v2854_v31 = vmul.f32 %v2790_v62, %v9741_v24  ;;  %v9767_v9 = vmul.f32 %v9721_v55, %v9648_v17  ;;  %v3309_v40 = vsub.f32 0.0, %v1581_v25  ;;  %v1758_v54 = vand.u32 2147483647, %v16214_v10  ;;  %v9775_v28 = vpop.eup %7522  ;;  %v16233_v17 = vld [vmem:[#allocation47_spill] sm:$0xff] }
 0x1ce   : > { %v1760_v3 = vand.u32 2147483648, %v16214_v10  ;;  %16219 = vst [vmem:[#allocation20_spill] sm:$0xff] %v9775_v28  ;;  %v3109_v20 = vmul.f32 %v3045_v14, %v9701_v43  ;;  %v1757_v30 = vsel %vm9769_vm10, %v16209_v0, %v1753_v26  ;;  %v16221_v41 = vsub.f32 1.0, %v16220_v13  ;;  %v16224_v10 = vld [vmem:[#allocation40_spill] sm:$0xff]  ;;  %v16226_v26 = vld [vmem:[#allocation37_spill] sm:$0xff]  ;;  %v16231_v13 = vld [vmem:[#allocation78_spill] sm:$0xff] }
 0x1cf   : > { %16216 = vst [vmem:[#allocation11_spill] sm:$0xff] %v9767_v9  ;;  %v2918_v50 = vadd.f32 1.4214138, %v2854_v31  ;;  %v9784_v51 = vpop.eup %7524  ;;  %v1646_v62 = vmul.f32 0.3275911, %v9758_v16  ;;  %vm1759_vm11 = vcmp.eq.f32.partialorder %v1758_v54, 8.507059e+37  ;;  %vm1769_vm12 = vweird.f32 %v16224_v10 }
 0x1d0   : > { %v1767_v2 = vmul.f32 %v16222_v18, %v16221_v41  ;;  %16223 = vst [vmem:[#allocation30_spill] sm:$0xff] %v9784_v51  ;;  %v1761_v1 = vor.u32 1.1754944e-38, %v1760_v3  ;;  %v3173_v53 = vadd.f32 0.2548296, %v3109_v20  ;;  %vm1770_vm13 = vweird.f32 %v16222_v18 }
 0x1d1   : > { %v2982_v14 = vmul.f32 %v2918_v50, %v9741_v24  ;;  %v9791_v0 = vpop.eup %7526  ;;  %vm3685_vm14 = vcmp.lt.f32.partialorder %v16226_v26, 0.0  ;;  %vm2519_vm15 = vweird.f32 %v16227_v35  ;;  %vm9798_vm0 = vmor %vm1769_vm12, %vm1770_vm13  ;;  %v1773_v3 = vand.u32 2147483647, %v16224_v10 }
 0x1d2   : > { %v1768_v31 = vadd.f32 %v16222_v18, %v1767_v2  ;;  %16225 = vst [vmem:[#allocation29_spill] sm:$0xff] %v9791_v0  ;;  %v9796_v41 = vsel %vm1759_vm11, %v1761_v1, %v1757_v30  ;;  %v1775_v20 = vand.u32 2147483648, %v16224_v10  ;;  %v9804_v50 = vadd.f32 1.0, %v1645_v34 }
 0x1d3   : > { %v3237_v2 = vmul.f32 %v3173_v53, %v9701_v43  ;;  %v3046_v51 = vadd.f32 -0.28449672, %v2982_v14  ;;  %v2709_v28 = vmul.f32 1.0614054, %v9796_v41  ;;  %vm1774_vm3 = vcmp.eq.f32.partialorder %v1773_v3, 8.507059e+37 }
 0x1d4   : > { %16230 = vst [vmem:[#allocation40_spill] sm:$0xff] %v9804_v50  ;;  %v1772_v30 = vsel %vm9798_vm0, %v16222_v18, %v1768_v31  ;;  %v1776_v1 = vor.u32 1.1754944e-38, %v1775_v20  ;;  %v2503_v15 = vadd.f32 %v16232_v19, %v16231_v13  ;;  %v9813_v21 = vmul.f32 %v3309_v40, %v1581_v25  ;;  %v16238_v13 = vld [vmem:[#allocation66_spill] sm:$0xff] }
 0x1d5   : > { %v3557_v10 = vmul.f32 %v16233_v17, %v3237_v2  ;;  %v3110_v34 = vmul.f32 %v3046_v51, %v9741_v24  ;;  %v2773_v55 = vadd.f32 -1.4531521, %v2709_v28  ;;  %v9817_v43 = vadd.f32 1.0, %v1646_v62  ;;  %v16235_v17 = vld [vmem:[#allocation12_spill] sm:$0xff]  ;;  %v16237_v62 = vld [vmem:[#allocation86_spill] sm:$0xff] }
 0x1d6   : > { %v9819_v53 = vsel %vm1774_vm3, %v1776_v1, %v1772_v30  ;;  %vm2505_vm4 = vweird.f32 %v16232_v19  ;;  %v2508_v18 = vand.u32 2147483647, %v16215_v4  ;;  %vm3686_vm6 = vcmp.lt.f32.partialorder %v16235_v17, 0.0 }
 0x1d7   : > { %16234 = vst [vmem:[#allocation37_spill] sm:$0xff] %v9817_v43  ;;  %v3621_v14 = vsub.f32 1.0, %v3557_v10  ;;  %v3174_v31 = vadd.f32 0.2548296, %v3110_v34  ;;  %v2837_v54 = vmul.f32 %v2773_v55, %v9796_v41  ;;  %v2710_v25 = vmul.f32 1.0614054, %v9819_v53  ;;  %vm2506_vm5 = vmor %vm2504_vm9, %vm2505_vm4 }
 0x1d8   : > { %v2507_v40 = vsel %vm2506_vm5, %v16232_v19, %v2503_v15  ;;  %vm2509_vm7 = vcmp.eq.f32.partialorder %v2508_v18, 8.507059e+37  ;;  %v16236_v28 = vand.u32 2147483648, %v16215_v4  ;;  %v2518_v3 = vadd.f32 %v16238_v13, %v16237_v62  ;;  %v16240_v34 = vld [vmem:[#allocation28_spill] sm:$0xff] }
 0x1d9   : > { %v3749_v20 = vsub.f32 0.0, %v3621_v14  ;;  %v3238_v2 = vmul.f32 %v3174_v31, %v9741_v24  ;;  %v2901_v55 = vadd.f32 1.4214138, %v2837_v54  ;;  %v2774_v30 = vadd.f32 -1.4531521, %v2710_v25 }
 0x1da   : > { %v2511_v51 = vor.u32 1.1754944e-38, %v16236_v28  ;;  %vm2520_vm8 = vweird.f32 %v16238_v13  ;;  %v2523_v10 = vand.u32 2147483647, %v16227_v35  ;;  %v16239_v19 = vand.u32 2147483648, %v16227_v35  ;;  %v16243_v35 = vld [vmem:[#allocation54_spill] sm:$0xff] }
 0x1db   : > { %v3813_v4 = vsel %vm3685_vm14, %v3749_v20, %v3621_v14  ;;  %v3558_v18 = vmul.f32 %v16240_v34, %v3238_v2  ;;  %v2965_v28 = vmul.f32 %v2901_v55, %v9796_v41  ;;  %v2838_v24 = vmul.f32 %v2774_v30, %v9819_v53  ;;  %vm2521_vm9 = vmor %vm2519_vm15, %vm2520_vm8  ;;  %v16241_v20 = vld [vmem:[#allocation57_spill] sm:$0xff]  ;;  %v16244_v30 = vld [vmem:[#allocation42_spill] sm:$0xff] }
 0x1dc   : > { %v9834_v1 = vsel %vm2509_vm7, %v2511_v51, %v2507_v40  ;;  %v2526_v15 = vor.u32 1.1754944e-38, %v16239_v19  ;;  %7528 = vrcp.f32 %v9804_v50  ;;  %3916 = vmatpush.msra.mxu0 %v3813_v4  ;;  %v2522_v54 = vsel %vm2521_vm9, %v16238_v13, %v2518_v3 }
 0x1dd   : > { %v2759_v31 = vmul.f32 1.0614054, %v9834_v1  ;;  %vm2524_vm10 = vcmp.eq.f32.partialorder %v2523_v10, 8.507059e+37  ;;  %v3622_v25 = vsub.f32 1.0, %v3558_v18  ;;  %v3029_v26 = vadd.f32 -0.28449672, %v2965_v28 }
 0x1de   : > { %v2902_v14 = vadd.f32 1.4214138, %v2838_v24  ;;  %v9850_v40 = vsel %vm2524_vm10, %v2526_v15, %v2522_v54  ;;  %v16242_v2 = vsub.f32 1.0, %v16241_v20  ;;  %vm2264_vm11 = vweird.f32 %v16244_v30 }
 0x1df   : > { %v2823_v51 = vadd.f32 -1.4531521, %v2759_v31  ;;  %v2760_v62 = vmul.f32 1.0614054, %v9850_v40  ;;  %v3750_v19 = vsub.f32 0.0, %v3622_v25  ;;  %v3093_v4 = vmul.f32 %v3029_v26, %v9796_v41 }
 0x1e0   : > { %v2262_v55 = vmul.f32 %v16243_v35, %v16242_v2  ;;  %v2966_v13 = vmul.f32 %v2902_v14, %v9819_v53  ;;  %vm2265_vm12 = vweird.f32 %v16243_v35  ;;  %v2268_v34 = vand.u32 2147483647, %v16244_v30  ;;  %v16248_v14 = vld [vmem:[#allocation43_spill] sm:$0xff] }
 0x1e1   : > { %v2887_v3 = vmul.f32 %v2823_v51, %v9834_v1  ;;  %v2824_v10 = vadd.f32 -1.4531521, %v2760_v62  ;;  %v3814_v18 = vsel %vm3686_vm6, %v3750_v19, %v3622_v25  ;;  %v3157_v28 = vadd.f32 0.2548296, %v3093_v4  ;;  %vm9865_vm13 = vmor %vm2264_vm11, %vm2265_vm12  ;;  %v16251_v19 = vld [vmem:[#allocation55_spill] sm:$0xff] }
 0x1e2   : > { %v2263_v15 = vadd.f32 %v16243_v35, %v2262_v55  ;;  %v3030_v24 = vadd.f32 -0.28449672, %v2966_v13  ;;  %v2270_v54 = vand.u32 2147483648, %v16244_v30  ;;  %v9870_v26 = vpop.eup %7528  ;;  %vm3669_vm14 = vcmp.lt.f32.partialorder %v16248_v14, 0.0  ;;  %3945 = vmatpush.msra.mxu1 %v3814_v18  ;;  %v16249_v55 = vld [vmem:[#allocation60_spill] sm:$0xff]  ;;  %v16252_v18 = vld [vmem:[#allocation31_spill] sm:$0xff] }
 0x1e3   : > { %16247 = vst [vmem:[#allocation52_spill] sm:$0xff] %v9870_v26  ;;  %v2951_v51 = vadd.f32 1.4214138, %v2887_v3  ;;  %v2888_v62 = vmul.f32 %v2824_v10, %v9850_v40  ;;  %vm15677_vm15 = vcmask 261120   ;;  %vm2269_vm0 = vcmp.eq.f32.partialorder %v2268_v34, 8.507059e+37  ;;  %v16253_v10 = vld [vmem:[#allocation44_spill] sm:$0xff] }
 0x1e4   : > { %v2267_v17 = vsel %vm9865_vm13, %v16243_v35, %v2263_v15  ;;  %v3221_v25 = vmul.f32 %v3157_v28, %v9796_v41  ;;  %v3094_v20 = vmul.f32 %v3030_v24, %v9819_v53  ;;  %v2271_v2 = vor.u32 1.1754944e-38, %v2270_v54  ;;  %v16254_v34 = vld [vmem:[#allocation23_spill] sm:$0xff] }
 0x1e5   : > { %v16250_v30 = vsub.f32 1.0, %v16249_v55  ;;  %v3015_v13 = vmul.f32 %v2951_v51, %v9834_v1  ;;  %v2952_v3 = vadd.f32 1.4214138, %v2888_v62  ;;  %vm2279_vm3 = vweird.f32 %v16252_v18 }
 0x1e6   : > { %vm2280_vm4 = vweird.f32 %v16251_v19  ;;  %v3541_v31 = vmul.f32 %v16253_v10, %v3221_v25  ;;  %v3158_v35 = vadd.f32 0.2548296, %v3094_v20  ;;  %v9886_v15 = vsel %vm2269_vm0, %v2271_v2, %v2267_v17 }
 0x1e7   : > { %v2277_v4 = vmul.f32 %v16251_v19, %v16250_v30  ;;  %vm3670_vm5 = vcmp.lt.f32.partialorder %v16254_v34, 0.0  ;;  %v3079_v28 = vadd.f32 -0.28449672, %v3015_v13  ;;  %v3016_v24 = vmul.f32 %v2952_v3, %v9850_v40  ;;  %vm9892_vm6 = vmor %vm2279_vm3, %vm2280_vm4  ;;  %v16257_v3 = vld [vmem:[#allocation18_spill] sm:$0xff]  ;;  %v16268_v34 = vld [vmem:[#allocation32_spill] sm:$0xff] }
 0x1e8   : > { %v2743_v54 = vmul.f32 1.0614054, %v9886_v15  ;;  %v2283_v62 = vand.u32 2147483647, %v16252_v18  ;;  %v3605_v55 = vsub.f32 1.0, %v3541_v31  ;;  %v3222_v25 = vmul.f32 %v3158_v35, %v9819_v53  ;;  %v16260_v31 = vld [vmem:[#allocation22_spill] sm:$0xff] }
 0x1e9   : > { %v2278_v41 = vadd.f32 %v16251_v19, %v2277_v4  ;;  %v2285_v20 = vand.u32 2147483648, %v16252_v18  ;;  %v3143_v2 = vmul.f32 %v3079_v28, %v9834_v1  ;;  %v3080_v30 = vadd.f32 -0.28449672, %v3016_v24  ;;  %v16262_v28 = vld [vmem:[#allocation10_spill] sm:$0xff] }
 0x1ea   : > { %v2807_v4 = vadd.f32 -1.4531521, %v2743_v54  ;;  %vm2284_vm7 = vcmp.eq.f32.partialorder %v2283_v62, 8.507059e+37  ;;  %v3733_v13 = vsub.f32 0.0, %v3605_v55  ;;  %v3542_v10 = vmul.f32 %v16257_v3, %v3222_v25 }
 0x1eb   : > { %v2282_v17 = vsel %vm9892_vm6, %v16251_v19, %v2278_v41  ;;  %v2286_v44 = vor.u32 1.1754944e-38, %v2285_v20  ;;  %v16259_v46 = vsub.f32 1.0, %v16258_v7  ;;  %v3207_v53 = vadd.f32 0.2548296, %v3143_v2  ;;  %v9911_v19 = vld [vmem:[%s15357_s3] sm:$0xff]  ;;  %v16261_v41 = vld [vmem:[#allocation27_spill] sm:$0xff] }
 0x1ec   : > { %v3144_v35 = vmul.f32 %v3080_v30, %v9850_v40  ;;  %v2871_v18 = vmul.f32 %v2807_v4, %v9886_v15  ;;  %vm2024_vm8 = vweird.f32 %v16261_v41  ;;  %vm3719_vm9 = vcmp.lt.f32.partialorder %v16262_v28, 0.0  ;;  %v16263_v2 = vld [vmem:[#allocation16_spill] sm:$0xff] }
 0x1ed   : > { %v2022_v33 = vmul.f32 %v16260_v31, %v16259_v46  ;;  %v3797_v24 = vsel %vm3669_vm14, %v3733_v13, %v3605_v55  ;;  %v3606_v7 = vsub.f32 1.0, %v3542_v10  ;;  %v9918_v54 = vsel %vm2284_vm7, %v2286_v44, %v2282_v17 }
 0x1ee   : > { %3917 = vmatpush.msra.mxu0 %v3797_v24  ;;  %v3271_v51 = vmul.f32 %v3207_v53, %v9834_v1  ;;  %v3208_v62 = vadd.f32 0.2548296, %v3144_v35  ;;  %v2935_v25 = vadd.f32 1.4214138, %v2871_v18  ;;  %v2744_v20 = vmul.f32 1.0614054, %v9918_v54 }
 0x1ef   : > { %v2023_v46 = vadd.f32 %v16260_v31, %v2022_v33  ;;  %vm3720_vm10 = vcmp.lt.f32.partialorder %v16263_v2, 0.0  ;;  %v3734_v30 = vsub.f32 0.0, %v3606_v7  ;;  %7233 = vmatmul.msk.f32.vlgmr.msra.gmra.mxu0 %vm15677_vm15, %v9911_v19  ;;  %vm2025_vm11 = vweird.f32 %v16260_v31  ;;  %v16264_v33 = vld [vmem:[#allocation77_spill] sm:$0xff]  ;;  %v16265_v35 = vld [vmem:[#allocation80_spill] sm:$0xff]  ;;  %v1432_v2 = vpop.f32.mrf.mxu3 }
 0x1f0   : > { %v2028_v44 = vand.u32 2147483647, %v16261_v41  ;;  %v2030_v14 = vand.u32 2147483648, %v16261_v41  ;;  %v3591_v55 = vmul.f32 %v16264_v33, %v3271_v51  ;;  %v3272_v1 = vmul.f32 %v3208_v62, %v9850_v40  ;;  %vm2026_vm12 = vmor %vm2024_vm8, %vm2025_vm11  ;;  %v16266_v41 = vld [vmem:[#allocation51_spill] sm:$0xff] }
 0x1f1   : > { %v2999_v17 = vmul.f32 %v2935_v25, %v9886_v15  ;;  %v2808_v4 = vadd.f32 -1.4531521, %v2744_v20  ;;  %v3798_v13 = vsel %vm3670_vm5, %v3734_v30, %v3606_v7  ;;  %v2027_v3 = vsel %vm2026_vm12, %v16260_v31, %v2023_v46  ;;  %v16269_v25 = vld [vmem:[#allocation9_spill] sm:$0xff] }
 0x1f2   : > { %vm2029_vm13 = vcmp.eq.f32.partialorder %v2028_v44, 8.507059e+37  ;;  %v2031_v10 = vor.u32 1.1754944e-38, %v2030_v14  ;;  %3946 = vmatpush.msra.mxu1 %v3798_v13  ;;  %v3655_v53 = vsub.f32 1.0, %v3591_v55  ;;  %v3592_v18 = vmul.f32 %v16265_v35, %v3272_v1  ;;  %v1403_v35 = vpop.f32.mrf.mxu2 }
 0x1f3   : > { %v3063_v24 = vadd.f32 -0.28449672, %v2999_v17  ;;  %v2872_v40 = vmul.f32 %v2808_v4, %v9918_v54  ;;  %7237 = vmatmul.msk.f32.vlgmr.msra.gmra.mxu1 %vm15677_vm15, %v9911_v19  ;;  %v16267_v62 = vsub.f32 1.0, %v16266_v41  ;;  %vm2039_vm14 = vweird.f32 %v16269_v25 }
 0x1f4   : > { %v9941_v51 = vsel %vm2029_vm13, %v2031_v10, %v2027_v3  ;;  %vm2040_vm0 = vweird.f32 %v16268_v34  ;;  %v3783_v31 = vsub.f32 0.0, %v3655_v53  ;;  %v3656_v46 = vsub.f32 1.0, %v3592_v18  ;;  %v16272_v10 = vld [vmem:[#allocation17_spill] sm:$0xff]  ;;  %v16279_v3 = vld [vmem:[#allocation46_spill] sm:$0xff] }
 0x1f5   : > { %v2037_v7 = vmul.f32 %v16268_v34, %v16267_v62  ;;  %v3127_v20 = vmul.f32 %v3063_v24, %v9886_v15  ;;  %v2936_v30 = vadd.f32 1.4214138, %v2872_v40  ;;  %v2727_v44 = vmul.f32 1.0614054, %v9941_v51  ;;  %vm9956_vm3 = vmor %vm2039_vm14, %vm2040_vm0 }
 0x1f6   : > { %v2043_v33 = vand.u32 2147483647, %v16269_v25  ;;  %v2045_v55 = vand.u32 2147483648, %v16269_v25  ;;  %v3847_v1 = vsel %vm3719_vm9, %v3783_v31, %v3655_v53  ;;  %v3784_v17 = vsub.f32 0.0, %v3656_v46  ;;  %v16275_v31 = vld [vmem:[#allocation65_spill] sm:$0xff] }
 0x1f7   : > { %v2038_v14 = vadd.f32 %v16268_v34, %v2037_v7  ;;  %v3191_v4 = vadd.f32 0.2548296, %v3127_v20  ;;  %v3000_v13 = vmul.f32 %v2936_v30, %v9918_v54  ;;  %vm3703_vm4 = vcmp.lt.f32.partialorder %v16272_v10, 0.0  ;;  %3972 = vmatpush.msra.mxu2 %v3847_v1 }
 0x1f8   : > { %7530 = vrcp.f32 %v9817_v43  ;;  %v2791_v18 = vadd.f32 -1.4531521, %v2727_v44  ;;  %v2046_v53 = vor.u32 1.1754944e-38, %v2045_v55  ;;  %v3848_v24 = vsel %vm3720_vm10, %v3784_v17, %v3656_v46 }
 0x1f9   : > { %v2042_v28 = vsel %vm9956_vm3, %v16268_v34, %v2038_v14  ;;  %v3255_v40 = vmul.f32 %v3191_v4, %v9886_v15  ;;  %v3064_v41 = vadd.f32 -0.28449672, %v3000_v13  ;;  %vm2044_vm5 = vcmp.eq.f32.partialorder %v2043_v33, 8.507059e+37  ;;  %4001 = vmatpush.msra.mxu3 %v3848_v24 }
 0x1fa   : > { %v9970_v62 = vmul.f32 %v9743_v23, %v9652_v27  ;;  %7532 = vpow2.f32 %v9750_v48  ;;  %v2855_v7 = vmul.f32 %v2791_v18, %v9941_v51  ;;  %v9974_v25 = vsel %vm2044_vm5, %v2046_v53, %v2042_v28  ;;  %v16282_v18 = vld [vmem:[#allocation41_spill] sm:$0xff]  ;;  %v16284_v53 = vld [vmem:[#allocation15_spill] sm:$0xff] }
 0x1fb   : > { %v9977_v34 = vadd.f32 %v1403_v35, %v8982_v12  ;;  %v3575_v46 = vmul.f32 %v16275_v31, %v3255_v40  ;;  %v3128_v15 = vmul.f32 %v3064_v41, %v9918_v54  ;;  %v2728_v20 = vmul.f32 1.0614054, %v9974_v25 }
 0x1fc   : > { %16273 = vst [vmem:[#allocation78_spill] sm:$0xff] %v9970_v62  ;;  %v3461_v44 = vmul.f32 1.442695, %v9813_v21  ;;  %v16276_v48 = vsub.f32 0.0, %v9758_v16  ;;  %v2919_v33 = vadd.f32 1.4214138, %v2855_v7  ;;  %v9989_v55 = vmul.f32 %v9791_v0, %v9726_v63 }
 0x1fd   : > { %16274 = vst [vmem:[#allocation63_spill] sm:$0xff] %v9977_v34  ;;  %v3639_v1 = vsub.f32 1.0, %v3575_v46  ;;  %v3192_v17 = vadd.f32 0.2548296, %v3128_v15  ;;  %v2792_v4 = vadd.f32 -1.4531521, %v2728_v20  ;;  %v9996_v35 = vmul.f32 %v9870_v26, %v9804_v50 }
 0x1fe   : > { %v3374_v14 = vmul.f32 %v16276_v48, %v9758_v16  ;;  %16277 = vst [vmem:[#allocation47_spill] sm:$0xff] %v9989_v55  ;;  %v9991_v13 = vpop.eup %7530  ;;  %vm3704_vm6 = vcmp.lt.f32.partialorder %v16279_v3, 0.0  ;;  %v9999_v21 = vadd.f32 %v1432_v2, %v8982_v12  ;;  %v2983_v16 = vmul.f32 %v2919_v33, %v9941_v51  ;;  %v16295_v0 = vld [vmem:[#allocation48_spill] sm:$0xff]  ;;  %v16296_v62 = vld [vmem:[#allocation45_spill] sm:$0xff] }
 0x1ff   : > { %16278 = vst [vmem:[#allocation12_spill] sm:$0xff] %v9991_v13  ;;  %v16283_v28 = vsub.f32 1.0, %v16282_v18  ;;  %v10006_v40 = vand.u32 2147483647, %v9977_v34  ;;  %v3767_v41 = vsub.f32 0.0, %v3639_v1  ;;  %v3256_v7 = vmul.f32 %v3192_v17, %v9918_v54  ;;  %v16286_v18 = vld [vmem:[#allocation68_spill] sm:$0xff] }
 0x200   : > { %16280 = vst [vmem:[#allocation86_spill] sm:$0xff] %v9996_v35  ;;  %v2856_v31 = vmul.f32 %v2792_v4, %v9974_v25  ;;  %v10010_v46 = vpop.eup %7532  ;;  %7534 = vpow2.f32 %v3461_v44  ;;  %v10013_v2 = vmul.f32 1.442695, %v3374_v14  ;;  %v3047_v20 = vadd.f32 -0.28449672, %v2983_v16  ;;  %v16293_v34 = vld [vmem:[#allocation34_spill] sm:$0xff] }
 0x201   : > { %16281 = vst [vmem:[#allocation66_spill] sm:$0xff] %v9999_v21  ;;  %v1782_v24 = vmul.f32 %v16284_v53, %v16283_v28  ;;  %v3831_v33 = vsel %vm3703_vm4, %v3767_v41, %v3639_v1  ;;  %v3576_v28 = vmul.f32 %v16286_v18, %v3256_v7  ;;  %v10022_v17 = vmul.f32 %v9991_v13, %v9817_v43  ;;  %v1348_v41 = vpop.f32.mrf.mxu0 }
 0x202   : > { %16285 = vst [vmem:[#allocation28_spill] sm:$0xff] %v10010_v46  ;;  %v2920_v30 = vadd.f32 1.4214138, %v2856_v31  ;;  %3973 = vmatpush.msra.mxu2 %v3831_v33  ;;  %v3111_v44 = vmul.f32 %v3047_v20, %v9941_v51  ;;  %v1647_v4 = vmul.f32 0.3275911, %v10006_v40  ;;  %v16288_v31 = vld [vmem:[#allocation36_spill] sm:$0xff]  ;;  %vm1785_vm8 = vweird.f32 %v16284_v53  ;;  %v1406_v46 = vpop.f32.mrf.mxu2 }
 0x203   : > { %16287 = vst [vmem:[#allocation57_spill] sm:$0xff] %v10022_v17  ;;  %v1783_v14 = vadd.f32 %v16284_v53, %v1782_v24  ;;  %v1584_v16 = vand.u32 2147483647, %v9999_v21  ;;  %v3640_v10 = vsub.f32 1.0, %v3576_v28  ;;  %vm1784_vm7 = vweird.f32 %v16288_v31  ;;  %v16289_v33 = vld [vmem:[#allocation39_spill] sm:$0xff]  ;;  %v1377_v24 = vpop.f32.mrf.mxu1 }
 0x204   : > { %v2984_v1 = vmul.f32 %v2920_v30, %v9974_v25  ;;  %v3175_v7 = vadd.f32 0.2548296, %v3111_v44  ;;  %v1788_v18 = vand.u32 2147483647, %v16288_v31  ;;  %vm3687_vm9 = vcmp.lt.f32.partialorder %v16289_v33, 0.0  ;;  %vm10034_vm10 = vmor %vm1784_vm7, %vm1785_vm8 }
 0x205   : > { %v3311_v20 = vsub.f32 0.0, %v10006_v40  ;;  %v3768_v48 = vsub.f32 0.0, %v3640_v10  ;;  %v1790_v30 = vand.u32 2147483648, %v16288_v31  ;;  %v1787_v21 = vsel %vm10034_vm10, %v16284_v53, %v1783_v14  ;;  %v1435_v31 = vpop.f32.mrf.mxu3  ;;  %v16300_v14 = vld [vmem:[#allocation35_spill] sm:$0xff] }
 0x206   : > { %v3048_v15 = vadd.f32 -0.28449672, %v2984_v1  ;;  %v10039_v28 = vpop.eup %7534  ;;  %v3239_v44 = vmul.f32 %v3175_v7, %v9941_v51  ;;  %vm1789_vm11 = vcmp.eq.f32.partialorder %v1788_v18, 8.507059e+37  ;;  %v16294_v63 = vsub.f32 1.0, %v16293_v34  ;;  %v16297_v51 = vld [vmem:[#allocation56_spill] sm:$0xff] }
 0x207   : > { %16292 = vst [vmem:[#allocation54_spill] sm:$0xff] %v10039_v28  ;;  %v3832_v55 = vsel %vm3704_vm6, %v3768_v48, %v3640_v10  ;;  %v1791_v23 = vor.u32 1.1754944e-38, %v1790_v30  ;;  %vm1799_vm12 = vweird.f32 %v16296_v62  ;;  %vm1800_vm13 = vweird.f32 %v16295_v0  ;;  %v16301_v10 = vld [vmem:[#allocation25_spill] sm:$0xff] }
 0x208   : > { %v1797_v1 = vmul.f32 %v16295_v0, %v16294_v63  ;;  %v3112_v27 = vmul.f32 %v3048_v15, %v9974_v25  ;;  %4002 = vmatpush.msra.mxu3 %v3832_v55  ;;  %v3559_v7 = vmul.f32 %v16297_v51, %v3239_v44  ;;  %v1803_v34 = vand.u32 2147483647, %v16296_v62  ;;  %v10059_v63 = vld [vmem:[%s15357_s3 + $0x8] sm:$0xff]  ;;  %vm10063_vm14 = vmor %vm1799_vm12, %vm1800_vm13 }
 0x209   : > { %v3312_v3 = vsub.f32 0.0, %v1584_v16  ;;  %v10061_v15 = vsel %vm1789_vm11, %v1791_v23, %v1787_v21  ;;  %v1805_v55 = vand.u32 2147483648, %v16296_v62  ;;  %7234 = vmatmul.msk.f32.gmra.mxu0 %vm15677_vm15, %v10059_v63  ;;  %7238 = vmatmul.msk.f32.gmra.mxu1 %vm15677_vm15, %v10059_v63  ;;  %vm3688_vm0 = vcmp.lt.f32.partialorder %v16300_v14, 0.0 }
 0x20a   : > { %v1798_v54 = vadd.f32 %v16295_v0, %v1797_v1  ;;  %v3176_v53 = vadd.f32 0.2548296, %v3112_v27  ;;  %v10074_v18 = vadd.f32 %v1348_v41, %v16301_v10  ;;  %v3623_v27 = vsub.f32 1.0, %v3559_v7  ;;  %v16305_v7 = vld [vmem:[#allocation59_spill] sm:$0xff] }
 0x20b   : > { %v2711_v23 = vmul.f32 1.0614054, %v10061_v15  ;;  %v10080_v30 = vadd.f32 1.0, %v1647_v4  ;;  %v10083_v62 = vadd.f32 %v1377_v24, %v16301_v10  ;;  %v1806_v1 = vor.u32 1.1754944e-38, %v1805_v55  ;;  %v1380_v48 = vpop.f32.mrf.mxu1 }
 0x20c   : > { %16302 = vst [vmem:[#allocation42_spill] sm:$0xff] %v10074_v18  ;;  %v1802_v21 = vsel %vm10063_vm14, %v16295_v0, %v1798_v54  ;;  %v3240_v44 = vmul.f32 %v3176_v53, %v9974_v25  ;;  %v1648_v51 = vmul.f32 0.3275911, %v1584_v16  ;;  %v3751_v28 = vsub.f32 0.0, %v3623_v27 }
 0x20d   : > { %16303 = vst [vmem:[#allocation43_spill] sm:$0xff] %v10080_v30  ;;  %v2775_v9 = vadd.f32 -1.4531521, %v2711_v23  ;;  %vm1804_vm3 = vcmp.eq.f32.partialorder %v1803_v34, 8.507059e+37  ;;  %v3375_v41 = vmul.f32 %v3311_v20, %v10006_v40  ;;  %v10089_v13 = vadd.f32 %v1406_v46, %v16301_v10  ;;  %v1351_v34 = vpop.f32.mrf.mxu0 }
 0x20e   : > { %16304 = vst [vmem:[#allocation60_spill] sm:$0xff] %v10083_v62  ;;  %v3560_v43 = vmul.f32 %v16305_v7, %v3240_v44  ;;  %v10091_v0 = vsel %vm1804_vm3, %v1806_v1, %v1802_v21  ;;  %v10094_v4 = vand.u32 2147483647, %v10074_v18  ;;  %v3815_v25 = vsel %vm3687_vm9, %v3751_v28, %v3623_v27  ;;  %v16321_v18 = vld [vmem:[#allocation13_spill] sm:$0xff] }
 0x20f   : > { %16306 = vst [vmem:[#allocation55_spill] sm:$0xff] %v10089_v13  ;;  %v2839_v24 = vmul.f32 %v2775_v9, %v10061_v15  ;;  %v2712_v54 = vmul.f32 1.0614054, %v10091_v0  ;;  %v3376_v53 = vmul.f32 %v3312_v3, %v1584_v16  ;;  %v10101_v40 = vand.u32 2147483647, %v10083_v62  ;;  %3974 = vmatpush.msra.mxu2 %v3815_v25  ;;  %v1409_v9 = vpop.f32.mrf.mxu2  ;;  %v16320_v62 = vld [vmem:[#allocation33_spill] sm:$0xff] }
 0x210   : > { %v3624_v46 = vsub.f32 1.0, %v3560_v43  ;;  %v10104_v20 = vadd.f32 %v1435_v31, %v16301_v10  ;;  %7536 = vrcp.f32 %v10080_v30  ;;  %v10107_v55 = vadd.f32 1.0, %v1648_v51  ;;  %v1438_v43 = vpop.f32.mrf.mxu3 }
 0x211   : > { %v2903_v33 = vadd.f32 1.4214138, %v2839_v24  ;;  %v2776_v28 = vadd.f32 -1.4531521, %v2712_v54  ;;  %v3465_v27 = vmul.f32 1.442695, %v3375_v41  ;;  %v10113_v3 = vadd.f32 %v1351_v34, %v8997_v60 }
 0x212   : > { %16307 = vst [vmem:[#allocation31_spill] sm:$0xff] %v10104_v20  ;;  %v3752_v23 = vsub.f32 0.0, %v3624_v46  ;;  %v10110_v16 = vand.u32 2147483647, %v10089_v13  ;;  %v1661_v31 = vmul.f32 0.3275911, %v10094_v4  ;;  %v10119_v1 = vadd.f32 %v1380_v48, %v8997_v60 }
 0x213   : > { %16308 = vst [vmem:[#allocation44_spill] sm:$0xff] %v10107_v55  ;;  %v2967_v21 = vmul.f32 %v2903_v33, %v10061_v15  ;;  %v2840_v44 = vmul.f32 %v2776_v28, %v10091_v0  ;;  %v1662_v51 = vmul.f32 0.3275911, %v10101_v40  ;;  %v10125_v7 = vand.u32 2147483647, %v10104_v20  ;;  %v10137_v48 = vld [vmem:[%s15357_s3 + $0x10] sm:$0xff] }
 0x214   : > { %16309 = vst [vmem:[#allocation23_spill] sm:$0xff] %v10113_v3  ;;  %v3816_v41 = vsel %vm3688_vm0, %v3752_v23, %v3624_v46  ;;  %v10128_v25 = vadd.f32 %v1409_v9, %v8997_v60  ;;  %v10132_v33 = vadd.f32 %v1438_v43, %v8997_v60  ;;  %7538 = vpow2.f32 %v10013_v2  ;;  %7235 = vmatmul.msk.f32.gmra.mxu0 %vm15677_vm15, %v10137_v48 }
 0x215   : > { %16310 = vst [vmem:[#allocation18_spill] sm:$0xff] %v10119_v1  ;;  %4003 = vmatpush.msra.mxu3 %v3816_v41  ;;  %v3031_v54 = vadd.f32 -0.28449672, %v2967_v21  ;;  %v2904_v34 = vadd.f32 1.4214138, %v2840_v44  ;;  %7239 = vmatmul.msk.f32.gmra.mxu1 %vm15677_vm15, %v10137_v48  ;;  %7540 = vrcp.f32 %v10107_v55  ;;  %v10156_v43 = vadd.f32 1.0, %v1661_v31 }
 0x216   : > { %16311 = vst [vmem:[#allocation50_spill] sm:$0xff] %v10128_v25  ;;  %v3467_v14 = vmul.f32 1.442695, %v3376_v53  ;;  %v1663_v46 = vmul.f32 0.3275911, %v10110_v16  ;;  %v10148_v9 = vpop.eup %7536  ;;  %v10158_v21 = vadd.f32 1.0, %v1662_v51  ;;  %7542 = vpow2.f32 %v3465_v27 }
 0x217   : > { %16312 = vst [vmem:[#allocation22_spill] sm:$0xff] %v10132_v33  ;;  %v10142_v28 = vand.u32 2147483647, %v10113_v3  ;;  %v3095_v23 = vmul.f32 %v3031_v54, %v10061_v15  ;;  %v2968_v2 = vmul.f32 %v2904_v34, %v10091_v0  ;;  %v10154_v53 = vand.u32 2147483647, %v10119_v1  ;;  %v16314_v54 = vld [vmem:[#allocation26_spill] sm:$0xff]  ;;  %v1458_v3 = vpop.f32.mrf.mxu0 }
 0x218   : > { %16313 = vst [vmem:[#allocation27_spill] sm:$0xff] %v10148_v9  ;;  %v1664_v44 = vmul.f32 0.3275911, %v10125_v7  ;;  %v10162_v41 = vand.u32 2147483647, %v10128_v25  ;;  %vm3671_vm4 = vcmp.lt.f32.partialorder %v16314_v54, 0.0  ;;  %v10170_v34 = vmul.f32 %v10148_v9, %v10080_v30 }
 0x219   : > { %v3159_v24 = vadd.f32 0.2548296, %v3095_v23  ;;  %v3032_v20 = vadd.f32 -0.28449672, %v2968_v2  ;;  %v10165_v13 = vand.u32 2147483647, %v10132_v33  ;;  %7544 = vpow2.f32 %v3467_v14 }
 0x21a   : > { %16315 = vst [vmem:[#allocation10_spill] sm:$0xff] %v10170_v34  ;;  %v10172_v31 = vadd.f32 1.0, %v1663_v46  ;;  %v1677_v51 = vmul.f32 0.3275911, %v10142_v28  ;;  %v3325_v25 = vsub.f32 0.0, %v10094_v4  ;;  %v10179_v33 = vpop.eup %7538  ;;  %7546 = vrcp.f32 %v10156_v43 }
 0x21b   : > { %v3223_v27 = vmul.f32 %v3159_v24, %v10061_v15  ;;  %v3096_v23 = vmul.f32 %v3032_v20, %v10091_v0  ;;  %v1678_v2 = vmul.f32 0.3275911, %v10154_v53  ;;  %16317 = vst [vmem:[#allocation77_spill] sm:$0xff] %v10179_v33  ;;  %v3326_v30 = vsub.f32 0.0, %v10101_v40  ;;  %v10186_v46 = vpop.eup %7540 }
 0x21c   : > { %16316 = vst [vmem:[#allocation16_spill] sm:$0xff] %v10172_v31  ;;  %v10183_v9 = vadd.f32 1.0, %v1664_v44  ;;  %v1679_v14 = vmul.f32 0.3275911, %v10162_v41  ;;  %7548 = vrcp.f32 %v10158_v21  ;;  %v1680_v20 = vmul.f32 0.3275911, %v10165_v13  ;;  %v10197_v17 = vpop.eup %7542 }
 0x21d   : > { %16319 = vst [vmem:[#allocation51_spill] sm:$0xff] %v10186_v46  ;;  %v3543_v15 = vmul.f32 %v16320_v62, %v3223_v27  ;;  %v3160_v24 = vadd.f32 0.2548296, %v3096_v23  ;;  %vm3672_vm5 = vcmp.lt.f32.partialorder %v16321_v18, 0.0  ;;  %7550 = vrcp.f32 %v10172_v31 }
 0x21e   : > { %16318 = vst [vmem:[#allocation80_spill] sm:$0xff] %v10183_v9  ;;  %v3327_v33 = vsub.f32 0.0, %v10110_v16  ;;  %v3328_v44 = vsub.f32 0.0, %v10125_v7  ;;  %v10195_v1 = vadd.f32 1.0, %v1677_v51  ;;  %v10201_v27 = vadd.f32 1.0, %v1678_v2 }
 0x21f   : > { %16322 = vst [vmem:[#allocation32_spill] sm:$0xff] %v10197_v17  ;;  %v3607_v26 = vsub.f32 1.0, %v3543_v15  ;;  %v3224_v62 = vmul.f32 %v3160_v24, %v10091_v0  ;;  %v10203_v23 = vpop.eup %7544  ;;  %v3389_v35 = vmul.f32 %v3325_v25, %v10094_v4  ;;  %v3390_v60 = vmul.f32 %v3326_v30, %v10101_v40 }
 0x220   : > { %16323 = vst [vmem:[#allocation9_spill] sm:$0xff] %v10203_v23  ;;  %7552 = vrcp.f32 %v10183_v9  ;;  %v10208_v51 = vadd.f32 1.0, %v1679_v14  ;;  %v10211_v32 = vadd.f32 1.0, %v1680_v20  ;;  %v10214_v15 = vadd.f32 %v1458_v3, %v8988_v6  ;;  %v10216_v0 = vpop.eup %7546 }
 0x221   : > { %v3735_v61 = vsub.f32 0.0, %v3607_v26  ;;  %v3544_v17 = vmul.f32 %v16324_v52, %v3224_v62  ;;  %v10220_v2 = vmul.f32 %v10186_v46, %v10107_v55  ;;  %v3391_v30 = vmul.f32 %v3327_v33, %v10110_v16  ;;  %v10228_v52 = vld [vmem:[%s15357_s3 + $0x18] sm:$0xff]  ;;  %v1487_v16 = vpop.f32.mrf.mxu1 }
 0x222   : > { %16325 = vst [vmem:[#allocation17_spill] sm:$0xff] %v10214_v15  ;;  %v3392_v4 = vmul.f32 %v3328_v44, %v10125_v7  ;;  %7554 = vrcp.f32 %v10195_v1  ;;  %v10230_v40 = vpop.eup %7548  ;;  %v3341_v14 = vsub.f32 0.0, %v10142_v28  ;;  %7236 = vmatmul.msk.f32.gmra.mxu0 %vm15677_vm15, %v10228_v52  ;;  %7240 = vmatmul.msk.f32.gmra.mxu1 %vm15677_vm15, %v10228_v52  ;;  %v3493_v33 = vmul.f32 1.442695, %v3389_v35 }
 0x223   : > { %16326 = vst [vmem:[#allocation65_spill] sm:$0xff] %v10220_v2  ;;  %v3799_v3 = vsel %vm3671_vm4, %v3735_v61, %v3607_v26  ;;  %v3608_v25 = vsub.f32 1.0, %v3544_v17  ;;  %7556 = vrcp.f32 %v10201_v27  ;;  %v10240_v7 = vpop.eup %7550  ;;  %v3495_v24 = vmul.f32 1.442695, %v3390_v60 }
 0x224   : > { %16327 = vst [vmem:[#allocation46_spill] sm:$0xff] %v10240_v7  ;;  %3975 = vmatpush.msra.mxu2 %v3799_v3  ;;  %v3342_v54 = vsub.f32 0.0, %v10154_v53  ;;  %7558 = vrcp.f32 %v10208_v51  ;;  %v3343_v26 = vsub.f32 0.0, %v10162_v41  ;;  %v1569_v17 = vand.u32 2147483647, %v10214_v15 }
 0x225   : > { %v3736_v61 = vsub.f32 0.0, %v3608_v25  ;;  %7241 = vmatmul.msk.f32.vlgmr.msra.gmra.mxu2 %vm15677_vm15, %v9911_v19  ;;  %7560 = vrcp.f32 %v10211_v32  ;;  %v10253_v60 = vmul.f32 %v10216_v0, %v10156_v43  ;;  %v10257_v35 = vmul.f32 %v10230_v40, %v10158_v21 }
 0x226   : > { %v10249_v20 = vpop.eup %7552  ;;  %v3497_v44 = vmul.f32 1.442695, %v3391_v30  ;;  %v10260_v62 = vadd.f32 %v1487_v16, %v8988_v6  ;;  %v10264_v3 = vmul.f32 %v10240_v7, %v10172_v31  ;;  %v3499_v50 = vmul.f32 1.442695, %v3392_v4 }
 0x227   : > { %16328 = vst [vmem:[#allocation41_spill] sm:$0xff] %v10249_v20  ;;  %v3800_v15 = vsel %vm3672_vm5, %v3736_v61, %v3608_v25  ;;  %v3405_v23 = vmul.f32 %v3341_v14, %v10142_v28  ;;  %7562 = vpow2.f32 %v3493_v33  ;;  %v3406_v30 = vmul.f32 %v3342_v54, %v10154_v53  ;;  %v1516_v25 = vpop.f32.mrf.mxu2 }
 0x228   : > { %16329 = vst [vmem:[#allocation15_spill] sm:$0xff] %v10260_v62  ;;  %v10269_v55 = vpop.eup %7554  ;;  %4004 = vmatpush.msra.mxu3 %v3800_v15  ;;  %v3344_v16 = vsub.f32 0.0, %v10165_v13  ;;  %7564 = vpow2.f32 %v3495_v24  ;;  %v10278_v4 = vmul.f32 %v10249_v20, %v10183_v9  ;;  %v3407_v18 = vmul.f32 %v3343_v26, %v10162_v41 }
 0x229   : > { %16330 = vst [vmem:[#allocation68_spill] sm:$0xff] %v10264_v3  ;;  %v10274_v34 = vpop.eup %7556  ;;  %7245 = vmatmul.msk.f32.vlgmr.msra.gmra.mxu3 %vm15677_vm15, %v9911_v19  ;;  %v3297_v28 = vsub.f32 0.0, %v1569_v17  ;;  %7566 = vpow2.f32 %v3497_v44  ;;  %v1633_v15 = vmul.f32 0.3275911, %v1569_v17  ;;  %v1570_v33 = vand.u32 2147483647, %v10260_v62  ;;  %v1545_v44 = vpop.f32.mrf.mxu3 }
 0x22a   : > { %16331 = vst [vmem:[#allocation36_spill] sm:$0xff] %v10278_v4  ;;  %v10283_v14 = vpop.eup %7558  ;;  %7568 = vpow2.f32 %v3499_v50  ;;  %v3525_v19 = vmul.f32 1.442695, %v3405_v23  ;;  %v2590_v41 = vmul.f32 %v10269_v55, %v10195_v1  ;;  %v3527_v26 = vmul.f32 1.442695, %v3406_v30  ;;  %v16382_v3 = vld [vmem:[#allocation102_spill] sm:$0xff] }
 0x22b   : > { %v10287_v24 = vpop.eup %7560  ;;  %v3408_v46 = vmul.f32 %v3344_v16, %v10165_v13  ;;  %v10295_v53 = vadd.f32 %v1516_v25, %v8988_v6  ;;  %vm2534_vm6 = vweird.f32 %v9416_v22  ;;  %v2605_v54 = vmul.f32 %v10274_v34, %v10201_v27 }
 0x22c   : > { %16332 = vst [vmem:[#allocation39_spill] sm:$0xff] %v10287_v24  ;;  %v3529_v61 = vmul.f32 1.442695, %v3407_v18  ;;  %v3361_v50 = vmul.f32 %v3297_v28, %v1569_v17  ;;  %v2620_v13 = vmul.f32 %v10283_v14, %v10208_v51  ;;  %v2635_v30 = vmul.f32 %v10287_v24, %v10211_v32 }
 0x22d   : > { %16333 = vst [vmem:[#allocation34_spill] sm:$0xff] %v10295_v53  ;;  %7242 = vmatmul.msk.f32.gmra.mxu2 %vm15677_vm15, %v10059_v63  ;;  %v10303_v23 = vpop.eup %7562  ;;  %v10309_v16 = vadd.f32 1.0, %v1633_v15  ;;  %v1634_v25 = vmul.f32 0.3275911, %v1570_v33  ;;  %7570 = vpow2.f32 %v3525_v19  ;;  %v3298_v17 = vsub.f32 0.0, %v1570_v33 }
 0x22e   : > { %v10311_v62 = vpop.eup %7564  ;;  %v10315_v18 = vadd.f32 %v1545_v44, %v8988_v6  ;;  %vm2549_vm7 = vweird.f32 %v9452_v37  ;;  %v2591_v9 = vsub.f32 1.0, %v2590_v41  ;;  %7572 = vpow2.f32 %v3527_v26 }
 0x22f   : > { %16334 = vst [vmem:[#allocation48_spill] sm:$0xff] %v10309_v16  ;;  %v10317_v28 = vpop.eup %7566  ;;  %v3531_v20 = vmul.f32 1.442695, %v3408_v46  ;;  %v10321_v15 = vand.u32 2147483647, %v10295_v53  ;;  %v2606_v31 = vsub.f32 1.0, %v2605_v54  ;;  %7574 = vpow2.f32 %v3529_v61  ;;  %v1461_v46 = vpop.f32.mrf.mxu0 }
 0x230   : > { %16335 = vst [vmem:[#allocation45_spill] sm:$0xff] %v10315_v18  ;;  %v10323_v4 = vpop.eup %7568  ;;  %v3437_v19 = vmul.f32 1.442695, %v3361_v50  ;;  %v2621_v6 = vsub.f32 1.0, %v2620_v13  ;;  %v2636_v44 = vsub.f32 1.0, %v2635_v30  ;;  %7576 = vrcp.f32 %v10309_v16 }
 0x231   : > { %16336 = vst [vmem:[#allocation56_spill] sm:$0xff] %v10317_v28  ;;  %7246 = vmatmul.msk.f32.gmra.mxu3 %vm15677_vm15, %v10059_v63  ;;  %v10329_v41 = vadd.f32 1.0, %v1634_v25  ;;  %v3362_v26 = vmul.f32 %v3298_v17, %v1570_v33  ;;  %v10332_v53 = vand.u32 2147483647, %v10315_v18  ;;  %v2533_v54 = vadd.f32 %v9482_v56, %v9554_v38 }
 0x232   : > { %16337 = vst [vmem:[#allocation35_spill] sm:$0xff] %v10321_v15  ;;  %vm2535_vm8 = vweird.f32 %v9482_v56  ;;  %v10338_v61 = vmul.f32 %v10269_v55, %v2591_v9  ;;  %7578 = vpow2.f32 %v3531_v20  ;;  %v1635_v50 = vmul.f32 0.3275911, %v10321_v15 }
 0x233   : > { %16338 = vst [vmem:[#allocation25_spill] sm:$0xff] %v10323_v4  ;;  %v10342_v13 = vpop.eup %7570  ;;  %7580 = vpow2.f32 %v3437_v19  ;;  %v10346_v30 = vadd.f32 %v1461_v46, %v8982_v12  ;;  %v2538_v38 = vand.u32 2147483647, %v9416_v22  ;;  %v10354_v25 = vmul.f32 %v10274_v34, %v2606_v31  ;;  %v1490_v19 = vpop.f32.mrf.mxu1  ;;  %vm10365_vm9 = vmor %vm2534_vm6, %vm2535_vm8 }
 0x234   : > { %16339 = vst [vmem:[#allocation59_spill] sm:$0xff] %v10329_v41  ;;  %v10351_v9 = vpop.eup %7572  ;;  %v10357_v20 = vmul.f32 %v10283_v14, %v2621_v6  ;;  %7582 = vrcp.f32 %v10329_v41  ;;  %v10372_v31 = vmul.f32 %v10287_v24, %v2636_v44  ;;  %v3439_v6 = vmul.f32 1.442695, %v3362_v26 }
 0x235   : > { %16340 = vst [vmem:[#allocation26_spill] sm:$0xff] %v10332_v53  ;;  %7243 = vmatmul.msk.f32.gmra.mxu2 %vm15677_vm15, %v10137_v48  ;;  %v10369_v33 = vpop.eup %7574  ;;  %v1636_v63 = vmul.f32 0.3275911, %v10332_v53  ;;  %v2537_v17 = vsel %vm10365_vm9, %v9482_v56, %v2533_v54  ;;  %v10380_v18 = vadd.f32 1.0, %v1635_v50  ;;  %v16347_v15 = vand.u32 2147483648, %v9416_v22 }
 0x236   : > { %16341 = vst [vmem:[#allocation33_spill] sm:$0xff] %v10346_v30  ;;  %v10378_v2 = vpop.eup %7576  ;;  %v2548_v28 = vadd.f32 %v9509_v11, %v9613_v5  ;;  %vm2550_vm10 = vweird.f32 %v9509_v11  ;;  %v10388_v44 = vand.u32 2147483647, %v10346_v30  ;;  %v10391_v26 = vadd.f32 %v1490_v19, %v8982_v12 }
 0x237   : > { %16344 = vst [vmem:[#allocation13_spill] sm:$0xff] %v10369_v33  ;;  %v2541_v4 = vor.u32 1.1754944e-38, %v16347_v15  ;;  %vm2539_vm11 = vcmp.eq.f32.partialorder %v2538_v38, 8.507059e+37  ;;  %vm2551_vm12 = vmor %vm2549_vm7, %vm2550_vm10  ;;  %v2553_v22 = vand.u32 2147483647, %v9452_v37  ;;  %v16350_v54 = vand.u32 2147483648, %v9452_v37 }
 0x238   : > { %16345 = vst [vmem:[#allocation19_spill] sm:$0xff] %v10378_v2  ;;  %v10398_v56 = vpop.eup %7578  ;;  %v2552_v15 = vsel %vm2551_vm12, %v9509_v11, %v2548_v28  ;;  %v16351_v19 = vsub.f32 1.0, %v9471_v49  ;;  %v10412_v38 = vmul.f32 %v10378_v2, %v10309_v16  ;;  %vm2294_vm14 = vweird.f32 %v9386_v57 }
 0x239   : > { %16346 = vst [vmem:[#allocation141_spill] sm:$0xff] %v10380_v18  ;;  %7247 = vmatmul.msk.f32.gmra.mxu3 %vm15677_vm15, %v10137_v48  ;;  %v10400_v5 = vsel %vm2539_vm11, %v2541_v4, %v2537_v17  ;;  %v2556_v50 = vor.u32 1.1754944e-38, %v16350_v54  ;;  %v10408_v48 = vpop.eup %7580  ;;  %vm2554_vm13 = vcmp.eq.f32.partialorder %v2553_v22, 8.507059e+37  ;;  %vm2295_vm0 = vweird.f32 %v9442_v45 }
 0x23a   : > { %16348 = vst [vmem:[#allocation142_spill] sm:$0xff] %v10391_v26  ;;  %v2292_v46 = vmul.f32 %v9442_v45, %v16351_v19  ;;  %v2761_v53 = vmul.f32 1.0614054, %v10400_v5  ;;  %v10416_v4 = vpop.eup %7582  ;;  %v2298_v49 = vand.u32 2147483647, %v9386_v57  ;;  %7584 = vpow2.f32 %v3439_v6  ;;  %vm10424_vm3 = vmor %vm2294_vm14, %vm2295_vm0 }
 0x23b   : > { %16349 = vst [vmem:[#allocation143_spill] sm:$0xff] %v10398_v56  ;;  %v10418_v11 = vsel %vm2554_vm13, %v2556_v50, %v2552_v15  ;;  %v2300_v22 = vand.u32 2147483648, %v9386_v57  ;;  %v10431_v15 = vadd.f32 1.0, %v1636_v63  ;;  %v1649_v50 = vmul.f32 0.3275911, %v10388_v44 }
 0x23c   : > { %16352 = vst [vmem:[#allocation144_spill] sm:$0xff] %v10408_v48  ;;  %v2293_v37 = vadd.f32 %v9442_v45, %v2292_v46  ;;  %v2825_v28 = vadd.f32 -1.4531521, %v2761_v53  ;;  %v2762_v17 = vmul.f32 1.0614054, %v10418_v11  ;;  %v16357_v53 = vsub.f32 1.0, %v9479_v29 }
 0x23d   : > { %16353 = vst [vmem:[#allocation145_spill] sm:$0xff] %v10416_v4  ;;  %7244 = vmatmul.msk.f32.gmra.mxu2 %vm15677_vm15, %v10228_v52  ;;  %v10441_v46 = vand.u32 2147483647, %v10391_v26  ;;  %v2301_v30 = vor.u32 1.1754944e-38, %v2300_v22  ;;  %vm2299_vm4 = vcmp.eq.f32.partialorder %v2298_v49, 8.507059e+37  ;;  %vm2309_vm5 = vweird.f32 %v9389_v42 }
 0x23e   : > { %16356 = vst [vmem:[#allocation146_spill] sm:$0xff] %v10431_v15  ;;  %v2297_v6 = vsel %vm10424_vm3, %v9442_v45, %v2293_v37  ;;  %v2307_v19 = vmul.f32 %v9454_v59, %v16357_v53  ;;  %v2889_v57 = vmul.f32 %v2825_v28, %v10400_v5  ;;  %v2826_v48 = vadd.f32 -1.4531521, %v2762_v17 }
 0x23f   : > { %vm2310_vm6 = vweird.f32 %v9454_v59  ;;  %v10448_v29 = vsel %vm2299_vm4, %v2301_v30, %v2297_v6  ;;  %v2313_v37 = vand.u32 2147483647, %v9389_v42  ;;  %v1931_v28 = vsub.f32 1.0, %v10412_v38  ;;  %v1519_v38 = vpop.f32.mrf.mxu2 }
 0x240   : > { %v2308_v63 = vadd.f32 %v9454_v59, %v2307_v19  ;;  %v2953_v54 = vadd.f32 1.4214138, %v2889_v57  ;;  %v2890_v45 = vmul.f32 %v2826_v48, %v10418_v11  ;;  %7586 = vrcp.f32 %v10380_v18  ;;  %vm10456_vm7 = vmor %vm2309_vm5, %vm2310_vm6  ;;  %v10461_v48 = vpop.eup %7584  ;;  %v1548_v19 = vpop.f32.mrf.mxu3 }
 0x241   : > { %7248 = vmatmul.msk.f32.gmra.mxu3 %vm15677_vm15, %v10228_v52  ;;  %v2745_v49 = vmul.f32 1.0614054, %v10448_v29  ;;  %v2315_v22 = vand.u32 2147483648, %v9389_v42  ;;  %16360 = vst [vmem:[#allocation147_spill] sm:$0xff] %v10461_v48  ;;  %v3313_v30 = vsub.f32 0.0, %v10388_v44  ;;  %v1945_v57 = vmul.f32 %v10416_v4, %v10329_v41 }
 0x242   : > { %v3017_v6 = vmul.f32 %v2953_v54, %v10400_v5  ;;  %v2954_v53 = vadd.f32 1.4214138, %v2890_v45  ;;  %v2312_v52 = vsel %vm10456_vm7, %v9454_v59, %v2308_v63  ;;  %v10470_v26 = vadd.f32 1.0, %v1649_v50 }
 0x243   : > { %v2809_v16 = vadd.f32 -1.4531521, %v2745_v49  ;;  %v2316_v42 = vor.u32 1.1754944e-38, %v2315_v22  ;;  %v1650_v48 = vmul.f32 0.3275911, %v10441_v46  ;;  %vm2314_vm8 = vcmp.eq.f32.partialorder %v2313_v37, 8.507059e+37 }
 0x244   : > { %16361 = vst [vmem:[#allocation148_spill] sm:$0xff] %v10470_v26  ;;  %v3081_v56 = vadd.f32 -0.28449672, %v3017_v6  ;;  %v3018_v33 = vmul.f32 %v2954_v53, %v10418_v11  ;;  %v10478_v59 = vadd.f32 %v1519_v38, %v8982_v12  ;;  %v10481_v63 = vadd.f32 %v1548_v19, %v8982_v12  ;;  %v16365_v19 = vld [vmem:[#allocation83_spill] sm:$0xff] }
 0x245   : > { %v2873_v54 = vmul.f32 %v2809_v16, %v10448_v29  ;;  %v10475_v45 = vsel %vm2314_vm8, %v2316_v42, %v2312_v52  ;;  %7588 = vrcp.f32 %v10431_v15  ;;  %v1946_v37 = vsub.f32 1.0, %v1945_v57 }
 0x246   : > { %16362 = vst [vmem:[#allocation149_spill] sm:$0xff] %v10478_v59  ;;  %v3145_v50 = vmul.f32 %v3081_v56, %v10400_v5  ;;  %v3082_v49 = vadd.f32 -0.28449672, %v3018_v33  ;;  %v2746_v17 = vmul.f32 1.0614054, %v10475_v45  ;;  %v10486_v22 = vpop.eup %7586  ;;  %7590 = vrcp.f32 %v10470_v26 }
 0x247   : > { %16363 = vst [vmem:[#allocation150_spill] sm:$0xff] %v10481_v63  ;;  %v3377_v16 = vmul.f32 %v3313_v30, %v10388_v44  ;;  %v2937_v6 = vadd.f32 1.4214138, %v2873_v54  ;;  %v10490_v53 = vadd.f32 1.0, %v1650_v48  ;;  %vm3721_vm9 = vcmp.lt.f32.partialorder %v16365_v19, 0.0 }
 0x248   : > { %16364 = vst [vmem:[#allocation151_spill] sm:$0xff] %v10486_v22  ;;  %v3209_v52 = vadd.f32 0.2548296, %v3145_v50  ;;  %v3146_v12 = vmul.f32 %v3082_v49, %v10418_v11  ;;  %v2810_v38 = vadd.f32 -1.4531521, %v2746_v17  ;;  %v10495_v33 = vmul.f32 %v10378_v2, %v1931_v28  ;;  %v16368_v49 = vld [vmem:[#allocation92_spill] sm:$0xff] }
 0x249   : > { %v3001_v56 = vmul.f32 %v2937_v6, %v10448_v29  ;;  %v10499_v57 = vand.u32 2147483647, %v10478_v59  ;;  %v10502_v42 = vand.u32 2147483647, %v10481_v63  ;;  %v16367_v54 = vsub.f32 1.0, %v9438_v47 }
 0x24a   : > { %16366 = vst [vmem:[#allocation83_spill] sm:$0xff] %v10495_v33  ;;  %v3273_v44 = vmul.f32 %v3209_v52, %v10400_v5  ;;  %v3210_v48 = vadd.f32 0.2548296, %v3146_v12  ;;  %v2874_v30 = vmul.f32 %v2810_v38, %v10475_v45  ;;  %vm3722_vm10 = vcmp.lt.f32.partialorder %v16368_v49, 0.0 }
 0x24b   : > { %v2052_v50 = vmul.f32 %v9407_v58, %v16367_v54  ;;  %v10511_v28 = vmul.f32 %v10416_v4, %v1946_v37  ;;  %v10513_v17 = vmul.f32 1.442695, %v3377_v16  ;;  %v3314_v6 = vsub.f32 0.0, %v10441_v46  ;;  %v10516_v59 = vpop.eup %7588  ;;  %v16372_v4 = vld [vmem:[#allocation126_spill] sm:$0xff] }
 0x24c   : > { %v3065_v63 = vadd.f32 -0.28449672, %v3001_v56  ;;  %16370 = vst [vmem:[#allocation152_spill] sm:$0xff] %v10516_v59  ;;  %7592 = vrcp.f32 %v10490_v53  ;;  %v3593_v5 = vmul.f32 %v9560_v36, %v3273_v44  ;;  %v3274_v47 = vmul.f32 %v3210_v48, %v10418_v11  ;;  %v10521_v12 = vpop.eup %7590  ;;  %v16373_v48 = vld [vmem:[#allocation85_spill] sm:$0xff] }
 0x24d   : > { %16369 = vst [vmem:[#allocation92_spill] sm:$0xff] %v10511_v28  ;;  %v2938_v52 = vadd.f32 1.4214138, %v2874_v30  ;;  %v10525_v37 = vmul.f32 %v10486_v22, %v10380_v18  ;;  %v1651_v38 = vmul.f32 0.3275911, %v10499_v57  ;;  %v2053_v11 = vadd.f32 %v9407_v58, %v2052_v50  ;;  %v16374_v18 = vld [vmem:[#allocation74_spill] sm:$0xff] }
 0x24e   : > { %16371 = vst [vmem:[#allocation153_spill] sm:$0xff] %v10521_v12  ;;  %v3129_v16 = vmul.f32 %v3065_v63, %v10448_v29  ;;  %v1652_v56 = vmul.f32 0.3275911, %v10502_v42  ;;  %v3657_v54 = vsub.f32 1.0, %v3593_v5  ;;  %v3594_v28 = vmul.f32 %v16372_v4, %v3274_v47 }
 0x24f   : > { %v3002_v36 = vmul.f32 %v2938_v52, %v10475_v45  ;;  %vm2054_vm11 = vweird.f32 %v16373_v48  ;;  %vm2055_vm12 = vweird.f32 %v9407_v58  ;;  %v2058_v30 = vand.u32 2147483647, %v16373_v48 }
 0x250   : > { %v3193_v44 = vadd.f32 0.2548296, %v3129_v16  ;;  %vm3705_vm13 = vcmp.lt.f32.partialorder %v16374_v18, 0.0  ;;  %v3785_v63 = vsub.f32 0.0, %v3657_v54  ;;  %v3658_v41 = vsub.f32 1.0, %v3594_v28  ;;  %vm10548_vm14 = vmor %vm2054_vm11, %vm2055_vm12 }
 0x251   : > { %v3066_v2 = vadd.f32 -0.28449672, %v3002_v36  ;;  %v2060_v5 = vand.u32 2147483648, %v16373_v48  ;;  %v10540_v4 = vmul.f32 %v10516_v59, %v10431_v15  ;;  %v10544_v50 = vmul.f32 %v10521_v12, %v10470_v26  ;;  %v16380_v26 = vld [vmem:[#allocation108_spill] sm:$0xff] }
 0x252   : > { %v3378_v47 = vmul.f32 %v3314_v6, %v10441_v46  ;;  %v3257_v52 = vmul.f32 %v3193_v44, %v10448_v29  ;;  %v10552_v28 = vpop.eup %7592  ;;  %v3849_v36 = vsel %vm3721_vm9, %v3785_v63, %v3657_v54  ;;  %v3786_v48 = vsub.f32 0.0, %v3658_v41  ;;  %v16378_v46 = vld [vmem:[#allocation118_spill] sm:$0xff] }
 0x253   : > { %16377 = vst [vmem:[#allocation126_spill] sm:$0xff] %v10552_v28  ;;  %v3130_v15 = vmul.f32 %v3066_v2, %v10475_v45  ;;  %v2057_v33 = vsel %vm10548_vm14, %v9407_v58, %v2053_v11  ;;  %4030 = vmatpush.msrb.mxu0 %v3849_v36  ;;  %v10561_v29 = vadd.f32 1.0, %v1651_v38  ;;  %v2061_v44 = vor.u32 1.1754944e-38, %v2060_v5  ;;  %v16384_v2 = vld [vmem:[#allocation76_spill] sm:$0xff] }
 0x254   : > { %v3577_v6 = vmul.f32 %v16378_v46, %v3257_v52  ;;  %v16381_v7 = vsub.f32 1.0, %v16380_v26  ;;  %v3850_v19 = vsel %vm3722_vm10, %v3786_v48, %v3658_v41  ;;  %v10568_v63 = vadd.f32 1.0, %v1652_v56  ;;  %v16385_v41 = vld [vmem:[#allocation88_spill] sm:$0xff]  ;;  %v16393_v56 = vld [vmem:[#allocation71_spill] sm:$0xff] }
 0x255   : > { %16379 = vst [vmem:[#allocation85_spill] sm:$0xff] %v10561_v29  ;;  %v3194_v54 = vadd.f32 0.2548296, %v3130_v15  ;;  %vm2059_vm0 = vcmp.eq.f32.partialorder %v2058_v30, 8.507059e+37  ;;  %vm3706_vm3 = vcmp.lt.f32.partialorder %v16384_v2, 0.0  ;;  %v2185_v58 = vmul.f32 %v10552_v28, %v10490_v53  ;;  %4059 = vmatpush.msrb.mxu1 %v3850_v19 }
 0x256   : > { %v2067_v24 = vmul.f32 %v16382_v3, %v16381_v7  ;;  %16383 = vst [vmem:[#allocation74_spill] sm:$0xff] %v10568_v63  ;;  %v3641_v38 = vsub.f32 1.0, %v3577_v6  ;;  %v10573_v11 = vsel %vm2059_vm0, %v2061_v44, %v2057_v33  ;;  %vm2069_vm4 = vweird.f32 %v16385_v41 }
 0x257   : > { %v3258_v7 = vmul.f32 %v3194_v54, %v10475_v45  ;;  %v2729_v49 = vmul.f32 1.0614054, %v10573_v11  ;;  %vm2070_vm5 = vweird.f32 %v16382_v3  ;;  %7594 = vrcp.f32 %v10561_v29 }
 0x258   : > { %v2068_v26 = vadd.f32 %v16382_v3, %v2067_v24  ;;  %v3769_v15 = vsub.f32 0.0, %v3641_v38  ;;  %vm10581_vm6 = vmor %vm2069_vm4, %vm2070_vm5  ;;  %v2073_v33 = vand.u32 2147483647, %v16385_v41  ;;  %v2075_v30 = vand.u32 2147483648, %v16385_v41  ;;  %v16388_v24 = vld [vmem:[#allocation121_spill] sm:$0xff]  ;;  %v1464_v41 = vpop.f32.mrf.mxu0 }
 0x259   : > { %v3578_v5 = vmul.f32 %v16388_v24, %v3258_v7  ;;  %7596 = vrcp.f32 %v10568_v63  ;;  %v2793_v45 = vadd.f32 -1.4531521, %v2729_v49  ;;  %v1961_v16 = vsub.f32 1.0, %v10525_v37 }
 0x25a   : > { %v2072_v52 = vsel %vm10581_vm6, %v16382_v3, %v2068_v26  ;;  %v3833_v36 = vsel %vm3705_vm13, %v3769_v15, %v3641_v38  ;;  %v3315_v48 = vsub.f32 0.0, %v10499_v57  ;;  %v2076_v46 = vor.u32 1.1754944e-38, %v2075_v30 }
 0x25b   : > { %v3471_v6 = vmul.f32 1.442695, %v3378_v47  ;;  %4031 = vmatpush.msrb.mxu0 %v3833_v36  ;;  %v3642_v44 = vsub.f32 1.0, %v3578_v5  ;;  %v2857_v19 = vmul.f32 %v2793_v45, %v10573_v11  ;;  %vm2074_vm7 = vcmp.eq.f32.partialorder %v2073_v33, 8.507059e+37 }
 0x25c   : > { %v1976_v54 = vsub.f32 1.0, %v10540_v4  ;;  %v2171_v7 = vsub.f32 1.0, %v10544_v50  ;;  %v2186_v49 = vsub.f32 1.0, %v2185_v58  ;;  %v10599_v3 = vsel %vm2074_vm7, %v2076_v46, %v2072_v52  ;;  %v16391_v50 = vld [vmem:[#allocation79_spill] sm:$0xff]  ;;  %v1493_v46 = vpop.f32.mrf.mxu1 }
 0x25d   : > { %v3770_v37 = vsub.f32 0.0, %v3642_v44  ;;  %v3316_v18 = vsub.f32 0.0, %v10502_v42  ;;  %v2921_v38 = vadd.f32 1.4214138, %v2857_v19  ;;  %v2730_v26 = vmul.f32 1.0614054, %v10599_v3  ;;  %v10603_v47 = vpop.eup %7594 }
 0x25e   : > { %16389 = vst [vmem:[#allocation118_spill] sm:$0xff] %v10603_v47  ;;  %v10606_v15 = vmul.f32 %v10486_v22, %v1961_v16  ;;  %7598 = vpow2.f32 %v10513_v17  ;;  %v3379_v4 = vmul.f32 %v3315_v48, %v10499_v57  ;;  %v16392_v58 = vsub.f32 1.0, %v16391_v50 }
 0x25f   : > { %v10613_v30 = vpop.eup %7596  ;;  %7600 = vpow2.f32 %v3471_v6  ;;  %v3834_v24 = vsel %vm3706_vm3, %v3770_v37, %v3642_v44  ;;  %v2985_v5 = vmul.f32 %v2921_v38, %v10573_v11  ;;  %v2794_v45 = vadd.f32 -1.4531521, %v2730_v26  ;;  %v16400_v44 = vld [vmem:[#allocation120_spill] sm:$0xff]  ;;  %v16401_v37 = vld [vmem:[#allocation61_spill] sm:$0xff] }
 0x260   : > { %16390 = vst [vmem:[#allocation108_spill] sm:$0xff] %v10606_v15  ;;  %v1812_v33 = vmul.f32 %v16393_v56, %v16392_v58  ;;  %v10619_v52 = vmul.f32 %v10516_v59, %v1976_v54  ;;  %v10622_v17 = vmul.f32 %v10521_v12, %v2171_v7  ;;  %v10625_v57 = vmul.f32 %v10552_v28, %v2186_v49  ;;  %v16406_v58 = vld [vmem:[#allocation93_spill] sm:$0xff] }
 0x261   : > { %16394 = vst [vmem:[#allocation102_spill] sm:$0xff] %v10613_v30  ;;  %4060 = vmatpush.msrb.mxu1 %v3834_v24  ;;  %v10628_v16 = vadd.f32 %v1464_v41, %v16301_v10  ;;  %v10631_v36 = vmul.f32 %v3316_v18, %v10502_v42  ;;  %v3049_v2 = vadd.f32 -0.28449672, %v2985_v5  ;;  %v2858_v48 = vmul.f32 %v2794_v45, %v10599_v3  ;;  %v16408_v24 = vld [vmem:[#allocation84_spill] sm:$0xff] }
 0x262   : > { %16395 = vst [vmem:[#allocation76_spill] sm:$0xff] %v10619_v52  ;;  %v1813_v6 = vadd.f32 %v16393_v56, %v1812_v33  ;;  %vm2564_vm8 = vweird.f32 %v16400_v44  ;;  %v10638_v19 = vmul.f32 %v10603_v47, %v10561_v29  ;;  %v10640_v54 = vmul.f32 1.442695, %v3379_v4 }
 0x263   : > { %16396 = vst [vmem:[#allocation88_spill] sm:$0xff] %v10622_v17  ;;  %v10644_v7 = vmul.f32 %v10613_v30, %v10568_v63  ;;  %vm1815_vm9 = vweird.f32 %v16393_v56  ;;  %v3113_v42 = vmul.f32 %v3049_v2, %v10573_v11  ;;  %v2922_v49 = vadd.f32 1.4214138, %v2858_v48 }
 0x264   : > { %16397 = vst [vmem:[#allocation121_spill] sm:$0xff] %v10625_v57  ;;  %vm1814_vm10 = vweird.f32 %v16401_v37  ;;  %v1818_v18 = vand.u32 2147483647, %v16401_v37  ;;  %v10650_v38 = vpop.eup %7598  ;;  %v10653_v26 = vand.u32 2147483647, %v10628_v16  ;;  %v10656_v41 = vadd.f32 %v1493_v46, %v16301_v10 }
 0x265   : > { %16398 = vst [vmem:[#allocation79_spill] sm:$0xff] %v10628_v16  ;;  %vm10658_vm11 = vmor %vm1814_vm10, %vm1815_vm9  ;;  %v1820_v50 = vand.u32 2147483648, %v16401_v37  ;;  %v16407_v33 = vsub.f32 1.0, %v16406_v58  ;;  %v10666_v45 = vpop.eup %7600  ;;  %v3177_v2 = vadd.f32 0.2548296, %v3113_v42  ;;  %v2986_v48 = vmul.f32 %v2922_v49, %v10599_v3  ;;  %v16411_v58 = vld [vmem:[#allocation69_spill] sm:$0xff] }
 0x266   : > { %16399 = vst [vmem:[#allocation71_spill] sm:$0xff] %v10631_v36  ;;  %v1817_v46 = vsel %vm10658_vm11, %v16393_v56, %v1813_v6  ;;  %vm1819_vm12 = vcmp.eq.f32.partialorder %v1818_v18, 8.507059e+37  ;;  %v16410_v36 = vld [vmem:[#allocation64_spill] sm:$0xff]  ;;  %vm2579_vm14 = vweird.f32 %v9546_v39  ;;  %vm1829_vm0 = vweird.f32 %v16411_v58  ;;  %v16445_v16 = vld [vmem:[#allocation89_spill] sm:$0xff] }
 0x267   : > { %16402 = vst [vmem:[#allocation120_spill] sm:$0xff] %v10650_v38  ;;  %v1827_v5 = vmul.f32 %v16408_v24, %v16407_v33  ;;  %vm3689_vm13 = vcmp.lt.f32.partialorder %v16410_v36, 0.0  ;;  %v1821_v59 = vor.u32 1.1754944e-38, %v1820_v50  ;;  %vm1830_vm3 = vweird.f32 %v16408_v24 }
 0x268   : > { %16403 = vst [vmem:[#allocation61_spill] sm:$0xff] %v10656_v41  ;;  %v3241_v42 = vmul.f32 %v3177_v2, %v10573_v11  ;;  %v3050_v33 = vadd.f32 -0.28449672, %v2986_v48  ;;  %v1833_v49 = vand.u32 2147483647, %v16411_v58  ;;  %v1835_v4 = vand.u32 2147483648, %v16411_v58  ;;  %vm10686_vm4 = vmor %vm1829_vm0, %vm1830_vm3 }
 0x269   : > { %16409 = vst [vmem:[#allocation93_spill] sm:$0xff] %v10666_v45  ;;  %v1828_v37 = vadd.f32 %v16408_v24, %v1827_v5  ;;  %v10682_v6 = vand.u32 2147483647, %v10656_v41  ;;  %v10684_v18 = vsel %vm1819_vm12, %v1821_v59, %v1817_v46  ;;  %v16414_v5 = vld [vmem:[#allocation127_spill] sm:$0xff]  ;;  %v16415_v11 = vld [vmem:[#allocation101_spill] sm:$0xff]  ;;  %v16421_v45 = vld [vmem:[#allocation130_spill] sm:$0xff] }
 0x26a   : > { %v2563_v52 = vadd.f32 %v16414_v5, %v9666_v8  ;;  %v3561_v2 = vmul.f32 %v16415_v11, %v3241_v42  ;;  %v3114_v48 = vmul.f32 %v3050_v33, %v10599_v3  ;;  %v2713_v58 = vmul.f32 1.0614054, %v10684_v18  ;;  %v16418_v33 = vld [vmem:[#allocation67_spill] sm:$0xff]  ;;  %v16441_v41 = vld [vmem:[#allocation109_spill] sm:$0xff] }
 0x26b   : > { %v1832_v56 = vsel %vm10686_vm4, %v16408_v24, %v1828_v37  ;;  %v10699_v59 = vmul.f32 0.3275911, %v10653_v26  ;;  %v1836_v46 = vor.u32 1.1754944e-38, %v1835_v4  ;;  %vm2565_vm5 = vweird.f32 %v16414_v5  ;;  %v16420_v24 = vld [vmem:[#allocation140_spill] sm:$0xff] }
 0x26c   : > { %v2568_v22 = vand.u32 2147483647, %v16400_v44  ;;  %v3625_v15 = vsub.f32 1.0, %v3561_v2  ;;  %v3178_v8 = vadd.f32 0.2548296, %v3114_v48  ;;  %vm1834_vm6 = vcmp.eq.f32.partialorder %v1833_v49, 8.507059e+37  ;;  %vm10705_vm7 = vmor %vm2564_vm8, %vm2565_vm5 }
 0x26d   : > { %v2777_v63 = vadd.f32 -1.4531521, %v2713_v58  ;;  %vm3690_vm9 = vcmp.lt.f32.partialorder %v16418_v33, 0.0  ;;  %v10712_v4 = vsel %vm1834_vm6, %v1836_v46, %v1832_v56  ;;  %v2567_v50 = vsel %vm10705_vm7, %v16414_v5, %v2563_v52  ;;  %v16422_v52 = vld [vmem:[#allocation106_spill] sm:$0xff] }
 0x26e   : > { %v3753_v11 = vsub.f32 0.0, %v3625_v15  ;;  %v3242_v49 = vmul.f32 %v3178_v8, %v10599_v3  ;;  %v2714_v48 = vmul.f32 1.0614054, %v10712_v4  ;;  %vm2569_vm8 = vcmp.eq.f32.partialorder %v2568_v22, 8.507059e+37 }
 0x26f   : > { %v2841_v2 = vmul.f32 %v2777_v63, %v10684_v18  ;;  %v16419_v58 = vand.u32 2147483648, %v16400_v44  ;;  %v2578_v37 = vadd.f32 %v16421_v45, %v16420_v24  ;;  %vm2580_vm10 = vweird.f32 %v16421_v45 }
 0x270   : > { %v3817_v56 = vsel %vm3689_vm13, %v3753_v11, %v3625_v15  ;;  %v3562_v5 = vmul.f32 %v16422_v52, %v3242_v49  ;;  %v2778_v3 = vadd.f32 -1.4531521, %v2714_v48  ;;  %vm10730_vm11 = vmor %vm2579_vm14, %vm2580_vm10  ;;  %v2583_v36 = vand.u32 2147483647, %v9546_v39 }
 0x271   : > { %v2571_v29 = vor.u32 1.1754944e-38, %v16419_v58  ;;  %v2905_v46 = vadd.f32 1.4214138, %v2841_v2  ;;  %4032 = vmatpush.msrb.mxu0 %v3817_v56  ;;  %v2582_v44 = vsel %vm10730_vm11, %v16421_v45, %v2578_v37  ;;  %v16425_v15 = vand.u32 2147483648, %v9546_v39  ;;  %v16426_v2 = vld [vmem:[#allocation115_spill] sm:$0xff]  ;;  %v16429_v58 = vld [vmem:[#allocation100_spill] sm:$0xff] }
 0x272   : > { %v3626_v42 = vsub.f32 1.0, %v3562_v5  ;;  %v2842_v11 = vmul.f32 %v2778_v3, %v10712_v4  ;;  %vm2584_vm12 = vcmp.eq.f32.partialorder %v2583_v36, 8.507059e+37  ;;  %vm2324_vm13 = vweird.f32 %v16429_v58 }
 0x273   : > { %v10734_v22 = vsel %vm2569_vm8, %v2571_v29, %v2567_v50  ;;  %v2586_v8 = vor.u32 1.1754944e-38, %v16425_v15  ;;  %v2969_v24 = vmul.f32 %v2905_v46, %v10684_v18  ;;  %v16427_v29 = vsub.f32 1.0, %v16426_v2  ;;  %v16428_v50 = vld [vmem:[#allocation113_spill] sm:$0xff] }
 0x274   : > { %v2763_v49 = vmul.f32 1.0614054, %v10734_v22  ;;  %vm2325_vm14 = vweird.f32 %v16428_v50  ;;  %v3754_v45 = vsub.f32 0.0, %v3626_v42  ;;  %v2906_v39 = vadd.f32 1.4214138, %v2842_v11 }
 0x275   : > { %v2322_v48 = vmul.f32 %v16428_v50, %v16427_v29  ;;  %v3033_v37 = vadd.f32 -0.28449672, %v2969_v24  ;;  %v10750_v56 = vsel %vm2584_vm12, %v2586_v8, %v2582_v44  ;;  %v2328_v3 = vand.u32 2147483647, %v16429_v58  ;;  %vm10759_vm0 = vmor %vm2324_vm13, %vm2325_vm14  ;;  %v16432_v29 = vld [vmem:[#allocation119_spill] sm:$0xff] }
 0x276   : > { %v2827_v52 = vadd.f32 -1.4531521, %v2763_v49  ;;  %v2764_v5 = vmul.f32 1.0614054, %v10750_v56  ;;  %v3818_v63 = vsel %vm3690_vm9, %v3754_v45, %v3626_v42  ;;  %v2970_v15 = vmul.f32 %v2906_v39, %v10712_v4  ;;  %v16434_v45 = vld [vmem:[#allocation114_spill] sm:$0xff]  ;;  %v16435_v39 = vld [vmem:[#allocation21_spill] sm:$0xff] }
 0x277   : > { %v2323_v46 = vadd.f32 %v16428_v50, %v2322_v48  ;;  %v3097_v36 = vmul.f32 %v3033_v37, %v10684_v18  ;;  %v2330_v44 = vand.u32 2147483648, %v16429_v58  ;;  %4061 = vmatpush.msrb.mxu1 %v3818_v63  ;;  %vm2329_vm3 = vcmp.eq.f32.partialorder %v2328_v3, 8.507059e+37  ;;  %v16436_v63 = vld [vmem:[#allocation104_spill] sm:$0xff] }
 0x278   : > { %v2891_v8 = vmul.f32 %v2827_v52, %v10734_v22  ;;  %v2828_v24 = vadd.f32 -1.4531521, %v2764_v5  ;;  %v3034_v42 = vadd.f32 -0.28449672, %v2970_v15  ;;  %v16433_v48 = vsub.f32 1.0, %v16432_v29 }
 0x279   : > { %v2327_v11 = vsel %vm10759_vm0, %v16428_v50, %v2323_v46  ;;  %v3161_v33 = vadd.f32 0.2548296, %v3097_v36  ;;  %v2331_v49 = vor.u32 1.1754944e-38, %v2330_v44  ;;  %vm3673_vm4 = vcmp.lt.f32.partialorder %v16435_v39, 0.0  ;;  %v16449_v39 = vld [vmem:[#allocation112_spill] sm:$0xff] }
 0x27a   : > { %v2337_v37 = vmul.f32 %v16434_v45, %v16433_v48  ;;  %v2955_v38 = vadd.f32 1.4214138, %v2891_v8  ;;  %v2892_v58 = vmul.f32 %v2828_v24, %v10750_v56  ;;  %vm2339_vm5 = vweird.f32 %v16436_v63  ;;  %v16439_v8 = vld [vmem:[#allocation81_spill] sm:$0xff] }
 0x27b   : > { %vm2340_vm6 = vweird.f32 %v16434_v45  ;;  %v3225_v52 = vmul.f32 %v3161_v33, %v10684_v18  ;;  %v3098_v50 = vmul.f32 %v3034_v42, %v10712_v4  ;;  %v10777_v5 = vsel %vm2329_vm3, %v2331_v49, %v2327_v11  ;;  %v16440_v42 = vld [vmem:[#allocation53_spill] sm:$0xff] }
 0x27c   : > { %v2338_v46 = vadd.f32 %v16434_v45, %v2337_v37  ;;  %v3019_v3 = vmul.f32 %v2955_v38, %v10734_v22  ;;  %v2956_v36 = vadd.f32 1.4214138, %v2892_v58  ;;  %v2747_v15 = vmul.f32 1.0614054, %v10777_v5  ;;  %vm10782_vm7 = vmor %vm2339_vm5, %vm2340_vm6 }
 0x27d   : > { %v2343_v44 = vand.u32 2147483647, %v16436_v63  ;;  %v3545_v24 = vmul.f32 %v16439_v8, %v3225_v52  ;;  %v3162_v18 = vadd.f32 0.2548296, %v3098_v50  ;;  %v2345_v33 = vand.u32 2147483648, %v16436_v63  ;;  %v16443_v50 = vld [vmem:[#allocation103_spill] sm:$0xff] }
 0x27e   : > { %v2342_v11 = vsel %vm10782_vm7, %v16434_v45, %v2338_v46  ;;  %vm3674_vm9 = vcmp.lt.f32.partialorder %v16440_v42, 0.0  ;;  %v3083_v38 = vadd.f32 -0.28449672, %v3019_v3  ;;  %v3020_v49 = vmul.f32 %v2956_v36, %v10750_v56  ;;  %v16444_v46 = vld [vmem:[#allocation90_spill] sm:$0xff] }
 0x27f   : > { %v2811_v29 = vadd.f32 -1.4531521, %v2747_v15  ;;  %vm2344_vm8 = vcmp.eq.f32.partialorder %v2343_v44, 8.507059e+37  ;;  %v3609_v48 = vsub.f32 1.0, %v3545_v24  ;;  %v3226_v37 = vmul.f32 %v3162_v18, %v10712_v4 }
 0x280   : > { %v2346_v58 = vor.u32 1.1754944e-38, %v2345_v33  ;;  %v16442_v52 = vsub.f32 1.0, %v16441_v41  ;;  %v3147_v2 = vmul.f32 %v3083_v38, %v10734_v22  ;;  %v3084_v45 = vadd.f32 -0.28449672, %v3020_v49  ;;  %v16446_v33 = vld [vmem:[#allocation105_spill] sm:$0xff] }
 0x281   : > { %v2875_v63 = vmul.f32 %v2811_v29, %v10777_v5  ;;  %vm2084_vm10 = vweird.f32 %v16444_v46  ;;  %v3737_v3 = vsub.f32 0.0, %v3609_v48  ;;  %v3546_v36 = vmul.f32 %v16445_v16, %v3226_v37 }
 0x282   : > { %v2082_v8 = vmul.f32 %v16443_v50, %v16442_v52  ;;  %v10802_v15 = vsel %vm2344_vm8, %v2346_v58, %v2342_v11  ;;  %v3211_v4 = vadd.f32 0.2548296, %v3147_v2  ;;  %v3148_v24 = vmul.f32 %v3084_v45, %v10750_v56  ;;  %v1522_v2 = vpop.f32.mrf.mxu2 }
 0x283   : > { %v2939_v41 = vadd.f32 1.4214138, %v2875_v63  ;;  %v2748_v18 = vmul.f32 1.0614054, %v10802_v15  ;;  %vm3723_vm11 = vcmp.lt.f32.partialorder %v16446_v33, 0.0  ;;  %v3801_v38 = vsel %vm3673_vm4, %v3737_v3, %v3609_v48  ;;  %v16452_v63 = vld [vmem:[#allocation129_spill] sm:$0xff] }
 0x284   : > { %v2083_v44 = vadd.f32 %v16443_v50, %v2082_v8  ;;  %v3610_v49 = vsub.f32 1.0, %v3546_v36  ;;  %vm2085_vm12 = vweird.f32 %v16443_v50  ;;  %v2088_v16 = vand.u32 2147483647, %v16444_v46  ;;  %4033 = vmatpush.msrb.mxu0 %v3801_v38  ;;  %v10824_v8 = vld [vmem:[%s15357_s3] sm:$0xff]  ;;  %v16453_v38 = vld [vmem:[#allocation111_spill] sm:$0xff]  ;;  %v10884_v33 = vld [vmem:[%s15357_s3 + $0x8] sm:$0xff] }
 0x285   : > { %v3275_v11 = vmul.f32 %v3211_v4, %v10734_v22  ;;  %v3212_v29 = vadd.f32 0.2548296, %v3148_v24  ;;  %v3003_v37 = vmul.f32 %v2939_v41, %v10777_v5  ;;  %v2812_v58 = vadd.f32 -1.4531521, %v2748_v18  ;;  %vm10816_vm13 = vmor %vm2084_vm10, %vm2085_vm12  ;;  %7249 = vmatmul.msk.f32.vlgmr.msrb.gmra.mxu0 %vm15677_vm15, %v10824_v8 }
 0x286   : > { %vm3724_vm14 = vcmp.lt.f32.partialorder %v16449_v39, 0.0  ;;  %v3738_v48 = vsub.f32 0.0, %v3610_v49  ;;  %v2087_v22 = vsel %vm10816_vm13, %v16443_v50, %v2083_v44  ;;  %vm10831_vm0 = vcmp.eq.f32.partialorder %v2088_v16, 8.507059e+37  ;;  %v16455_v50 = vld [vmem:[#allocation107_spill] sm:$0xff]  ;;  %v16456_v16 = vld [vmem:[#allocation94_spill] sm:$0xff] }
 0x287   : > { %v2090_v45 = vand.u32 2147483648, %v16444_v46  ;;  %v3595_v3 = vmul.f32 %v16452_v63, %v3275_v11  ;;  %v3276_v36 = vmul.f32 %v3212_v29, %v10750_v56  ;;  %v3067_v4 = vadd.f32 -0.28449672, %v3003_v37  ;;  %v16457_v46 = vld [vmem:[#allocation134_spill] sm:$0xff]  ;;  %v16465_v63 = vld [vmem:[#allocation87_spill] sm:$0xff] }
 0x288   : > { %v2876_v24 = vmul.f32 %v2812_v58, %v10802_v15  ;;  %v3802_v41 = vsel %vm3674_vm9, %v3738_v48, %v3610_v49  ;;  %v16454_v52 = vsub.f32 1.0, %v16453_v38  ;;  %vm2099_vm3 = vweird.f32 %v16456_v16 }
 0x289   : > { %v2091_v18 = vor.u32 1.1754944e-38, %v2090_v45  ;;  %4062 = vmatpush.msrb.mxu1 %v3802_v41  ;;  %v3659_v57 = vsub.f32 1.0, %v3595_v3  ;;  %v3596_v17 = vmul.f32 %v16457_v46, %v3276_v36  ;;  %v3131_v11 = vmul.f32 %v3067_v4, %v10777_v5 }
 0x28a   : > { %v2097_v44 = vmul.f32 %v16455_v50, %v16454_v52  ;;  %v2940_v56 = vadd.f32 1.4214138, %v2876_v24  ;;  %7253 = vmatmul.msk.f32.vlgmr.msrb.gmra.mxu1 %vm15677_vm15, %v10824_v8  ;;  %vm2100_vm4 = vweird.f32 %v16455_v50  ;;  %v2103_v29 = vand.u32 2147483647, %v16456_v16  ;;  %v1551_v52 = vpop.f32.mrf.mxu3 }
 0x28b   : > { %v10851_v42 = vsel %vm10831_vm0, %v2091_v18, %v2087_v22  ;;  %v3787_v37 = vsub.f32 0.0, %v3659_v57  ;;  %v3660_v58 = vsub.f32 1.0, %v3596_v17  ;;  %v3195_v48 = vadd.f32 0.2548296, %v3131_v11  ;;  %vm10859_vm5 = vmor %vm2099_vm3, %vm2100_vm4  ;;  %v16460_v22 = vld [vmem:[#allocation82_spill] sm:$0xff] }
 0x28c   : > { %v2098_v49 = vadd.f32 %v16455_v50, %v2097_v44  ;;  %v3004_v45 = vmul.f32 %v2940_v56, %v10802_v15  ;;  %vm3707_vm6 = vcmp.lt.f32.partialorder %v16460_v22, 0.0  ;;  %v10865_v3 = vadd.f32 1.0, %v10699_v59  ;;  %v10938_v22 = vld [vmem:[%s15357_s3 + $0x10] sm:$0xff] }
 0x28d   : > { %v2731_v36 = vmul.f32 1.0614054, %v10851_v42  ;;  %v2105_v4 = vand.u32 2147483648, %v16456_v16  ;;  %v3851_v24 = vsel %vm3723_vm11, %v3787_v37, %v3659_v57  ;;  %v3788_v41 = vsub.f32 0.0, %v3660_v58  ;;  %7250 = vmatmul.msk.f32.gmra.mxu0 %vm15677_vm15, %v10884_v33 }
 0x28e   : > { %v2102_v17 = vsel %vm10859_vm5, %v16455_v50, %v2098_v49  ;;  %v3259_v18 = vmul.f32 %v3195_v48, %v10777_v5  ;;  %v3068_v38 = vadd.f32 -0.28449672, %v3004_v45  ;;  %v16461_v59 = vsub.f32 0.0, %v10653_v26  ;;  %4088 = vmatpush.msrb.mxu2 %v3851_v24  ;;  %v16463_v5 = vld [vmem:[#allocation122_spill] sm:$0xff] }
 0x28f   : > { %v2795_v46 = vadd.f32 -1.4531521, %v2731_v36  ;;  %v2106_v11 = vor.u32 1.1754944e-38, %v2105_v4  ;;  %v10879_v56 = vadd.f32 %v1522_v2, %v16301_v10  ;;  %v3852_v57 = vsel %vm3724_vm14, %v3788_v41, %v3660_v58 }
 0x290   : > { %v3393_v44 = vmul.f32 %v16461_v59, %v10653_v26  ;;  %v3579_v50 = vmul.f32 %v16463_v5, %v3259_v18  ;;  %v3132_v26 = vmul.f32 %v3068_v38, %v10802_v15  ;;  %vm2104_vm7 = vcmp.eq.f32.partialorder %v2103_v29, 8.507059e+37  ;;  %4117 = vmatpush.msrb.mxu3 %v3852_v57  ;;  %v16469_v59 = vld [vmem:[#allocation91_spill] sm:$0xff]  ;;  %v16470_v57 = vld [vmem:[#allocation125_spill] sm:$0xff] }
 0x291   : > { %16462 = vst [vmem:[#allocation84_spill] sm:$0xff] %v10879_v56  ;;  %v1666_v16 = vmul.f32 0.3275911, %v10682_v6  ;;  %v2859_v49 = vmul.f32 %v2795_v46, %v10851_v42  ;;  %v10894_v37 = vsel %vm2104_vm7, %v2106_v11, %v2102_v17  ;;  %v10897_v48 = vadd.f32 %v1551_v52, %v16301_v10 }
 0x292   : > { %7602 = vrcp.f32 %v10865_v3  ;;  %v3643_v45 = vsub.f32 1.0, %v3579_v50  ;;  %v3196_v39 = vadd.f32 0.2548296, %v3132_v26  ;;  %v2732_v58 = vmul.f32 1.0614054, %v10894_v37  ;;  %7254 = vmatmul.msk.f32.gmra.mxu1 %vm15677_vm15, %v10884_v33 }
 0x293   : > { %16464 = vst [vmem:[#allocation64_spill] sm:$0xff] %v10897_v48  ;;  %vm3708_vm9 = vcmp.lt.f32.partialorder %v16465_v63, 0.0  ;;  %v2216_v29 = vsub.f32 1.0, %v10644_v7  ;;  %v16466_v2 = vsub.f32 0.0, %v10682_v6  ;;  %v2923_v4 = vadd.f32 1.4214138, %v2859_v49 }
 0x294   : > { %v10907_v17 = vand.u32 2147483647, %v10879_v56  ;;  %v3501_v10 = vmul.f32 1.442695, %v3393_v44  ;;  %v3771_v24 = vsub.f32 0.0, %v3643_v45  ;;  %v3260_v41 = vmul.f32 %v3196_v39, %v10802_v15  ;;  %v16490_v56 = vld [vmem:[#allocation24_spill] sm:$0xff] }
 0x295   : > { %v3394_v36 = vmul.f32 %v16466_v2, %v10682_v6  ;;  %v2796_v18 = vadd.f32 -1.4531521, %v2732_v58  ;;  %7604 = vpow2.f32 %v10640_v54  ;;  %v2987_v7 = vmul.f32 %v2923_v4, %v10851_v42  ;;  %v16467_v6 = vld [vmem:[#allocation97_spill] sm:$0xff]  ;;  %7251 = vmatmul.msk.f32.gmra.mxu0 %vm15677_vm15, %v10938_v22 }
 0x296   : > { %v10915_v38 = vand.u32 2147483647, %v10897_v48  ;;  %v16468_v52 = vsub.f32 1.0, %v16467_v6  ;;  %v10920_v11 = vadd.f32 1.0, %v1666_v16  ;;  %v3835_v44 = vsel %vm3707_vm6, %v3771_v24, %v3643_v45 }
 0x297   : > { %v3580_v5 = vmul.f32 %v16470_v57, %v3260_v41  ;;  %v2860_v15 = vmul.f32 %v2796_v18, %v10894_v37  ;;  %v16471_v54 = vsub.f32 1.0, %v10638_v19  ;;  %v10932_v26 = vmul.f32 %v10613_v30, %v2216_v29  ;;  %4089 = vmatpush.msrb.mxu2 %v3835_v44  ;;  %v16474_v18 = vld [vmem:[#allocation73_spill] sm:$0xff] }
 0x298   : > { %v1842_v46 = vmul.f32 %v16469_v59, %v16468_v52  ;;  %v3051_v49 = vadd.f32 -0.28449672, %v2987_v7  ;;  %v1667_v16 = vmul.f32 0.3275911, %v10907_v17  ;;  %v10942_v45 = vpop.eup %7602  ;;  %7606 = vpow2.f32 %v3501_v10 }
 0x299   : > { %v10929_v50 = vmul.f32 %v10603_v47, %v16471_v54  ;;  %16473 = vst [vmem:[#allocation127_spill] sm:$0xff] %v10932_v26  ;;  %v10944_v19 = vmul.f32 1.442695, %v3394_v36  ;;  %v3644_v39 = vsub.f32 1.0, %v3580_v5  ;;  %v2924_v58 = vadd.f32 1.4214138, %v2860_v15 }
 0x29a   : > { %v3115_v29 = vmul.f32 %v3051_v49, %v10851_v42  ;;  %v1668_v2 = vmul.f32 0.3275911, %v10915_v38  ;;  %v1843_v4 = vadd.f32 %v16469_v59, %v1842_v46  ;;  %vm1845_vm8 = vweird.f32 %v16469_v59  ;;  %7255 = vmatmul.msk.f32.gmra.mxu1 %vm15677_vm15, %v10938_v22  ;;  %v16477_v46 = vld [vmem:[#allocation70_spill] sm:$0xff]  ;;  %v16480_v54 = vld [vmem:[#allocation99_spill] sm:$0xff]  ;;  %v16493_v47 = vld [vmem:[#allocation117_spill] sm:$0xff] }
 0x29b   : > { %16472 = vst [vmem:[#allocation69_spill] sm:$0xff] %v10929_v50  ;;  %7608 = vrcp.f32 %v10920_v11  ;;  %v3772_v24 = vsub.f32 0.0, %v3644_v39  ;;  %v2988_v41 = vmul.f32 %v2924_v58, %v10894_v37  ;;  %v1848_v7 = vand.u32 2147483647, %v16474_v18  ;;  %v10953_v10 = vpop.eup %7604 }
 0x29c   : > { %16475 = vst [vmem:[#allocation101_spill] sm:$0xff] %v10953_v10  ;;  %v10957_v36 = vmul.f32 %v10942_v45, %v10865_v3  ;;  %v3179_v6 = vadd.f32 0.2548296, %v3115_v29  ;;  %v10959_v52 = vadd.f32 1.0, %v1667_v16  ;;  %vm1844_vm10 = vweird.f32 %v16474_v18  ;;  %v16482_v16 = vld [vmem:[#allocation95_spill] sm:$0xff] }
 0x29d   : > { %vm3691_vm11 = vcmp.lt.f32.partialorder %v16477_v46, 0.0  ;;  %v3836_v44 = vsel %vm3708_vm9, %v3772_v24, %v3644_v39  ;;  %v3052_v57 = vadd.f32 -0.28449672, %v2988_v41  ;;  %vm10967_vm12 = vmor %vm1844_vm10, %vm1845_vm8  ;;  %v1850_v15 = vand.u32 2147483648, %v16474_v18 }
 0x29e   : > { %16476 = vst [vmem:[#allocation67_spill] sm:$0xff] %v10959_v52  ;;  %v16481_v49 = vsub.f32 1.0, %v16480_v54  ;;  %4118 = vmatpush.msrb.mxu3 %v3836_v44  ;;  %v3243_v29 = vmul.f32 %v3179_v6, %v10851_v42  ;;  %v10976_v10 = vadd.f32 1.0, %v1668_v2  ;;  %v1847_v63 = vsel %vm10967_vm12, %v16469_v59, %v1843_v4  ;;  %v10982_v39 = vpop.eup %7606  ;;  %v16485_v54 = vld [vmem:[#allocation110_spill] sm:$0xff]  ;;  %v1467_v6 = vpop.f32.mrf.mxu0  ;;  %v3868_v59 = vld [vmem:[%s15358_s4 + $0x18] sm:$0xff] }
 0x29f   : > { %vm1860_vm13 = vweird.f32 %v16482_v16  ;;  %16484 = vst [vmem:[#allocation130_spill] sm:$0xff] %v10982_v39  ;;  %v3116_v24 = vmul.f32 %v3052_v57, %v10894_v37  ;;  %vm1849_vm14 = vcmp.eq.f32.partialorder %v1848_v7, 8.507059e+37  ;;  %v1851_v41 = vor.u32 1.1754944e-38, %v1850_v15  ;;  %v10996_v4 = vld [vmem:[%s15357_s3 + $0x18] sm:$0xff]  ;;  %3886 = vperm.xlu2 %7369, %v3868_v59  }
 0x2a0   : > { %v1857_v58 = vmul.f32 %v16482_v16, %v16481_v49  ;;  %16483 = vst [vmem:[#allocation140_spill] sm:$0xff] %v10976_v10  ;;  %v3563_v44 = vmul.f32 %v16485_v54, %v3243_v29  ;;  %v16486_v49 = vld [vmem:[#allocation75_spill] sm:$0xff]  ;;  %7252 = vmatmul.msk.f32.gmra.mxu0 %vm15677_vm15, %v10996_v4  ;;  %7610 = vrcp.f32 %v10959_v52  ;;  %v1496_v29 = vpop.f32.mrf.mxu1  ;;  %v16489_v54 = vld [vmem:[#allocation72_spill] sm:$0xff]  ;;  %v11021_v30 = vadd.f32 %v1467_v6, %v16490_v56 }
 0x2a1   : > { %vm1859_vm0 = vweird.f32 %v16486_v49  ;;  %v1863_v42 = vand.u32 2147483647, %v16486_v49  ;;  %v1865_v2 = vand.u32 2147483648, %v16486_v49  ;;  %v11000_v7 = vpop.eup %7608  ;;  %v3180_v5 = vadd.f32 0.2548296, %v3116_v24 }
 0x2a2   : > { %v1858_v18 = vadd.f32 %v16482_v16, %v1857_v58  ;;  %v11004_v15 = vsel %vm1849_vm14, %v1851_v41, %v1847_v63  ;;  %vm11008_vm3 = vmor %vm1859_vm0, %vm1860_vm13  ;;  %vm3692_vm4 = vcmp.lt.f32.partialorder %v16489_v54, 0.0  ;;  %v3627_v49 = vsub.f32 1.0, %v3563_v44  ;;  %16491 = vst [vmem:[#allocation106_spill] sm:$0xff] %v11021_v30  ;;  %7256 = vmatmul.msk.f32.gmra.mxu1 %vm15677_vm15, %v10996_v4 }
 0x2a3   : > { %7612 = vrcp.f32 %v10976_v10  ;;  %v2715_v57 = vmul.f32 1.0614054, %v11004_v15  ;;  %v3244_v24 = vmul.f32 %v3180_v5, %v10894_v37  ;;  %v3331_v41 = vsub.f32 0.0, %v10907_v17 }
 0x2a4   : > { %v1862_v63 = vsel %vm11008_vm3, %v16482_v16, %v1858_v18  ;;  %v1866_v48 = vor.u32 1.1754944e-38, %v1865_v2  ;;  %v3755_v59 = vsub.f32 0.0, %v3627_v49  ;;  %vm1864_vm5 = vcmp.eq.f32.partialorder %v1863_v42, 8.507059e+37  ;;  %v1525_v2 = vpop.f32.mrf.mxu2 }
 0x2a5   : > { %v2779_v26 = vadd.f32 -1.4531521, %v2715_v57  ;;  %v11024_v44 = vadd.f32 %v1496_v29, %v16490_v56  ;;  %v3564_v58 = vmul.f32 %v16493_v47, %v3244_v24  ;;  %v3332_v16 = vsub.f32 0.0, %v10915_v38 }
 0x2a6   : > { %v11030_v37 = vsel %vm1864_vm5, %v1866_v48, %v1862_v63  ;;  %v1617_v18 = vand.u32 2147483647, %v11021_v30  ;;  %v2425_v6 = vmul.f32 %v11000_v7, %v10920_v11  ;;  %v3819_v42 = vsel %vm3691_vm11, %v3755_v59, %v3627_v49  ;;  %v11039_v29 = vpop.eup %7610 }
 0x2a7   : > { %16492 = vst [vmem:[#allocation115_spill] sm:$0xff] %v11024_v44  ;;  %v2843_v57 = vmul.f32 %v2779_v26, %v11004_v15  ;;  %v2716_v5 = vmul.f32 1.0614054, %v11030_v37  ;;  %4090 = vmatpush.msrb.mxu2 %v3819_v42  ;;  %v3628_v47 = vsub.f32 1.0, %v3564_v58  ;;  %v3395_v48 = vmul.f32 %v3331_v41, %v10907_v17  ;;  %v3867_v26 = vld [vmem:[%s15358_s4 + $0x10] sm:$0xff] }
 0x2a8   : > { %16494 = vst [vmem:[#allocation113_spill] sm:$0xff] %v11039_v29  ;;  %v1681_v63 = vmul.f32 0.3275911, %v1617_v18  ;;  %v1618_v24 = vand.u32 2147483647, %v11024_v44  ;;  %v3345_v28 = vsub.f32 0.0, %v1617_v18  ;;  %v11046_v46 = vadd.f32 %v1525_v2, %v16490_v56  ;;  %3881 = vperm.xlu2 %7369, %v3867_v26  }
 0x2a9   : > { %v11043_v50 = vpop.eup %7612  ;;  %v2907_v39 = vadd.f32 1.4214138, %v2843_v57  ;;  %v2780_v30 = vadd.f32 -1.4531521, %v2716_v5  ;;  %v3756_v49 = vsub.f32 0.0, %v3628_v47  ;;  %v3396_v59 = vmul.f32 %v3332_v16, %v10915_v38 }
 0x2aa   : > { %16495 = vst [vmem:[#allocation100_spill] sm:$0xff] %v11043_v50  ;;  %v11052_v58 = vadd.f32 1.0, %v1681_v63  ;;  %v1682_v17 = vmul.f32 0.3275911, %v1618_v24  ;;  %v2426_v41 = vsub.f32 1.0, %v2425_v6  ;;  %v2440_v44 = vmul.f32 %v11039_v29, %v10959_v52 }
 0x2ab   : > { %16496 = vst [vmem:[#allocation119_spill] sm:$0xff] %v11046_v46  ;;  %v2971_v42 = vmul.f32 %v2907_v39, %v11004_v15  ;;  %v2844_v57 = vmul.f32 %v2780_v30, %v11030_v37  ;;  %v1619_v5 = vand.u32 2147483647, %v11046_v46  ;;  %v3820_v2 = vsel %vm3692_vm4, %v3756_v49, %v3628_v47 }
 0x2ac   : > { %v2455_v38 = vmul.f32 %v11043_v50, %v10976_v10  ;;  %7614 = vrcp.f32 %v11052_v58  ;;  %4119 = vmatpush.msrb.mxu3 %v3820_v2  ;;  %v3505_v16 = vmul.f32 1.442695, %v3395_v48  ;;  %v3409_v39 = vmul.f32 %v3345_v28, %v1617_v18 }
 0x2ad   : > { %v3035_v6 = vadd.f32 -0.28449672, %v2971_v42  ;;  %v2908_v63 = vadd.f32 1.4214138, %v2844_v57  ;;  %v3507_v26 = vmul.f32 1.442695, %v3396_v59  ;;  %7616 = vpow2.f32 %v10944_v19 }
 0x2ae   : > { %v11064_v30 = vadd.f32 1.0, %v1682_v17  ;;  %v3346_v46 = vsub.f32 0.0, %v1618_v24  ;;  %v1683_v12 = vmul.f32 0.3275911, %v1619_v5  ;;  %v3347_v49 = vsub.f32 0.0, %v1619_v5  ;;  %v1554_v17 = vpop.f32.mrf.mxu3  ;;  %v16497_v57 = vld [vmem:[#allocation58_spill] sm:$0xff] }
 0x2af   : > { %v3099_v54 = vmul.f32 %v3035_v6, %v11004_v15  ;;  %v2972_v47 = vmul.f32 %v2908_v63, %v11030_v37  ;;  %v2441_v10 = vsub.f32 1.0, %v2440_v44  ;;  %v2456_v52 = vsub.f32 1.0, %v2455_v38 }
 0x2b0   : > { %7618 = vrcp.f32 %v11064_v30  ;;  %v11070_v48 = vadd.f32 1.0, %v1683_v12  ;;  %v3533_v59 = vmul.f32 1.442695, %v3409_v39  ;;  %vm3675_vm6 = vcmp.lt.f32.partialorder %v16497_v57, 0.0 }
 0x2b1   : > { %7620 = vpow2.f32 %v3505_v16  ;;  %v3163_v28 = vadd.f32 0.2548296, %v3099_v54  ;;  %v3036_v18 = vadd.f32 -0.28449672, %v2972_v47  ;;  %vm2594_vm7 = vweird.f32 %v10195_v1 }
 0x2b2   : > { %v11072_v42 = vpop.eup %7614  ;;  %v16498_v19 = vsub.f32 1.0, %v10957_v36  ;;  %v11082_v2 = vmul.f32 %v11000_v7, %v2426_v41  ;;  %7622 = vpow2.f32 %v3507_v26  ;;  %v3410_v12 = vmul.f32 %v3346_v46, %v1618_v24 }
 0x2b3   : > { %v3227_v38 = vmul.f32 %v3163_v28, %v11004_v15  ;;  %v3100_v16 = vmul.f32 %v3036_v18, %v11030_v37  ;;  %7624 = vrcp.f32 %v11070_v48  ;;  %v3411_v6 = vmul.f32 %v3347_v49, %v1619_v5  ;;  %v11098_v24 = vpop.eup %7616  ;;  %v16503_v15 = vld [vmem:[#allocation96_spill] sm:$0xff] }
 0x2b4   : > { %v11079_v44 = vmul.f32 %v10942_v45, %v16498_v19  ;;  %v11088_v63 = vmul.f32 %v11039_v29, %v2441_v10  ;;  %v11091_v36 = vmul.f32 %v11043_v50, %v2456_v52  ;;  %v2650_v39 = vmul.f32 %v11072_v42, %v11052_v58  ;;  %16502 = vst [vmem:[#allocation81_spill] sm:$0xff] %v11098_v24  ;;  %v16504_v10 = vld [vmem:[#allocation62_spill] sm:$0xff] }
 0x2b5   : > { %v11096_v41 = vadd.f32 %v1554_v17, %v16490_v56  ;;  %v3547_v46 = vmul.f32 %v16503_v15, %v3227_v38  ;;  %v3164_v26 = vadd.f32 0.2548296, %v3100_v16  ;;  %v2660_v54 = vand.u32 2147483648, %v11052_v58 }
 0x2b6   : > { %16499 = vst [vmem:[#allocation114_spill] sm:$0xff] %v11088_v63  ;;  %7626 = vpow2.f32 %v3533_v59  ;;  %v11102_v5 = vpop.eup %7618  ;;  %vm3676_vm9 = vcmp.lt.f32.partialorder %v16504_v10, 0.0  ;;  %vm2609_vm8 = vweird.f32 %v10201_v27  ;;  %v2675_v52 = vand.u32 2147483648, %v11064_v30 }
 0x2b7   : > { %16500 = vst [vmem:[#allocation21_spill] sm:$0xff] %v11091_v36  ;;  %v3535_v47 = vmul.f32 1.442695, %v3410_v12  ;;  %v2690_v56 = vand.u32 2147483648, %v11070_v48  ;;  %v1620_v49 = vand.u32 2147483647, %v11096_v41  ;;  %v11109_v28 = vpop.eup %7620  ;;  %v3228_v17 = vmul.f32 %v3164_v26, %v11030_v37 }
 0x2b8   : > { %16501 = vst [vmem:[#allocation104_spill] sm:$0xff] %v11096_v41  ;;  %v3611_v18 = vsub.f32 1.0, %v3547_v46  ;;  %v2665_v59 = vmul.f32 %v11102_v5, %v11064_v30  ;;  %v3537_v19 = vmul.f32 1.442695, %v3411_v6  ;;  %v11114_v38 = vpop.eup %7622  ;;  %v2651_v16 = vsub.f32 1.0, %v2650_v39 }
 0x2b9   : > { %16505 = vst [vmem:[#allocation53_spill] sm:$0xff] %v11109_v28  ;;  %v1684_v15 = vmul.f32 0.3275911, %v1620_v49  ;;  %v2593_v12 = vadd.f32 %v10269_v55, %v10338_v61  ;;  %vm2595_vm10 = vweird.f32 %v10269_v55  ;;  %v11119_v50 = vpop.eup %7624  ;;  %v16507_v28 = vld [vmem:[#allocation98_spill] sm:$0xff]  ;;  %v3348_v37 = vsub.f32 0.0, %v1620_v49 }
 0x2ba   : > { %16506 = vst [vmem:[#allocation109_spill] sm:$0xff] %v11114_v38  ;;  %v3739_v41 = vsub.f32 0.0, %v3611_v18  ;;  %v3548_v46 = vmul.f32 %v16507_v28, %v3228_v17  ;;  %v2666_v36 = vsub.f32 1.0, %v2665_v59  ;;  %v11122_v26 = vor.u32 1.1754944e-38, %v2660_v54  ;;  %vm11139_vm11 = vmor %vm2594_vm7, %vm2595_vm10 }
 0x2bb   : > { %7628 = vpow2.f32 %v3535_v47  ;;  %v11124_v6 = vadd.f32 1.0, %v1684_v15  ;;  %v2598_v39 = vand.u32 2147483647, %v10195_v1  ;;  %v11131_v63 = vor.u32 1.1754944e-38, %v2675_v52 }
 0x2bc   : > { %v11127_v38 = vpop.eup %7626  ;;  %v3803_v61 = vsel %vm3675_vm6, %v3739_v41, %v3611_v18  ;;  %v3612_v29 = vsub.f32 1.0, %v3548_v46  ;;  %v11133_v24 = vor.u32 1.1754944e-38, %v2690_v56  ;;  %v11144_v47 = vmul.f32 %v11072_v42, %v2651_v16 }
 0x2bd   : > { %4091 = vmatpush.msrb.mxu2 %v3803_v61  ;;  %v11148_v57 = vmul.f32 %v11119_v50, %v11070_v48  ;;  %7630 = vpow2.f32 %v3537_v19  ;;  %v2597_v41 = vsel %vm11139_vm11, %v10269_v55, %v2593_v12  ;;  %v11154_v56 = vmul.f32 %v11102_v5, %v2666_v36 }
 0x2be   : > { %v3740_v52 = vsub.f32 0.0, %v3612_v29  ;;  %7257 = vmatmul.msk.f32.vlgmr.msrb.gmra.mxu2 %vm15677_vm15, %v10824_v8  ;;  %v3412_v28 = vmul.f32 %v3348_v37, %v1620_v49  ;;  %v16510_v18 = vand.u32 2147483648, %v10195_v1  ;;  %7632 = vrcp.f32 %v11124_v6 }
 0x2bf   : > { %vm2599_vm12 = vcmp.eq.f32.partialorder %v2598_v39, 8.507059e+37  ;;  %v2608_v59 = vadd.f32 %v10274_v34, %v10354_v25  ;;  %vm2610_vm13 = vweird.f32 %v10274_v34  ;;  %v2613_v1 = vand.u32 2147483647, %v10201_v27 }
 0x2c0   : > { %v2601_v17 = vor.u32 1.1754944e-38, %v16510_v18  ;;  %v3804_v55 = vsel %vm3676_vm9, %v3740_v52, %v3612_v29  ;;  %vm11170_vm14 = vmor %vm2609_vm8, %vm2610_vm13  ;;  %v16513_v19 = vand.u32 2147483648, %v10201_v27  ;;  %v16514_v10 = vsub.f32 1.0, %v10253_v60 }
 0x2c1   : > { %v11177_v15 = vpop.eup %7628  ;;  %4120 = vmatpush.msrb.mxu3 %v3804_v55  ;;  %v2612_v29 = vsel %vm11170_vm14, %v10274_v34, %v2608_v59  ;;  %vm2354_vm0 = vweird.f32 %v10156_v43  ;;  %vm2614_vm3 = vcmp.eq.f32.partialorder %v2613_v1, 8.507059e+37  ;;  %vm2355_vm4 = vweird.f32 %v10216_v0 }
 0x2c2   : > { %v11166_v36 = vsel %vm2599_vm12, %v2601_v17, %v2597_v41  ;;  %v2616_v16 = vor.u32 1.1754944e-38, %v16513_v19  ;;  %v2352_v12 = vmul.f32 %v10216_v0, %v16514_v10  ;;  %7261 = vmatmul.msk.f32.vlgmr.msrb.gmra.mxu3 %vm15677_vm15, %v10824_v8  ;;  %v2358_v27 = vand.u32 2147483647, %v10156_v43  ;;  %vm2356_vm5 = vmor %vm2354_vm0, %vm2355_vm4  ;;  %v16535_v8 = vld [vmem:[#allocation135_spill] sm:$0xff] }
 0x2c3   : > { %v2765_v25 = vmul.f32 1.0614054, %v11166_v36  ;;  %v2360_v46 = vand.u32 2147483648, %v10156_v43  ;;  %v11192_v37 = vpop.eup %7630  ;;  %v16515_v61 = vsub.f32 1.0, %v10257_v35  ;;  %v11202_v52 = vmul.f32 1.442695, %v3412_v28 }
 0x2c4   : > { %v11194_v34 = vsel %vm2614_vm3, %v2616_v16, %v2612_v29  ;;  %v2353_v60 = vadd.f32 %v10216_v0, %v2352_v12  ;;  %v11207_v17 = vpop.eup %7632  ;;  %vm2359_vm6 = vcmp.eq.f32.partialorder %v2358_v27, 8.507059e+37  ;;  %vm2369_vm7 = vweird.f32 %v10158_v21 }
 0x2c5   : > { %v2829_v39 = vadd.f32 -1.4531521, %v2765_v25  ;;  %v2367_v54 = vmul.f32 %v10230_v40, %v16515_v61  ;;  %v2766_v18 = vmul.f32 1.0614054, %v11194_v34  ;;  %v2361_v35 = vor.u32 1.1754944e-38, %v2360_v46  ;;  %v16520_v61 = vld [vmem:[#allocation52_spill] sm:$0xff] }
 0x2c6   : > { %v2357_v55 = vsel %vm2356_vm5, %v10216_v0, %v2353_v60  ;;  %7258 = vmatmul.msk.f32.gmra.mxu2 %vm15677_vm15, %v10884_v33  ;;  %vm2370_vm9 = vweird.f32 %v10230_v40  ;;  %v2373_v0 = vand.u32 2147483647, %v10158_v21  ;;  %v2375_v16 = vand.u32 2147483648, %v10158_v21 }
 0x2c7   : > { %v2893_v59 = vmul.f32 %v2829_v39, %v11166_v36  ;;  %v2368_v49 = vadd.f32 %v10230_v40, %v2367_v54  ;;  %v2830_v1 = vadd.f32 -1.4531521, %v2766_v18  ;;  %v11216_v28 = vsel %vm2359_vm6, %v2361_v35, %v2357_v55  ;;  %vm11218_vm8 = vmor %vm2369_vm7, %vm2370_vm9  ;;  %v16518_v39 = vld [vmem:[#allocation86_spill] sm:$0xff] }
 0x2c8   : > { %v11226_v25 = vmul.f32 %v11207_v17, %v11124_v6  ;;  %v2749_v10 = vmul.f32 1.0614054, %v11216_v28  ;;  %vm2374_vm10 = vcmp.eq.f32.partialorder %v2373_v0, 8.507059e+37  ;;  %v2376_v46 = vor.u32 1.1754944e-38, %v2375_v16 }
 0x2c9   : > { %v2957_v43 = vadd.f32 1.4214138, %v2893_v59  ;;  %v2894_v29 = vmul.f32 %v2830_v1, %v11194_v34  ;;  %v2372_v12 = vsel %vm11218_vm8, %v10230_v40, %v2368_v49  ;;  %v16519_v60 = vsub.f32 1.0, %v16518_v39  ;;  %v16521_v59 = vld [vmem:[#allocation40_spill] sm:$0xff] }
 0x2ca   : > { %7262 = vmatmul.msk.f32.gmra.mxu3 %vm15677_vm15, %v10884_v33  ;;  %v2813_v18 = vadd.f32 -1.4531521, %v2749_v10  ;;  %vm2114_vm11 = vweird.f32 %v16521_v59  ;;  %vm2115_vm12 = vweird.f32 %v16520_v61  ;;  %v11241_v35 = vsel %vm2374_vm10, %v2376_v46, %v2372_v12  ;;  %v16526_v12 = vld [vmem:[#allocation57_spill] sm:$0xff]  ;;  %v16528_v46 = vld [vmem:[#allocation12_spill] sm:$0xff] }
 0x2cb   : > { %v3021_v27 = vmul.f32 %v2957_v43, %v11166_v36  ;;  %v2112_v21 = vmul.f32 %v16520_v61, %v16519_v60  ;;  %v2958_v54 = vadd.f32 1.4214138, %v2894_v29  ;;  %v2118_v49 = vand.u32 2147483647, %v16521_v59  ;;  %vm11248_vm13 = vmor %vm2114_vm11, %vm2115_vm12 }
 0x2cc   : > { %v2877_v43 = vmul.f32 %v2813_v18, %v11216_v28  ;;  %v2750_v19 = vmul.f32 1.0614054, %v11241_v35  ;;  %v2120_v0 = vand.u32 2147483648, %v16521_v59  ;;  %v16529_v18 = vld [vmem:[#allocation37_spill] sm:$0xff]  ;;  %vm2130_vm3 = vweird.f32 %v16528_v46 }
 0x2cd   : > { %v3085_v55 = vadd.f32 -0.28449672, %v3021_v27  ;;  %v2113_v40 = vadd.f32 %v16520_v61, %v2112_v21  ;;  %v3022_v1 = vmul.f32 %v2958_v54, %v11194_v34  ;;  %vm11257_vm14 = vcmp.eq.f32.partialorder %v2118_v49, 8.507059e+37 }
 0x2ce   : > { %v16527_v27 = vsub.f32 1.0, %v16526_v12  ;;  %7259 = vmatmul.msk.f32.gmra.mxu2 %vm15677_vm15, %v10938_v22  ;;  %v2941_v21 = vadd.f32 1.4214138, %v2877_v43  ;;  %v2814_v54 = vadd.f32 -1.4531521, %v2750_v19  ;;  %vm2129_vm0 = vweird.f32 %v16529_v18 }
 0x2cf   : > { %v3149_v16 = vmul.f32 %v3085_v55, %v11166_v36  ;;  %v2117_v29 = vsel %vm11248_vm13, %v16520_v61, %v2113_v40  ;;  %v3086_v60 = vadd.f32 -0.28449672, %v3022_v1  ;;  %v2121_v55 = vor.u32 1.1754944e-38, %v2120_v0  ;;  %v16530_v40 = vld [vmem:[#allocation23_spill] sm:$0xff]  ;;  %vm11273_vm5 = vmor %vm2129_vm0, %vm2130_vm3 }
 0x2d0   : > { %v2127_v39 = vmul.f32 %v16528_v46, %v16527_v27  ;;  %vm3725_vm4 = vcmp.lt.f32.partialorder %v16530_v40, 0.0  ;;  %v3005_v33 = vmul.f32 %v2941_v21, %v11216_v28  ;;  %v2878_v12 = vmul.f32 %v2814_v54, %v11241_v35  ;;  %v16533_v54 = vld [vmem:[#allocation38_spill] sm:$0xff]  ;;  %v16543_v40 = vld [vmem:[#allocation60_spill] sm:$0xff] }
 0x2d1   : > { %v3213_v59 = vadd.f32 0.2548296, %v3149_v16  ;;  %v3150_v49 = vmul.f32 %v3086_v60, %v11194_v34  ;;  %v2133_v43 = vand.u32 2147483647, %v16529_v18  ;;  %v11281_v0 = vsel %vm11257_vm14, %v2121_v55, %v2117_v29 }
 0x2d2   : > { %v2128_v61 = vadd.f32 %v16528_v46, %v2127_v39  ;;  %v2135_v27 = vand.u32 2147483648, %v16529_v18  ;;  %7263 = vmatmul.msk.f32.gmra.mxu3 %vm15677_vm15, %v10938_v22  ;;  %v3069_v60 = vadd.f32 -0.28449672, %v3005_v33  ;;  %v2942_v21 = vadd.f32 1.4214138, %v2878_v12 }
 0x2d3   : > { %v3277_v19 = vmul.f32 %v3213_v59, %v11166_v36  ;;  %v3214_v39 = vadd.f32 0.2548296, %v3150_v49  ;;  %v16534_v41 = vsub.f32 1.0, %v16533_v54  ;;  %v16536_v59 = vld [vmem:[#allocation18_spill] sm:$0xff]  ;;  %v2733_v10 = vmul.f32 1.0614054, %v11281_v0 }
 0x2d4   : > { %v2132_v16 = vsel %vm11273_vm5, %v16528_v46, %v2128_v61  ;;  %vm3726_vm6 = vcmp.lt.f32.partialorder %v16536_v59, 0.0  ;;  %vm2134_vm7 = vcmp.eq.f32.partialorder %v2133_v43, 8.507059e+37  ;;  %v2136_v46 = vor.u32 1.1754944e-38, %v2135_v27 }
 0x2d5   : > { %v1872_v36 = vmul.f32 %v16535_v8, %v16534_v41  ;;  %v3597_v29 = vmul.f32 %v10342_v13, %v3277_v19  ;;  %v3278_v18 = vmul.f32 %v3214_v39, %v11194_v34  ;;  %v3133_v55 = vmul.f32 %v3069_v60, %v11216_v28  ;;  %v16537_v41 = vld [vmem:[#allocation128_spill] sm:$0xff]  ;;  %v16538_v34 = vld [vmem:[#allocation42_spill] sm:$0xff] }
 0x2d6   : > { %v3006_v22 = vmul.f32 %v2942_v21, %v11241_v35  ;;  %v2797_v33 = vadd.f32 -1.4531521, %v2733_v10  ;;  %v11299_v12 = vsel %vm2134_vm7, %v2136_v46, %v2132_v16  ;;  %vm1874_vm9 = vweird.f32 %v16537_v41  ;;  %7260 = vmatmul.msk.f32.gmra.mxu2 %vm15677_vm15, %v10996_v4 }
 0x2d7   : > { %v1873_v61 = vadd.f32 %v16535_v8, %v1872_v36  ;;  %v3661_v49 = vsub.f32 1.0, %v3597_v29  ;;  %v3598_v13 = vmul.f32 %v10351_v9, %v3278_v18  ;;  %v3197_v1 = vadd.f32 0.2548296, %v3133_v55  ;;  %v16550_v18 = vld [vmem:[#allocation137_spill] sm:$0xff] }
 0x2d8   : > { %v3070_v19 = vadd.f32 -0.28449672, %v3006_v22  ;;  %v2734_v43 = vmul.f32 1.0614054, %v11299_v12  ;;  %vm3709_vm8 = vcmp.lt.f32.partialorder %v16538_v34, 0.0  ;;  %v2861_v39 = vmul.f32 %v2797_v33, %v11281_v0 }
 0x2d9   : > { %v3789_v27 = vsub.f32 0.0, %v3661_v49  ;;  %vm1875_vm10 = vweird.f32 %v16535_v8  ;;  %v1878_v16 = vand.u32 2147483647, %v16537_v41  ;;  %v3662_v60 = vsub.f32 1.0, %v3598_v13 }
 0x2da   : > { %v3261_v21 = vmul.f32 %v3197_v1, %v11216_v28  ;;  %v3134_v9 = vmul.f32 %v3070_v19, %v11241_v35  ;;  %v2798_v54 = vadd.f32 -1.4531521, %v2734_v43  ;;  %vm11314_vm11 = vmor %vm1874_vm9, %vm1875_vm10  ;;  %v2925_v10 = vadd.f32 1.4214138, %v2861_v39  ;;  %7264 = vmatmul.msk.f32.gmra.mxu3 %vm15677_vm15, %v10996_v4  ;;  %v16546_v1 = vld [vmem:[#allocation138_spill] sm:$0xff]  ;;  %v16547_v43 = vld [vmem:[#allocation132_spill] sm:$0xff] }
 0x2db   : > { %v3853_v29 = vsel %vm3725_vm4, %v3789_v27, %v3661_v49  ;;  %v1877_v46 = vsel %vm11314_vm11, %v16535_v8, %v1873_v61  ;;  %vm11323_vm12 = vcmp.eq.f32.partialorder %v1878_v16, 8.507059e+37  ;;  %v3790_v28 = vsub.f32 0.0, %v3662_v60  ;;  %v16544_v49 = vld [vmem:[#allocation11_spill] sm:$0xff] }
 0x2dc   : > { %4146 = vmatpush.msra.mxu0 %v3853_v29  ;;  %v3581_v55 = vmul.f32 %v10303_v23, %v3261_v21  ;;  %v3198_v22 = vadd.f32 0.2548296, %v3134_v9  ;;  %v2862_v33 = vmul.f32 %v2798_v54, %v11299_v12  ;;  %vm3710_vm13 = vcmp.lt.f32.partialorder %v16543_v40, 0.0 }
 0x2dd   : > { %vm2624_vm14 = vweird.f32 %v10208_v51  ;;  %v2989_v8 = vmul.f32 %v2925_v10, %v11281_v0  ;;  %v1880_v61 = vand.u32 2147483648, %v16537_v41  ;;  %v16545_v13 = vsub.f32 1.0, %v16544_v49 }
 0x2de   : > { %vm1889_vm0 = vweird.f32 %v16547_v43  ;;  %v3854_v23 = vsel %vm3726_vm6, %v3790_v28, %v3662_v60  ;;  %v3645_v27 = vsub.f32 1.0, %v3581_v55  ;;  %v3262_v4 = vmul.f32 %v3198_v22, %v11241_v35 }
 0x2df   : > { %v1887_v19 = vmul.f32 %v16546_v1, %v16545_v13  ;;  %v2926_v39 = vadd.f32 1.4214138, %v2862_v33  ;;  %4175 = vmatpush.msra.mxu1 %v3854_v23  ;;  %v3053_v16 = vadd.f32 -0.28449672, %v2989_v8  ;;  %v1881_v21 = vor.u32 1.1754944e-38, %v1880_v61 }
 0x2e0   : > { %vm1890_vm3 = vweird.f32 %v16546_v1  ;;  %v3773_v41 = vsub.f32 0.0, %v3645_v27  ;;  %v3582_v54 = vmul.f32 %v10311_v62, %v3262_v4  ;;  %v1893_v59 = vand.u32 2147483647, %v16547_v43 }
 0x2e1   : > { %v1888_v9 = vadd.f32 %v16546_v1, %v1887_v19  ;;  %v2990_v36 = vmul.f32 %v2926_v39, %v11299_v12  ;;  %vm11346_vm4 = vmor %vm1889_vm0, %vm1890_vm3  ;;  %vm2639_vm5 = vweird.f32 %v10211_v32  ;;  %v3117_v35 = vmul.f32 %v3053_v16, %v11281_v0 }
 0x2e2   : > { %v11355_v60 = vsel %vm11323_vm12, %v1881_v21, %v1877_v46  ;;  %v1895_v10 = vand.u32 2147483648, %v16547_v43  ;;  %v3837_v28 = vsel %vm3709_vm8, %v3773_v41, %v3645_v27  ;;  %v3646_v55 = vsub.f32 1.0, %v3582_v54  ;;  %v16552_v21 = vld [vmem:[#allocation14_spill] sm:$0xff]  ;;  %v16554_v54 = vld [vmem:[#allocation39_spill] sm:$0xff] }
 0x2e3   : > { %v1892_v62 = vsel %vm11346_vm4, %v16546_v1, %v1888_v9  ;;  %v3054_v22 = vadd.f32 -0.28449672, %v2990_v36  ;;  %v2717_v33 = vmul.f32 1.0614054, %v11355_v60  ;;  %4147 = vmatpush.msra.mxu0 %v3837_v28  ;;  %v3181_v8 = vadd.f32 0.2548296, %v3117_v35 }
 0x2e4   : > { %vm1894_vm6 = vcmp.eq.f32.partialorder %v1893_v59, 8.507059e+37  ;;  %v1896_v61 = vor.u32 1.1754944e-38, %v1895_v10  ;;  %v2623_v46 = vadd.f32 %v10283_v14, %v10357_v20  ;;  %vm3693_vm7 = vcmp.lt.f32.partialorder %v16550_v18, 0.0  ;;  %v16555_v28 = vld [vmem:[#allocation77_spill] sm:$0xff] }
 0x2e5   : > { %v3774_v49 = vsub.f32 0.0, %v3646_v55  ;;  %v3118_v13 = vmul.f32 %v3054_v22, %v11299_v12  ;;  %v2781_v1 = vadd.f32 -1.4531521, %v2717_v33  ;;  %vm2625_vm9 = vweird.f32 %v10283_v14 }
 0x2e6   : > { %v3245_v34 = vmul.f32 %v3181_v8, %v11281_v0  ;;  %v11370_v19 = vsel %vm1894_vm6, %v1896_v61, %v1892_v62  ;;  %v2628_v43 = vand.u32 2147483647, %v10208_v51  ;;  %v16551_v23 = vand.u32 2147483648, %v10208_v51  ;;  %vm2626_vm8 = vmor %vm2624_vm14, %vm2625_vm9  ;;  %v16553_v0 = vld [vmem:[#allocation54_spill] sm:$0xff] }
 0x2e7   : > { %v3838_v20 = vsel %vm3710_vm13, %v3774_v49, %v3646_v55  ;;  %v3182_v4 = vadd.f32 0.2548296, %v3118_v13  ;;  %v2845_v39 = vmul.f32 %v2781_v1, %v11355_v60  ;;  %v2718_v16 = vmul.f32 1.0614054, %v11370_v19 }
 0x2e8   : > { %v2631_v27 = vor.u32 1.1754944e-38, %v16551_v23  ;;  %vm3694_vm10 = vcmp.lt.f32.partialorder %v16552_v21, 0.0  ;;  %4176 = vmatpush.msra.mxu1 %v3838_v20  ;;  %v3565_v9 = vmul.f32 %v16553_v0, %v3245_v34  ;;  %v2627_v41 = vsel %vm2626_vm8, %v10283_v14, %v2623_v46  ;;  %v16559_v20 = vld [vmem:[#allocation46_spill] sm:$0xff] }
 0x2e9   : > { %vm2629_vm11 = vcmp.eq.f32.partialorder %v2628_v43, 8.507059e+37  ;;  %v2638_v40 = vadd.f32 %v16554_v54, %v10372_v31  ;;  %v3246_v36 = vmul.f32 %v3182_v4, %v11299_v12  ;;  %v2909_v29 = vadd.f32 1.4214138, %v2845_v39 }
 0x2ea   : > { %v2782_v59 = vadd.f32 -1.4531521, %v2718_v16  ;;  %v11387_v35 = vsel %vm2629_vm11, %v2631_v27, %v2627_v41  ;;  %v3629_v62 = vsub.f32 1.0, %v3565_v9  ;;  %vm2640_vm12 = vweird.f32 %v16554_v54  ;;  %v16557_v27 = vld [vmem:[#allocation68_spill] sm:$0xff] }
 0x2eb   : > { %v2767_v51 = vmul.f32 1.0614054, %v11387_v35  ;;  %v2643_v10 = vand.u32 2147483647, %v10211_v32  ;;  %v3566_v55 = vmul.f32 %v16555_v28, %v3246_v36  ;;  %v2973_v14 = vmul.f32 %v2909_v29, %v11355_v60  ;;  %vm2641_vm13 = vmor %vm2639_vm5, %vm2640_vm12  ;;  %v16560_v9 = vld [vmem:[#allocation16_spill] sm:$0xff] }
 0x2ec   : > { %v2846_v22 = vmul.f32 %v2782_v59, %v11370_v19  ;;  %v16556_v31 = vand.u32 2147483648, %v10211_v32  ;;  %v3757_v33 = vsub.f32 0.0, %v3629_v62  ;;  %v2642_v61 = vsel %vm2641_vm13, %v16554_v54, %v2638_v40  ;;  %v16574_v59 = vld [vmem:[#allocation50_spill] sm:$0xff] }
 0x2ed   : > { %v2831_v8 = vadd.f32 -1.4531521, %v2767_v51  ;;  %vm2644_vm14 = vcmp.eq.f32.partialorder %v2643_v10, 8.507059e+37  ;;  %v3630_v46 = vsub.f32 1.0, %v3566_v55  ;;  %v3037_v49 = vadd.f32 -0.28449672, %v2973_v14 }
 0x2ee   : > { %v2646_v12 = vor.u32 1.1754944e-38, %v16556_v31  ;;  %v2910_v13 = vadd.f32 1.4214138, %v2846_v22  ;;  %v3821_v34 = vsel %vm3693_vm7, %v3757_v33, %v3629_v62  ;;  %v16558_v32 = vsub.f32 1.0, %v16557_v27  ;;  %v16563_v51 = vld [vmem:[#allocation116_spill] sm:$0xff]  ;;  %v16566_v33 = vld [vmem:[#allocation41_spill] sm:$0xff] }
 0x2ef   : > { %v2895_v43 = vmul.f32 %v2831_v8, %v11387_v35  ;;  %4148 = vmatpush.msra.mxu0 %v3821_v34  ;;  %v3758_v39 = vsub.f32 0.0, %v3630_v46  ;;  %v3101_v16 = vmul.f32 %v3037_v49, %v11355_v60  ;;  %vm2384_vm0 = vweird.f32 %v16560_v9  ;;  %v16564_v31 = vld [vmem:[#allocation36_spill] sm:$0xff] }
 0x2f0   : > { %v11400_v1 = vsel %vm2644_vm14, %v2646_v12, %v2642_v61  ;;  %v2382_v4 = vmul.f32 %v16559_v20, %v16558_v32  ;;  %v2974_v0 = vmul.f32 %v2910_v13, %v11370_v19  ;;  %vm2385_vm3 = vweird.f32 %v16559_v20  ;;  %v16567_v13 = vld [vmem:[#allocation80_spill] sm:$0xff] }
 0x2f1   : > { %v2768_v23 = vmul.f32 1.0614054, %v11400_v1  ;;  %v2959_v41 = vadd.f32 1.4214138, %v2895_v43  ;;  %v3822_v40 = vsel %vm3694_vm10, %v3758_v39, %v3630_v46  ;;  %v3165_v36 = vadd.f32 0.2548296, %v3101_v16  ;;  %vm11416_vm4 = vmor %vm2384_vm0, %vm2385_vm3 }
 0x2f2   : > { %v2383_v18 = vadd.f32 %v16559_v20, %v2382_v4  ;;  %v3038_v29 = vadd.f32 -0.28449672, %v2974_v0  ;;  %v2388_v62 = vand.u32 2147483647, %v16560_v9  ;;  %vm3677_vm5 = vcmp.lt.f32.partialorder %v16563_v51, 0.0  ;;  %4177 = vmatpush.msra.mxu1 %v3822_v40  ;;  %v16568_v34 = vld [vmem:[#allocation136_spill] sm:$0xff] }
 0x2f3   : > { %v2832_v54 = vadd.f32 -1.4531521, %v2768_v23  ;;  %v3023_v10 = vmul.f32 %v2959_v41, %v11387_v35  ;;  %v2390_v55 = vand.u32 2147483648, %v16560_v9  ;;  %v3229_v14 = vmul.f32 %v3165_v36, %v11355_v60  ;;  %v16569_v60 = vld [vmem:[#allocation123_spill] sm:$0xff]  ;;  %v11479_v51 = vld [vmem:[%s15357_s3] sm:$0xff] }
 0x2f4   : > { %v2387_v21 = vsel %vm11416_vm4, %v16559_v20, %v2383_v18  ;;  %v3102_v22 = vmul.f32 %v3038_v29, %v11370_v19  ;;  %vm2389_vm6 = vcmp.eq.f32.partialorder %v2388_v62, 8.507059e+37  ;;  %v16565_v12 = vsub.f32 1.0, %v16564_v31 }
 0x2f5   : > { %v2896_v28 = vmul.f32 %v2832_v54, %v11400_v1  ;;  %v3087_v61 = vadd.f32 -0.28449672, %v3023_v10  ;;  %v2391_v49 = vor.u32 1.1754944e-38, %v2390_v55  ;;  %vm2399_vm7 = vweird.f32 %v16567_v13  ;;  %v16575_v10 = vld [vmem:[#allocation20_spill] sm:$0xff] }
 0x2f6   : > { %v2397_v8 = vmul.f32 %v16566_v33, %v16565_v12  ;;  %v3549_v43 = vmul.f32 %v16568_v34, %v3229_v14  ;;  %v3166_v23 = vadd.f32 0.2548296, %v3102_v22  ;;  %vm2400_vm9 = vweird.f32 %v16566_v33  ;;  %v16578_v14 = vld [vmem:[#allocation27_spill] sm:$0xff]  ;;  %v16580_v34 = vld [vmem:[#allocation13_spill] sm:$0xff] }
 0x2f7   : > { %v2960_v46 = vadd.f32 1.4214138, %v2896_v28  ;;  %vm3678_vm8 = vcmp.lt.f32.partialorder %v16569_v60, 0.0  ;;  %v3151_v32 = vmul.f32 %v3087_v61, %v11387_v35  ;;  %v11440_v4 = vsel %vm2389_vm6, %v2391_v49, %v2387_v21  ;;  %vm11442_vm10 = vmor %vm2399_vm7, %vm2400_vm9  ;;  %v16576_v21 = vld [vmem:[#allocation10_spill] sm:$0xff] }
 0x2f8   : > { %v2398_v27 = vadd.f32 %v16566_v33, %v2397_v8  ;;  %v2403_v16 = vand.u32 2147483647, %v16567_v13  ;;  %v3613_v0 = vsub.f32 1.0, %v3549_v43  ;;  %v3230_v9 = vmul.f32 %v3166_v23, %v11370_v19  ;;  %v16579_v8 = vld [vmem:[#allocation43_spill] sm:$0xff] }
 0x2f9   : > { %v3024_v20 = vmul.f32 %v2960_v46, %v11400_v1  ;;  %v2751_v41 = vmul.f32 1.0614054, %v11440_v4  ;;  %v3215_v18 = vadd.f32 0.2548296, %v3151_v32  ;;  %v2405_v29 = vand.u32 2147483648, %v16567_v13 }
 0x2fa   : > { %v2402_v54 = vsel %vm11442_vm10, %v16566_v33, %v2398_v27  ;;  %vm11452_vm11 = vcmp.eq.f32.partialorder %v2403_v16, 8.507059e+37  ;;  %vm3727_vm12 = vcmp.lt.f32.partialorder %v16574_v59, 0.0  ;;  %v3741_v62 = vsub.f32 0.0, %v3613_v0  ;;  %v16581_v27 = vld [vmem:[#allocation22_spill] sm:$0xff]  ;;  %v16593_v16 = vld [vmem:[#allocation139_spill] sm:$0xff] }
 0x2fb   : > { %v3088_v40 = vadd.f32 -0.28449672, %v3024_v20  ;;  %v3550_v28 = vmul.f32 %v16575_v10, %v3230_v9  ;;  %v2815_v19 = vadd.f32 -1.4531521, %v2751_v41  ;;  %v16577_v55 = vsub.f32 1.0, %v16576_v21  ;;  %v16585_v21 = vld [vmem:[#allocation65_spill] sm:$0xff] }
 0x2fc   : > { %v3279_v31 = vmul.f32 %v3215_v18, %v11387_v35  ;;  %v2406_v33 = vor.u32 1.1754944e-38, %v2405_v29  ;;  %vm2144_vm13 = vweird.f32 %v16579_v8  ;;  %v3805_v61 = vsel %vm3677_vm5, %v3741_v62, %v3613_v0 }
 0x2fd   : > { %v2142_v22 = vmul.f32 %v16578_v14, %v16577_v55  ;;  %v3152_v12 = vmul.f32 %v3088_v40, %v11400_v1  ;;  %v3614_v46 = vsub.f32 1.0, %v3550_v28  ;;  %v2879_v49 = vmul.f32 %v2815_v19, %v11440_v4  ;;  %4149 = vmatpush.msra.mxu0 %v3805_v61  ;;  %v16584_v28 = vld [vmem:[#allocation143_spill] sm:$0xff] }
 0x2fe   : > { %v3599_v43 = vmul.f32 %v16580_v34, %v3279_v31  ;;  %v11472_v35 = vsel %vm11452_vm11, %v2406_v33, %v2402_v54  ;;  %vm2145_vm14 = vweird.f32 %v16578_v14  ;;  %vm3728_vm0 = vcmp.lt.f32.partialorder %v16581_v27, 0.0  ;;  %7265 = vmatmul.msk.f32.vlgmr.msra.gmra.mxu0 %vm15677_vm15, %v11479_v51  ;;  %v16587_v55 = vld [vmem:[#allocation51_spill] sm:$0xff] }
 0x2ff   : > { %v2143_v13 = vadd.f32 %v16578_v14, %v2142_v22  ;;  %v3216_v23 = vadd.f32 0.2548296, %v3152_v12  ;;  %v3742_v32 = vsub.f32 0.0, %v3614_v46  ;;  %v2943_v20 = vadd.f32 1.4214138, %v2879_v49  ;;  %vm11486_vm3 = vmor %vm2144_vm13, %vm2145_vm14  ;;  %v16588_v12 = vld [vmem:[#allocation44_spill] sm:$0xff] }
 0x300   : > { %v2752_v39 = vmul.f32 1.0614054, %v11472_v35  ;;  %v2150_v0 = vand.u32 2147483648, %v16579_v8  ;;  %v3663_v9 = vsub.f32 1.0, %v3599_v43  ;;  %v2148_v18 = vand.u32 2147483647, %v16579_v8 }
 0x301   : > { %v3280_v41 = vmul.f32 %v3216_v23, %v11400_v1  ;;  %v2147_v54 = vsel %vm11486_vm3, %v16578_v14, %v2143_v13  ;;  %v3806_v40 = vsel %vm3678_vm8, %v3742_v32, %v3614_v46  ;;  %v3007_v36 = vmul.f32 %v2943_v20, %v11440_v4  ;;  %v16591_v20 = vld [vmem:[#allocation78_spill] sm:$0xff] }
 0x302   : > { %v2816_v29 = vadd.f32 -1.4531521, %v2752_v39  ;;  %v2151_v62 = vor.u32 1.1754944e-38, %v2150_v0  ;;  %4178 = vmatpush.msra.mxu1 %v3806_v40  ;;  %v3791_v10 = vsub.f32 0.0, %v3663_v9  ;;  %vm2149_vm4 = vcmp.eq.f32.partialorder %v2148_v18, 8.507059e+37  ;;  %v11531_v18 = vld [vmem:[%s15357_s3 + $0x8] sm:$0xff] }
 0x303   : > { %v3600_v19 = vmul.f32 %v16584_v28, %v3280_v41  ;;  %v16586_v1 = vsub.f32 1.0, %v16585_v21  ;;  %7269 = vmatmul.msk.f32.vlgmr.msra.gmra.mxu1 %vm15677_vm15, %v11479_v51  ;;  %v3071_v14 = vadd.f32 -0.28449672, %v3007_v36  ;;  %vm2159_vm5 = vweird.f32 %v16588_v12  ;;  %v16594_v40 = vld [vmem:[#allocation55_spill] sm:$0xff]  ;;  %v16595_v21 = vld [vmem:[#allocation133_spill] sm:$0xff] }
 0x304   : > { %v2880_v60 = vmul.f32 %v2816_v29, %v11472_v35  ;;  %v11506_v31 = vsel %vm2149_vm4, %v2151_v62, %v2147_v54  ;;  %v3855_v33 = vsel %vm3727_vm12, %v3791_v10, %v3663_v9  ;;  %vm2160_vm6 = vweird.f32 %v16587_v55 }
 0x305   : > { %v2157_v22 = vmul.f32 %v16587_v55, %v16586_v1  ;;  %v3664_v8 = vsub.f32 1.0, %v3600_v19  ;;  %v2735_v61 = vmul.f32 1.0614054, %v11506_v31  ;;  %4204 = vmatpush.msra.mxu2 %v3855_v33  ;;  %v3135_v49 = vmul.f32 %v3071_v14, %v11440_v4  ;;  %vm11516_vm7 = vmor %vm2159_vm5, %vm2160_vm6 }
 0x306   : > { %v2944_v13 = vadd.f32 1.4214138, %v2880_v60  ;;  %v2163_v34 = vand.u32 2147483647, %v16588_v12  ;;  %v2165_v59 = vand.u32 2147483648, %v16588_v12  ;;  %v16592_v39 = vsub.f32 1.0, %v16591_v20  ;;  %7266 = vmatmul.msk.f32.gmra.mxu0 %vm15677_vm15, %v11531_v18 }
 0x307   : > { %v2158_v46 = vadd.f32 %v16587_v55, %v2157_v22  ;;  %v3792_v43 = vsub.f32 0.0, %v3664_v8  ;;  %v2799_v23 = vadd.f32 -1.4531521, %v2735_v61  ;;  %v3199_v9 = vadd.f32 0.2548296, %v3135_v49  ;;  %v16598_v60 = vld [vmem:[#allocation56_spill] sm:$0xff] }
 0x308   : > { %v1902_v0 = vmul.f32 %v16593_v16, %v16592_v39  ;;  %v3008_v41 = vmul.f32 %v2944_v13, %v11472_v35  ;;  %vm2164_vm9 = vcmp.eq.f32.partialorder %v2163_v34, 8.507059e+37  ;;  %vm3711_vm8 = vcmp.lt.f32.partialorder %v16594_v40, 0.0  ;;  %v16599_v49 = vld [vmem:[#allocation47_spill] sm:$0xff]  ;;  %v16601_v34 = vld [vmem:[#allocation29_spill] sm:$0xff] }
 0x309   : > { %v2162_v54 = vsel %vm11516_vm7, %v16587_v55, %v2158_v46  ;;  %v3856_v36 = vsel %vm3728_vm0, %v3792_v43, %v3664_v8  ;;  %v2863_v29 = vmul.f32 %v2799_v23, %v11506_v31  ;;  %v2166_v62 = vor.u32 1.1754944e-38, %v2165_v59  ;;  %v16602_v20 = vld [vmem:[#allocation49_spill] sm:$0xff]  ;;  %v16603_v39 = vld [vmem:[#allocation31_spill] sm:$0xff] }
 0x30a   : > { %v1903_v10 = vadd.f32 %v16593_v16, %v1902_v0  ;;  %4233 = vmatpush.msra.mxu3 %v3856_v36  ;;  %v3263_v28 = vmul.f32 %v3199_v9, %v11440_v4  ;;  %v3072_v19 = vadd.f32 -0.28449672, %v3008_v41  ;;  %vm1904_vm10 = vweird.f32 %v16595_v21  ;;  %v16606_v22 = vld [vmem:[#allocation25_spill] sm:$0xff] }
 0x30b   : > { %vm1905_vm11 = vweird.f32 %v16593_v16  ;;  %v2927_v1 = vadd.f32 1.4214138, %v2863_v29  ;;  %v11543_v55 = vsel %vm2164_vm9, %v2166_v62, %v2162_v54  ;;  %v1908_v27 = vand.u32 2147483647, %v16595_v21  ;;  %7270 = vmatmul.msk.f32.gmra.mxu1 %vm15677_vm15, %v11531_v18 }
 0x30c   : > { %vm11545_vm12 = vmor %vm1904_vm10, %vm1905_vm11  ;;  %v1910_v14 = vand.u32 2147483648, %v16595_v21  ;;  %v3583_v12 = vmul.f32 %v16598_v60, %v3263_v28  ;;  %v3136_v4 = vmul.f32 %v3072_v19, %v11472_v35  ;;  %v2736_v33 = vmul.f32 1.0614054, %v11543_v55 }
 0x30d   : > { %v1907_v8 = vsel %vm11545_vm12, %v16593_v16, %v1903_v10  ;;  %v2991_v61 = vmul.f32 %v2927_v1, %v11506_v31  ;;  %vm1909_vm13 = vcmp.eq.f32.partialorder %v1908_v27, 8.507059e+37  ;;  %v16600_v13 = vsub.f32 1.0, %v16599_v49  ;;  %v11579_v10 = vld [vmem:[%s15357_s3 + $0x10] sm:$0xff] }
 0x30e   : > { %v1911_v46 = vor.u32 1.1754944e-38, %v1910_v14  ;;  %v3647_v23 = vsub.f32 1.0, %v3583_v12  ;;  %v3200_v32 = vadd.f32 0.2548296, %v3136_v4  ;;  %v2800_v59 = vadd.f32 -1.4531521, %v2736_v33  ;;  %7267 = vmatmul.msk.f32.gmra.mxu0 %vm15677_vm15, %v11579_v10 }
 0x30f   : > { %v1917_v43 = vmul.f32 %v16601_v34, %v16600_v13  ;;  %vm1919_vm14 = vweird.f32 %v16602_v20  ;;  %vm3712_vm0 = vcmp.lt.f32.partialorder %v16603_v39, 0.0  ;;  %v3055_v0 = vadd.f32 -0.28449672, %v2991_v61 }
 0x310   : > { %v11565_v16 = vsel %vm1909_vm13, %v1911_v46, %v1907_v8  ;;  %vm1920_vm3 = vweird.f32 %v16601_v34  ;;  %v3775_v41 = vsub.f32 0.0, %v3647_v23  ;;  %v3264_v54 = vmul.f32 %v3200_v32, %v11472_v35  ;;  %v16608_v46 = vld [vmem:[#allocation63_spill] sm:$0xff]  ;;  %v16611_v32 = vld [vmem:[#allocation148_spill] sm:$0xff] }
 0x311   : > { %v1918_v9 = vadd.f32 %v16601_v34, %v1917_v43  ;;  %v2864_v36 = vmul.f32 %v2800_v59, %v11543_v55  ;;  %v2719_v29 = vmul.f32 1.0614054, %v11565_v16  ;;  %vm11572_vm4 = vmor %vm1919_vm14, %vm1920_vm3  ;;  %v3119_v28 = vmul.f32 %v3055_v0, %v11506_v31 }
 0x312   : > { %v1923_v19 = vand.u32 2147483647, %v16602_v20  ;;  %v1925_v21 = vand.u32 2147483648, %v16602_v20  ;;  %v3839_v1 = vsel %vm3711_vm8, %v3775_v41, %v3647_v23  ;;  %v3584_v27 = vmul.f32 %v16606_v22, %v3264_v54  ;;  %v16612_v54 = vld [vmem:[#allocation32_spill] sm:$0xff] }
 0x313   : > { %v1922_v35 = vsel %vm11572_vm4, %v16601_v34, %v1918_v9  ;;  %v2928_v14 = vadd.f32 1.4214138, %v2864_v36  ;;  %v2783_v60 = vadd.f32 -1.4531521, %v2719_v29  ;;  %v16607_v12 = vsub.f32 1.0, %v11148_v57  ;;  %4205 = vmatpush.msra.mxu2 %v3839_v1  ;;  %7271 = vmatmul.msk.f32.gmra.mxu1 %vm15677_vm15, %v11579_v10  ;;  %v16609_v57 = vld [vmem:[#allocation48_spill] sm:$0xff] }
 0x314   : > { %v2696_v33 = vsub.f32 1.0, %v11226_v25  ;;  %v3183_v8 = vadd.f32 0.2548296, %v3119_v28  ;;  %v1926_v61 = vor.u32 1.1754944e-38, %v1925_v21  ;;  %vm3695_vm5 = vcmp.lt.f32.partialorder %v16608_v46, 0.0 }
 0x315   : > { %v11595_v4 = vmul.f32 %v11119_v50, %v16607_v12  ;;  %v3648_v49 = vsub.f32 1.0, %v3584_v27  ;;  %v2992_v40 = vmul.f32 %v2928_v14, %v11543_v55  ;;  %v2847_v13 = vmul.f32 %v2783_v60, %v11565_v16  ;;  %v16613_v60 = vld [vmem:[#allocation83_spill] sm:$0xff] }
 0x316   : > { %vm1924_vm6 = vcmp.eq.f32.partialorder %v1923_v19, 8.507059e+37  ;;  %vm1934_vm7 = vweird.f32 %v16609_v57  ;;  %v16610_v34 = vand.u32 2147483648, %v11124_v6  ;;  %v3247_v25 = vmul.f32 %v3183_v8, %v11506_v31  ;;  %v16614_v12 = vld [vmem:[#allocation19_spill] sm:$0xff]  ;;  %v16615_v8 = vld [vmem:[#allocation66_spill] sm:$0xff] }
 0x317   : > { %v11609_v23 = vsel %vm1924_vm6, %v1926_v61, %v1922_v35  ;;  %v2180_v59 = vand.u32 2147483648, %v16611_v32  ;;  %vm2655_vm9 = vweird.f32 %v11072_v42  ;;  %7634 = vpow2.f32 %v11202_v52  ;;  %v11629_v35 = vld [vmem:[%s15357_s3 + $0x18] sm:$0xff] }
 0x318   : > { %v11606_v43 = vor.u32 1.1754944e-38, %v16610_v34  ;;  %v3776_v20 = vsub.f32 0.0, %v3648_v49  ;;  %v3056_v0 = vadd.f32 -0.28449672, %v2992_v40  ;;  %v2911_v9 = vadd.f32 1.4214138, %v2847_v13  ;;  %7268 = vmatmul.msk.f32.gmra.mxu0 %vm15677_vm15, %v11629_v35 }
 0x319   : > { %vm2670_vm8 = vweird.f32 %v11102_v5  ;;  %v11616_v41 = vmul.f32 %v11207_v17, %v2696_v33  ;;  %v3567_v36 = vmul.f32 %v16612_v54, %v3247_v25  ;;  %v2720_v31 = vmul.f32 1.0614054, %v11609_v23 }
 0x31a   : > { %v2178_v29 = vand.u32 2147483647, %v16611_v32  ;;  %vm2654_vm10 = vweird.f32 %v11052_v58  ;;  %v3840_v62 = vsel %vm3712_vm0, %v3776_v20, %v3648_v49  ;;  %v3120_v52 = vmul.f32 %v3056_v0, %v11543_v55 }
 0x31b   : > { %v2975_v28 = vmul.f32 %v2911_v9, %v11565_v16  ;;  %v2193_v19 = vand.u32 2147483647, %v10490_v53  ;;  %vm2669_vm11 = vweird.f32 %v11064_v30  ;;  %4234 = vmatpush.msra.mxu3 %v3840_v62  ;;  %v3631_v21 = vsub.f32 1.0, %v3567_v36  ;;  %7272 = vmatmul.msk.f32.gmra.mxu1 %vm15677_vm15, %v11629_v35  ;;  %v16616_v36 = vld [vmem:[#allocation153_spill] sm:$0xff]  ;;  %vm11699_vm15 = vmor %vm2654_vm10, %vm2655_vm9 }
 0x31c   : > { %v2784_v39 = vadd.f32 -1.4531521, %v2720_v31  ;;  %v11635_v1 = vor.u32 1.1754944e-38, %v2180_v59  ;;  %v2195_v22 = vand.u32 2147483648, %v10490_v53  ;;  %v3184_v27 = vadd.f32 0.2548296, %v3120_v52  ;;  %vm11716_vm9 = vmor %vm2669_vm11, %vm2670_vm8 }
 0x31d   : > { %v3039_v14 = vadd.f32 -0.28449672, %v2975_v28  ;;  %v11640_v33 = vadd.f32 %v16614_v12, %v16613_v60  ;;  %vm1935_vm12 = vweird.f32 %v16614_v12  ;;  %vm3696_vm13 = vcmp.lt.f32.partialorder %v16615_v8, 0.0  ;;  %v11647_v34 = vpop.eup %7634  ;;  %v16634_v60 = vld [vmem:[#allocation30_spill] sm:$0xff] }
 0x31e   : > { %v3759_v61 = vsub.f32 0.0, %v3631_v21  ;;  %v2848_v49 = vmul.f32 %v2784_v39, %v11609_v23  ;;  %v2418_v40 = vand.u32 2147483647, %v10865_v3  ;;  %v2420_v13 = vand.u32 2147483648, %v10865_v3 }
 0x31f   : > { %vm2174_vm14 = vweird.f32 %v16611_v32  ;;  %v3248_v25 = vmul.f32 %v3184_v27, %v11543_v55  ;;  %v3103_v59 = vmul.f32 %v3039_v14, %v11565_v16  ;;  %v2433_v20 = vand.u32 2147483647, %v10920_v11  ;;  %v16617_v55 = vld [vmem:[#allocation9_spill] sm:$0xff]  ;;  %v16618_v27 = vld [vmem:[#allocation126_spill] sm:$0xff] }
 0x320   : > { %v2435_v0 = vand.u32 2147483648, %v10920_v11  ;;  %vm2414_vm0 = vweird.f32 %v10865_v3  ;;  %v3823_v9 = vsel %vm3695_vm5, %v3759_v61, %v3631_v21  ;;  %v2912_v54 = vadd.f32 1.4214138, %v2848_v49  ;;  %vm11669_vm5 = vmor %vm1934_vm7, %vm1935_vm12  ;;  %v16621_v21 = vld [vmem:[#allocation124_spill] sm:$0xff] }
 0x321   : > { %vm2175_vm3 = vweird.f32 %v16616_v36  ;;  %v11660_v31 = vor.u32 1.1754944e-38, %v2195_v22  ;;  %vm2429_vm4 = vweird.f32 %v10920_v11  ;;  %4206 = vmatpush.msra.mxu2 %v3823_v9  ;;  %v3568_v62 = vmul.f32 %v16617_v55, %v3248_v25  ;;  %v16627_v9 = vld [vmem:[#allocation121_spill] sm:$0xff] }
 0x322   : > { %v3167_v52 = vadd.f32 0.2548296, %v3103_v59  ;;  %v2421_v28 = vor.u32 1.1754944e-38, %v2420_v13  ;;  %v2436_v39 = vor.u32 1.1754944e-38, %v2435_v0  ;;  %vm2190_vm6 = vweird.f32 %v16618_v27 }
 0x323   : > { %vm3679_vm1 = vcmp.lt.f32.partialorder %v16621_v21, 0.0  ;;  %v2976_v22 = vmul.f32 %v2912_v54, %v11609_v23  ;;  %vm11675_vm2 = vcmp.eq.f32.partialorder %v2418_v40, 8.507059e+37  ;;  %v3632_v13 = vsub.f32 1.0, %v3568_v62  ;;  %v16626_v40 = vld [vmem:[#allocation88_spill] sm:$0xff] }
 0x324   : > { %v3231_v25 = vmul.f32 %v3167_v52, %v11565_v16  ;;  %vm11687_vm12 = vcmp.eq.f32.partialorder %v2433_v20, 8.507059e+37  ;;  %v2173_v0 = vadd.f32 %v16616_v36, %v16626_v40  ;;  %v2188_v54 = vadd.f32 %v16618_v27, %v16627_v9 }
 0x325   : > { %v3040_v62 = vadd.f32 -0.28449672, %v2976_v22  ;;  %v2653_v16 = vadd.f32 %v11072_v42, %v11144_v47  ;;  %v2658_v20 = vand.u32 2147483647, %v11052_v58  ;;  %v2668_v52 = vadd.f32 %v11102_v5, %v11154_v56 }
 0x326   : > { %vm11708_vm7 = vcmp.eq.f32.partialorder %v2178_v29, 8.507059e+37  ;;  %v3760_v22 = vsub.f32 0.0, %v3632_v13  ;;  %v3551_v47 = vmul.f32 %v16634_v60, %v3231_v25  ;;  %v2673_v58 = vand.u32 2147483647, %v11064_v30 }
 0x327   : > { %v2413_v56 = vadd.f32 %v10942_v45, %v11079_v44  ;;  %vm11724_vm10 = vcmp.eq.f32.partialorder %v2193_v19, 8.507059e+37  ;;  %v3104_v49 = vmul.f32 %v3040_v62, %v11609_v23  ;;  %v2657_v61 = vsel %vm11699_vm15, %v11072_v42, %v2653_v16 }
 0x328   : > { %vm2659_vm8 = vcmp.eq.f32.partialorder %v2658_v20, 8.507059e+37  ;;  %v2672_v60 = vsel %vm11716_vm9, %v11102_v5, %v2668_v52  ;;  %v3824_v30 = vsel %vm3696_vm13, %v3760_v22, %v3632_v13  ;;  %v3615_v25 = vsub.f32 1.0, %v3551_v47  ;;  %vm11749_vm9 = vmor %vm2174_vm14, %vm2175_vm3  ;;  %v16639_v5 = vld [vmem:[#allocation131_spill] sm:$0xff] }
 0x329   : > { %v11738_v44 = vsel %vm2659_vm8, %v11122_v26, %v2657_v61  ;;  %vm2674_vm11 = vcmp.eq.f32.partialorder %v2673_v58, 8.507059e+37  ;;  %4235 = vmatpush.msra.mxu3 %v3824_v30  ;;  %v3168_v19 = vadd.f32 0.2548296, %v3104_v49  ;;  %vm2415_vm15 = vweird.f32 %v10942_v45  ;;  %v16640_v20 = vld [vmem:[#allocation59_spill] sm:$0xff] }
 0x32a   : > { %v2769_v62 = vmul.f32 1.0614054, %v11738_v44  ;;  %v11742_v55 = vsel %vm2674_vm11, %v11131_v63, %v2672_v60  ;;  %vm3680_vm13 = vcmp.lt.f32.partialorder %v16639_v5, 0.0  ;;  %v3743_v26 = vsub.f32 0.0, %v3615_v25  ;;  %vm2416_vm8 = vmor %vm2414_vm0, %vm2415_vm15  ;;  %v16645_v60 = vld [vmem:[#allocation145_spill] sm:$0xff] }
 0x32b   : > { %v2770_v8 = vmul.f32 1.0614054, %v11742_v55  ;;  %v2428_v63 = vadd.f32 %v11000_v7, %v11082_v2  ;;  %vm2430_vm11 = vweird.f32 %v11000_v7  ;;  %v3232_v61 = vmul.f32 %v3168_v19, %v11609_v23 }
 0x32c   : > { %v2833_v32 = vadd.f32 -1.4531521, %v2769_v62  ;;  %v2417_v49 = vsel %vm2416_vm8, %v10942_v45, %v2413_v56  ;;  %vm2431_vm14 = vmor %vm2429_vm4, %vm2430_vm11  ;;  %v2177_v13 = vsel %vm11749_vm9, %v16616_v36, %v2173_v0  ;;  %v3807_v3 = vsel %vm3679_vm1, %v3743_v26, %v3615_v25  ;;  %v16641_v45 = vld [vmem:[#allocation28_spill] sm:$0xff] }
 0x32d   : > { %v2834_v16 = vadd.f32 -1.4531521, %v2770_v8  ;;  %v11771_v2 = vsel %vm11675_vm2, %v2421_v28, %v2417_v49  ;;  %v2432_v23 = vsel %vm2431_vm14, %v11000_v7, %v2428_v63  ;;  %vm1949_vm0 = vweird.f32 %v16640_v20  ;;  %4207 = vmatpush.msra.mxu2 %v3807_v3  ;;  %v16644_v56 = vld [vmem:[#allocation92_spill] sm:$0xff] }
 0x32e   : > { %v3552_v11 = vmul.f32 %v16641_v45, %v3232_v61  ;;  %v2897_v52 = vmul.f32 %v2833_v32, %v11738_v44  ;;  %v2753_v9 = vmul.f32 1.0614054, %v11771_v2  ;;  %v11780_v36 = vsel %vm11687_vm12, %v2436_v39, %v2432_v23 }
 0x32f   : > { %vm16642_vm1 = vweird.f32 %v10490_v53  ;;  %vm16643_vm3 = vcmask 261120   ;;  %v2898_v7 = vmul.f32 %v2834_v16, %v11742_v55  ;;  %v2754_v28 = vmul.f32 1.0614054, %v11780_v36 }
 0x330   : > { %vm2191_vm2 = vmor %vm16642_vm1, %vm2190_vm6  ;;  %7273 = vmatmul.msk.f32.vlgmr.msra.gmra.mxu2 %vm16643_vm3, %v11479_v51  ;;  %v11793_v21 = vsel %vm11708_vm7, %v11635_v1, %v2177_v13  ;;  %v3616_v14 = vsub.f32 1.0, %v3552_v11  ;;  %v2961_v59 = vadd.f32 1.4214138, %v2897_v52  ;;  %v2817_v0 = vadd.f32 -1.4531521, %v2753_v9 }
 0x331   : > { %v2192_v39 = vsel %vm2191_vm2, %v16618_v27, %v2188_v54  ;;  %v2962_v22 = vadd.f32 1.4214138, %v2898_v7  ;;  %v2818_v47 = vadd.f32 -1.4531521, %v2754_v28  ;;  %v2737_v58 = vmul.f32 1.0614054, %v11793_v21  ;;  %vm16650_vm6 = vmmov %vm16643_vm3 }
 0x332   : > { %v11799_v53 = vsel %vm11724_vm10, %v11660_v31, %v2192_v39  ;;  %v11804_v30 = vadd.f32 %v16645_v60, %v16644_v56  ;;  %v3744_v1 = vsub.f32 0.0, %v3616_v14  ;;  %v3025_v40 = vmul.f32 %v2961_v59, %v11738_v44  ;;  %vm16651_vm12 = vmmov %vm16643_vm3  ;;  %v16655_v59 = vld [vmem:[#allocation106_spill] sm:$0xff] }
 0x333   : > { %v2881_v27 = vmul.f32 %v2817_v0, %v11771_v2  ;;  %v2738_v54 = vmul.f32 1.0614054, %v11799_v53  ;;  %v3026_v25 = vmul.f32 %v2962_v22, %v11742_v55  ;;  %v2882_v31 = vmul.f32 %v2818_v47, %v11780_v36  ;;  %v16656_v47 = vld [vmem:[#allocation115_spill] sm:$0xff]  ;;  %vm16661_vm1 = vmmov %vm16643_vm3 }
 0x334   : > { %v2801_v29 = vadd.f32 -1.4531521, %v2737_v58  ;;  %v16646_v19 = vand.u32 2147483647, %v16609_v57  ;;  %v3808_v42 = vsel %vm3680_vm13, %v3744_v1, %v3616_v14  ;;  %v3089_v26 = vadd.f32 -0.28449672, %v3025_v40  ;;  %vm16662_vm2 = vmmov %vm16661_vm1 }
 0x335   : > { %v2945_v8 = vadd.f32 1.4214138, %v2881_v27  ;;  %v2802_v63 = vadd.f32 -1.4531521, %v2738_v54  ;;  %4236 = vmatpush.msra.mxu3 %v3808_v42  ;;  %v3090_v61 = vadd.f32 -0.28449672, %v3026_v25  ;;  %vm1950_vm7 = vweird.f32 %v16645_v60 }
 0x336   : > { %vm11813_vm4 = vcmp.eq.f32.partialorder %v16646_v19, 8.507059e+37  ;;  %v2946_v32 = vadd.f32 1.4214138, %v2882_v31  ;;  %v2865_v49 = vmul.f32 %v2801_v29, %v11793_v21  ;;  %v16649_v13 = vand.u32 2147483648, %v16609_v57  ;;  %7277 = vmatmul.msk.f32.vlgmr.msra.gmra.mxu3 %vm16650_vm6, %v11479_v51  ;;  %vm11843_vm10 = vmor %vm1949_vm0, %vm1950_vm7  ;;  %v16659_v19 = vld [vmem:[#allocation79_spill] sm:$0xff] }
 0x337   : > { %v3153_v16 = vmul.f32 %v3089_v26, %v11738_v44  ;;  %v3009_v23 = vmul.f32 %v2945_v8, %v11771_v2  ;;  %v2866_v5 = vmul.f32 %v2802_v63, %v11799_v53  ;;  %v3154_v45 = vmul.f32 %v3090_v61, %v11742_v55  ;;  %v16660_v8 = vld [vmem:[#allocation61_spill] sm:$0xff] }
 0x338   : > { %v1941_v3 = vor.u32 1.1754944e-38, %v16649_v13  ;;  %7274 = vmatmul.msk.f32.gmra.mxu2 %vm16651_vm12, %v11531_v18  ;;  %v3010_v11 = vmul.f32 %v2946_v32, %v11780_v36  ;;  %v2929_v57 = vadd.f32 1.4214138, %v2865_v49  ;;  %v16652_v52 = vsel %vm11669_vm5, %v16614_v12, %v11640_v33 }
 0x339   : > { %v3217_v28 = vadd.f32 0.2548296, %v3153_v16  ;;  %v3073_v39 = vadd.f32 -0.28449672, %v3009_v23  ;;  %v2930_v14 = vadd.f32 1.4214138, %v2866_v5  ;;  %v1952_v46 = vsel %vm11843_vm10, %v16645_v60, %v11804_v30  ;;  %vm16672_vm10 = vmmov %vm16661_vm1 }
 0x33a   : > { %v11839_v9 = vsel %vm11813_vm4, %v1941_v3, %v16652_v52  ;;  %vm3729_vm5 = vcmp.lt.f32.partialorder %v16655_v59, 0.0  ;;  %v3218_v12 = vadd.f32 0.2548296, %v3154_v45  ;;  %v3074_v33 = vadd.f32 -0.28449672, %v3010_v11  ;;  %v16663_v16 = vld [vmem:[#allocation33_spill] sm:$0xff] }
 0x33b   : > { %v2993_v0 = vmul.f32 %v2929_v57, %v11793_v21  ;;  %v2721_v22 = vmul.f32 1.0614054, %v11839_v9  ;;  %vm3730_vm15 = vcmp.lt.f32.partialorder %v16656_v47, 0.0  ;;  %vm2685_vm9 = vweird.f32 %v11119_v50  ;;  %v16664_v5 = vld [vmem:[#allocation130_spill] sm:$0xff]  ;;  %v16666_v52 = vld [vmem:[#allocation81_spill] sm:$0xff] }
 0x33c   : > { %v3281_v58 = vmul.f32 %v3217_v28, %v11738_v44  ;;  %v3137_v56 = vmul.f32 %v3073_v39, %v11771_v2  ;;  %v2994_v1 = vmul.f32 %v2930_v14, %v11799_v53  ;;  %v1953_v60 = vand.u32 2147483647, %v16640_v20  ;;  %v16665_v57 = vld [vmem:[#allocation142_spill] sm:$0xff] }
 0x33d   : > { %v3282_v30 = vmul.f32 %v3218_v12, %v11742_v55  ;;  %v3138_v40 = vmul.f32 %v3074_v33, %v11780_v36  ;;  %v3057_v27 = vadd.f32 -0.28449672, %v2993_v0  ;;  %v2785_v54 = vadd.f32 -1.4531521, %v2721_v22  ;;  %v16667_v0 = vld [vmem:[#allocation67_spill] sm:$0xff] }
 0x33e   : > { %vm2684_vm13 = vweird.f32 %v11070_v48  ;;  %v3601_v25 = vmul.f32 %v11127_v38, %v3281_v58  ;;  %v3201_v31 = vadd.f32 0.2548296, %v3137_v56  ;;  %v3058_v29 = vadd.f32 -0.28449672, %v2994_v1  ;;  %7278 = vmatmul.msk.f32.gmra.mxu3 %vm16661_vm1, %v11531_v18 }
 0x33f   : > { %vm11864_vm8 = vcmp.eq.f32.partialorder %v1953_v60, 8.507059e+37  ;;  %vm3713_vm11 = vcmp.lt.f32.partialorder %v16659_v19, 0.0  ;;  %v3602_v62 = vmul.f32 %v11177_v15, %v3282_v30  ;;  %v3202_v42 = vadd.f32 0.2548296, %v3138_v40  ;;  %v16669_v60 = vld [vmem:[#allocation93_spill] sm:$0xff]  ;;  %vm11908_vm12 = vmor %vm2684_vm13, %vm2685_vm9  ;;  %v16675_v19 = vld [vmem:[#allocation140_spill] sm:$0xff] }
 0x340   : > { %v3121_v55 = vmul.f32 %v3057_v27, %v11793_v21  ;;  %v2849_v26 = vmul.f32 %v2785_v54, %v11839_v9  ;;  %vm3714_vm14 = vcmp.lt.f32.partialorder %v16660_v8, 0.0  ;;  %vm2700_vm0 = vweird.f32 %v11207_v17  ;;  %7275 = vmatmul.msk.f32.gmra.mxu2 %vm16662_vm2, %v11579_v10 }
 0x341   : > { %v3665_v38 = vsub.f32 1.0, %v3601_v25  ;;  %v3265_v63 = vmul.f32 %v3201_v31, %v11771_v2  ;;  %v3122_v61 = vmul.f32 %v3058_v29, %v11799_v53  ;;  %v1955_v32 = vand.u32 2147483648, %v16640_v20 }
 0x342   : > { %v3666_v15 = vsub.f32 1.0, %v3602_v62  ;;  %v3266_v49 = vmul.f32 %v3202_v42, %v11780_v36  ;;  %v3185_v13 = vadd.f32 0.2548296, %v3121_v55  ;;  %v2913_v3 = vadd.f32 1.4214138, %v2849_v26  ;;  %v16674_v55 = vld [vmem:[#allocation17_spill] sm:$0xff] }
 0x343   : > { %vm3697_vm3 = vcmp.lt.f32.partialorder %v16663_v16, 0.0  ;;  %vm2699_vm4 = vweird.f32 %v11124_v6  ;;  %v3793_v23 = vsub.f32 0.0, %v3665_v38  ;;  %v3585_v45 = vmul.f32 %v16664_v5, %v3265_v63  ;;  %v16680_v16 = vld [vmem:[#allocation144_spill] sm:$0xff] }
 0x344   : > { %v3186_v2 = vadd.f32 0.2548296, %v3122_v61  ;;  %v1956_v11 = vor.u32 1.1754944e-38, %v1955_v32  ;;  %vm3698_vm6 = vcmp.lt.f32.partialorder %v16665_v57, 0.0  ;;  %v3794_v20 = vsub.f32 0.0, %v3666_v15 }
 0x345   : > { %v3586_v7 = vmul.f32 %v16666_v52, %v3266_v49  ;;  %v3249_v28 = vmul.f32 %v3185_v13, %v11793_v21  ;;  %v2977_v36 = vmul.f32 %v2913_v3, %v11839_v9  ;;  %v3857_v39 = vsel %vm3729_vm5, %v3793_v23, %v3665_v38  ;;  %v16668_v21 = vld [vmem:[#allocation120_spill] sm:$0xff]  ;;  %vm16673_vm5 = vmmov %vm16661_vm1  ;;  %v16678_v3 = vld [vmem:[#allocation114_spill] sm:$0xff] }
 0x346   : > { %v3649_v14 = vsub.f32 1.0, %v3585_v45  ;;  %v3250_v12 = vmul.f32 %v3186_v2, %v11799_v53  ;;  %v11894_v33 = vsel %vm11864_vm8, %v1956_v11, %v1952_v46  ;;  %vm2444_vm7 = vweird.f32 %v16667_v0  ;;  %4262 = vmatpush.msrb.mxu0 %v3857_v39  ;;  %7279 = vmatmul.msk.f32.gmra.mxu3 %vm16672_vm10, %v11579_v10  ;;  %vm11937_vm8 = vmor %vm2699_vm4, %vm2700_vm0  ;;  %v16679_v23 = vld [vmem:[#allocation113_spill] sm:$0xff] }
 0x347   : > { %v3858_v22 = vsel %vm3730_vm15, %v3794_v20, %v3666_v15  ;;  %v3650_v58 = vsub.f32 1.0, %v3586_v7  ;;  %v3569_v56 = vmul.f32 %v16668_v21, %v3249_v28  ;;  %v3041_v1 = vadd.f32 -0.28449672, %v2977_v36 }
 0x348   : > { %4291 = vmatpush.msrb.mxu1 %v3858_v22  ;;  %v3777_v59 = vsub.f32 0.0, %v3649_v14  ;;  %v3570_v30 = vmul.f32 %v16669_v60, %v3250_v12  ;;  %v2722_v53 = vmul.f32 1.0614054, %v11894_v33  ;;  %v2683_v46 = vadd.f32 %v11119_v50, %v11595_v4  ;;  %7276 = vmatmul.msk.f32.gmra.mxu2 %vm16673_vm5, %v11629_v35  ;;  %v16685_v12 = vld [vmem:[#allocation100_spill] sm:$0xff]  ;;  %vm16688_vm5 = vmmov %vm16662_vm2 }
 0x349   : > { %v3778_v40 = vsub.f32 0.0, %v3650_v58  ;;  %v3633_v27 = vsub.f32 1.0, %v3569_v56  ;;  %v3105_v54 = vmul.f32 %v3041_v1, %v11839_v9  ;;  %v2688_v25 = vand.u32 2147483647, %v11070_v48  ;;  %v16686_v56 = vld [vmem:[#allocation74_spill] sm:$0xff] }
 0x34a   : > { %v3841_v4 = vsel %vm3713_vm11, %v3777_v59, %v3649_v14  ;;  %v3634_v31 = vsub.f32 1.0, %v3570_v30  ;;  %v2786_v29 = vadd.f32 -1.4531521, %v2722_v53  ;;  %v2687_v44 = vsel %vm11908_vm12, %v11119_v50, %v2683_v46  ;;  %v16684_v14 = vld [vmem:[#allocation21_spill] sm:$0xff] }
 0x34b   : > { %4263 = vmatpush.msrb.mxu0 %v3841_v4  ;;  %v3842_v62 = vsel %vm3714_vm14, %v3778_v40, %v3650_v58  ;;  %v3761_v42 = vsub.f32 0.0, %v3633_v27  ;;  %v3169_v48 = vadd.f32 0.2548296, %v3105_v54  ;;  %vm2689_vm15 = vcmp.eq.f32.partialorder %v2688_v25, 8.507059e+37  ;;  %v16687_v4 = vld [vmem:[#allocation15_spill] sm:$0xff] }
 0x34c   : > { %vm3681_vm9 = vcmp.lt.f32.partialorder %v16674_v55, 0.0  ;;  %vm2459_vm13 = vweird.f32 %v16675_v19  ;;  %4292 = vmatpush.msrb.mxu1 %v3842_v62  ;;  %v3762_v26 = vsub.f32 0.0, %v3634_v31  ;;  %v2850_v38 = vmul.f32 %v2786_v29, %v11894_v33  ;;  %v16689_v62 = vld [vmem:[#allocation69_spill] sm:$0xff] }
 0x34d   : > { %v11929_v50 = vsel %vm2689_vm15, %v11133_v24, %v2687_v44  ;;  %v2698_v8 = vadd.f32 %v11207_v17, %v11616_v41  ;;  %v3825_v61 = vsel %vm3697_vm3, %v3761_v42, %v3633_v27  ;;  %v3233_v32 = vmul.f32 %v3169_v48, %v11839_v9  ;;  %v16690_v42 = vld [vmem:[#allocation118_spill] sm:$0xff] }
 0x34e   : > { %v2771_v15 = vmul.f32 1.0614054, %v11929_v50  ;;  %v2703_v24 = vand.u32 2147483647, %v11124_v6  ;;  %4264 = vmatpush.msrb.mxu0 %v3825_v61  ;;  %v3826_v41 = vsel %vm3698_vm6, %v3762_v26, %v3634_v31  ;;  %v2914_v49 = vadd.f32 1.4214138, %v2850_v38  ;;  %7280 = vmatmul.msk.f32.gmra.mxu3 %vm16662_vm2, %v11629_v35 }
 0x34f   : > { %v2702_v13 = vsel %vm11937_vm8, %v11207_v17, %v2698_v8  ;;  %v2443_v5 = vadd.f32 %v16679_v23, %v16678_v3  ;;  %4293 = vmatpush.msrb.mxu1 %v3826_v41  ;;  %v3553_v45 = vmul.f32 %v16680_v16, %v3233_v32  ;;  %vm2445_vm14 = vweird.f32 %v16679_v23  ;;  %v16681_v6 = vld [vmem:[#allocation85_spill] sm:$0xff]  ;;  %v16697_v16 = vld [vmem:[#allocation102_spill] sm:$0xff] }
 0x350   : > { %v2835_v9 = vadd.f32 -1.4531521, %v2771_v15  ;;  %vm2704_vm11 = vcmp.eq.f32.partialorder %v2703_v24, 8.507059e+37  ;;  %vm2204_vm0 = vweird.f32 %v16681_v6  ;;  %v2978_v2 = vmul.f32 %v2914_v49, %v11894_v33  ;;  %vm11962_vm1 = vmor %vm2444_vm7, %vm2445_vm14 }
 0x351   : > { %v11958_v11 = vsel %vm2704_vm11, %v11606_v43, %v2702_v13  ;;  %v2448_v57 = vand.u32 2147483647, %v16667_v0  ;;  %v2450_v20 = vand.u32 2147483648, %v16667_v0  ;;  %v3617_v52 = vsub.f32 1.0, %v3553_v45 }
 0x352   : > { %v2899_v7 = vmul.f32 %v2835_v9, %v11929_v50  ;;  %v2772_v28 = vmul.f32 1.0614054, %v11958_v11  ;;  %v2447_v43 = vsel %vm11962_vm1, %v16679_v23, %v2443_v5  ;;  %v3042_v36 = vadd.f32 -0.28449672, %v2978_v2  ;;  %v16696_v5 = vld [vmem:[#allocation127_spill] sm:$0xff]  ;;  %v16698_v9 = vld [vmem:[#allocation141_spill] sm:$0xff]  ;;  %vm16702_vm1 = vmmov %vm16662_vm2 }
 0x353   : > { %vm2449_vm3 = vcmp.eq.f32.partialorder %v2448_v57, 8.507059e+37  ;;  %v2451_v39 = vor.u32 1.1754944e-38, %v2450_v20  ;;  %v2458_v22 = vadd.f32 %v16685_v12, %v16684_v14  ;;  %v3745_v58 = vsub.f32 0.0, %v3617_v52  ;;  %v16699_v2 = vld [vmem:[#allocation119_spill] sm:$0xff] }
 0x354   : > { %v2963_v0 = vadd.f32 1.4214138, %v2899_v7  ;;  %v2836_v21 = vadd.f32 -1.4531521, %v2772_v28  ;;  %vm2460_vm4 = vweird.f32 %v16685_v12  ;;  %vm2219_vm6 = vweird.f32 %v16686_v56 }
 0x355   : > { %v3106_v1 = vmul.f32 %v3042_v36, %v11894_v33  ;;  %v11980_v59 = vsel %vm2449_vm3, %v2451_v39, %v2447_v43  ;;  %v2463_v60 = vand.u32 2147483647, %v16675_v19  ;;  %v2465_v30 = vand.u32 2147483648, %v16675_v19  ;;  %vm2461_vm7 = vmor %vm2459_vm13, %vm2460_vm4 }
 0x356   : > { %v3809_v53 = vsel %vm3681_vm9, %v3745_v58, %v3617_v52  ;;  %v3027_v46 = vmul.f32 %v2963_v0, %v11929_v50  ;;  %v2900_v47 = vmul.f32 %v2836_v21, %v11958_v11  ;;  %v2755_v40 = vmul.f32 1.0614054, %v11980_v59  ;;  %vm16705_vm3 = vmmov %vm16702_vm1 }
 0x357   : > { %4265 = vmatpush.msrb.mxu0 %v3809_v53  ;;  %v3170_v27 = vadd.f32 0.2548296, %v3106_v1  ;;  %v2462_v54 = vsel %vm2461_vm7, %v16685_v12, %v2458_v22  ;;  %vm2464_vm12 = vcmp.eq.f32.partialorder %v2463_v60, 8.507059e+37  ;;  %v2466_v25 = vor.u32 1.1754944e-38, %v2465_v30  ;;  %v16722_v60 = vld [vmem:[#allocation35_spill] sm:$0xff] }
 0x358   : > { %vm3682_vm10 = vcmp.lt.f32.partialorder %v16687_v4, 0.0  ;;  %v3091_v31 = vadd.f32 -0.28449672, %v3027_v46  ;;  %v2964_v29 = vadd.f32 1.4214138, %v2900_v47  ;;  %7281 = vmatmul.msk.f32.vlgmr.msrb.gmra.mxu0 %vm16688_vm5, %v11479_v51  ;;  %v2203_v48 = vadd.f32 %v16690_v42, %v16689_v62  ;;  %v16709_v62 = vld [vmem:[#allocation104_spill] sm:$0xff]  ;;  %vm16713_vm5 = vmmov %vm16702_vm1 }
 0x359   : > { %v2819_v44 = vadd.f32 -1.4531521, %v2755_v40  ;;  %v3234_v55 = vmul.f32 %v3170_v27, %v11894_v33  ;;  %v11998_v19 = vsel %vm2464_vm12, %v2466_v25, %v2462_v54  ;;  %vm2205_vm15 = vweird.f32 %v16690_v42  ;;  %v16693_v33 = vld [vmem:[#allocation147_spill] sm:$0xff]  ;;  %v16706_v54 = vld [vmem:[#allocation108_spill] sm:$0xff] }
 0x35a   : > { %v2208_v26 = vand.u32 2147483647, %v16681_v6  ;;  %v3155_v38 = vmul.f32 %v3091_v31, %v11929_v50  ;;  %v3028_v8 = vmul.f32 %v2964_v29, %v11958_v11  ;;  %v2756_v61 = vmul.f32 1.0614054, %v11998_v19  ;;  %vm12008_vm9 = vmor %vm2204_vm0, %vm2205_vm15  ;;  %v16707_v25 = vld [vmem:[#allocation151_spill] sm:$0xff]  ;;  %v16708_v31 = vld [vmem:[#allocation146_spill] sm:$0xff] }
 0x35b   : > { %v2883_v63 = vmul.f32 %v2819_v44, %v11980_v59  ;;  %v3554_v15 = vmul.f32 %v16693_v33, %v3234_v55  ;;  %v2207_v24 = vsel %vm12008_vm9, %v16690_v42, %v2203_v48  ;;  %v2210_v49 = vand.u32 2147483648, %v16681_v6  ;;  %vm16717_vm9 = vmmov %vm16702_vm1 }
 0x35c   : > { %vm12016_vm13 = vcmp.eq.f32.partialorder %v2208_v26, 8.507059e+37  ;;  %v3219_v13 = vadd.f32 0.2548296, %v3155_v38  ;;  %v3092_v3 = vadd.f32 -0.28449672, %v3028_v8  ;;  %v2218_v45 = vadd.f32 %v16697_v16, %v16696_v5  ;;  %v16715_v5 = vld [vmem:[#allocation152_spill] sm:$0xff] }
 0x35d   : > { %v2947_v23 = vadd.f32 1.4214138, %v2883_v63  ;;  %vm1964_vm8 = vweird.f32 %v16698_v9  ;;  %vm3731_vm11 = vcmp.lt.f32.partialorder %v16699_v2, 0.0  ;;  %v3618_v17 = vsub.f32 1.0, %v3554_v15 }
 0x35e   : > { %v2820_v57 = vadd.f32 -1.4531521, %v2756_v61  ;;  %v2211_v20 = vor.u32 1.1754944e-38, %v2210_v49  ;;  %vm2220_vm14 = vweird.f32 %v16697_v16  ;;  %v3283_v52 = vmul.f32 %v3219_v13, %v11929_v50 }
 0x35f   : > { %v3156_v7 = vmul.f32 %v3092_v3, %v11958_v11  ;;  %v3011_v6 = vmul.f32 %v2947_v23, %v11980_v59  ;;  %vm12031_vm0 = vmor %vm2219_vm6, %vm2220_vm14  ;;  %v2223_v43 = vand.u32 2147483647, %v16686_v56  ;;  %v3746_v36 = vsub.f32 0.0, %v3618_v17  ;;  %v16714_v23 = vld [vmem:[#allocation76_spill] sm:$0xff] }
 0x360   : > { %v2884_v39 = vmul.f32 %v2820_v57, %v11998_v19  ;;  %v12039_v14 = vsel %vm12016_vm13, %v2211_v20, %v2207_v24  ;;  %v2222_v50 = vsel %vm12031_vm0, %v16697_v16, %v2218_v45  ;;  %v3603_v12 = vmul.f32 %v11192_v37, %v3283_v52  ;;  %7282 = vmatmul.msk.f32.gmra.mxu0 %vm16702_vm1, %v11531_v18  ;;  %vm16725_vm14 = vmmov %vm16702_vm1 }
 0x361   : > { %v3220_v22 = vadd.f32 0.2548296, %v3156_v7  ;;  %v3075_v58 = vadd.f32 -0.28449672, %v3011_v6  ;;  %v2739_v0 = vmul.f32 1.0614054, %v12039_v14  ;;  %v3810_v21 = vsel %vm3682_vm10, %v3746_v36, %v3618_v17 }
 0x362   : > { %v2948_v1 = vadd.f32 1.4214138, %v2884_v39  ;;  %vm12050_vm2 = vcmp.eq.f32.partialorder %v2223_v43, 8.507059e+37  ;;  %v2225_v30 = vand.u32 2147483648, %v16686_v56  ;;  %4294 = vmatpush.msrb.mxu1 %v3810_v21  ;;  %v3667_v53 = vsub.f32 1.0, %v3603_v12  ;;  %v16716_v17 = vld [vmem:[#allocation71_spill] sm:$0xff] }
 0x363   : > { %v3284_v37 = vmul.f32 %v3220_v22, %v11958_v11  ;;  %v3139_v46 = vmul.f32 %v3075_v58, %v11980_v59  ;;  %v2803_v47 = vadd.f32 -1.4531521, %v2739_v0  ;;  %7285 = vmatmul.msk.f32.vlgmr.msrb.gmra.mxu1 %vm16705_vm3, %v11479_v51  ;;  %v1963_v4 = vadd.f32 %v16707_v25, %v16706_v54  ;;  %v16718_v39 = vld [vmem:[#allocation84_spill] sm:$0xff]  ;;  %vm16729_vm3 = vmmov %vm16702_vm1 }
 0x364   : > { %v3012_v40 = vmul.f32 %v2948_v1, %v11998_v19  ;;  %v2226_v27 = vor.u32 1.1754944e-38, %v2225_v30  ;;  %vm1965_vm4 = vweird.f32 %v16707_v25  ;;  %vm1979_vm6 = vweird.f32 %v16708_v31 }
 0x365   : > { %v3795_v56 = vsub.f32 0.0, %v3667_v53  ;;  %v3604_v29 = vmul.f32 %v11647_v34, %v3284_v37  ;;  %v3203_v11 = vadd.f32 0.2548296, %v3139_v46  ;;  %v2867_v44 = vmul.f32 %v2803_v47, %v12039_v14  ;;  %vm12077_vm12 = vmor %vm1964_vm8, %vm1965_vm4 }
 0x366   : > { %vm3732_vm7 = vcmp.lt.f32.partialorder %v16709_v62, 0.0  ;;  %v3076_v42 = vadd.f32 -0.28449672, %v3012_v40  ;;  %v12069_v51 = vsel %vm12050_vm2, %v2226_v27, %v2222_v50  ;;  %v1968_v48 = vand.u32 2147483647, %v16698_v9  ;;  %v16719_v50 = vld [vmem:[#allocation109_spill] sm:$0xff] }
 0x367   : > { %v3859_v55 = vsel %vm3731_vm11, %v3795_v56, %v3667_v53  ;;  %v3668_v26 = vsub.f32 1.0, %v3604_v29  ;;  %v3267_v38 = vmul.f32 %v3203_v11, %v11980_v59  ;;  %v2931_v8 = vadd.f32 1.4214138, %v2867_v44  ;;  %v16712_v59 = vld [vmem:[#allocation53_spill] sm:$0xff]  ;;  %v16724_v40 = vld [vmem:[#allocation26_spill] sm:$0xff]  ;;  %v16726_v29 = vld [vmem:[#allocation64_spill] sm:$0xff] }
 0x368   : > { %4320 = vmatpush.msrb.mxu2 %v3859_v55  ;;  %v3140_v63 = vmul.f32 %v3076_v42, %v11998_v19  ;;  %v2740_v61 = vmul.f32 1.0614054, %v12069_v51  ;;  %v1967_v32 = vsel %vm12077_vm12, %v16707_v25, %v1963_v4  ;;  %v1970_v33 = vand.u32 2147483648, %v16698_v9  ;;  %7283 = vmatmul.msk.f32.gmra.mxu0 %vm16713_vm5, %v11579_v10  ;;  %v16727_v11 = vld [vmem:[#allocation101_spill] sm:$0xff]  ;;  %vm16735_vm5 = vmmov %vm16702_vm1 }
 0x369   : > { %v3796_v15 = vsub.f32 0.0, %v3668_v26  ;;  %v3587_v24 = vmul.f32 %v16712_v59, %v3267_v38  ;;  %v2995_v41 = vmul.f32 %v2931_v8, %v12039_v14  ;;  %vm1969_vm10 = vcmp.eq.f32.partialorder %v1968_v48, 8.507059e+37  ;;  %v16728_v59 = vld [vmem:[#allocation149_spill] sm:$0xff] }
 0x36a   : > { %v3204_v49 = vadd.f32 0.2548296, %v3140_v63  ;;  %v2804_v13 = vadd.f32 -1.4531521, %v2740_v61  ;;  %v1971_v3 = vor.u32 1.1754944e-38, %v1970_v33  ;;  %v1978_v16 = vadd.f32 %v16715_v5, %v16714_v23 }
 0x36b   : > { %v3860_v45 = vsel %vm3732_vm7, %v3796_v15, %v3668_v26  ;;  %v3651_v2 = vsub.f32 1.0, %v3587_v24  ;;  %v3059_v9 = vadd.f32 -0.28449672, %v2995_v41  ;;  %vm1980_vm15 = vweird.f32 %v16715_v5  ;;  %7286 = vmatmul.msk.f32.gmra.mxu1 %vm16717_vm9, %v11531_v18  ;;  %vm16732_vm7 = vmmov %vm16702_vm1 }
 0x36c   : > { %v3475_v57 = vmul.f32 1.442695, %v16716_v17  ;;  %4349 = vmatpush.msrb.mxu3 %v3860_v45  ;;  %v3268_v20 = vmul.f32 %v3204_v49, %v11998_v19  ;;  %v2868_v52 = vmul.f32 %v2804_v13, %v12069_v51  ;;  %v1972_v7 = vsel %vm1969_vm10, %v1971_v3, %v1967_v32  ;;  %vm12107_vm8 = vmor %vm1979_vm6, %vm1980_vm15 }
 0x36d   : > { %v3779_v6 = vsub.f32 0.0, %v3651_v2  ;;  %v3123_v28 = vmul.f32 %v3059_v9, %v12039_v14  ;;  %v2723_v43 = vmul.f32 1.0614054, %v1972_v7  ;;  %v1983_v36 = vand.u32 2147483647, %v16708_v31  ;;  %vm16734_vm10 = vmmov %vm16702_vm1 }
 0x36e   : > { %vm3715_vm13 = vcmp.lt.f32.partialorder %v16718_v39, 0.0  ;;  %v3588_v12 = vmul.f32 %v16719_v50, %v3268_v20  ;;  %v2932_v22 = vadd.f32 1.4214138, %v2868_v52  ;;  %v1985_v58 = vand.u32 2147483648, %v16708_v31  ;;  %v16730_v20 = vld [vmem:[#allocation150_spill] sm:$0xff]  ;;  %vm16736_vm15 = vmmov %vm16702_vm1 }
 0x36f   : > { %v3843_v0 = vsel %vm3715_vm13, %v3779_v6, %v3651_v2  ;;  %v3187_v21 = vadd.f32 0.2548296, %v3123_v28  ;;  %v2787_v1 = vadd.f32 -1.4531521, %v2723_v43  ;;  %v1982_v18 = vsel %vm12107_vm8, %v16715_v5, %v1978_v16  ;;  %vm16737_vm9 = vmmov %vm16702_vm1 }
 0x370   : > { %v16723_v30 = vsub.f32 0.0, %v16722_v60  ;;  %4321 = vmatpush.msrb.mxu2 %v3843_v0  ;;  %v3652_v37 = vsub.f32 1.0, %v3588_v12  ;;  %v2996_v46 = vmul.f32 %v2932_v22, %v12069_v51  ;;  %v1986_v47 = vor.u32 1.1754944e-38, %v1985_v58  ;;  %7284 = vmatmul.msk.f32.gmra.mxu0 %vm16725_vm14, %v11629_v35  ;;  %v16731_v12 = vld [vmem:[#allocation34_spill] sm:$0xff]  ;;  %v7906_v58 = vld [vmem:[%s15357_s3] sm:$0xff]  ;;  %vm16740_vm13 = vmmov %vm16702_vm1 }
 0x371   : > { %v3300_v27 = vsub.f32 0.0, %v16724_v40  ;;  %v3251_v54 = vmul.f32 %v3187_v21, %v12039_v14  ;;  %v2851_v25 = vmul.f32 %v2787_v1, %v1972_v7  ;;  %vm1984_vm11 = vcmp.eq.f32.partialorder %v1983_v36, 8.507059e+37  ;;  %v6671_v0 = vld [vmem:[%s15360_s6] sm:$0x3]  ;;  %v16733_v1 = vld [vmem:[#allocation45_spill] sm:$0xff]  ;;  %vm16742_vm8 = vmmov %vm16702_vm1 }
 0x372   : > { %v3363_v53 = vmul.f32 %v16723_v30, %v16722_v60  ;;  %7636 = vpow2.f32 %v3475_v57  ;;  %v3780_v4 = vsub.f32 0.0, %v3652_v37  ;;  %v3060_v31 = vadd.f32 -0.28449672, %v2996_v46  ;;  %6674 = vperm.xlu2 %7369, %v6671_v0   ;;  %v7907_v60 = vld [vmem:[%s15357_s3 + $0x8] sm:$0xff]  ;;  %v3919_v30 = vpop.f32.mrf.mxu0 }
 0x373   : > { %v1987_v56 = vsel %vm1984_vm11, %v1986_v47, %v1982_v18  ;;  %vm3716_vm0 = vcmp.lt.f32.partialorder %v16726_v29, 0.0  ;;  %v3571_v44 = vmul.f32 %v16727_v11, %v3251_v54  ;;  %v2915_v62 = vadd.f32 1.4214138, %v2851_v25  ;;  %7287 = vmatmul.msk.f32.gmra.mxu1 %vm16702_vm1, %v11579_v10  ;;  %v12159_v54 = vpop.permute.xlu0 %3876  ;;  %v3977_v11 = vpop.f32.mrf.mxu2  ;;  %vm16746_vm11 = vmmov %vm16702_vm1 }
 0x374   : > { %v2724_v42 = vmul.f32 1.0614054, %v1987_v56  ;;  %v3441_v48 = vmul.f32 1.442695, %v3363_v53  ;;  %v3844_v55 = vsel %vm3716_vm0, %v3780_v4, %v3652_v37  ;;  %v3124_v26 = vmul.f32 %v3060_v31, %v12069_v51  ;;  %v3948_v53 = vpop.f32.mrf.mxu1  ;;  %v12151_v37 = vpop.permute.xlu1 %3871 }
 0x375   : > { %4350 = vmatpush.msrb.mxu3 %v3844_v55  ;;  %v3635_v14 = vsub.f32 1.0, %v3571_v44  ;;  %v2979_v38 = vmul.f32 %v2915_v62, %v1972_v7  ;;  %v3364_v34 = vmul.f32 %v3300_v27, %v16724_v40  ;;  %vm3699_vm2 = vcmp.lt.f32.partialorder %v16728_v59, 0.0  ;;  %v12164_v4 = vpop.permute.xlu2 %3886 }
 0x376   : > { %v2788_v8 = vadd.f32 -1.4531521, %v2724_v42  ;;  %v3188_v63 = vadd.f32 0.2548296, %v3124_v26  ;;  %7638 = vpow2.f32 %v3441_v48  ;;  %vm3700_vm4 = vcmp.lt.f32.partialorder %v16730_v20, 0.0 }
 0x377   : > { %v3763_v61 = vsub.f32 0.0, %v3635_v14  ;;  %v3043_v32 = vadd.f32 -0.28449672, %v2979_v38  ;;  %v3443_v3 = vmul.f32 1.442695, %v3364_v34  ;;  %vm3683_vm6 = vcmp.lt.f32.partialorder %v16731_v12, 0.0 }
 0x378   : > { %v2852_v33 = vmul.f32 %v2788_v8, %v1987_v56  ;;  %v7637_v15 = vpop.eup %7636  ;;  %v3252_v24 = vmul.f32 %v3188_v63, %v12069_v51  ;;  %vm3684_vm12 = vcmp.lt.f32.partialorder %v16733_v1, 0.0  ;;  %v12154_v46 = vadd.f32 %v3919_v30, %v12151_v37 }
 0x379   : > { %v3827_v41 = vsel %vm3699_vm2, %v3763_v61, %v3635_v14  ;;  %v3107_v49 = vmul.f32 %v3043_v32, %v1972_v7  ;;  %7640 = vpow2.f32 %v3443_v3  ;;  %v12157_v47 = vadd.f32 %v3948_v53, %v12151_v37 }
 0x37a   : > { %v2916_v13 = vadd.f32 1.4214138, %v2852_v33  ;;  %4322 = vmatpush.msrb.mxu2 %v3827_v41  ;;  %v3572_v23 = vmul.f32 %v7637_v15, %v3252_v24  ;;  %16738 = vst [vmem:[#allocation103_spill] sm:$0xff] %v12154_v46  ;;  %v3922_v40 = vpop.f32.mrf.mxu0  ;;  %v4366_v25 = vand.u32 2147483647, %v12154_v46  ;;  %v12178_v55 = vadd.f32 %v3977_v11, %v12151_v37 }
 0x37b   : > { %v3171_v5 = vadd.f32 0.2548296, %v3107_v49  ;;  %7288 = vmatmul.msk.f32.gmra.mxu1 %vm16729_vm3, %v11629_v35  ;;  %16739 = vst [vmem:[#allocation90_spill] sm:$0xff] %v12157_v47  ;;  %v12167_v31 = vadd.f32 %v3922_v40, %v12159_v54 }
 0x37c   : > { %v2980_v16 = vmul.f32 %v2916_v13, %v1987_v56  ;;  %v3636_v45 = vsub.f32 1.0, %v3572_v23  ;;  %v7639_v17 = vpop.eup %7638  ;;  %v3951_v27 = vpop.f32.mrf.mxu1  ;;  %v4430_v44 = vmul.f32 0.3275911, %v4366_v25  ;;  %16744 = vst [vmem:[#allocation112_spill] sm:$0xff] %v12178_v55  ;;  %v6094_v38 = vsub.f32 0.0, %v4366_v25 }
 0x37d   : > { %v3235_v2 = vmul.f32 %v3171_v5, %v1972_v7  ;;  %16741 = vst [vmem:[#allocation89_spill] sm:$0xff] %v12167_v31  ;;  %v12173_v29 = vadd.f32 %v3951_v27, %v12159_v54  ;;  %v4382_v62 = vand.u32 2147483647, %v12167_v31  ;;  %v12189_v61 = vpop.permute.xlu2 %3881  ;;  %v4368_v33 = vand.u32 2147483647, %v12178_v55  ;;  %v3980_v13 = vpop.f32.mrf.mxu2 }
 0x37e   : > { %v3044_v9 = vadd.f32 -0.28449672, %v2980_v16  ;;  %v3764_v57 = vsub.f32 0.0, %v3636_v45  ;;  %v12180_v26 = vadd.f32 1.0, %v4430_v44  ;;  %v6158_v24 = vmul.f32 %v6094_v38, %v4366_v25 }
 0x37f   : > { %v3555_v51 = vmul.f32 %v7639_v17, %v3235_v2  ;;  %v7641_v50 = vpop.eup %7640  ;;  %16743 = vst [vmem:[#allocation105_spill] sm:$0xff] %v12173_v29  ;;  %v4383_v48 = vand.u32 2147483647, %v12173_v29  ;;  %v4446_v8 = vmul.f32 0.3275911, %v4382_v62  ;;  %v6110_v3 = vsub.f32 0.0, %v4382_v62 }
 0x380   : > { %v3108_v52 = vmul.f32 %v3044_v9, %v1987_v56  ;;  %v3828_v6 = vsel %vm3700_vm4, %v3764_v57, %v3636_v45  ;;  %16745 = vst [vmem:[#allocation129_spill] sm:$0xff] %v12180_v26  ;;  %7642 = vrcp.f32 %v12180_v26  ;;  %v4432_v16 = vmul.f32 0.3275911, %v4368_v33 }
 0x381   : > { %4351 = vmatpush.msrb.mxu3 %v3828_v6  ;;  %v3619_v28 = vsub.f32 1.0, %v3555_v51  ;;  %v4447_v63 = vmul.f32 0.3275911, %v4383_v48  ;;  %v12194_v41 = vadd.f32 1.0, %v4446_v8  ;;  %v6111_v45 = vsub.f32 0.0, %v4383_v48 }
 0x382   : > { %v3172_v43 = vadd.f32 0.2548296, %v3108_v52  ;;  %v3925_v32 = vpop.f32.mrf.mxu0  ;;  %v12206_v9 = vadd.f32 %v3980_v13, %v12159_v54  ;;  %v6222_v51 = vmul.f32 1.442695, %v6158_v24  ;;  %v6174_v52 = vmul.f32 %v6110_v3, %v4382_v62 }
 0x383   : > { %v3747_v36 = vsub.f32 0.0, %v3619_v28  ;;  %v12197_v49 = vadd.f32 %v3925_v32, %v12189_v61  ;;  %v12200_v23 = vadd.f32 1.0, %v4447_v63  ;;  %v6096_v0 = vsub.f32 0.0, %v4368_v33 }
 0x384   : > { %v3236_v39 = vmul.f32 %v3172_v43, %v1987_v56  ;;  %v4367_v56 = vand.u32 2147483647, %v12157_v47  ;;  %v3954_v15 = vpop.f32.mrf.mxu1  ;;  %16751 = vst [vmem:[#allocation82_spill] sm:$0xff] %v12206_v9  ;;  %v12225_v12 = vand.u32 2147483647, %v12206_v9 }
 0x385   : > { %v3811_v7 = vsel %vm3683_vm6, %v3747_v36, %v3619_v28  ;;  %16749 = vst [vmem:[#allocation94_spill] sm:$0xff] %v12197_v49  ;;  %v12203_v5 = vadd.f32 %v3954_v15, %v12189_v61  ;;  %v12210_v57 = vand.u32 2147483647, %v12197_v49  ;;  %v12218_v28 = vadd.f32 1.0, %v4432_v16  ;;  %v3983_v38 = vpop.f32.mrf.mxu2 }
 0x386   : > { %v3556_v22 = vmul.f32 %v7641_v50, %v3236_v39  ;;  %4323 = vmatpush.msrb.mxu2 %v3811_v7  ;;  %v4431_v42 = vmul.f32 0.3275911, %v4367_v56  ;;  %v12212_v20 = vpop.eup %7642  ;;  %v6175_v39 = vmul.f32 %v6111_v45, %v4383_v48  ;;  %v4448_v25 = vmul.f32 0.3275911, %v12225_v12 }
 0x387   : > { %7289 = vmatmul.msk.f32.vlgmr.msrb.gmra.mxu2 %vm16732_vm7, %v7906_v58  ;;  %16750 = vst [vmem:[#allocation134_spill] sm:$0xff] %v12203_v5  ;;  %v12216_v6 = vand.u32 2147483647, %v12203_v5  ;;  %v4559_v7 = vmul.f32 %v12212_v20, %v12180_v26  ;;  %v6126_v15 = vsub.f32 0.0, %v12210_v57 }
 0x388   : > { %v3620_v19 = vsub.f32 1.0, %v3556_v22  ;;  %v12187_v34 = vadd.f32 1.0, %v4431_v42  ;;  %16752 = vst [vmem:[#allocation122_spill] sm:$0xff] %v12212_v20  ;;  %v6256_v27 = vmul.f32 1.442695, %v6175_v39 }
 0x389   : > { %16753 = vst [vmem:[#allocation87_spill] sm:$0xff] %v12218_v28  ;;  %v4560_v11 = vsub.f32 1.0, %v4559_v7 }
 0x38a   : > { %v3748_v21 = vsub.f32 0.0, %v3620_v19  ;;  %16748 = vst [vmem:[#allocation107_spill] sm:$0xff] %v12187_v34  ;;  %7644 = vrcp.f32 %v12187_v34  ;;  %v3928_v1 = vpop.f32.mrf.mxu0 }
 0x38b   : > { %7646 = vrcp.f32 %v12194_v41  ;;  %v12246_v62 = vadd.f32 %v3928_v1, %v12164_v4  ;;  %v12266_v16 = vmul.f32 %v12212_v20, %v4560_v11 }
 0x38c   : > { %v3812_v18 = vsel %vm3684_vm12, %v3748_v21, %v3620_v19  ;;  %7648 = vrcp.f32 %v12200_v23  ;;  %v4462_v19 = vmul.f32 0.3275911, %v12210_v57  ;;  %v4463_v21 = vmul.f32 0.3275911, %v12216_v6  ;;  %v3957_v53 = vpop.f32.mrf.mxu1 }
 0x38d   : > { %4352 = vmatpush.msrb.mxu3 %v3812_v18  ;;  %7650 = vpow2.f32 %v6222_v51  ;;  %v12251_v48 = vadd.f32 %v3957_v53, %v12164_v4  ;;  %16761 = vst [vmem:[#allocation110_spill] sm:$0xff] %v12266_v16  ;;  %v12270_v45 = vand.u32 2147483647, %v12246_v62 }
 0x38e   : > { %7293 = vmatmul.msk.f32.vlgmr.msrb.gmra.mxu3 %vm16734_vm10, %v7906_v58  ;;  %v6254_v58 = vmul.f32 1.442695, %v6174_v52  ;;  %7652 = vrcp.f32 %v12218_v28  ;;  %v12243_v44 = vadd.f32 1.0, %v4462_v19  ;;  %v12248_v42 = vadd.f32 1.0, %v4463_v21 }
 0x38f   : > { %7290 = vmatmul.msk.f32.gmra.mxu2 %vm16735_vm5, %v7907_v60  ;;  %v6127_v52 = vsub.f32 0.0, %v12216_v6  ;;  %v6112_v21 = vsub.f32 0.0, %v12225_v12 }
 0x390   : > { %v12220_v36 = vpop.eup %7644  ;;  %vm5043_vm6 = vweird.f32 %v12243_v44  ;;  %vm5058_vm10 = vweird.f32 %v12248_v42 }
 0x391   : > { %16754 = vst [vmem:[#allocation97_spill] sm:$0xff] %v12220_v36  ;;  %v12231_v18 = vpop.eup %7646 }
 0x392   : > { %v12236_v40 = vpop.eup %7648  ;;  %v4799_v8 = vmul.f32 %v12231_v18, %v12194_v41 }
 0x393   : > { %16756 = vst [vmem:[#allocation125_spill] sm:$0xff] %v12236_v40  ;;  %v4814_v63 = vmul.f32 %v12236_v40, %v12200_v23  ;;  %v12258_v24 = vpop.eup %7650 }
 0x394   : > { %16758 = vst [vmem:[#allocation70_spill] sm:$0xff] %v12258_v24  ;;  %v12263_v3 = vpop.eup %7652  ;;  %v4800_v7 = vsub.f32 1.0, %v4799_v8 }
 0x395   : > { %16760 = vst [vmem:[#allocation95_spill] sm:$0xff] %v12263_v3 }
 0x396   : > { %7294 = vmatmul.msk.f32.gmra.mxu3 %vm16736_vm15, %v7907_v60  ;;  %v4574_v60 = vmul.f32 %v12220_v36, %v12187_v34 }
 0x397   : > { %7291 = vmatmul.msk.f32.gmra.mxu2 %vm16737_vm9, %v11579_v10  ;;  %vm4803_vm9 = vweird.f32 %v12194_v41 }
 0x39e   : > { %7295 = vmatmul.msk.f32.gmra.mxu3 %vm16740_vm13, %v11579_v10  ;;  %v4006_v10 = vpop.f32.mrf.mxu3 }
 0x39f   : > { %7292 = vmatmul.msk.f32.gmra.mxu2 %vm16742_vm8, %v11629_v35  ;;  %v12185_v14 = vadd.f32 %v4006_v10, %v12151_v37  ;;  %v6160_v10 = vmul.f32 %v6096_v0, %v4368_v33  ;;  %v12260_v33 = vadd.f32 1.0, %v4448_v25 }
 0x3a1   : > { %16747 = vst [vmem:[#allocation111_spill] sm:$0xff] %v12185_v14  ;;  %v4369_v59 = vand.u32 2147483647, %v12185_v14  ;;  %v6226_v51 = vmul.f32 1.442695, %v6160_v10  ;;  %v6191_v10 = vmul.f32 %v6127_v52, %v12216_v6 }
 0x3a2   : > { %16759 = vst [vmem:[#allocation99_spill] sm:$0xff] %v12260_v33 }
 0x3a3   : > { %v4433_v2 = vmul.f32 0.3275911, %v4369_v59  ;;  %v6097_v30 = vsub.f32 0.0, %v4369_v59 }
 0x3a5   : > { %v12222_v50 = vadd.f32 1.0, %v4433_v2  ;;  %v6161_v32 = vmul.f32 %v6097_v30, %v4369_v59  ;;  %v12273_v59 = vadd.f32 %v3983_v38, %v12189_v61  ;;  %v4589_v30 = vmul.f32 %v12263_v3, %v12218_v28 }
 0x3a6   : > { %7296 = vmatmul.msk.f32.gmra.mxu3 %vm16746_vm11, %v11629_v35  ;;  %v6095_v35 = vsub.f32 0.0, %v4367_v56  ;;  %v4009_v43 = vpop.f32.mrf.mxu3 }
 0x3a7   : > { %16755 = vst [vmem:[#allocation91_spill] sm:$0xff] %v12222_v50  ;;  %7654 = vrcp.f32 %v12222_v50  ;;  %v6228_v19 = vmul.f32 1.442695, %v6161_v32  ;;  %v4590_v52 = vsub.f32 1.0, %v4589_v30 }
 0x3a8   : > { %v6159_v17 = vmul.f32 %v6095_v35, %v4367_v56  ;;  %v12241_v56 = vadd.f32 %v4009_v43, %v12159_v54  ;;  %v4575_v35 = vsub.f32 1.0, %v4574_v60  ;;  %16762 = vst [vmem:[#allocation75_spill] sm:$0xff] %v12273_v59  ;;  %v12280_v43 = vand.u32 2147483647, %v12251_v48 }
 0x3aa   : > { %v6224_v22 = vmul.f32 1.442695, %v6159_v17  ;;  %16757 = vst [vmem:[#allocation73_spill] sm:$0xff] %v12241_v56  ;;  %v4385_v13 = vand.u32 2147483647, %v12241_v56  ;;  %v12303_v11 = vmul.f32 %v12220_v36, %v4575_v35  ;;  %v6176_v35 = vmul.f32 %v6112_v21, %v12225_v12 }
 0x3ab   : > { %v4479_v38 = vmul.f32 0.3275911, %v12280_v43 }
 0x3ac   : > { %7656 = vpow2.f32 %v6224_v22  ;;  %v4815_v22 = vsub.f32 1.0, %v4814_v63  ;;  %v4449_v1 = vmul.f32 0.3275911, %v4385_v13  ;;  %16768 = vst [vmem:[#allocation62_spill] sm:$0xff] %v12303_v11  ;;  %v12310_v63 = vmul.f32 %v12231_v18, %v4800_v7 }
 0x3ad   : > { %7658 = vpow2.f32 %v6254_v58  ;;  %v12275_v17 = vpop.eup %7654  ;;  %v6190_v58 = vmul.f32 %v6126_v15, %v12210_v57  ;;  %v12298_v57 = vand.u32 2147483647, %v12273_v59  ;;  %v6113_v15 = vsub.f32 0.0, %v4385_v13 }
 0x3ae   : > { %7660 = vpow2.f32 %v6256_v27  ;;  %v4012_v2 = vpop.f32.mrf.mxu3  ;;  %16763 = vst [vmem:[#allocation72_spill] sm:$0xff] %v12275_v17  ;;  %v4604_v53 = vmul.f32 %v12275_v17, %v12222_v50  ;;  %v4478_v27 = vmul.f32 0.3275911, %v12270_v45  ;;  %v12315_v55 = vmul.f32 %v12236_v40, %v4815_v22 }
 0x3af   : > { %7662 = vrcp.f32 %v12243_v44  ;;  %v12290_v60 = vadd.f32 %v4012_v2, %v12189_v61  ;;  %v6286_v32 = vmul.f32 1.442695, %v6190_v58  ;;  %v4035_v2 = vpop.f32.mrf.mxu0  ;;  %v4064_v58 = vpop.f32.mrf.mxu1  ;;  %v6288_v50 = vmul.f32 1.442695, %v6191_v10 }
 0x3b0   : > { %7664 = vrcp.f32 %v12248_v42  ;;  %v4605_v56 = vsub.f32 1.0, %v4604_v53  ;;  %v12323_v7 = vadd.f32 1.0, %v4478_v27  ;;  %v6142_v22 = vsub.f32 0.0, %v12270_v45 }
 0x3b1   : > { %7666 = vrcp.f32 %v12260_v33  ;;  %16766 = vst [vmem:[#allocation58_spill] sm:$0xff] %v12290_v60  ;;  %v12321_v6 = vand.u32 2147483647, %v12290_v60  ;;  %v12329_v59 = vadd.f32 1.0, %v4479_v38  ;;  %v12332_v12 = vadd.f32 %v4035_v2, %v12151_v37 }
 0x3b2   : > { %v12282_v39 = vpop.eup %7656  ;;  %7668 = vpow2.f32 %v6226_v51  ;;  %v12318_v51 = vadd.f32 1.0, %v4449_v1  ;;  %v6177_v30 = vmul.f32 %v6113_v15, %v4385_v13  ;;  %v6258_v27 = vmul.f32 1.442695, %v6176_v35  ;;  %v3986_v15 = vpop.f32.mrf.mxu2 }
 0x3b3   : > { %16764 = vst [vmem:[#allocation24_spill] sm:$0xff] %v12282_v39  ;;  %v12285_v0 = vpop.eup %7658  ;;  %7670 = vpow2.f32 %v6228_v19  ;;  %v4464_v19 = vmul.f32 0.3275911, %v12298_v57  ;;  %v4465_v10 = vmul.f32 0.3275911, %v12321_v6  ;;  %v12343_v38 = vadd.f32 %v4064_v58, %v12151_v37 }
 0x3b4   : > { %16765 = vst [vmem:[#allocation117_spill] sm:$0xff] %v12285_v0  ;;  %v12300_v25 = vpop.eup %7660  ;;  %7672 = vpow2.f32 %v6286_v32  ;;  %v6143_v32 = vsub.f32 0.0, %v12280_v43  ;;  %v12354_v35 = vmul.f32 %v12263_v3, %v4590_v52  ;;  %v4370_v58 = vand.u32 2147483647, %v12332_v12 }
 0x3b5   : > { %16767 = vst [vmem:[#allocation96_spill] sm:$0xff] %v12300_v25  ;;  %v12307_v8 = vpop.eup %7662  ;;  %7674 = vrcp.f32 %v12318_v51  ;;  %v12351_v13 = vadd.f32 1.0, %v4464_v19  ;;  %v12359_v39 = vadd.f32 1.0, %v4465_v10  ;;  %v4371_v19 = vand.u32 2147483647, %v12343_v38 }
 0x3b6   : > { %v12312_v14 = vpop.eup %7664  ;;  %16769 = vst [vmem:[#allocation98_spill] sm:$0xff] %v12318_v51  ;;  %v5039_v21 = vmul.f32 %v12307_v8, %v12243_v44  ;;  %7676 = vrcp.f32 %v12323_v7  ;;  %v12363_v24 = vadd.f32 %v3986_v15, %v12164_v4  ;;  %v4434_v10 = vmul.f32 0.3275911, %v4370_v58 }
 0x3b7   : > { %v12326_v9 = vpop.eup %7666  ;;  %16771 = vst [vmem:[#allocation52_spill] sm:$0xff] %v12332_v12  ;;  %v5054_v1 = vmul.f32 %v12312_v14, %v12248_v42  ;;  %7678 = vrcp.f32 %v12329_v59  ;;  %v6207_v12 = vmul.f32 %v6143_v32, %v12280_v43  ;;  %v6129_v43 = vsub.f32 0.0, %v12321_v6 }
 0x3b8   : > { %16770 = vst [vmem:[#allocation86_spill] sm:$0xff] %v12326_v9  ;;  %v12338_v53 = vpop.eup %7668  ;;  %v4829_v60 = vmul.f32 %v12326_v9, %v12260_v33  ;;  %7680 = vpow2.f32 %v6288_v50  ;;  %v6260_v33 = vmul.f32 1.442695, %v6177_v30  ;;  %v4015_v50 = vpop.f32.mrf.mxu3  ;;  %v5304_v32 = vand.u32 2147483648, %v12329_v59 }
 0x3b9   : > { %16772 = vst [vmem:[#allocation40_spill] sm:$0xff] %v12338_v53  ;;  %v12345_v2 = vpop.eup %7670  ;;  %v6206_v53 = vmul.f32 %v6142_v22, %v12270_v45  ;;  %v5055_v28 = vsub.f32 1.0, %v5054_v1  ;;  %7682 = vpow2.f32 %v6258_v27  ;;  %v12368_v45 = vmul.f32 %v12275_v17, %v4605_v56 }
 0x3ba   : > { %16773 = vst [vmem:[#allocation57_spill] sm:$0xff] %v12343_v38  ;;  %v12365_v52 = vpop.eup %7672  ;;  %v4830_v22 = vsub.f32 1.0, %v4829_v60  ;;  %7684 = vrcp.f32 %v12351_v13  ;;  %v5289_v1 = vand.u32 2147483648, %v12323_v7  ;;  %v6128_v27 = vsub.f32 0.0, %v12298_v57 }
 0x3bb   : > { %16774 = vst [vmem:[#allocation12_spill] sm:$0xff] %v12345_v2  ;;  %v5040_v2 = vsub.f32 1.0, %v5039_v21  ;;  %v12372_v21 = vpop.eup %7674  ;;  %v6318_v30 = vmul.f32 1.442695, %v6206_v53  ;;  %v12382_v56 = vmul.f32 %v12312_v14, %v5055_v28  ;;  %7686 = vpow2.f32 %v6260_v33 }
 0x3bc   : > { %16775 = vst [vmem:[#allocation37_spill] sm:$0xff] %v12351_v13  ;;  %v12376_v15 = vpop.eup %7676  ;;  %7688 = vrcp.f32 %v12359_v39  ;;  %v4435_v53 = vmul.f32 0.3275911, %v4371_v19  ;;  %v12390_v17 = vand.u32 2147483647, %v12363_v24  ;;  %v4844_v28 = vmul.f32 %v12372_v21, %v12318_v51 }
 0x3bd   : > { %16776 = vst [vmem:[#allocation23_spill] sm:$0xff] %v12354_v35  ;;  %v12379_v38 = vmul.f32 %v12307_v8, %v5040_v2  ;;  %v12385_v60 = vpop.eup %7678  ;;  %v12395_v2 = vmul.f32 %v12326_v9, %v4830_v22  ;;  %v6320_v33 = vmul.f32 1.442695, %v6207_v12  ;;  %v6098_v3 = vsub.f32 0.0, %v4370_v58  ;;  %v4038_v35 = vpop.f32.mrf.mxu0 }
 0x3be   : > { %16777 = vst [vmem:[#allocation38_spill] sm:$0xff] %v12359_v39  ;;  %v12401_v46 = vor.u32 1.1754944e-38, %v5289_v1  ;;  %7690 = vpow2.f32 %v6318_v30  ;;  %v6192_v25 = vmul.f32 %v6128_v27, %v12298_v57  ;;  %v5279_v22 = vmul.f32 %v12376_v15, %v12323_v7  ;;  %v4067_v1 = vpop.f32.mrf.mxu1 }
 0x3bf   : > { %16778 = vst [vmem:[#allocation135_spill] sm:$0xff] %v12363_v24  ;;  %v12404_v24 = vadd.f32 1.0, %v4434_v10  ;;  %v5294_v9 = vmul.f32 %v12385_v60, %v12329_v59  ;;  %v6193_v12 = vmul.f32 %v6129_v43, %v12321_v6  ;;  %v6099_v30 = vsub.f32 0.0, %v4371_v19  ;;  %v4093_v6 = vpop.f32.mrf.mxu2 }
 0x3c0   : > { %16779 = vst [vmem:[#allocation18_spill] sm:$0xff] %v12365_v52  ;;  %v4480_v57 = vmul.f32 0.3275911, %v12390_v17  ;;  %v12420_v27 = vadd.f32 %v4038_v35, %v12159_v54  ;;  %v4845_v51 = vsub.f32 1.0, %v4844_v28  ;;  %v12424_v0 = vor.u32 1.1754944e-38, %v5304_v32  ;;  %v4122_v28 = vpop.f32.mrf.mxu3 }
 0x3c1   : > { %16780 = vst [vmem:[#allocation128_spill] sm:$0xff] %v12368_v45  ;;  %v12392_v45 = vpop.eup %7680  ;;  %7692 = vpow2.f32 %v6320_v33  ;;  %v6162_v36 = vmul.f32 %v6098_v3, %v4370_v58  ;;  %v12432_v11 = vadd.f32 %v4067_v1, %v12159_v54  ;;  %v5280_v35 = vsub.f32 1.0, %v5279_v22 }
 0x3c2   : > { %16781 = vst [vmem:[#allocation42_spill] sm:$0xff] %v12372_v21  ;;  %v12399_v47 = vpop.eup %7682  ;;  %7694 = vrcp.f32 %v12404_v24  ;;  %v5295_v31 = vsub.f32 1.0, %v5294_v9  ;;  %v6163_v3 = vmul.f32 %v6099_v30, %v4371_v19  ;;  %v12438_v58 = vadd.f32 1.0, %v4480_v57 }
 0x3c3   : > { %16782 = vst [vmem:[#allocation60_spill] sm:$0xff] %v12392_v45  ;;  %v12406_v29 = vpop.eup %7684  ;;  %v6230_v1 = vmul.f32 1.442695, %v6162_v36  ;;  %v6144_v22 = vsub.f32 0.0, %v12390_v17  ;;  %v12445_v9 = vadd.f32 %v4093_v6, %v12151_v37  ;;  %v12451_v19 = vadd.f32 %v4122_v28, %v12151_v37 }
 0x3c4   : > { %16783 = vst [vmem:[#allocation11_spill] sm:$0xff] %v12395_v2  ;;  %v12414_v2 = vadd.f32 %v4015_v50, %v12164_v4  ;;  %v12422_v10 = vpop.eup %7686  ;;  %v5069_v50 = vmul.f32 %v12406_v29, %v12351_v13  ;;  %v12456_v57 = vmul.f32 %v12372_v21, %v4845_v51  ;;  %v12459_v36 = vmul.f32 %v12376_v15, %v5280_v35 }
 0x3c5   : > { %16784 = vst [vmem:[#allocation138_spill] sm:$0xff] %v12399_v47  ;;  %v12416_v47 = vadd.f32 1.0, %v4435_v53  ;;  %v12426_v43 = vpop.eup %7688  ;;  %v6290_v53 = vmul.f32 1.442695, %v6192_v25  ;;  %v4386_v25 = vand.u32 2147483647, %v12420_v27  ;;  %v6208_v51 = vmul.f32 %v6144_v22, %v12390_v17 }
 0x3c6   : > { %16785 = vst [vmem:[#allocation132_spill] sm:$0xff] %v12404_v24  ;;  %v4417_v32 = vand.u32 2147483647, %v12414_v2  ;;  %v12435_v33 = vpop.eup %7690  ;;  %v5084_v13 = vmul.f32 %v12426_v43, %v12359_v39  ;;  %v12469_v21 = vand.u32 2147483647, %v12445_v9  ;;  %v4070_v35 = vpop.f32.mrf.mxu1  ;;  %v5319_v17 = vand.u32 2147483648, %v12438_v58 }
 0x3c7   : > { %16786 = vst [vmem:[#allocation137_spill] sm:$0xff] %v12406_v29  ;;  %7696 = vrcp.f32 %v12416_v47  ;;  %v12453_v30 = vpop.eup %7692  ;;  %v4450_v28 = vmul.f32 0.3275911, %v4386_v25  ;;  %v12478_v45 = vand.u32 2147483647, %v12451_v19  ;;  %vm5283_vm14 = vweird.f32 %v12323_v7 }
 0x3c8   : > { %16787 = vst [vmem:[#allocation14_spill] sm:$0xff] %v12414_v2  ;;  %7698 = vpow2.f32 %v6290_v53  ;;  %v12448_v2 = vand.u32 2147483647, %v12432_v11  ;;  %v12461_v6 = vpop.eup %7694  ;;  %v6232_v53 = vmul.f32 1.442695, %v6163_v3  ;;  %v5085_v39 = vsub.f32 1.0, %v5084_v13 }
 0x3c9   : > { %16788 = vst [vmem:[#allocation54_spill] sm:$0xff] %v12416_v47  ;;  %v4619_v13 = vmul.f32 %v12461_v6, %v12404_v24  ;;  %v4436_v16 = vmul.f32 0.3275911, %v12469_v21  ;;  %vm5284_vm0 = vweird.f32 %v12376_v15  ;;  %vm5298_vm1 = vweird.f32 %v12329_v59 }
 0x3ca   : > { %16789 = vst [vmem:[#allocation39_spill] sm:$0xff] %v12420_v27  ;;  %v4481_v27 = vmul.f32 0.3275911, %v4417_v32  ;;  %v4451_v3 = vmul.f32 0.3275911, %v12448_v2  ;;  %v12498_v24 = vmul.f32 %v12426_v43, %v5085_v39  ;;  %vm5299_vm2 = vweird.f32 %v12385_v60  ;;  %vm12716_vm3 = vmor %vm5283_vm14, %vm5284_vm0 }
 0x3cb   : > { %16790 = vst [vmem:[#allocation77_spill] sm:$0xff] %v12422_v10  ;;  %v6292_v10 = vmul.f32 1.442695, %v6193_v12  ;;  %v5070_v12 = vsub.f32 1.0, %v5069_v50  ;;  %v12464_v50 = vmul.f32 %v12385_v60, %v5295_v31  ;;  %v6145_v31 = vsub.f32 0.0, %v4417_v32  ;;  %vm12733_vm4 = vmor %vm5298_vm1, %vm5299_vm2 }
 0x3cc   : > { %16791 = vst [vmem:[#allocation68_spill] sm:$0xff] %v12426_v43  ;;  %v4620_v39 = vsub.f32 1.0, %v4619_v13  ;;  %v12513_v43 = vor.u32 1.1754944e-38, %v5319_v17  ;;  %v6115_v13 = vsub.f32 0.0, %v12448_v2  ;;  %v12525_v17 = vadd.f32 1.0, %v4436_v16 }
 0x3cd   : > { %16792 = vst [vmem:[#allocation46_spill] sm:$0xff] %v12432_v11  ;;  %7700 = vpow2.f32 %v6292_v10  ;;  %v4041_v11 = vpop.f32.mrf.mxu0  ;;  %v12471_v10 = vpop.eup %7696  ;;  %vm5044_vm5 = vweird.f32 %v12307_v8  ;;  %vm5059_vm8 = vweird.f32 %v12312_v14  ;;  %vm4818_vm14 = vweird.f32 %v12200_v23 }
 0x3ce   : > { %16793 = vst [vmem:[#allocation16_spill] sm:$0xff] %v12438_v58  ;;  %7702 = vrcp.f32 %v12438_v58  ;;  %v12486_v22 = vadd.f32 %v4041_v11, %v12189_v61  ;;  %v12488_v20 = vpop.eup %7698  ;;  %v6322_v11 = vmul.f32 1.442695, %v6208_v51  ;;  %v12540_v16 = vmul.f32 %v12461_v6, %v4620_v39  ;;  %vm12809_vm15 = vmor %vm5043_vm6, %vm5044_vm5 }
 0x3cf   : > { %16794 = vst [vmem:[#allocation116_spill] sm:$0xff] %v12445_v9  ;;  %7704 = vpow2.f32 %v6230_v1  ;;  %v12483_v1 = vadd.f32 1.0, %v4481_v27  ;;  %v4096_v9 = vpop.f32.mrf.mxu2  ;;  %v4634_v27 = vmul.f32 %v12471_v10, %v12416_v47  ;;  %vm12854_vm11 = vmor %vm5058_vm10, %vm5059_vm8  ;;  %vm6526_vm0 = vcmp.lt.f32.partialorder %v12246_v62, 0.0 }
 0x3d0   : > { %16795 = vst [vmem:[#allocation36_spill] sm:$0xff] %v12451_v19  ;;  %7706 = vpow2.f32 %v6232_v53  ;;  %v12493_v19 = vadd.f32 %v4070_v35, %v12189_v61  ;;  %v6209_v53 = vmul.f32 %v6145_v31, %v4417_v32  ;;  %v12509_v35 = vadd.f32 %v4096_v9, %v12159_v54 }
 0x3d1   : > { %16796 = vst [vmem:[#allocation41_spill] sm:$0xff] %v12456_v57  ;;  %v12474_v57 = vmul.f32 %v12406_v29, %v5070_v12  ;;  %v12490_v12 = vadd.f32 1.0, %v4450_v28  ;;  %v6114_v29 = vsub.f32 0.0, %v4386_v25  ;;  %v12505_v28 = vadd.f32 1.0, %v4451_v3  ;;  %v4125_v3 = vpop.f32.mrf.mxu3 }
 0x3d2   : > { %16797 = vst [vmem:[#allocation80_spill] sm:$0xff] %v12461_v6  ;;  %7708 = vrcp.f32 %v12483_v1  ;;  %v4402_v51 = vand.u32 2147483647, %v12486_v22  ;;  %v5334_v47 = vand.u32 2147483648, %v12483_v1  ;;  %v12520_v31 = vand.u32 2147483647, %v12493_v19 }
 0x3d3   : > { %16798 = vst [vmem:[#allocation136_spill] sm:$0xff] %v12471_v10  ;;  %7710 = vrcp.f32 %v12490_v12  ;;  %v6178_v32 = vmul.f32 %v6114_v29, %v4386_v25  ;;  %v4635_v9 = vsub.f32 1.0, %v4634_v27  ;;  %v12534_v29 = vand.u32 2147483647, %v12509_v35 }
 0x3d4   : > { %16799 = vst [vmem:[#allocation123_spill] sm:$0xff] %v12474_v57  ;;  %v12495_v57 = vpop.eup %7700  ;;  %7712 = vrcp.f32 %v12505_v28  ;;  %v6324_v25 = vmul.f32 1.442695, %v6209_v53  ;;  %v4466_v27 = vmul.f32 0.3275911, %v4402_v51  ;;  %v6101_v53 = vsub.f32 0.0, %v12478_v45 }
 0x3d5   : > { %16800 = vst [vmem:[#allocation50_spill] sm:$0xff] %v12483_v1  ;;  %v12503_v5 = vpop.eup %7702  ;;  %7714 = vpow2.f32 %v6322_v11  ;;  %v4467_v34 = vmul.f32 0.3275911, %v12520_v31  ;;  %v4044_v52 = vpop.f32.mrf.mxu0  ;;  %v6179_v11 = vmul.f32 %v6115_v13, %v12448_v2  ;;  %v4452_v6 = vmul.f32 0.3275911, %v12534_v29 }
 0x3d6   : > { %16801 = vst [vmem:[#allocation20_spill] sm:$0xff] %v12486_v22  ;;  %v6100_v22 = vsub.f32 0.0, %v12469_v21  ;;  %7716 = vrcp.f32 %v12525_v17  ;;  %v12564_v2 = vadd.f32 %v4044_v52, %v12164_v4  ;;  %v6165_v52 = vmul.f32 %v6101_v53, %v12478_v45 }
 0x3d7   : > { %16802 = vst [vmem:[#allocation10_spill] sm:$0xff] %v12488_v20  ;;  %v4437_v20 = vmul.f32 0.3275911, %v12478_v45  ;;  %vm6527_vm2 = vcmp.lt.f32.partialorder %v12251_v48, 0.0 }
 0x3d8   : > { %16803 = vst [vmem:[#allocation27_spill] sm:$0xff] %v12490_v12  ;;  %v4418_v45 = vand.u32 2147483647, %v12564_v2 }
 0x3d9   : > { %16804 = vst [vmem:[#allocation43_spill] sm:$0xff] %v12493_v19  ;;  %v12537_v19 = vadd.f32 %v4125_v3, %v12159_v54  ;;  %v4073_v3 = vpop.f32.mrf.mxu1 }
 0x3da   : > { %16805 = vst [vmem:[#allocation13_spill] sm:$0xff] %v12495_v57  ;;  %v12511_v57 = vpop.eup %7704  ;;  %v6146_v49 = vsub.f32 0.0, %v4418_v45 }
 0x3db   : > { %16806 = vst [vmem:[#allocation22_spill] sm:$0xff] %v12498_v24  ;;  %v12527_v24 = vpop.eup %7706 }
 0x3dc   : > { %16807 = vst [vmem:[#allocation143_spill] sm:$0xff] %v12503_v5 }
 0x3dd   : > { %16808 = vst [vmem:[#allocation65_spill] sm:$0xff] %v12505_v28 }
 0x3de   : > { %16809 = vst [vmem:[#allocation51_spill] sm:$0xff] %v12509_v35  ;;  %v12548_v35 = vmul.f32 %v12471_v10, %v4635_v9  ;;  %v12561_v9 = vand.u32 2147483647, %v12537_v19  ;;  %v6130_v10 = vsub.f32 0.0, %v4402_v51 }
 0x3df   : > { %16810 = vst [vmem:[#allocation44_spill] sm:$0xff] %v12511_v57  ;;  %v5309_v57 = vmul.f32 %v12503_v5, %v12438_v58  ;;  %v12542_v58 = vor.u32 1.1754944e-38, %v5334_v47 }
 0x3e0   : > { %16811 = vst [vmem:[#allocation78_spill] sm:$0xff] %v12513_v43  ;;  %v12531_v43 = vadd.f32 1.0, %v4437_v20  ;;  %v12545_v20 = vpop.eup %7708 }
 0x3e1   : > { %16812 = vst [vmem:[#allocation139_spill] sm:$0xff] %v12525_v17  ;;  %v12553_v39 = vpop.eup %7710  ;;  %v5310_v47 = vsub.f32 1.0, %v5309_v57  ;;  %v12568_v57 = vadd.f32 1.0, %v4467_v34 }
 0x3e2   : > { %16813 = vst [vmem:[#allocation55_spill] sm:$0xff] %v12527_v24  ;;  %v6262_v24 = vmul.f32 1.442695, %v6178_v32  ;;  %v6164_v32 = vmul.f32 %v6100_v22, %v12469_v21  ;;  %7718 = vrcp.f32 %v12531_v43  ;;  %v12566_v13 = vpop.eup %7712  ;;  %v12571_v21 = vadd.f32 %v4073_v3, %v12164_v4 }
 0x3e3   : > { %16814 = vst [vmem:[#allocation133_spill] sm:$0xff] %v12531_v43  ;;  %7720 = vpow2.f32 %v6324_v25  ;;  %v12573_v22 = vpop.eup %7714  ;;  %v5324_v25 = vmul.f32 %v12545_v20, %v12483_v1  ;;  %v12584_v3 = vadd.f32 1.0, %v4452_v6  ;;  %v6236_v1 = vmul.f32 1.442695, %v6165_v52 }
 0x3e4   : > { %16815 = vst [vmem:[#allocation56_spill] sm:$0xff] %v12537_v19  ;;  %7722 = vpow2.f32 %v6262_v24  ;;  %v6264_v19 = vmul.f32 1.442695, %v6179_v11  ;;  %v12581_v24 = vmul.f32 %v12503_v5, %v5310_v47  ;;  %v6234_v34 = vmul.f32 1.442695, %v6164_v32  ;;  %v12586_v26 = vpop.eup %7716 }
 0x3e5   : > { %16816 = vst [vmem:[#allocation47_spill] sm:$0xff] %v12540_v16  ;;  %v12558_v16 = vadd.f32 1.0, %v4466_v27  ;;  %v4859_v27 = vmul.f32 %v12553_v39, %v12490_v12  ;;  %v4453_v11 = vmul.f32 0.3275911, %v12561_v9  ;;  %v6194_v47 = vmul.f32 %v6130_v10, %v4402_v51 }
 0x3e6   : > { %16817 = vst [vmem:[#allocation29_spill] sm:$0xff] %v12542_v58  ;;  %v6131_v58 = vsub.f32 0.0, %v12520_v31  ;;  %v12597_v32 = vand.u32 2147483647, %v12571_v21  ;;  %v6116_v51 = vsub.f32 0.0, %v12534_v29 }
 0x3e7   : > { %16818 = vst [vmem:[#allocation49_spill] sm:$0xff] %v12548_v35  ;;  %v4099_v35 = vpop.f32.mrf.mxu2  ;;  %7724 = vrcp.f32 %v12558_v16 }
 0x3e8   : > { %16819 = vst [vmem:[#allocation31_spill] sm:$0xff] %v12553_v39  ;;  %v12593_v53 = vpop.eup %7718  ;;  %7726 = vrcp.f32 %v12568_v57  ;;  %v12600_v6 = vadd.f32 %v4099_v35, %v12189_v61  ;;  %v6195_v10 = vmul.f32 %v6131_v58, %v12520_v31  ;;  %v4483_v52 = vmul.f32 0.3275911, %v12597_v32 }
 0x3e9   : > { %16820 = vst [vmem:[#allocation25_spill] sm:$0xff] %v12564_v2  ;;  %v12602_v12 = vpop.eup %7720  ;;  %7728 = vpow2.f32 %v6264_v19  ;;  %v4649_v2 = vmul.f32 %v12586_v26, %v12525_v17  ;;  %v4482_v19 = vmul.f32 0.3275911, %v4418_v45 }
 0x3ea   : > { %16821 = vst [vmem:[#allocation63_spill] sm:$0xff] %v12566_v13  ;;  %v12604_v5 = vpop.eup %7722  ;;  %7730 = vrcp.f32 %v12584_v3  ;;  %v12617_v17 = vand.u32 2147483647, %v12600_v6 }
 0x3eb   : > { %16822 = vst [vmem:[#allocation48_spill] sm:$0xff] %v12571_v21  ;;  %v4128_v21 = vpop.f32.mrf.mxu3  ;;  %7732 = vpow2.f32 %v6234_v34  ;;  %v4650_v34 = vsub.f32 1.0, %v4649_v2 }
 0x3ec   : > { %16823 = vst [vmem:[#allocation148_spill] sm:$0xff] %v12573_v22  ;;  %v4874_v22 = vmul.f32 %v12566_v13, %v12505_v28  ;;  %v5325_v28 = vsub.f32 1.0, %v5324_v25  ;;  %v12613_v25 = vadd.f32 1.0, %v4453_v11  ;;  %7734 = vpow2.f32 %v6236_v1 }
 0x3ed   : > { %16824 = vst [vmem:[#allocation32_spill] sm:$0xff] %v12581_v24  ;;  %v4860_v24 = vsub.f32 1.0, %v4859_v27  ;;  %v6294_v27 = vmul.f32 1.442695, %v6194_v47  ;;  %v12619_v58 = vpop.eup %7724  ;;  %v6296_v47 = vmul.f32 1.442695, %v6195_v10 }
 0x3ee   : > { %16825 = vst [vmem:[#allocation83_spill] sm:$0xff] %v12584_v3  ;;  %v4875_v35 = vsub.f32 1.0, %v4874_v22  ;;  %v12622_v31 = vmul.f32 %v12545_v20, %v5325_v28  ;;  %v6117_v22 = vsub.f32 0.0, %v12561_v9  ;;  %v12628_v11 = vpop.eup %7726  ;;  %7736 = vrcp.f32 %v12613_v25 }
 0x3ef   : > { %16826 = vst [vmem:[#allocation19_spill] sm:$0xff] %v12586_v26  ;;  %v12634_v40 = vmul.f32 %v12553_v39, %v4860_v24  ;;  %v12637_v1 = vadd.f32 1.0, %v4482_v19  ;;  %7738 = vpow2.f32 %v6294_v27  ;;  %v5114_v24 = vmul.f32 %v12628_v11, %v12568_v57  ;;  %v4151_v19 = vpop.f32.mrf.mxu0 }
 0x3f0   : > { %16827 = vst [vmem:[#allocation66_spill] sm:$0xff] %v12593_v53  ;;  %v12644_v2 = vmul.f32 %v12566_v13, %v4875_v35  ;;  %v6181_v10 = vmul.f32 %v6117_v22, %v12561_v9  ;;  %v12660_v35 = vmul.f32 %v12586_v26, %v4650_v34  ;;  %7740 = vpow2.f32 %v6296_v47 }
 0x3f1   : > { %16828 = vst [vmem:[#allocation153_spill] sm:$0xff] %v12600_v6  ;;  %v12631_v6 = vpop.eup %7728  ;;  %7742 = vrcp.f32 %v12637_v1  ;;  %v12675_v34 = vadd.f32 %v4151_v19, %v12151_v37  ;;  %v5115_v47 = vsub.f32 1.0, %v5114_v24 }
 0x3f2   : > { %16829 = vst [vmem:[#allocation9_spill] sm:$0xff] %v12602_v12  ;;  %v4664_v12 = vmul.f32 %v12593_v53, %v12531_v43  ;;  %v12626_v43 = vadd.f32 %v4128_v21, %v12189_v61  ;;  %v4468_v21 = vmul.f32 0.3275911, %v12617_v17 }
 0x3f3   : > { %16830 = vst [vmem:[#allocation126_spill] sm:$0xff] %v12604_v5  ;;  %v6180_v5 = vmul.f32 %v6116_v51, %v12534_v29  ;;  %v12646_v29 = vadd.f32 1.0, %v4483_v52  ;;  %v6210_v52 = vmul.f32 %v6146_v49, %v4418_v45  ;;  %v4374_v24 = vand.u32 2147483647, %v12675_v34 }
 0x3f4   : > { %16831 = vst [vmem:[#allocation124_spill] sm:$0xff] %v12613_v25  ;;  %v4665_v28 = vsub.f32 1.0, %v4664_v12  ;;  %v5099_v12 = vmul.f32 %v12619_v58, %v12558_v16  ;;  %v4405_v51 = vand.u32 2147483647, %v12626_v43 }
 0x3f5   : > { %16832 = vst [vmem:[#allocation88_spill] sm:$0xff] %v12619_v58  ;;  %v6266_v27 = vmul.f32 1.442695, %v6180_v5  ;;  %7744 = vrcp.f32 %v12646_v29  ;;  %v6326_v26 = vmul.f32 1.442695, %v6210_v52  ;;  %v5364_v19 = vand.u32 2147483648, %v12646_v29 }
 0x3f6   : > { %16833 = vst [vmem:[#allocation121_spill] sm:$0xff] %v12622_v31  ;;  %v12639_v31 = vpop.eup %7730  ;;  %v12665_v9 = vmul.f32 %v12593_v53, %v4665_v28  ;;  %v5100_v45 = vsub.f32 1.0, %v5099_v12  ;;  %v6268_v28 = vmul.f32 1.442695, %v6181_v10 }
 0x3f7   : > { %16834 = vst [vmem:[#allocation30_spill] sm:$0xff] %v12626_v43  ;;  %v12655_v39 = vpop.eup %7732  ;;  %v4889_v22 = vmul.f32 %v12639_v31, %v12584_v3  ;;  %v12672_v43 = vadd.f32 1.0, %v4468_v21  ;;  %7746 = vpow2.f32 %v6266_v27  ;;  %v6132_v21 = vsub.f32 0.0, %v12617_v17 }
 0x3f8   : > { %16835 = vst [vmem:[#allocation131_spill] sm:$0xff] %v12628_v11  ;;  %v12662_v13 = vpop.eup %7734  ;;  %v6133_v3 = vsub.f32 0.0, %v4405_v51  ;;  %v12698_v52 = vmul.f32 %v12619_v58, %v5100_v45 }
 0x3f9   : > { %16836 = vst [vmem:[#allocation59_spill] sm:$0xff] %v12631_v6  ;;  %v4180_v6 = vpop.f32.mrf.mxu1  ;;  %v12680_v5 = vpop.eup %7736  ;;  %7748 = vrcp.f32 %v12672_v43 }
 0x3fa   : > { %16837 = vst [vmem:[#allocation28_spill] sm:$0xff] %v12634_v40  ;;  %v12678_v49 = vadd.f32 %v4180_v6, %v12151_v37  ;;  %v12682_v53 = vpop.eup %7738  ;;  %v4904_v12 = vmul.f32 %v12680_v5, %v12613_v25  ;;  %7750 = vpow2.f32 %v6268_v28 }
 0x3fb   : > { %16838 = vst [vmem:[#allocation92_spill] sm:$0xff] %v12639_v31  ;;  %7752 = vpow2.f32 %v6326_v26 }
 0x3fc   : > { %16839 = vst [vmem:[#allocation145_spill] sm:$0xff] %v12644_v2  ;;  %v12688_v2 = vpop.eup %7740  ;;  %v4375_v10 = vand.u32 2147483647, %v12678_v49  ;;  %v4905_v28 = vsub.f32 1.0, %v4904_v12 }
 0x3fd   : > { %16840 = vst [vmem:[#allocation106_spill] sm:$0xff] %v12655_v39  ;;  %v6147_v39 = vsub.f32 0.0, %v12597_v32  ;;  %v12695_v27 = vpop.eup %7742 }
 0x3fe   : > { %16841 = vst [vmem:[#allocation115_spill] sm:$0xff] %v12660_v35  ;;  %v4890_v35 = vsub.f32 1.0, %v4889_v22  ;;  %v12701_v22 = vmul.f32 %v12628_v11, %v5115_v47  ;;  %v6197_v47 = vmul.f32 %v6133_v3, %v4405_v51  ;;  %v4438_v11 = vmul.f32 0.3275911, %v4374_v24 }
 0x3ff   : > { %16842 = vst [vmem:[#allocation79_spill] sm:$0xff] %v12662_v13  ;;  %v4469_v13 = vmul.f32 0.3275911, %v4405_v51  ;;  %v6211_v6 = vmul.f32 %v6147_v39, %v12597_v32  ;;  %v12705_v32 = vpop.eup %7744  ;;  %v5287_v51 = vand.u32 2147483647, %v12323_v7  ;;  %v12767_v45 = vmul.f32 %v12680_v5, %v4905_v28 }
 0x400   : > { %16843 = vst [vmem:[#allocation61_spill] sm:$0xff] %v12665_v9  ;;  %v5349_v9 = vand.u32 2147483648, %v12637_v1  ;;  %v4439_v7 = vmul.f32 0.3275911, %v4375_v10  ;;  %v12772_v40 = vadd.f32 1.0, %v4438_v11 }
 0x401   : > { %16844 = vst [vmem:[#allocation33_spill] sm:$0xff] %v12675_v34  ;;  %v12703_v39 = vadd.f32 1.0, %v4469_v13  ;;  %v6196_v34 = vmul.f32 %v6132_v21, %v12617_v17  ;;  %v12721_v13 = vmul.f32 %v12639_v31, %v4890_v35  ;;  %v6328_v26 = vmul.f32 1.442695, %v6211_v6  ;;  %v12725_v17 = vpop.eup %7746 }
 0x402   : > { %16845 = vst [vmem:[#allocation130_spill] sm:$0xff] %v12678_v49  ;;  %v12707_v25 = vor.u32 1.1754944e-38, %v5349_v9  ;;  %v5282_v49 = vadd.f32 %v12376_v15, %v12459_v36  ;;  %v12723_v9 = vor.u32 1.1754944e-38, %v5364_v19  ;;  %v5339_v36 = vmul.f32 %v12695_v27, %v12637_v1  ;;  %v12744_v19 = vpop.eup %7748 }
 0x403   : > { %16846 = vst [vmem:[#allocation142_spill] sm:$0xff] %v12680_v5  ;;  %v6102_v21 = vsub.f32 0.0, %v4374_v24  ;;  %v5354_v35 = vmul.f32 %v12705_v32, %v12646_v29  ;;  %7754 = vrcp.f32 %v12703_v39  ;;  %v6298_v6 = vmul.f32 1.442695, %v6196_v34  ;;  %v4131_v34 = vpop.f32.mrf.mxu3 }
 0x404   : > { %16847 = vst [vmem:[#allocation81_spill] sm:$0xff] %v12682_v53  ;;  %v6103_v53 = vsub.f32 0.0, %v4375_v10  ;;  %v5286_v12 = vsel %vm12716_vm3, %v12376_v15, %v5282_v49  ;;  %v5302_v31 = vand.u32 2147483647, %v12329_v59  ;;  %7756 = vpow2.f32 %v6328_v26 }
 0x405   : > { %16848 = vst [vmem:[#allocation67_spill] sm:$0xff] %v12688_v2  ;;  %v4102_v2 = vpop.f32.mrf.mxu2  ;;  %vm5288_vm7 = vcmp.eq.f32.partialorder %v5287_v51, 8.507059e+37  ;;  %7758 = vpow2.f32 %v6298_v6  ;;  %vm4804_vm3 = vweird.f32 %v12231_v18 }
 0x406   : > { %16849 = vst [vmem:[#allocation120_spill] sm:$0xff] %v12698_v52  ;;  %v12741_v3 = vadd.f32 %v4102_v2, %v12164_v4  ;;  %v6300_v2 = vmul.f32 1.442695, %v6197_v47  ;;  %v6166_v52 = vmul.f32 %v6102_v21, %v4374_v24  ;;  %v6167_v58 = vmul.f32 %v6103_v53, %v4375_v10 }
 0x407   : > { %16850 = vst [vmem:[#allocation93_spill] sm:$0xff] %v12701_v22  ;;  %v12764_v49 = vsel %vm5288_vm7, %v12401_v46, %v5286_v12  ;;  %vm5303_vm12 = vcmp.eq.f32.partialorder %v5302_v31, 8.507059e+37  ;;  %v5340_v24 = vsub.f32 1.0, %v5339_v36  ;;  %v5355_v53 = vsub.f32 1.0, %v5354_v35 }
 0x408   : > { %16851 = vst [vmem:[#allocation17_spill] sm:$0xff] %v12703_v39  ;;  %v4420_v59 = vand.u32 2147483647, %v12741_v3  ;;  %v5566_v10 = vmul.f32 1.0614054, %v12764_v49  ;;  %v12777_v47 = vadd.f32 %v4131_v34, %v12164_v4  ;;  %7760 = vpow2.f32 %v6300_v2 }
 0x409   : > { %16854 = vst [vmem:[#allocation140_spill] sm:$0xff] %v12721_v13  ;;  %v12753_v13 = vpop.eup %7750  ;;  %v6238_v31 = vmul.f32 1.442695, %v6166_v52  ;;  %v6240_v11 = vmul.f32 1.442695, %v6167_v58  ;;  %v12791_v52 = vmul.f32 %v12695_v27, %v5340_v24  ;;  %7762 = vrcp.f32 %v12772_v40 }
 0x40a   : > { %16855 = vst [vmem:[#allocation114_spill] sm:$0xff] %v12725_v17  ;;  %v5297_v17 = vadd.f32 %v12385_v60, %v12464_v50  ;;  %v12755_v22 = vpop.eup %7752  ;;  %v5129_v50 = vmul.f32 %v12744_v19, %v12672_v43  ;;  %v4484_v35 = vmul.f32 0.3275911, %v4420_v59  ;;  %v6148_v6 = vsub.f32 0.0, %v4420_v59 }
 0x40b   : > { %16858 = vst [vmem:[#allocation113_spill] sm:$0xff] %v12741_v3  ;;  %v12770_v26 = vpop.eup %7754  ;;  %v5042_v34 = vadd.f32 %v12307_v8, %v12379_v38 }
 0x40c   : > { %16859 = vst [vmem:[#allocation144_spill] sm:$0xff] %v12744_v19  ;;  %v5301_v15 = vsel %vm12733_vm4, %v12385_v60, %v5297_v17  ;;  %v12774_v60 = vadd.f32 1.0, %v4439_v7  ;;  %v5630_v17 = vadd.f32 -1.4531521, %v5566_v10  ;;  %v12783_v36 = vpop.eup %7756  ;;  %v5130_v21 = vsub.f32 1.0, %v5129_v50  ;;  %vm12896_vm4 = vmor %vm4803_vm9, %vm4804_vm3 }
 0x40d   : > { %16860 = vst [vmem:[#allocation85_spill] sm:$0xff] %v12753_v13  ;;  %v12780_v46 = vsel %vm5303_vm12, %v12424_v0, %v5301_v15  ;;  %v5144_v51 = vmul.f32 %v12770_v26, %v12703_v39  ;;  %v4421_v7 = vand.u32 2147483647, %v12777_v47  ;;  %v12800_v15 = vmul.f32 %v12705_v32, %v5355_v53 }
 0x40e   : > { %16861 = vst [vmem:[#allocation21_spill] sm:$0xff] %v12767_v45  ;;  %v5567_v28 = vmul.f32 1.0614054, %v12780_v46  ;;  %v5694_v12 = vmul.f32 %v5630_v17, %v12764_v49  ;;  %7764 = vrcp.f32 %v12774_v60  ;;  %v12803_v50 = vmul.f32 %v12744_v19, %v5130_v21  ;;  %v12813_v17 = vpop.eup %7758 }
 0x40f   : > { %16862 = vst [vmem:[#allocation100_spill] sm:$0xff] %v12770_v26  ;;  %7766 = vpow2.f32 %v6238_v31  ;;  %v12805_v24 = vadd.f32 1.0, %v4484_v35  ;;  %v6212_v21 = vmul.f32 %v6148_v6, %v4420_v59  ;;  %v4154_v31 = vpop.f32.mrf.mxu0  ;;  %v5047_v35 = vand.u32 2147483647, %v12243_v44 }
 0x410   : > { %16863 = vst [vmem:[#allocation74_spill] sm:$0xff] %v12772_v40  ;;  %v5631_v0 = vadd.f32 -1.4531521, %v5567_v28  ;;  %v5758_v58 = vadd.f32 1.4214138, %v5694_v12  ;;  %v5145_v28 = vsub.f32 1.0, %v5144_v51  ;;  %7768 = vpow2.f32 %v6240_v11  ;;  %v12816_v12 = vpop.eup %7760 }
 0x411   : > { %16864 = vst [vmem:[#allocation15_spill] sm:$0xff] %v12774_v60  ;;  %v5049_v13 = vand.u32 2147483648, %v12243_v44  ;;  %v6149_v5 = vsub.f32 0.0, %v4421_v7  ;;  %v5046_v11 = vsel %vm12809_vm15, %v12307_v8, %v5042_v34  ;;  %v12824_v51 = vpop.eup %7762  ;;  %7770 = vrcp.f32 %v12805_v24 }
 0x412   : > { %16865 = vst [vmem:[#allocation69_spill] sm:$0xff] %v12777_v47  ;;  %v5695_v2 = vmul.f32 %v5631_v0, %v12780_v46  ;;  %v5822_v38 = vmul.f32 %v5758_v58, %v12764_v49  ;;  %v4485_v0 = vmul.f32 0.3275911, %v4421_v7  ;;  %vm5048_vm13 = vcmp.eq.f32.partialorder %v5047_v35, 8.507059e+37 }
 0x413   : > { %16866 = vst [vmem:[#allocation118_spill] sm:$0xff] %v12803_v50  ;;  %v5050_v59 = vor.u32 1.1754944e-38, %v5049_v13  ;;  %v5057_v6 = vadd.f32 %v12312_v14, %v12382_v56  ;;  %v5379_v58 = vand.u32 2147483648, %v12805_v24  ;;  %v5062_v56 = vand.u32 2147483647, %v12248_v42  ;;  %v17022_v50 = vld [vmem:[#allocation12_spill] sm:$0xff] }
 0x414   : > { %16869 = vst [vmem:[#allocation147_spill] sm:$0xff] %v12813_v17  ;;  %v5759_v53 = vadd.f32 1.4214138, %v5695_v2  ;;  %v5886_v45 = vadd.f32 -0.28449672, %v5822_v38  ;;  %v12830_v44 = vpop.eup %7764  ;;  %v12834_v2 = vadd.f32 %v4154_v31, %v12159_v54  ;;  %v12840_v38 = vmul.f32 %v12770_v26, %v5145_v28 }
 0x415   : > { %16870 = vst [vmem:[#allocation127_spill] sm:$0xff] %v12816_v12  ;;  %v12837_v10 = vpop.eup %7766  ;;  %v12848_v35 = vmul.f32 1.442695, %v6212_v21  ;;  %v12860_v28 = vadd.f32 1.0, %v4485_v0  ;;  %v5061_v21 = vsel %vm12854_vm11, %v12312_v14, %v5057_v6  ;;  %vm5063_vm1 = vcmp.eq.f32.partialorder %v5062_v56, 8.507059e+37 }
 0x416   : > { %v5823_v47 = vmul.f32 %v5759_v53, %v12780_v46  ;;  %16871 = vst [vmem:[#allocation102_spill] sm:$0xff] %v12824_v51  ;;  %v5950_v8 = vmul.f32 %v5886_v45, %v12764_v49  ;;  %v12842_v53 = vsel %vm5048_vm13, %v5050_v59, %v5046_v11  ;;  %v12846_v13 = vpop.eup %7768  ;;  %v12862_v11 = vmul.f32 %v6149_v5, %v4421_v7 }
 0x417   : > { %16872 = vst [vmem:[#allocation141_spill] sm:$0xff] %v12830_v44  ;;  %v5550_v45 = vmul.f32 1.0614054, %v12842_v53  ;;  %v5064_v59 = vand.u32 2147483648, %v12248_v42  ;;  %v12874_v0 = vmul.f32 %v12824_v51, %v12772_v40  ;;  %v4802_v7 = vadd.f32 %v12231_v18, %v12310_v63  ;;  %v16905_v40 = vld [vmem:[#allocation97_spill] sm:$0xff] }
 0x418   : > { %16873 = vst [vmem:[#allocation119_spill] sm:$0xff] %v12834_v2  ;;  %v5887_v34 = vadd.f32 -0.28449672, %v5823_v47  ;;  %v6014_v31 = vadd.f32 0.2548296, %v5950_v8  ;;  %v12879_v14 = vor.u32 1.1754944e-38, %v5379_v58  ;;  %v12886_v6 = vmul.f32 %v12830_v44, %v12774_v60 }
 0x419   : > { %16874 = vst [vmem:[#allocation108_spill] sm:$0xff] %v12837_v10  ;;  %v12869_v10 = vpop.eup %7770  ;;  %v5065_v5 = vor.u32 1.1754944e-38, %v5064_v59  ;;  %v4390_v56 = vand.u32 2147483647, %v12834_v2  ;;  %v4807_v63 = vand.u32 2147483647, %v12194_v41  ;;  %7772 = vrcp.f32 %v12860_v28 }
 0x41a   : > { %16875 = vst [vmem:[#allocation151_spill] sm:$0xff] %v12840_v38  ;;  %v5951_v12 = vmul.f32 %v5887_v34, %v12780_v46  ;;  %v6078_v8 = vmul.f32 %v6014_v31, %v12764_v49  ;;  %v16881_v59 = vld [vmem:[#allocation125_spill] sm:$0xff]  ;;  %v4822_v2 = vand.u32 2147483647, %v12200_v23  ;;  %v4695_v48 = vsub.f32 1.0, %v12886_v6 }
 0x41b   : > { %16876 = vst [vmem:[#allocation146_spill] sm:$0xff] %v12846_v13  ;;  %v5614_v13 = vadd.f32 -1.4531521, %v5550_v45  ;;  %v12889_v31 = vsel %vm5063_vm1, %v5065_v5, %v5061_v21  ;;  %v4809_v21 = vand.u32 2147483648, %v12194_v41  ;;  %vm4819_vm6 = vweird.f32 %v16881_v59 }
 0x41c   : > { %v6015_v34 = vadd.f32 0.2548296, %v5951_v12  ;;  %v6398_v42 = vmul.f32 %v12435_v33, %v6078_v8  ;;  %v5551_v33 = vmul.f32 1.0614054, %v12889_v31  ;;  %v4817_v8 = vadd.f32 %v16881_v59, %v12315_v55  ;;  %vm12915_vm12 = vmor %vm4818_vm14, %vm4819_vm6 }
 0x41d   : > { %v5678_v12 = vmul.f32 %v5614_v13, %v12842_v53  ;;  %v4806_v13 = vsel %vm12896_vm4, %v12231_v18, %v4802_v7  ;;  %vm4808_vm7 = vcmp.eq.f32.partialorder %v4807_v63, 8.507059e+37  ;;  %vm4823_vm10 = vcmp.eq.f32.partialorder %v4822_v2, 8.507059e+37 }
 0x41e   : > { %v6079_v49 = vmul.f32 %v6015_v34, %v12780_v46  ;;  %v6462_v45 = vsub.f32 1.0, %v6398_v42  ;;  %v5615_v42 = vadd.f32 -1.4531521, %v5551_v33  ;;  %v4821_v62 = vsel %vm12915_vm12, %v16881_v59, %v4817_v8  ;;  %v4183_v33 = vpop.f32.mrf.mxu1 }
 0x41f   : > { %v5742_v47 = vadd.f32 1.4214138, %v5678_v12  ;;  %v4810_v12 = vor.u32 1.1754944e-38, %v4809_v21  ;;  %7774 = vpow2.f32 %v12848_v35  ;;  %vm4579_vm1 = vweird.f32 %v16905_v40 }
 0x420   : > { %v6399_v58 = vmul.f32 %v12453_v30, %v6079_v49  ;;  %v6590_v30 = vsub.f32 0.0, %v6462_v45  ;;  %v5394_v49 = vand.u32 2147483648, %v12860_v28  ;;  %v5679_v55 = vmul.f32 %v5615_v42, %v12889_v31 }
 0x421   : > { %v5806_v5 = vmul.f32 %v5742_v47, %v12842_v53  ;;  %v4680_v47 = vsub.f32 1.0, %v12874_v0  ;;  %v12920_v63 = vsel %vm4808_vm7, %v4810_v12, %v4806_v13  ;;  %v4454_v0 = vmul.f32 0.3275911, %v4390_v56 }
 0x422   : > { %v6463_v34 = vsub.f32 1.0, %v6399_v58  ;;  %v6654_v18 = vsel %vm6526_vm0, %v6590_v30, %v6462_v45  ;;  %v4824_v45 = vand.u32 2147483648, %v12200_v23  ;;  %v5743_v30 = vadd.f32 1.4214138, %v5679_v55  ;;  %v16884_v23 = vld [vmem:[#allocation94_spill] sm:$0xff] }
 0x423   : > { %v5870_v7 = vadd.f32 -0.28449672, %v5806_v5  ;;  %6692 = vmatpush.msra.mxu0 %v6654_v18  ;;  %v5534_v5 = vmul.f32 1.0614054, %v12920_v63  ;;  %v6118_v13 = vsub.f32 0.0, %v4390_v56  ;;  %vm6510_vm5 = vcmp.lt.f32.partialorder %v16884_v23, 0.0 }
 0x424   : > { %v6591_v41 = vsub.f32 0.0, %v6463_v34  ;;  %v4825_v42 = vor.u32 1.1754944e-38, %v4824_v45  ;;  %v5807_v59 = vmul.f32 %v5743_v30, %v12889_v31  ;;  %v12936_v18 = vadd.f32 %v4183_v33, %v12159_v54  ;;  %v16888_v33 = vld [vmem:[#allocation18_spill] sm:$0xff] }
 0x425   : > { %v5934_v21 = vmul.f32 %v5870_v7, %v12842_v53  ;;  %v5598_v8 = vadd.f32 -1.4531521, %v5534_v5  ;;  %v16886_v7 = vld [vmem:[#allocation129_spill] sm:$0xff]  ;;  %v12947_v6 = vadd.f32 1.0, %v4454_v0  ;;  %vm5329_vm12 = vweird.f32 %v12545_v20 }
 0x426   : > { %v6655_v46 = vsel %vm6527_vm2, %v6591_v41, %v6463_v34  ;;  %v6332_v34 = vmul.f32 1.442695, %v12862_v11  ;;  %16885 = vst [vmem:[#allocation104_spill] sm:$0xff] %v12936_v18  ;;  %v12938_v41 = vsel %vm4823_vm10, %v4825_v42, %v4821_v62  ;;  %vm4563_vm15 = vweird.f32 %v16886_v7  ;;  %v12951_v42 = vpop.eup %7772 }
 0x427   : > { %6712 = vmatpush.msra.mxu1 %v6655_v46  ;;  %v5998_v12 = vadd.f32 0.2548296, %v5934_v21  ;;  %v5871_v58 = vadd.f32 -0.28449672, %v5807_v59  ;;  %v5662_v45 = vmul.f32 %v5598_v8, %v12920_v63  ;;  %v5535_v2 = vmul.f32 1.0614054, %v12938_v41 }
 0x428   : > { %v12945_v46 = vor.u32 1.1754944e-38, %v5394_v49  ;;  %16887 = vst [vmem:[#allocation53_spill] sm:$0xff] %v12947_v6  ;;  %v6182_v11 = vmul.f32 %v6118_v13, %v4390_v56  ;;  %7776 = vpow2.f32 %v6332_v34  ;;  %v4391_v35 = vand.u32 2147483647, %v12936_v18  ;;  %v16891_v49 = vld [vmem:[#allocation107_spill] sm:$0xff]  ;;  %v16892_v8 = vld [vmem:[#allocation134_spill] sm:$0xff] }
 0x429   : > { %v6062_v55 = vmul.f32 %v5998_v12, %v12842_v53  ;;  %v5935_v62 = vmul.f32 %v5871_v58, %v12889_v31  ;;  %v5726_v30 = vadd.f32 1.4214138, %v5662_v45  ;;  %v5599_v5 = vadd.f32 -1.4531521, %v5535_v2  ;;  %v16893_v34 = vld [vmem:[#allocation110_spill] sm:$0xff]  ;;  %v4209_v45 = vpop.f32.mrf.mxu2  ;;  %v4238_v2 = vpop.f32.mrf.mxu3 }
 0x42a   : > { %v12954_v53 = vmul.f32 %v12824_v51, %v4680_v47  ;;  %v12957_v12 = vmul.f32 %v12830_v44, %v4695_v48  ;;  %vm4578_vm9 = vweird.f32 %v16891_v49  ;;  %vm6511_vm13 = vcmp.lt.f32.partialorder %v16892_v8, 0.0  ;;  %v16896_v51 = vld [vmem:[#allocation60_spill] sm:$0xff] }
 0x42b   : > { %v6382_v21 = vmul.f32 %v16888_v33, %v6062_v55  ;;  %v5999_v0 = vadd.f32 0.2548296, %v5935_v62  ;;  %v5790_v13 = vmul.f32 %v5726_v30, %v12920_v63  ;;  %v5663_v59 = vmul.f32 %v5599_v5, %v12938_v41  ;;  %v16894_v55 = vld [vmem:[#allocation122_spill] sm:$0xff]  ;;  %v12974_v5 = vpop.eup %7774  ;;  %vm13025_vm3 = vmor %vm4578_vm9, %vm4579_vm1 }
 0x42c   : > { %16889 = vst [vmem:[#allocation76_spill] sm:$0xff] %v12954_v53  ;;  %v12966_v47 = vmul.f32 %v12869_v10, %v12805_v24  ;;  %7778 = vrcp.f32 %v12947_v6  ;;  %v12969_v48 = vmul.f32 1.442695, %v6182_v11  ;;  %v4562_v58 = vadd.f32 %v16894_v55, %v16893_v34 }
 0x42d   : > { %16890 = vst [vmem:[#allocation152_spill] sm:$0xff] %v12957_v12  ;;  %v6446_v56 = vsub.f32 1.0, %v6382_v21  ;;  %v6063_v21 = vmul.f32 %v5999_v0, %v12889_v31  ;;  %v5854_v62 = vadd.f32 -0.28449672, %v5790_v13  ;;  %v5727_v30 = vadd.f32 1.4214138, %v5663_v59 }
 0x42e   : > { %16895 = vst [vmem:[#allocation71_spill] sm:$0xff] %v12974_v5  ;;  %v4455_v18 = vmul.f32 0.3275911, %v4391_v35  ;;  %v6119_v44 = vsub.f32 0.0, %v4391_v35  ;;  %vm4564_vm8 = vweird.f32 %v16894_v55  ;;  %v4567_v12 = vand.u32 2147483647, %v16886_v7  ;;  %v12983_v31 = vpop.eup %7776 }
 0x42f   : > { %v6574_v33 = vsub.f32 0.0, %v6446_v56  ;;  %v6383_v34 = vmul.f32 %v16896_v51, %v6063_v21  ;;  %v5918_v53 = vmul.f32 %v5854_v62, %v12920_v63  ;;  %v5791_v60 = vmul.f32 %v5727_v30, %v12938_v41  ;;  %16897 = vst [vmem:[#allocation84_spill] sm:$0xff] %v12983_v31  ;;  %vm12997_vm11 = vmor %vm4563_vm15, %vm4564_vm8  ;;  %v16914_v51 = vld [vmem:[#allocation50_spill] sm:$0xff] }
 0x430   : > { %v12987_v0 = vmul.f32 %v12951_v42, %v12860_v28  ;;  %v12990_v13 = vadd.f32 %v4209_v45, %v12151_v37  ;;  %v12993_v59 = vadd.f32 %v4238_v2, %v12151_v37  ;;  %v4569_v23 = vand.u32 2147483648, %v16886_v7  ;;  %v16903_v2 = vld [vmem:[#allocation89_spill] sm:$0xff] }
 0x431   : > { %v6638_v11 = vsel %vm6510_vm5, %v6574_v33, %v6446_v56  ;;  %v6447_v56 = vsub.f32 1.0, %v6383_v34  ;;  %v5982_v33 = vadd.f32 0.2548296, %v5918_v53  ;;  %v5855_v21 = vadd.f32 -0.28449672, %v5791_v60  ;;  %v16906_v34 = vld [vmem:[#allocation143_spill] sm:$0xff] }
 0x432   : > { %16898 = vst [vmem:[#allocation109_spill] sm:$0xff] %v12990_v13  ;;  %6693 = vmatpush.msra.mxu0 %v6638_v11  ;;  %v4566_v45 = vsel %vm12997_vm11, %v16894_v55, %v4562_v58  ;;  %v13005_v62 = vpop.eup %7778  ;;  %vm6494_vm14 = vcmp.lt.f32.partialorder %v16903_v2, 0.0  ;;  %vm4568_vm0 = vcmp.eq.f32.partialorder %v4567_v12, 8.507059e+37  ;;  %v4570_v30 = vor.u32 1.1754944e-38, %v4569_v23  ;;  %v16904_v11 = vld [vmem:[#allocation62_spill] sm:$0xff] }
 0x433   : > { %16899 = vst [vmem:[#allocation35_spill] sm:$0xff] %v12993_v59  ;;  %v4577_v17 = vadd.f32 %v16905_v40, %v16904_v11  ;;  %v6575_v31 = vsub.f32 0.0, %v6447_v56  ;;  %v6046_v7 = vmul.f32 %v5982_v33, %v12920_v63  ;;  %v5919_v60 = vmul.f32 %v5855_v21, %v12938_v41  ;;  %v16909_v33 = vld [vmem:[#allocation117_spill] sm:$0xff] }
 0x434   : > { %16902 = vst [vmem:[#allocation26_spill] sm:$0xff] %v13005_v62  ;;  %v4582_v53 = vand.u32 2147483647, %v16891_v49  ;;  %vm5314_vm2 = vweird.f32 %v16906_v34  ;;  %v13016_v55 = vand.u32 2147483647, %v12990_v13  ;;  %v13021_v58 = vsel %vm4568_vm0, %v4570_v30, %v4566_v45  ;;  %v16910_v45 = vld [vmem:[#allocation105_spill] sm:$0xff] }
 0x435   : > { %v13019_v12 = vand.u32 2147483647, %v12993_v59  ;;  %v4584_v63 = vand.u32 2147483648, %v16891_v49  ;;  %v6639_v23 = vsel %vm6511_vm13, %v6575_v31, %v6447_v56  ;;  %v6366_v21 = vmul.f32 %v16909_v33, %v6046_v7  ;;  %v16911_v30 = vld [vmem:[#allocation16_spill] sm:$0xff] }
 0x436   : > { %v5983_v11 = vadd.f32 0.2548296, %v5919_v60  ;;  %v4581_v59 = vsel %vm13025_vm3, %v16905_v40, %v4577_v17  ;;  %vm6495_vm4 = vcmp.lt.f32.partialorder %v16910_v45, 0.0  ;;  %vm5313_vm6 = vweird.f32 %v16911_v30  ;;  %6713 = vmatpush.msra.mxu1 %v6639_v23  ;;  %v4186_v23 = vpop.f32.mrf.mxu1 }
 0x437   : > { %v13038_v13 = vadd.f32 1.0, %v4455_v18  ;;  %v6183_v5 = vmul.f32 %v6119_v44, %v4391_v35  ;;  %v5518_v49 = vmul.f32 1.0614054, %v13021_v58  ;;  %v4585_v26 = vor.u32 1.1754944e-38, %v4584_v63  ;;  %v16913_v35 = vld [vmem:[#allocation96_spill] sm:$0xff]  ;;  %v4157_v63 = vpop.f32.mrf.mxu0  ;;  %vm13085_vm5 = vmor %vm5313_vm6, %vm5314_vm2 }
 0x438   : > { %v5370_v8 = vsub.f32 1.0, %v12966_v47  ;;  %v6430_v31 = vsub.f32 1.0, %v6366_v21  ;;  %v6047_v56 = vmul.f32 %v5983_v11, %v12938_v41  ;;  %vm4583_vm7 = vcmp.eq.f32.partialorder %v4582_v53, 8.507059e+37 }
 0x439   : > { %16912 = vst [vmem:[#allocation64_spill] sm:$0xff] %v13038_v13  ;;  %v4440_v40 = vmul.f32 0.3275911, %v13016_v55  ;;  %v4441_v17 = vmul.f32 0.3275911, %v13019_v12  ;;  %v13046_v18 = vsel %vm4583_vm7, %v4585_v26, %v4581_v59  ;;  %7780 = vpow2.f32 %v12969_v48 }
 0x43a   : > { %v5582_v7 = vadd.f32 -1.4531521, %v5518_v49  ;;  %v6558_v44 = vsub.f32 0.0, %v6430_v31  ;;  %v6367_v60 = vmul.f32 %v16913_v35, %v6047_v56  ;;  %v5519_v47 = vmul.f32 1.0614054, %v13046_v18  ;;  %v16917_v56 = vld [vmem:[#allocation32_spill] sm:$0xff] }
 0x43b   : > { %vm5328_vm10 = vweird.f32 %v16914_v51  ;;  %v5385_v41 = vsub.f32 1.0, %v12987_v0  ;;  %7782 = vrcp.f32 %v13038_v13  ;;  %v6272_v53 = vmul.f32 1.442695, %v6183_v5 }
 0x43c   : > { %v5646_v33 = vmul.f32 %v5582_v7, %v13021_v58  ;;  %v4919_v26 = vmul.f32 %v13005_v62, %v12947_v6  ;;  %v6622_v48 = vsel %vm6494_vm14, %v6558_v44, %v6430_v31  ;;  %v6431_v59 = vsub.f32 1.0, %v6367_v60  ;;  %vm5330_vm9 = vmor %vm5328_vm10, %vm5329_vm12 }
 0x43d   : > { %v5583_v21 = vadd.f32 -1.4531521, %v5519_v47  ;;  %v13059_v11 = vadd.f32 1.0, %v4440_v40  ;;  %v13061_v49 = vadd.f32 1.0, %v4441_v17  ;;  %6694 = vmatpush.msra.mxu0 %v6622_v48  ;;  %v5312_v5 = vadd.f32 %v16906_v34, %v16917_v56 }
 0x43e   : > { %v5710_v0 = vadd.f32 1.4214138, %v5646_v33  ;;  %v6559_v35 = vsub.f32 0.0, %v6431_v59  ;;  %v13066_v7 = vadd.f32 %v4157_v63, %v12189_v61  ;;  %v13069_v6 = vadd.f32 %v4186_v23, %v12189_v61 }
 0x43f   : > { %16915 = vst [vmem:[#allocation101_spill] sm:$0xff] %v13059_v11  ;;  %v5647_v2 = vmul.f32 %v5583_v21, %v13046_v18  ;;  %v13073_v31 = vmul.f32 %v12869_v10, %v5370_v8  ;;  %v13076_v40 = vmul.f32 %v12951_v42, %v5385_v41  ;;  %7784 = vpow2.f32 %v6272_v53  ;;  %v13079_v44 = vpop.eup %7780 }
 0x440   : > { %16916 = vst [vmem:[#allocation149_spill] sm:$0xff] %v13061_v49  ;;  %v5774_v17 = vmul.f32 %v5710_v0, %v13021_v58  ;;  %v4920_v47 = vsub.f32 1.0, %v4919_v26  ;;  %v6104_v8 = vsub.f32 0.0, %v13016_v55  ;;  %v6623_v41 = vsel %vm6495_vm4, %v6559_v35, %v6431_v59  ;;  %v16924_v0 = vld [vmem:[#allocation121_spill] sm:$0xff] }
 0x441   : > { %16918 = vst [vmem:[#allocation150_spill] sm:$0xff] %v13066_v7  ;;  %v5711_v63 = vadd.f32 1.4214138, %v5647_v2  ;;  %v13092_v53 = vpop.eup %7782  ;;  %7786 = vrcp.f32 %v13059_v11  ;;  %6714 = vmatpush.msra.mxu1 %v6623_v41  ;;  %v5316_v33 = vsel %vm13085_vm5, %v16906_v34, %v5312_v5  ;;  %v5317_v48 = vand.u32 2147483647, %v16911_v30  ;;  %v16925_v2 = vld [vmem:[#allocation78_spill] sm:$0xff] }
 0x442   : > { %16919 = vst [vmem:[#allocation34_spill] sm:$0xff] %v13069_v6  ;;  %v5838_v23 = vadd.f32 -0.28449672, %v5774_v17  ;;  %7788 = vrcp.f32 %v13061_v49  ;;  %v4406_v26 = vand.u32 2147483647, %v13066_v7  ;;  %v5327_v56 = vadd.f32 %v12545_v20, %v16924_v0  ;;  %v16933_v7 = vld [vmem:[#allocation70_spill] sm:$0xff] }
 0x443   : > { %16920 = vst [vmem:[#allocation45_spill] sm:$0xff] %v13079_v44  ;;  %v13102_v45 = vand.u32 2147483647, %v13069_v6  ;;  %v5775_v59 = vmul.f32 %v5711_v63, %v13046_v18  ;;  %vm5318_vm15 = vcmp.eq.f32.partialorder %v5317_v48, 8.507059e+37  ;;  %v5332_v35 = vand.u32 2147483647, %v16914_v51 }
 0x444   : > { %16923 = vst [vmem:[#allocation125_spill] sm:$0xff] %v13092_v53  ;;  %v5902_v21 = vmul.f32 %v5838_v23, %v13021_v58  ;;  %v6168_v34 = vmul.f32 %v6104_v8, %v13016_v55  ;;  %v6105_v30 = vsub.f32 0.0, %v13019_v12  ;;  %v13116_v17 = vsel %vm5318_vm15, %v16925_v2, %v5316_v33  ;;  %v16927_v48 = vld [vmem:[#allocation103_spill] sm:$0xff] }
 0x445   : > { %v5839_v5 = vadd.f32 -0.28449672, %v5775_v59  ;;  %v13118_v60 = vpop.eup %7784  ;;  %v5568_v63 = vmul.f32 1.0614054, %v13116_v17  ;;  %v5331_v23 = vsel %vm5330_vm9, %v12545_v20, %v5327_v56  ;;  %vm5333_vm13 = vcmp.eq.f32.partialorder %v5332_v35, 8.507059e+37  ;;  %v16928_v59 = vld [vmem:[#allocation29_spill] sm:$0xff] }
 0x446   : > { %16926 = vst [vmem:[#allocation94_spill] sm:$0xff] %v13118_v60  ;;  %v5966_v41 = vadd.f32 0.2548296, %v5902_v21  ;;  %vm6478_vm8 = vcmp.lt.f32.partialorder %v16927_v48, 0.0  ;;  %v13125_v51 = vmul.f32 %v13092_v53, %v13038_v13  ;;  %v4470_v55 = vmul.f32 0.3275911, %v4406_v26 }
 0x447   : > { %v5903_v8 = vmul.f32 %v5839_v5, %v13046_v18  ;;  %v13129_v33 = vsel %vm5333_vm13, %v16928_v59, %v5331_v23  ;;  %v13131_v0 = vpop.eup %7786  ;;  %v4471_v21 = vmul.f32 0.3275911, %v13102_v45  ;;  %v5632_v20 = vadd.f32 -1.4531521, %v5568_v63  ;;  %v16932_v23 = vld [vmem:[#allocation90_spill] sm:$0xff] }
 0x448   : > { %16929 = vst [vmem:[#allocation129_spill] sm:$0xff] %v13131_v0  ;;  %v6030_v2 = vmul.f32 %v5966_v41, %v13021_v58  ;;  %v5569_v56 = vmul.f32 1.0614054, %v13129_v33  ;;  %v13136_v35 = vpop.eup %7788  ;;  %v13139_v60 = vmul.f32 %v13005_v62, %v4920_v47  ;;  %v6169_v44 = vmul.f32 %v6105_v30, %v13019_v12  ;;  %v16934_v41 = vld [vmem:[#allocation37_spill] sm:$0xff] }
 0x449   : > { %16930 = vst [vmem:[#allocation18_spill] sm:$0xff] %v13136_v35  ;;  %v6134_v5 = vsub.f32 0.0, %v4406_v26  ;;  %v5967_v6 = vadd.f32 0.2548296, %v5903_v8  ;;  %vm6479_vm11 = vcmp.lt.f32.partialorder %v16932_v23, 0.0  ;;  %v5696_v38 = vmul.f32 %v5632_v20, %v13116_v17 }
 0x44a   : > { %16931 = vst [vmem:[#allocation107_spill] sm:$0xff] %v13139_v60  ;;  %v6242_v59 = vmul.f32 1.442695, %v6168_v34  ;;  %v6350_v13 = vmul.f32 %v16933_v7, %v6030_v2  ;;  %v5633_v58 = vadd.f32 -1.4531521, %v5569_v56  ;;  %vm5073_vm14 = vweird.f32 %v16934_v41  ;;  %v4212_v34 = vpop.f32.mrf.mxu2 }
 0x44b   : > { %v4935_v63 = vsub.f32 1.0, %v13125_v51  ;;  %v4709_v47 = vmul.f32 %v13131_v0, %v13059_v11  ;;  %v13149_v62 = vadd.f32 1.0, %v4470_v55  ;;  %v6031_v12 = vmul.f32 %v5967_v6, %v13046_v18  ;;  %v16937_v51 = vld [vmem:[#allocation24_spill] sm:$0xff] }
 0x44c   : > { %v13152_v30 = vadd.f32 1.0, %v4471_v21  ;;  %v6414_v8 = vsub.f32 1.0, %v6350_v13  ;;  %v5760_v60 = vadd.f32 1.4214138, %v5696_v38  ;;  %v5697_v7 = vmul.f32 %v5633_v58, %v13129_v33  ;;  %v13164_v38 = vld [vmem:[%s15359_s5] sm:$0x3] }
 0x44d   : > { %16935 = vst [vmem:[#allocation134_spill] sm:$0xff] %v13149_v62  ;;  %v4724_v2 = vmul.f32 %v13136_v35, %v13061_v49  ;;  %v6244_v20 = vmul.f32 1.442695, %v6169_v44  ;;  %v6198_v56 = vmul.f32 %v6134_v5, %v4406_v26  ;;  %v6351_v3 = vmul.f32 %v16937_v51, %v6031_v12  ;;  %v16940_v12 = vld [vmem:[#allocation137_spill] sm:$0xff]  ;;  %v16941_v51 = vld [vmem:[#allocation38_spill] sm:$0xff]  ;;  %v4241_v49 = vpop.f32.mrf.mxu3 }
 0x44e   : > { %16936 = vst [vmem:[#allocation110_spill] sm:$0xff] %v13152_v30  ;;  %v6135_v11 = vsub.f32 0.0, %v13102_v45  ;;  %v6542_v55 = vsub.f32 0.0, %v6414_v8  ;;  %v5824_v19 = vmul.f32 %v5760_v60, %v13116_v17  ;;  %v5761_v6 = vadd.f32 1.4214138, %v5697_v7 }
 0x44f   : > { %v4710_v18 = vsub.f32 1.0, %v4709_v47  ;;  %7790 = vrcp.f32 %v13149_v62  ;;  %v6415_v13 = vsub.f32 1.0, %v6351_v3  ;;  %v13167_v44 = vadd.f32 %v4212_v34, %v12159_v54  ;;  %v16939_v47 = vld [vmem:[#allocation123_spill] sm:$0xff] }
 0x450   : > { %7792 = vrcp.f32 %v13152_v30  ;;  %v6606_v26 = vsel %vm6478_vm8, %v6542_v55, %v6414_v8  ;;  %v5888_v21 = vadd.f32 -0.28449672, %v5824_v19  ;;  %v5825_v60 = vmul.f32 %v5761_v6, %v13129_v33 }
 0x451   : > { %16938 = vst [vmem:[#allocation122_spill] sm:$0xff] %v13167_v44  ;;  %v4725_v5 = vsub.f32 1.0, %v4724_v2  ;;  %v6302_v58 = vmul.f32 1.442695, %v6198_v56  ;;  %6695 = vmatpush.msra.mxu0 %v6606_v26  ;;  %v6543_v3 = vsub.f32 0.0, %v6415_v13  ;;  %v5072_v7 = vadd.f32 %v16940_v12, %v16939_v47  ;;  %v16947_v26 = vld [vmem:[#allocation135_spill] sm:$0xff] }
 0x452   : > { %vm5088_vm0 = vweird.f32 %v16941_v51  ;;  %v6199_v34 = vmul.f32 %v6135_v11, %v13102_v45  ;;  %vm16942_vm1 = vcmask 261120   ;;  %v5952_v48 = vmul.f32 %v5888_v21, %v13116_v17 }
 0x453   : > { %7297 = vmatmul.msk.f32.vlgmr.msra.gmra.mxu0 %vm16942_vm1, %v13164_v38  ;;  %v5889_v19 = vadd.f32 -0.28449672, %v5825_v60  ;;  %vm5074_vm2 = vweird.f32 %v16940_v12  ;;  %v6607_v8 = vsel %vm6479_vm11, %v6543_v3, %v6415_v13  ;;  %v13184_v2 = vand.u32 2147483647, %v13167_v44  ;;  %vm16949_vm6 = vmmov %vm16942_vm1  ;;  %v16952_v60 = vld [vmem:[#allocation99_spill] sm:$0xff] }
 0x454   : > { %v5077_v56 = vand.u32 2147483647, %v16934_v41  ;;  %v5079_v55 = vand.u32 2147483648, %v16934_v41  ;;  %v13189_v11 = vmul.f32 %v13092_v53, %v4935_v63  ;;  %7794 = vpow2.f32 %v6242_v59  ;;  %6715 = vmatpush.msra.mxu1 %v6607_v8  ;;  %vm13194_vm3 = vmor %vm5073_vm14, %vm5074_vm2 }
 0x455   : > { %v6016_v45 = vadd.f32 0.2548296, %v5952_v48  ;;  %v5953_v6 = vmul.f32 %v5889_v19, %v13129_v33  ;;  %v13198_v13 = vpop.eup %7790  ;;  %vm6528_vm4 = vcmp.lt.f32.partialorder %v16947_v26, 0.0  ;;  %v13202_v21 = vmul.f32 %v13131_v0, %v4710_v18  ;;  %7298 = vmatmul.msk.f32.vlgmr.msra.gmra.mxu1 %vm16949_vm6, %v13164_v38  ;;  %v16954_v48 = vld [vmem:[#allocation14_spill] sm:$0xff] }
 0x456   : > { %16943 = vst [vmem:[#allocation60_spill] sm:$0xff] %v13189_v11  ;;  %7796 = vpow2.f32 %v6244_v20  ;;  %v13207_v59 = vadd.f32 %v4241_v49, %v12159_v54  ;;  %v5076_v41 = vsel %vm13194_vm3, %v16940_v12, %v5072_v7  ;;  %v13212_v63 = vpop.eup %7792  ;;  %vm4833_vm7 = vweird.f32 %v16952_v60  ;;  %v16955_v7 = vld [vmem:[#allocation148_spill] sm:$0xff]  ;;  %v16986_v11 = vld [vmem:[#allocation95_spill] sm:$0xff] }
 0x457   : > { %16946 = vst [vmem:[#allocation89_spill] sm:$0xff] %v13198_v13  ;;  %v13216_v3 = vmul.f32 %v13136_v35, %v4725_v5  ;;  %v6080_v18 = vmul.f32 %v6016_v45, %v13116_v17  ;;  %v6017_v20 = vadd.f32 0.2548296, %v5953_v6  ;;  %v5080_v47 = vor.u32 1.1754944e-38, %v5079_v55  ;;  %v16956_v17 = vld [vmem:[#allocation98_spill] sm:$0xff]  ;;  %v16958_v45 = vld [vmem:[#allocation68_spill] sm:$0xff] }
 0x458   : > { %16948 = vst [vmem:[#allocation62_spill] sm:$0xff] %v13202_v21  ;;  %vm6529_vm12 = vcmp.lt.f32.partialorder %v16954_v48, 0.0  ;;  %7798 = vpow2.f32 %v6302_v58  ;;  %v13220_v49 = vmul.f32 1.442695, %v6199_v34  ;;  %v4456_v19 = vmul.f32 0.3275911, %v13184_v2 }
 0x459   : > { %16950 = vst [vmem:[#allocation97_spill] sm:$0xff] %v13207_v59  ;;  %vm5078_vm10 = vcmp.eq.f32.partialorder %v5077_v56, 8.507059e+37  ;;  %v13225_v12 = vmul.f32 %v13198_v13, %v13149_v62  ;;  %v6400_v8 = vmul.f32 %v16955_v7, %v6080_v18  ;;  %v6081_v5 = vmul.f32 %v6017_v20, %v13129_v33  ;;  %v16957_v55 = vld [vmem:[#allocation22_spill] sm:$0xff]  ;;  %v16960_v7 = vld [vmem:[#allocation9_spill] sm:$0xff] }
 0x45a   : > { %16951 = vst [vmem:[#allocation143_spill] sm:$0xff] %v13212_v63  ;;  %v13229_v23 = vsel %vm5078_vm10, %v5080_v47, %v5076_v41  ;;  %vm4848_vm5 = vweird.f32 %v16956_v17  ;;  %v13234_v58 = vmul.f32 %v13212_v63, %v13152_v30  ;;  %v4393_v34 = vand.u32 2147483647, %v13207_v59  ;;  %v13240_v44 = vpop.eup %7794 }
 0x45b   : > { %16953 = vst [vmem:[#allocation117_spill] sm:$0xff] %v13216_v3  ;;  %v5552_v56 = vmul.f32 1.0614054, %v13229_v23  ;;  %v5087_v6 = vadd.f32 %v16958_v45, %v16957_v55  ;;  %v6464_v18 = vsub.f32 1.0, %v6400_v8  ;;  %v6401_v33 = vmul.f32 %v16960_v7, %v6081_v5  ;;  %v16965_v8 = vld [vmem:[#allocation11_spill] sm:$0xff] }
 0x45c   : > { %16959 = vst [vmem:[#allocation105_spill] sm:$0xff] %v13240_v44  ;;  %vm5089_vm15 = vweird.f32 %v16958_v45  ;;  %v5092_v41 = vand.u32 2147483647, %v16941_v51  ;;  %v13245_v20 = vpop.eup %7796  ;;  %v13247_v47 = vadd.f32 1.0, %v4456_v19  ;;  %v5094_v55 = vand.u32 2147483648, %v16941_v51  ;;  %v16966_v44 = vld [vmem:[#allocation86_spill] sm:$0xff] }
 0x45d   : > { %16961 = vst [vmem:[#allocation16_spill] sm:$0xff] %v13245_v20  ;;  %v5616_v35 = vadd.f32 -1.4531521, %v5552_v56  ;;  %vm13251_vm9 = vmor %vm5088_vm0, %vm5089_vm15  ;;  %v4832_v5 = vadd.f32 %v16966_v44, %v16965_v8  ;;  %v6592_v7 = vsub.f32 0.0, %v6464_v18  ;;  %v6465_v3 = vsub.f32 1.0, %v6401_v33 }
 0x45e   : > { %16962 = vst [vmem:[#allocation96_spill] sm:$0xff] %v13247_v47  ;;  %v5091_v20 = vsel %vm13251_vm9, %v16958_v45, %v5087_v6  ;;  %vm4834_vm13 = vweird.f32 %v16966_v44  ;;  %v13262_v19 = vpop.eup %7798  ;;  %v6120_v56 = vsub.f32 0.0, %v13184_v2  ;;  %v6121_v0 = vsub.f32 0.0, %v4393_v34 }
 0x45f   : > { %16967 = vst [vmem:[#allocation50_spill] sm:$0xff] %v13262_v19  ;;  %v5680_v21 = vmul.f32 %v5616_v35, %v13229_v23  ;;  %v5095_v53 = vor.u32 1.1754944e-38, %v5094_v55  ;;  %v6656_v51 = vsel %vm6528_vm4, %v6592_v7, %v6464_v18  ;;  %v6593_v8 = vsub.f32 0.0, %v6465_v3  ;;  %vm13274_vm11 = vmor %vm4833_vm7, %vm4834_vm13  ;;  %v4244_v19 = vpop.f32.mrf.mxu3 }
 0x460   : > { %vm5093_vm8 = vcmp.eq.f32.partialorder %v5092_v41, 8.507059e+37  ;;  %v4837_v33 = vand.u32 2147483647, %v16952_v60  ;;  %7800 = vrcp.f32 %v13247_v47  ;;  %6732 = vmatpush.msra.mxu2 %v6656_v51  ;;  %v4839_v35 = vand.u32 2147483648, %v16952_v60 }
 0x461   : > { %v5744_v59 = vadd.f32 1.4214138, %v5680_v21  ;;  %v13270_v45 = vsel %vm5093_vm8, %v5095_v53, %v5091_v20  ;;  %v6657_v26 = vsel %vm6529_vm12, %v6593_v8, %v6465_v3  ;;  %v4836_v41 = vsel %vm13274_vm11, %v16966_v44, %v4832_v5  ;;  %v16970_v21 = vld [vmem:[#allocation41_spill] sm:$0xff]  ;;  %v16971_v53 = vld [vmem:[#allocation42_spill] sm:$0xff]  ;;  %v4160_v3 = vpop.f32.mrf.mxu0 }
 0x462   : > { %v5553_v18 = vmul.f32 1.0614054, %v13270_v45  ;;  %v4847_v20 = vadd.f32 %v16971_v53, %v16970_v21  ;;  %6752 = vmatpush.msra.mxu3 %v6657_v26  ;;  %v4840_v7 = vor.u32 1.1754944e-38, %v4839_v35  ;;  %vm4849_vm14 = vweird.f32 %v16971_v53 }
 0x463   : > { %v5808_v55 = vmul.f32 %v5744_v59, %v13229_v23  ;;  %v4852_v60 = vand.u32 2147483647, %v16956_v17  ;;  %v6184_v48 = vmul.f32 %v6120_v56, %v13184_v2  ;;  %vm4838_vm0 = vcmp.eq.f32.partialorder %v4837_v33, 8.507059e+37  ;;  %vm13293_vm1 = vmor %vm4848_vm5, %vm4849_vm14 }
 0x464   : > { %v5617_v51 = vadd.f32 -1.4531521, %v5553_v18  ;;  %v4854_v5 = vand.u32 2147483648, %v16956_v17  ;;  %v4457_v8 = vmul.f32 0.3275911, %v4393_v34  ;;  %v13298_v6 = vsel %vm4838_vm0, %v4840_v7, %v4836_v41 }
 0x465   : > { %v5872_v59 = vadd.f32 -0.28449672, %v5808_v55  ;;  %v4851_v35 = vsel %vm13293_vm1, %v16971_v53, %v4847_v20  ;;  %v6185_v2 = vmul.f32 %v6121_v0, %v4393_v34  ;;  %v5536_v33 = vmul.f32 1.0614054, %v13298_v6 }
 0x466   : > { %v5681_v56 = vmul.f32 %v5617_v51, %v13270_v45  ;;  %v4855_v26 = vor.u32 1.1754944e-38, %v4854_v5  ;;  %v13305_v18 = vpop.eup %7800  ;;  %v5160_v21 = vsub.f32 1.0, %v13225_v12  ;;  %v13309_v17 = vadd.f32 %v4160_v3, %v12164_v4  ;;  %v16977_v5 = vld [vmem:[#allocation87_spill] sm:$0xff] }
 0x467   : > { %16974 = vst [vmem:[#allocation32_spill] sm:$0xff] %v13305_v18  ;;  %v5936_v41 = vmul.f32 %v5872_v59, %v13229_v23  ;;  %vm4853_vm2 = vcmp.eq.f32.partialorder %v4852_v60, 8.507059e+37  ;;  %v6274_v55 = vmul.f32 1.442695, %v6184_v48  ;;  %v5600_v44 = vadd.f32 -1.4531521, %v5536_v33 }
 0x468   : > { %16975 = vst [vmem:[#allocation121_spill] sm:$0xff] %v13309_v17  ;;  %v5745_v7 = vadd.f32 1.4214138, %v5681_v56  ;;  %v13312_v53 = vsel %vm4853_vm2, %v4855_v26, %v4851_v35  ;;  %v5175_v0 = vsub.f32 1.0, %v13234_v58  ;;  %v13315_v34 = vadd.f32 1.0, %v4457_v8  ;;  %v16978_v12 = vld [vmem:[#allocation75_spill] sm:$0xff]  ;;  %v4189_v8 = vpop.f32.mrf.mxu1 }
 0x469   : > { %v6000_v20 = vadd.f32 0.2548296, %v5936_v41  ;;  %v5537_v51 = vmul.f32 1.0614054, %v13312_v53  ;;  %vm4593_vm3 = vweird.f32 %v16977_v5  ;;  %vm6512_vm4 = vcmp.lt.f32.partialorder %v16978_v12, 0.0  ;;  %v16981_v41 = vld [vmem:[#allocation10_spill] sm:$0xff] }
 0x46a   : > { %16976 = vst [vmem:[#allocation78_spill] sm:$0xff] %v13315_v34  ;;  %7802 = vpow2.f32 %v13220_v49  ;;  %v6276_v3 = vmul.f32 1.442695, %v6185_v2  ;;  %v5809_v60 = vmul.f32 %v5745_v7, %v13270_v45  ;;  %v5664_v48 = vmul.f32 %v5600_v44, %v13298_v6 }
 0x46b   : > { %v13325_v59 = vmul.f32 %v13305_v18, %v13247_v47  ;;  %v13328_v58 = vand.u32 2147483647, %v13309_v17  ;;  %v6064_v35 = vmul.f32 %v6000_v20, %v13229_v23  ;;  %v5601_v56 = vadd.f32 -1.4531521, %v5537_v51  ;;  %v16982_v47 = vld [vmem:[#allocation91_spill] sm:$0xff] }
 0x46c   : > { %v13332_v33 = vmul.f32 %v13198_v13, %v5160_v21  ;;  %7804 = vpow2.f32 %v6274_v55  ;;  %v5873_v49 = vadd.f32 -0.28449672, %v5809_v60  ;;  %v5728_v2 = vadd.f32 1.4214138, %v5664_v48  ;;  %v4215_v48 = vpop.f32.mrf.mxu2 }
 0x46d   : > { %v13335_v26 = vmul.f32 %v13212_v63, %v5175_v0  ;;  %7806 = vrcp.f32 %v13315_v34  ;;  %v6384_v7 = vmul.f32 %v16981_v41, %v6064_v35  ;;  %v5665_v44 = vmul.f32 %v5601_v56, %v13312_v53 }
 0x46e   : > { %16979 = vst [vmem:[#allocation103_spill] sm:$0xff] %v13332_v33  ;;  %vm4608_vm6 = vweird.f32 %v16982_v47  ;;  %7808 = vpow2.f32 %v6276_v3  ;;  %v13342_v23 = vadd.f32 %v4189_v8, %v12164_v4  ;;  %v5937_v21 = vmul.f32 %v5873_v49, %v13270_v45  ;;  %v16985_v3 = vld [vmem:[#allocation23_spill] sm:$0xff]  ;;  %v16987_v49 = vld [vmem:[#allocation58_spill] sm:$0xff] }
 0x46f   : > { %16980 = vst [vmem:[#allocation29_spill] sm:$0xff] %v13335_v26  ;;  %v5792_v55 = vmul.f32 %v5728_v2, %v13298_v6  ;;  %v4486_v0 = vmul.f32 0.3275911, %v13328_v58  ;;  %v6448_v51 = vsub.f32 1.0, %v6384_v7  ;;  %v5729_v60 = vadd.f32 1.4214138, %v5665_v44 }
 0x470   : > { %16983 = vst [vmem:[#allocation90_spill] sm:$0xff] %v13342_v23  ;;  %v13348_v35 = vpop.eup %7802  ;;  %v6001_v56 = vadd.f32 0.2548296, %v5937_v21  ;;  %v4592_v8 = vadd.f32 %v16986_v11, %v16985_v3  ;;  %vm4594_vm7 = vweird.f32 %v16986_v11  ;;  %vm6513_vm12 = vcmp.lt.f32.partialorder %v16987_v49, 0.0 }
 0x471   : > { %16984 = vst [vmem:[#allocation70_spill] sm:$0xff] %v13348_v35  ;;  %v5856_v41 = vadd.f32 -0.28449672, %v5792_v55  ;;  %v6576_v20 = vsub.f32 0.0, %v6448_v51  ;;  %v5793_v17 = vmul.f32 %v5729_v60, %v13312_v53  ;;  %v4597_v7 = vand.u32 2147483647, %v16977_v5  ;;  %vm13378_vm10 = vmor %vm4593_vm3, %vm4594_vm7 }
 0x472   : > { %v13357_v44 = vpop.eup %7804  ;;  %v13360_v21 = vand.u32 2147483647, %v13342_v23  ;;  %v6065_v55 = vmul.f32 %v6001_v56, %v13270_v45  ;;  %v13365_v35 = vadd.f32 %v4215_v48, %v12189_v61  ;;  %v13372_v26 = vadd.f32 %v4244_v19, %v12189_v61  ;;  %v16998_v23 = vld [vmem:[#allocation82_spill] sm:$0xff] }
 0x473   : > { %16988 = vst [vmem:[#allocation37_spill] sm:$0xff] %v13357_v44  ;;  %v5920_v3 = vmul.f32 %v5856_v41, %v13298_v6  ;;  %v13367_v63 = vpop.eup %7806  ;;  %v6640_v2 = vsel %vm6512_vm4, %v6576_v20, %v6448_v51  ;;  %v5857_v60 = vadd.f32 -0.28449672, %v5793_v17  ;;  %v4599_v48 = vand.u32 2147483648, %v16977_v5  ;;  %v16995_v41 = vld [vmem:[#allocation13_spill] sm:$0xff]  ;;  %v16996_v17 = vld [vmem:[#allocation128_spill] sm:$0xff] }
 0x474   : > { %16989 = vst [vmem:[#allocation24_spill] sm:$0xff] %v13365_v35  ;;  %v13383_v56 = vpop.eup %7808  ;;  %6733 = vmatpush.msra.mxu2 %v6640_v2  ;;  %v6385_v12 = vmul.f32 %v16995_v41, %v6065_v55  ;;  %v4596_v19 = vsel %vm13378_vm10, %v16986_v11, %v4592_v8  ;;  %v16997_v51 = vld [vmem:[#allocation72_spill] sm:$0xff]  ;;  %vm6496_vm5 = vcmp.lt.f32.partialorder %v16998_v23, 0.0  ;;  %vm4598_vm15 = vcmp.eq.f32.partialorder %v4597_v7, 8.507059e+37 }
 0x475   : > { %16990 = vst [vmem:[#allocation123_spill] sm:$0xff] %v13367_v63  ;;  %v5984_v20 = vadd.f32 0.2548296, %v5920_v3  ;;  %v4607_v44 = vadd.f32 %v16997_v51, %v16996_v17  ;;  %v5921_v13 = vmul.f32 %v5857_v60, %v13312_v53  ;;  %v4600_v33 = vor.u32 1.1754944e-38, %v4599_v48  ;;  %v17002_v60 = vld [vmem:[#allocation73_spill] sm:$0xff]  ;;  %v17003_v48 = vld [vmem:[#allocation138_spill] sm:$0xff] }
 0x476   : > { %16991 = vst [vmem:[#allocation137_spill] sm:$0xff] %v13372_v26  ;;  %vm4609_vm9 = vweird.f32 %v16997_v51  ;;  %v6449_v5 = vsub.f32 1.0, %v6385_v12  ;;  %v4612_v55 = vand.u32 2147483647, %v16982_v47  ;;  %v4614_v3 = vand.u32 2147483648, %v16982_v47 }
 0x477   : > { %16994 = vst [vmem:[#allocation38_spill] sm:$0xff] %v13383_v56  ;;  %v6048_v2 = vmul.f32 %v5984_v20, %v13298_v6  ;;  %v13397_v45 = vadd.f32 1.0, %v4486_v0  ;;  %v5985_v11 = vadd.f32 0.2548296, %v5921_v13  ;;  %v13400_v8 = vand.u32 2147483647, %v13365_v35  ;;  %vm13406_vm13 = vmor %vm4608_vm6, %vm4609_vm9 }
 0x478   : > { %v13402_v41 = vsel %vm4598_vm15, %v4600_v33, %v4596_v19  ;;  %vm6497_vm8 = vcmp.lt.f32.partialorder %v17002_v60, 0.0  ;;  %v6577_v6 = vsub.f32 0.0, %v6449_v5  ;;  %v4611_v13 = vsel %vm13406_vm13, %v16997_v51, %v4607_v44  ;;  %v17004_v44 = vld [vmem:[#allocation77_spill] sm:$0xff] }
 0x479   : > { %16999 = vst [vmem:[#allocation135_spill] sm:$0xff] %v13397_v45  ;;  %v6368_v12 = vmul.f32 %v17003_v48, %v6048_v2  ;;  %v5520_v0 = vmul.f32 1.0614054, %v13402_v41  ;;  %v4487_v33 = vmul.f32 0.3275911, %v13360_v21  ;;  %v6049_v20 = vmul.f32 %v5985_v11, %v13312_v53  ;;  %v4267_v53 = vpop.f32.mrf.mxu0 }
 0x47a   : > { %v13419_v47 = vand.u32 2147483647, %v13372_v26  ;;  %v4615_v19 = vor.u32 1.1754944e-38, %v4614_v3  ;;  %v6641_v17 = vsel %vm6513_vm12, %v6577_v6, %v6449_v5  ;;  %vm4613_vm11 = vcmp.eq.f32.partialorder %v4612_v55, 8.507059e+37 }
 0x47b   : > { %v6432_v56 = vsub.f32 1.0, %v6368_v12  ;;  %v5584_v35 = vadd.f32 -1.4531521, %v5520_v0  ;;  %v4964_v2 = vmul.f32 %v13367_v63, %v13315_v34  ;;  %7810 = vrcp.f32 %v13397_v45  ;;  %6753 = vmatpush.msra.mxu3 %v6641_v17 }
 0x47c   : > { %v6369_v51 = vmul.f32 %v17004_v44, %v6049_v20  ;;  %v13427_v7 = vsel %vm4613_vm11, %v4615_v19, %v4611_v13  ;;  %v4472_v3 = vmul.f32 0.3275911, %v13400_v8  ;;  %v17005_v55 = vsub.f32 1.0, %v13325_v59  ;;  %v4296_v13 = vpop.f32.mrf.mxu1  ;;  %v4218_v44 = vpop.f32.mrf.mxu2 }
 0x47d   : > { %v6560_v11 = vsub.f32 0.0, %v6432_v56  ;;  %v5648_v49 = vmul.f32 %v5584_v35, %v13402_v41  ;;  %v5521_v5 = vmul.f32 1.0614054, %v13427_v7  ;;  %v13437_v48 = vadd.f32 1.0, %v4487_v33 }
 0x47e   : > { %v13435_v6 = vmul.f32 %v13305_v18, %v17005_v55  ;;  %v6433_v12 = vsub.f32 1.0, %v6369_v51  ;;  %v4473_v0 = vmul.f32 0.3275911, %v13419_v47  ;;  %v13443_v35 = vadd.f32 %v4267_v53, %v12151_v37  ;;  %v4247_v53 = vpop.f32.mrf.mxu3 }
 0x47f   : > { %17007 = vst [vmem:[#allocation14_spill] sm:$0xff] %v13437_v48  ;;  %v6624_v20 = vsel %vm6496_vm5, %v6560_v11, %v6432_v56  ;;  %v5712_v19 = vadd.f32 1.4214138, %v5648_v49  ;;  %v5585_v17 = vadd.f32 -1.4531521, %v5521_v5  ;;  %v4965_v26 = vsub.f32 1.0, %v4964_v2 }
 0x480   : > { %17006 = vst [vmem:[#allocation99_spill] sm:$0xff] %v13435_v6  ;;  %v17009_v59 = vsub.f32 0.0, %v13328_v58  ;;  %v6151_v33 = vsub.f32 0.0, %v13360_v21  ;;  %6734 = vmatpush.msra.mxu2 %v6624_v20  ;;  %v6561_v51 = vsub.f32 0.0, %v6433_v12  ;;  %v13449_v18 = vadd.f32 1.0, %v4472_v3  ;;  %v17017_v6 = vld [vmem:[#allocation40_spill] sm:$0xff] }
 0x481   : > { %17008 = vst [vmem:[#allocation148_spill] sm:$0xff] %v13443_v35  ;;  %v5776_v23 = vmul.f32 %v5712_v19, %v13402_v41  ;;  %v5649_v56 = vmul.f32 %v5585_v17, %v13427_v7  ;;  %v13454_v11 = vadd.f32 %v4296_v13, %v12151_v37  ;;  %v13456_v49 = vpop.eup %7810  ;;  %v13461_v5 = vadd.f32 1.0, %v4473_v0 }
 0x482   : > { %v6214_v55 = vmul.f32 %v17009_v59, %v13328_v58  ;;  %v6625_v2 = vsel %vm6497_vm8, %v6561_v51, %v6433_v12  ;;  %v6136_v58 = vsub.f32 0.0, %v13400_v8  ;;  %v13464_v3 = vadd.f32 %v4218_v44, %v12164_v4 }
 0x483   : > { %17010 = vst [vmem:[#allocation98_spill] sm:$0xff] %v13454_v11  ;;  %7812 = vrcp.f32 %v13437_v48  ;;  %6754 = vmatpush.msra.mxu3 %v6625_v2  ;;  %v5840_v20 = vadd.f32 -0.28449672, %v5776_v23  ;;  %v5713_v19 = vadd.f32 1.4214138, %v5649_v56  ;;  %v5409_v17 = vand.u32 2147483648, %v13397_v45 }
 0x484   : > { %17011 = vst [vmem:[#allocation22_spill] sm:$0xff] %v13464_v3  ;;  %v4378_v13 = vand.u32 2147483647, %v13443_v35  ;;  %v6334_v59 = vmul.f32 1.442695, %v6214_v55  ;;  %v6215_v60 = vmul.f32 %v6151_v33, %v13360_v21  ;;  %v13471_v12 = vadd.f32 %v4247_v53, %v12164_v4 }
 0x485   : > { %7814 = vrcp.f32 %v13449_v18  ;;  %v5904_v0 = vmul.f32 %v5840_v20, %v13402_v41  ;;  %v5777_v44 = vmul.f32 %v5713_v19, %v13427_v7  ;;  %v4379_v51 = vand.u32 2147483647, %v13454_v11  ;;  %v17013_v20 = vld [vmem:[#allocation112_spill] sm:$0xff] }
 0x486   : > { %17012 = vst [vmem:[#allocation68_spill] sm:$0xff] %v13471_v12  ;;  %v13479_v23 = vmul.f32 %v13456_v49, %v13397_v45  ;;  %v6200_v56 = vmul.f32 %v6136_v58, %v13400_v8  ;;  %v6137_v55 = vsub.f32 0.0, %v13419_v47  ;;  %v13484_v21 = vand.u32 2147483647, %v13464_v3 }
 0x487   : > { %7816 = vrcp.f32 %v13461_v5  ;;  %v5968_v33 = vadd.f32 0.2548296, %v5904_v0  ;;  %v5841_v53 = vadd.f32 -0.28449672, %v5777_v44  ;;  %v4442_v2 = vmul.f32 0.3275911, %v4378_v13 }
 0x488   : > { %vm6480_vm14 = vcmp.lt.f32.partialorder %v17013_v20, 0.0  ;;  %v13489_v19 = vmul.f32 %v13367_v63, %v4965_v26  ;;  %v13491_v11 = vor.u32 1.1754944e-38, %v5409_v17  ;;  %v6336_v35 = vmul.f32 1.442695, %v6215_v60 }
 0x489   : > { %v13494_v8 = vand.u32 2147483647, %v13471_v12  ;;  %v13496_v58 = vpop.eup %7812  ;;  %vm5343_vm0 = vweird.f32 %v12637_v1  ;;  %vm5344_vm1 = vweird.f32 %v12695_v27  ;;  %7818 = vpow2.f32 %v6334_v59  ;;  %v17019_v59 = vld [vmem:[#allocation111_spill] sm:$0xff] }
 0x48a   : > { %17014 = vst [vmem:[#allocation9_spill] sm:$0xff] %v13489_v19  ;;  %v6032_v0 = vmul.f32 %v5968_v33, %v13402_v41  ;;  %v5905_v44 = vmul.f32 %v5841_v53, %v13427_v7  ;;  %v4443_v3 = vmul.f32 0.3275911, %v4379_v51  ;;  %v5400_v26 = vsub.f32 1.0, %v13479_v23  ;;  %vm13557_vm7 = vmor %vm5343_vm0, %vm5344_vm1 }
 0x48b   : > { %17015 = vst [vmem:[#allocation11_spill] sm:$0xff] %v13491_v11  ;;  %v6306_v17 = vmul.f32 1.442695, %v6200_v56  ;;  %v6106_v63 = vsub.f32 0.0, %v4378_v13  ;;  %v4488_v60 = vmul.f32 0.3275911, %v13484_v21  ;;  %v13504_v19 = vpop.eup %7814  ;;  %v6201_v12 = vmul.f32 %v6137_v55, %v13419_v47 }
 0x48c   : > { %17016 = vst [vmem:[#allocation86_spill] sm:$0xff] %v13504_v19  ;;  %v6352_v34 = vmul.f32 %v17017_v6, %v6032_v0  ;;  %v5969_v11 = vadd.f32 0.2548296, %v5905_v44  ;;  %v13508_v30 = vadd.f32 1.0, %v4442_v2  ;;  %vm6481_vm2 = vcmp.lt.f32.partialorder %v17019_v59, 0.0  ;;  %v4270_v2 = vpop.f32.mrf.mxu0 }
 0x48d   : > { %vm5358_vm3 = vweird.f32 %v12646_v29  ;;  %vm5359_vm4 = vweird.f32 %v12705_v32  ;;  %v5414_v41 = vmul.f32 %v13496_v58, %v13437_v48  ;;  %v5424_v23 = vand.u32 2147483648, %v13437_v48  ;;  %v13517_v47 = vpop.eup %7816 }
 0x48e   : > { %17018 = vst [vmem:[#allocation41_spill] sm:$0xff] %v13508_v30  ;;  %7820 = vpow2.f32 %v6336_v35  ;;  %v4489_v56 = vmul.f32 0.3275911, %v13494_v8  ;;  %v6416_v6 = vsub.f32 1.0, %v6352_v34  ;;  %v6033_v55 = vmul.f32 %v5969_v11, %v13427_v7  ;;  %vm13584_vm12 = vmor %vm5358_vm3, %vm5359_vm4 }
 0x48f   : > { %17020 = vst [vmem:[#allocation42_spill] sm:$0xff] %v13517_v47  ;;  %v13520_v33 = vadd.f32 1.0, %v4443_v3  ;;  %v6107_v53 = vsub.f32 0.0, %v4379_v51  ;;  %v5189_v0 = vmul.f32 %v13504_v19, %v13449_v18  ;;  %7822 = vpow2.f32 %v6306_v17  ;;  %v13526_v48 = vpop.eup %7818 }
 0x490   : > { %v6170_v44 = vmul.f32 %v6106_v63, %v4378_v13  ;;  %v13524_v62 = vadd.f32 1.0, %v4488_v60  ;;  %v6308_v35 = vmul.f32 1.442695, %v6201_v12  ;;  %v6544_v45 = vsub.f32 0.0, %v6416_v6 }
 0x491   : > { %17021 = vst [vmem:[#allocation87_spill] sm:$0xff] %v13520_v33  ;;  %v6353_v39 = vmul.f32 %v17022_v50, %v6033_v55  ;;  %7824 = vrcp.f32 %v13508_v30  ;;  %v5204_v34 = vmul.f32 %v13517_v47, %v13461_v5  ;;  %v6152_v7 = vsub.f32 0.0, %v13484_v21 }
 0x492   : > { %v13533_v11 = vadd.f32 1.0, %v4489_v56  ;;  %v13536_v3 = vadd.f32 %v4270_v2, %v12159_v54  ;;  %v6608_v63 = vsel %vm6480_vm14, %v6544_v45, %v6416_v6  ;;  %7826 = vrcp.f32 %v13520_v33 }
 0x493   : > { %v6417_v13 = vsub.f32 1.0, %v6353_v39  ;;  %v6171_v12 = vmul.f32 %v6107_v53, %v4379_v51  ;;  %v5415_v17 = vsub.f32 1.0, %v5414_v41  ;;  %v5190_v60 = vsub.f32 1.0, %v5189_v0  ;;  %6735 = vmatpush.msra.mxu2 %v6608_v63 }
 0x494   : > { %17023 = vst [vmem:[#allocation75_spill] sm:$0xff] %v13536_v3  ;;  %v13541_v50 = vpop.eup %7820  ;;  %v6246_v55 = vmul.f32 1.442695, %v6170_v44  ;;  %7828 = vrcp.f32 %v13524_v62  ;;  %v13545_v56 = vmul.f32 %v13456_v49, %v5400_v26  ;;  %v13547_v2 = vor.u32 1.1754944e-38, %v5424_v23  ;;  %v4299_v26 = vpop.f32.mrf.mxu1 }
 0x495   : > { %7830 = vpow2.f32 %v6308_v35  ;;  %v6545_v20 = vsub.f32 0.0, %v6417_v13  ;;  %vm17024_vm6 = vcmask 261120   ;;  %v13551_v39 = vpop.eup %7822  ;;  %v4394_v51 = vand.u32 2147483647, %v13536_v3 }
 0x496   : > { %7299 = vmatmul.msk.f32.vlgmr.msra.gmra.mxu2 %vm17024_vm6, %v13164_v38  ;;  %17025 = vst [vmem:[#allocation10_spill] sm:$0xff] %v13551_v39  ;;  %7832 = vrcp.f32 %v13533_v11  ;;  %v5342_v41 = vadd.f32 %v12695_v27, %v12791_v52  ;;  %v5347_v23 = vand.u32 2147483647, %v12637_v1  ;;  %v5205_v53 = vsub.f32 1.0, %v5204_v34  ;;  %vm17033_vm10 = vmmov %vm17024_vm6 }
 0x497   : > { %v13566_v6 = vpop.eup %7824  ;;  %v6609_v0 = vsel %vm6481_vm2, %v6545_v20, %v6417_v13  ;;  %v6248_v44 = vmul.f32 1.442695, %v6171_v12  ;;  %v6216_v35 = vmul.f32 %v6152_v7, %v13484_v21  ;;  %v13572_v63 = vmul.f32 %v13496_v58, %v5415_v17 }
 0x498   : > { %17028 = vst [vmem:[#allocation91_spill] sm:$0xff] %v13566_v6  ;;  %v13575_v3 = vmul.f32 %v13504_v19, %v5190_v60  ;;  %6755 = vmatpush.msra.mxu3 %v6609_v0  ;;  %7834 = vpow2.f32 %v6246_v55  ;;  %v6153_v52 = vsub.f32 0.0, %v13494_v8  ;;  %v13578_v1 = vpop.eup %7826  ;;  %v5439_v21 = vand.u32 2147483648, %v13524_v62 }
 0x499   : > { %17030 = vst [vmem:[#allocation95_spill] sm:$0xff] %v13578_v1  ;;  %7300 = vmatmul.msk.f32.vlgmr.msra.gmra.mxu3 %vm17033_vm10, %v13164_v38  ;;  %v13592_v34 = vadd.f32 %v4299_v26, %v12159_v54  ;;  %v5346_v7 = vsel %vm13557_vm7, %v12695_v27, %v5342_v41  ;;  %vm5348_vm5 = vcmp.eq.f32.partialorder %v5347_v23, 8.507059e+37  ;;  %vm5103_vm15 = vweird.f32 %v12558_v16 }
 0x49a   : > { %17029 = vst [vmem:[#allocation23_spill] sm:$0xff] %v13575_v3  ;;  %v13597_v13 = vpop.eup %7828  ;;  %v4739_v12 = vmul.f32 %v13566_v6, %v13508_v30  ;;  %v6122_v17 = vsub.f32 0.0, %v4394_v51  ;;  %v13603_v38 = vsel %vm5348_vm5, %v12707_v25, %v5346_v7  ;;  %v5357_v60 = vadd.f32 %v12705_v32, %v12800_v15  ;;  %v17090_v3 = vld [vmem:[#allocation49_spill] sm:$0xff] }
 0x49b   : > { %17034 = vst [vmem:[#allocation58_spill] sm:$0xff] %v13592_v34  ;;  %v13607_v55 = vpop.eup %7830  ;;  %v13610_v20 = vmul.f32 %v13517_v47, %v5205_v53  ;;  %7836 = vpow2.f32 %v6248_v44  ;;  %v6338_v27 = vmul.f32 1.442695, %v6216_v35  ;;  %v5570_v45 = vmul.f32 1.0614054, %v13603_v38  ;;  %v17040_v47 = vld [vmem:[#allocation88_spill] sm:$0xff] }
 0x49c   : > { %17035 = vst [vmem:[#allocation13_spill] sm:$0xff] %v13607_v55  ;;  %v13613_v26 = vpop.eup %7832  ;;  %v4754_v41 = vmul.f32 %v13578_v1, %v13520_v33  ;;  %v6217_v25 = vmul.f32 %v6153_v52, %v13494_v8  ;;  %v5361_v15 = vsel %vm13584_vm12, %v12705_v32, %v5357_v60  ;;  %v5362_v23 = vand.u32 2147483647, %v12646_v29 }
 0x49d   : > { %17036 = vst [vmem:[#allocation128_spill] sm:$0xff] %v13610_v20  ;;  %v5429_v53 = vmul.f32 %v13597_v13, %v13524_v62  ;;  %v4458_v0 = vmul.f32 0.3275911, %v4394_v51  ;;  %v4395_v44 = vand.u32 2147483647, %v13592_v34  ;;  %vm5118_vm9 = vweird.f32 %v12568_v57 }
 0x49e   : > { %v5634_v35 = vadd.f32 -1.4531521, %v5570_v45  ;;  %v13625_v7 = vpop.eup %7834  ;;  %v4740_v33 = vsub.f32 1.0, %v4739_v12  ;;  %v13628_v30 = vor.u32 1.1754944e-38, %v5439_v21  ;;  %v6186_v8 = vmul.f32 %v6122_v17, %v4394_v51 }
 0x49f   : > { %17037 = vst [vmem:[#allocation72_spill] sm:$0xff] %v13625_v7  ;;  %vm5363_vm13 = vcmp.eq.f32.partialorder %v5362_v23, 8.507059e+37  ;;  %v5444_v32 = vmul.f32 %v13613_v26, %v13533_v11  ;;  %v5454_v29 = vand.u32 2147483648, %v13533_v11  ;;  %v4755_v60 = vsub.f32 1.0, %v4754_v41 }
 0x4a0   : > { %v5698_v52 = vmul.f32 %v5634_v35, %v13603_v38  ;;  %v13635_v59 = vsel %vm5363_vm13, %v12723_v9, %v5361_v15  ;;  %7838 = vpow2.f32 %v6338_v27  ;;  %v6340_v45 = vmul.f32 1.442695, %v6217_v25  ;;  %v4325_v15 = vpop.f32.mrf.mxu2  ;;  %v17044_v35 = vld [vmem:[#allocation120_spill] sm:$0xff] }
 0x4a1   : > { %v5571_v7 = vmul.f32 1.0614054, %v13635_v59  ;;  %v13638_v12 = vpop.eup %7836  ;;  %v5430_v21 = vsub.f32 1.0, %v5429_v53  ;;  %v13640_v51 = vadd.f32 1.0, %v4458_v0  ;;  %v4459_v17 = vmul.f32 0.3275911, %v4395_v44 }
 0x4a2   : > { %17038 = vst [vmem:[#allocation82_spill] sm:$0xff] %v13638_v12  ;;  %v5762_v23 = vadd.f32 1.4214138, %v5698_v52  ;;  %v6278_v34 = vmul.f32 1.442695, %v6186_v8  ;;  %v6123_v55 = vsub.f32 0.0, %v4395_v44  ;;  %vm5104_vm8 = vweird.f32 %v17040_v47 }
 0x4a3   : > { %17039 = vst [vmem:[#allocation73_spill] sm:$0xff] %v13640_v51  ;;  %v5635_v39 = vadd.f32 -1.4531521, %v5571_v7  ;;  %v13644_v9 = vmul.f32 %v13566_v6, %v4740_v33  ;;  %v5445_v41 = vsub.f32 1.0, %v5444_v32  ;;  %v13646_v27 = vor.u32 1.1754944e-38, %v5454_v29  ;;  %vm13663_vm11 = vmor %vm5103_vm15, %vm5104_vm8  ;;  %v17056_v29 = vld [vmem:[#allocation65_spill] sm:$0xff] }
 0x4a4   : > { %v5826_v25 = vmul.f32 %v5762_v23, %v13603_v38  ;;  %v13650_v53 = vmul.f32 %v13578_v1, %v4755_v60  ;;  %7840 = vpow2.f32 %v6340_v45  ;;  %v5102_v7 = vadd.f32 %v17040_v47, %v17044_v35 }
 0x4a5   : > { %17041 = vst [vmem:[#allocation138_spill] sm:$0xff] %v13644_v9  ;;  %v5699_v0 = vmul.f32 %v5635_v39, %v13635_v59  ;;  %v13656_v8 = vmul.f32 %v13597_v13, %v5430_v21  ;;  %7842 = vrcp.f32 %v13640_v51  ;;  %v13659_v33 = vadd.f32 1.0, %v4459_v17  ;;  %v17049_v39 = vld [vmem:[#allocation27_spill] sm:$0xff] }
 0x4a6   : > { %17042 = vst [vmem:[#allocation77_spill] sm:$0xff] %v13646_v27  ;;  %v5890_v32 = vadd.f32 -0.28449672, %v5826_v25  ;;  %v13667_v52 = vpop.eup %7838  ;;  %vm4863_vm14 = vweird.f32 %v17049_v39  ;;  %7844 = vpow2.f32 %v6278_v34  ;;  %v6187_v60 = vmul.f32 %v6123_v55, %v4395_v44  ;;  %v4354_v25 = vpop.f32.mrf.mxu3  ;;  %v17051_v55 = vld [vmem:[#allocation93_spill] sm:$0xff]  ;;  %v17052_v44 = vld [vmem:[#allocation131_spill] sm:$0xff]  ;;  %v17091_v27 = vld [vmem:[#allocation136_spill] sm:$0xff] }
 0x4a7   : > { %17043 = vst [vmem:[#allocation112_spill] sm:$0xff] %v13650_v53  ;;  %v5763_v45 = vadd.f32 1.4214138, %v5699_v0  ;;  %v13671_v21 = vadd.f32 %v4325_v15, %v12151_v37  ;;  %v13674_v17 = vmul.f32 %v13613_v26, %v5445_v41  ;;  %v5107_v35 = vand.u32 2147483647, %v12558_v16 }
 0x4a8   : > { %17045 = vst [vmem:[#allocation40_spill] sm:$0xff] %v13659_v33  ;;  %v5954_v23 = vmul.f32 %v5890_v32, %v13603_v38  ;;  %v5109_v12 = vand.u32 2147483648, %v12558_v16  ;;  %v5106_v34 = vsel %vm13663_vm11, %v17040_v47, %v5102_v7  ;;  %v5117_v15 = vadd.f32 %v17052_v44, %v17051_v55  ;;  %v17057_v47 = vld [vmem:[#allocation25_spill] sm:$0xff]  ;;  %v17063_v32 = vld [vmem:[#allocation48_spill] sm:$0xff] }
 0x4a9   : > { %17048 = vst [vmem:[#allocation111_spill] sm:$0xff] %v13667_v52  ;;  %v5827_v1 = vmul.f32 %v5763_v45, %v13635_v59  ;;  %vm5119_vm0 = vweird.f32 %v17052_v44  ;;  %vm5108_vm1 = vcmp.eq.f32.partialorder %v5107_v35, 8.507059e+37  ;;  %v5122_v16 = vand.u32 2147483647, %v12568_v57 }
 0x4aa   : > { %17050 = vst [vmem:[#allocation12_spill] sm:$0xff] %v13671_v21  ;;  %v6018_v41 = vadd.f32 0.2548296, %v5954_v23  ;;  %v5110_v0 = vor.u32 1.1754944e-38, %v5109_v12  ;;  %vm13688_vm2 = vmor %vm5118_vm9, %vm5119_vm0  ;;  %v13693_v45 = vpop.eup %7840  ;;  %vm4878_vm3 = vweird.f32 %v17056_v29  ;;  %vm6530_vm4 = vcmp.lt.f32.partialorder %v17057_v47, 0.0 }
 0x4ab   : > { %17055 = vst [vmem:[#allocation88_spill] sm:$0xff] %v13693_v45  ;;  %v5891_v7 = vadd.f32 -0.28449672, %v5827_v1  ;;  %v13698_v55 = vand.u32 2147483647, %v13671_v21  ;;  %v13701_v12 = vadd.f32 %v4354_v25, %v12151_v37  ;;  %v5124_v23 = vand.u32 2147483648, %v12568_v57  ;;  %v13704_v35 = vpop.eup %7842 }
 0x4ac   : > { %17059 = vst [vmem:[#allocation27_spill] sm:$0xff] %v13704_v35  ;;  %v6082_v53 = vmul.f32 %v6018_v41, %v13603_v38  ;;  %v13707_v6 = vsel %vm5108_vm1, %v5110_v0, %v5106_v34  ;;  %v5121_v9 = vsel %vm13688_vm2, %v17052_v44, %v5117_v15  ;;  %vm5123_vm6 = vcmp.eq.f32.partialorder %v5122_v16, 8.507059e+37  ;;  %v13712_v1 = vpop.eup %7844  ;;  %v17061_v45 = vld [vmem:[#allocation28_spill] sm:$0xff]  ;;  %v17062_v57 = vld [vmem:[#allocation31_spill] sm:$0xff] }
 0x4ad   : > { %17058 = vst [vmem:[#allocation120_spill] sm:$0xff] %v13701_v12  ;;  %v5955_v21 = vmul.f32 %v5891_v7, %v13635_v59  ;;  %v5554_v37 = vmul.f32 1.0614054, %v13707_v6  ;;  %v5125_v25 = vor.u32 1.1754944e-38, %v5124_v23  ;;  %v4862_v52 = vadd.f32 %v17062_v57, %v17061_v45 }
 0x4ae   : > { %17060 = vst [vmem:[#allocation93_spill] sm:$0xff] %v13712_v1  ;;  %7846 = vrcp.f32 %v13659_v33  ;;  %v13719_v38 = vmul.f32 1.442695, %v6187_v60  ;;  %v6402_v34 = vmul.f32 %v12755_v22, %v6082_v53  ;;  %vm4864_vm7 = vweird.f32 %v17062_v57  ;;  %v17067_v1 = vld [vmem:[#allocation63_spill] sm:$0xff] }
 0x4af   : > { %v6019_v44 = vadd.f32 0.2548296, %v5955_v21  ;;  %v13724_v15 = vand.u32 2147483647, %v13701_v12  ;;  %v5618_v41 = vadd.f32 -1.4531521, %v5554_v37  ;;  %v13726_v0 = vsel %vm5123_vm6, %v5125_v25, %v5121_v9  ;;  %vm13737_vm10 = vmor %vm4863_vm14, %vm4864_vm7 }
 0x4b0   : > { %vm6531_vm12 = vcmp.lt.f32.partialorder %v17063_v32, 0.0  ;;  %v13731_v16 = vmul.f32 %v13704_v35, %v13640_v51  ;;  %v6466_v45 = vsub.f32 1.0, %v6402_v34  ;;  %v4444_v60 = vmul.f32 0.3275911, %v13698_v55  ;;  %v17066_v12 = vld [vmem:[#allocation145_spill] sm:$0xff] }
 0x4b1   : > { %v5555_v22 = vmul.f32 1.0614054, %v13726_v0  ;;  %v6083_v9 = vmul.f32 %v6019_v44, %v13635_v59  ;;  %v5682_v21 = vmul.f32 %v5618_v41, %v13707_v6  ;;  %v4866_v7 = vsel %vm13737_vm10, %v17062_v57, %v4862_v52 }
 0x4b2   : > { %v4867_v23 = vand.u32 2147483647, %v17049_v39  ;;  %v6594_v37 = vsub.f32 0.0, %v6466_v45  ;;  %v4869_v34 = vand.u32 2147483648, %v17049_v39  ;;  %v4877_v51 = vadd.f32 %v17067_v1, %v17066_v12 }
 0x4b3   : > { %v5619_v25 = vadd.f32 -1.4531521, %v5555_v22  ;;  %v6403_v20 = vmul.f32 %v12783_v36, %v6083_v9  ;;  %v5746_v19 = vadd.f32 1.4214138, %v5682_v21  ;;  %vm4879_vm5 = vweird.f32 %v17067_v1 }
 0x4b4   : > { %v4882_v59 = vand.u32 2147483647, %v17056_v29  ;;  %v13753_v44 = vpop.eup %7846  ;;  %v6658_v52 = vsel %vm6530_vm4, %v6594_v37, %v6466_v45  ;;  %v4870_v41 = vor.u32 1.1754944e-38, %v4869_v34  ;;  %vm13760_vm15 = vmor %vm4878_vm3, %vm4879_vm5  ;;  %v4884_v36 = vand.u32 2147483648, %v17056_v29  ;;  %v4273_v29 = vpop.f32.mrf.mxu0 }
 0x4b5   : > { %17068 = vst [vmem:[#allocation131_spill] sm:$0xff] %v13753_v44  ;;  %v5683_v57 = vmul.f32 %v5619_v25, %v13726_v0  ;;  %6772 = vmatpush.msrb.mxu0 %v6658_v52  ;;  %v6467_v12 = vsub.f32 1.0, %v6403_v20  ;;  %v5810_v22 = vmul.f32 %v5746_v19, %v13707_v6  ;;  %vm4868_vm9 = vcmp.eq.f32.partialorder %v4867_v23, 8.507059e+37 }
 0x4b6   : > { %v4881_v47 = vsel %vm13760_vm15, %v17067_v1, %v4877_v51  ;;  %v13769_v45 = vadd.f32 1.0, %v4444_v60  ;;  %v13771_v9 = vsel %vm4868_vm9, %v4870_v41, %v4866_v7  ;;  %v4885_v21 = vor.u32 1.1754944e-38, %v4884_v36  ;;  %v17073_v36 = vld [vmem:[#allocation132_spill] sm:$0xff] }
 0x4b7   : > { %v5747_v53 = vadd.f32 1.4214138, %v5683_v57  ;;  %v6595_v37 = vsub.f32 0.0, %v6467_v12  ;;  %v5874_v25 = vadd.f32 -0.28449672, %v5810_v22  ;;  %vm4883_vm13 = vcmp.eq.f32.partialorder %v4882_v59, 8.507059e+37  ;;  %v4302_v57 = vpop.f32.mrf.mxu1 }
 0x4b8   : > { %17071 = vst [vmem:[#allocation65_spill] sm:$0xff] %v13769_v45  ;;  %v5538_v34 = vmul.f32 1.0614054, %v13771_v9  ;;  %v4980_v20 = vsub.f32 1.0, %v13731_v16  ;;  %v6108_v19 = vsub.f32 0.0, %v13698_v55  ;;  %v13777_v52 = vsel %vm4883_vm13, %v4885_v21, %v4881_v47  ;;  %v17074_v47 = vld [vmem:[#allocation20_spill] sm:$0xff] }
 0x4b9   : > { %v5811_v23 = vmul.f32 %v5747_v53, %v13726_v0  ;;  %v6659_v51 = vsel %vm6531_vm12, %v6595_v37, %v6467_v12  ;;  %v5938_v1 = vmul.f32 %v5874_v25, %v13707_v6  ;;  %v5539_v7 = vmul.f32 1.0614054, %v13777_v52 }
 0x4ba   : > { %v5602_v60 = vadd.f32 -1.4531521, %v5538_v34  ;;  %6792 = vmatpush.msrb.mxu1 %v6659_v51  ;;  %v4445_v59 = vmul.f32 0.3275911, %v13724_v15  ;;  %v6109_v16 = vsub.f32 0.0, %v13724_v15  ;;  %v13786_v39 = vadd.f32 %v4273_v29, %v12189_v61 }
 0x4bb   : > { %v5875_v41 = vadd.f32 -0.28449672, %v5811_v23  ;;  %vm4623_vm8 = vweird.f32 %v17073_v36  ;;  %7848 = vrcp.f32 %v13769_v45  ;;  %v6002_v32 = vadd.f32 0.2548296, %v5938_v1 }
 0x4bc   : > { %17072 = vst [vmem:[#allocation25_spill] sm:$0xff] %v13786_v39  ;;  %v5666_v12 = vmul.f32 %v5602_v60, %v13771_v9  ;;  %v5603_v22 = vadd.f32 -1.4531521, %v5539_v7  ;;  %vm6514_vm11 = vcmp.lt.f32.partialorder %v17074_v47, 0.0  ;;  %v13794_v53 = vmul.f32 %v13753_v44, %v13659_v33  ;;  %v17078_v7 = vld [vmem:[#allocation43_spill] sm:$0xff] }
 0x4bd   : > { %7850 = vpow2.f32 %v13719_v38  ;;  %v5939_v21 = vmul.f32 %v5875_v41, %v13726_v0  ;;  %v13799_v37 = vadd.f32 %v4302_v57, %v12189_v61  ;;  %v6172_v25 = vmul.f32 %v6108_v19, %v13698_v55  ;;  %v17080_v55 = vld [vmem:[#allocation81_spill] sm:$0xff] }
 0x4be   : > { %v6066_v34 = vmul.f32 %v6002_v32, %v13707_v6  ;;  %v5730_v29 = vadd.f32 1.4214138, %v5666_v12  ;;  %v5667_v23 = vmul.f32 %v5603_v22, %v13777_v52  ;;  %v13805_v51 = vmul.f32 %v13704_v35, %v4980_v20  ;;  %v17081_v32 = vld [vmem:[#allocation54_spill] sm:$0xff]  ;;  %v17082_v22 = vld [vmem:[#allocation47_spill] sm:$0xff] }
 0x4bf   : > { %17075 = vst [vmem:[#allocation28_spill] sm:$0xff] %v13799_v37  ;;  %v13807_v1 = vadd.f32 1.0, %v4445_v59  ;;  %v6003_v60 = vadd.f32 0.2548296, %v5939_v21  ;;  %v13810_v38 = vand.u32 2147483647, %v13786_v39  ;;  %v13814_v57 = vmul.f32 %v6109_v16, %v13724_v15 }
 0x4c0   : > { %17076 = vst [vmem:[#allocation31_spill] sm:$0xff] %v13805_v51  ;;  %vm6515_vm14 = vcmp.lt.f32.partialorder %v17078_v7, 0.0  ;;  %v6386_v19 = vmul.f32 %v17080_v55, %v6066_v34  ;;  %v5794_v6 = vmul.f32 %v5730_v29, %v13771_v9  ;;  %v5731_v41 = vadd.f32 1.4214138, %v5667_v23  ;;  %v17083_v21 = vld [vmem:[#allocation80_spill] sm:$0xff] }
 0x4c1   : > { %17077 = vst [vmem:[#allocation48_spill] sm:$0xff] %v13807_v1  ;;  %vm4638_vm0 = vweird.f32 %v17081_v32  ;;  %v6067_v59 = vmul.f32 %v6003_v60, %v13726_v0  ;;  %v13822_v12 = vand.u32 2147483647, %v13799_v37  ;;  %v4622_v39 = vadd.f32 %v17083_v21, %v17082_v22  ;;  %v13826_v35 = vpop.eup %7848  ;;  %v17086_v0 = vld [vmem:[#allocation67_spill] sm:$0xff] }
 0x4c2   : > { %17079 = vst [vmem:[#allocation145_spill] sm:$0xff] %v13814_v57  ;;  %v6450_v15 = vsub.f32 1.0, %v6386_v19  ;;  %v5858_v16 = vadd.f32 -0.28449672, %v5794_v6  ;;  %v5795_v34 = vmul.f32 %v5731_v41, %v13777_v52  ;;  %vm4624_vm1 = vweird.f32 %v17083_v21 }
 0x4c3   : > { %17084 = vst [vmem:[#allocation63_spill] sm:$0xff] %v13826_v35  ;;  %v13830_v29 = vpop.eup %7850  ;;  %v13832_v23 = vmul.f32 1.442695, %v6172_v25  ;;  %7852 = vrcp.f32 %v13807_v1  ;;  %v6387_v60 = vmul.f32 %v17086_v0, %v6067_v59  ;;  %v4474_v55 = vmul.f32 0.3275911, %v13810_v38  ;;  %vm13846_vm2 = vmor %vm4623_vm8, %vm4624_vm1 }
 0x4c4   : > { %17085 = vst [vmem:[#allocation132_spill] sm:$0xff] %v13830_v29  ;;  %v6578_v20 = vsub.f32 0.0, %v6450_v15  ;;  %v5922_v22 = vmul.f32 %v5858_v16, %v13771_v9  ;;  %v5859_v57 = vadd.f32 -0.28449672, %v5795_v34  ;;  %v4627_v19 = vand.u32 2147483647, %v17073_v36 }
 0x4c5   : > { %v13841_v6 = vmul.f32 %v13826_v35, %v13769_v45  ;;  %v6451_v41 = vsub.f32 1.0, %v6387_v60  ;;  %v4475_v25 = vmul.f32 0.3275911, %v13822_v12  ;;  %v4629_v59 = vand.u32 2147483648, %v17073_v36  ;;  %v17089_v45 = vld [vmem:[#allocation39_spill] sm:$0xff] }
 0x4c6   : > { %v6642_v16 = vsel %vm6514_vm11, %v6578_v20, %v6450_v15  ;;  %v5986_v34 = vadd.f32 0.2548296, %v5922_v22  ;;  %v5923_v0 = vmul.f32 %v5859_v57, %v13777_v52  ;;  %v4626_v60 = vsel %vm13846_vm2, %v17083_v21, %v4622_v39  ;;  %v17093_v15 = vld [vmem:[#allocation46_spill] sm:$0xff] }
 0x4c7   : > { %vm6498_vm3 = vcmp.lt.f32.partialorder %v17089_v45, 0.0  ;;  %6773 = vmatpush.msrb.mxu0 %v6642_v16  ;;  %v6579_v37 = vsub.f32 0.0, %v6451_v41  ;;  %v13858_v51 = vadd.f32 1.0, %v4474_v55  ;;  %v4630_v33 = vor.u32 1.1754944e-38, %v4629_v59 }
 0x4c8   : > { %v4637_v36 = vadd.f32 %v17091_v27, %v17090_v3  ;;  %v6050_v47 = vmul.f32 %v5986_v34, %v13771_v9  ;;  %v5987_v20 = vadd.f32 0.2548296, %v5923_v0  ;;  %vm4628_vm4 = vcmp.eq.f32.partialorder %v4627_v19, 8.507059e+37  ;;  %v17094_v9 = vld [vmem:[#allocation126_spill] sm:$0xff]  ;;  %v17097_v34 = vld [vmem:[#allocation59_spill] sm:$0xff] }
 0x4c9   : > { %vm4639_vm6 = vweird.f32 %v17091_v27  ;;  %v13864_v57 = vpop.eup %7852  ;;  %vm6499_vm7 = vcmp.lt.f32.partialorder %v17093_v15, 0.0  ;;  %vm5374_vm12 = vweird.f32 %v12869_v10  ;;  %v6643_v39 = vsel %vm6515_vm14, %v6579_v37, %v6451_v41  ;;  %v4328_v37 = vpop.f32.mrf.mxu2 }
 0x4ca   : > { %17092 = vst [vmem:[#allocation20_spill] sm:$0xff] %v13864_v57  ;;  %v13870_v21 = vadd.f32 1.0, %v4475_v25  ;;  %v13872_v29 = vsel %vm4628_vm4, %v4630_v33, %v4626_v60  ;;  %v4642_v3 = vand.u32 2147483647, %v17081_v32  ;;  %6793 = vmatpush.msrb.mxu1 %v6643_v39  ;;  %v6370_v55 = vmul.f32 %v17094_v9, %v6050_v47  ;;  %vm13881_vm10 = vmor %vm4638_vm0, %vm4639_vm6  ;;  %v4357_v33 = vpop.f32.mrf.mxu3 }
 0x4cb   : > { %v6051_v22 = vmul.f32 %v5987_v20, %v13777_v52  ;;  %v6138_v19 = vsub.f32 0.0, %v13810_v38  ;;  %v5522_v59 = vmul.f32 1.0614054, %v13872_v29  ;;  %vm5373_vm5 = vweird.f32 %v12805_v24 }
 0x4cc   : > { %vm5389_vm15 = vweird.f32 %v12951_v42  ;;  %7854 = vrcp.f32 %v13858_v51  ;;  %v6139_v52 = vsub.f32 0.0, %v13822_v12  ;;  %v4641_v41 = vsel %vm13881_vm10, %v17091_v27, %v4637_v36  ;;  %vm13942_vm8 = vmor %vm5373_vm5, %vm5374_vm12 }
 0x4cd   : > { %v4644_v25 = vand.u32 2147483648, %v17081_v32  ;;  %v6434_v16 = vsub.f32 1.0, %v6370_v55  ;;  %v6371_v0 = vmul.f32 %v17097_v34, %v6051_v22  ;;  %v5586_v60 = vadd.f32 -1.4531521, %v5522_v59 }
 0x4ce   : > { %v13895_v47 = vadd.f32 %v4328_v37, %v12159_v54  ;;  %vm5388_vm9 = vweird.f32 %v12860_v28  ;;  %7856 = vrcp.f32 %v13870_v21  ;;  %vm4643_vm13 = vcmp.eq.f32.partialorder %v4642_v3, 8.507059e+37 }
 0x4cf   : > { %v4645_v20 = vor.u32 1.1754944e-38, %v4644_v25  ;;  %v13900_v39 = vadd.f32 %v4357_v33, %v12159_v54  ;;  %v6562_v9 = vsub.f32 0.0, %v6434_v16  ;;  %v6435_v27 = vsub.f32 1.0, %v6371_v0  ;;  %vm13959_vm11 = vmor %vm5388_vm9, %vm5389_vm15 }
 0x4d0   : > { %17098 = vst [vmem:[#allocation43_spill] sm:$0xff] %v13895_v47  ;;  %v5650_v32 = vmul.f32 %v5586_v60, %v13872_v29  ;;  %v13904_v36 = vand.u32 2147483647, %v13895_v47  ;;  %v4784_v55 = vmul.f32 %v13864_v57, %v13807_v1  ;;  %v6202_v22 = vmul.f32 %v6138_v19, %v13810_v38  ;;  %v17137_v1 = vld [vmem:[#allocation124_spill] sm:$0xff] }
 0x4d1   : > { %17099 = vst [vmem:[#allocation81_spill] sm:$0xff] %v13900_v39  ;;  %v13909_v59 = vsel %vm4643_vm13, %v4645_v20, %v4641_v41  ;;  %v13912_v3 = vand.u32 2147483647, %v13900_v39  ;;  %v6626_v54 = vsel %vm6498_vm3, %v6562_v9, %v6434_v16  ;;  %v6563_v7 = vsub.f32 0.0, %v6435_v27 }
 0x4d2   : > { %v5714_v37 = vadd.f32 1.4214138, %v5650_v32  ;;  %v5523_v33 = vmul.f32 1.0614054, %v13909_v59  ;;  %v13917_v25 = vpop.eup %7854  ;;  %6774 = vmatpush.msrb.mxu0 %v6626_v54  ;;  %v6203_v34 = vmul.f32 %v6139_v52, %v13822_v12  ;;  %v4460_v0 = vmul.f32 0.3275911, %v13904_v36 }
 0x4d3   : > { %v4461_v38 = vmul.f32 0.3275911, %v13912_v3  ;;  %v5372_v19 = vadd.f32 %v12869_v10, %v13073_v31  ;;  %v17100_v41 = vsub.f32 1.0, %v13794_v53  ;;  %v6627_v16 = vsel %vm6499_vm7, %v6563_v7, %v6435_v27 }
 0x4d4   : > { %v5778_v60 = vmul.f32 %v5714_v37, %v13872_v29  ;;  %v5587_v20 = vadd.f32 -1.4531521, %v5523_v33  ;;  %v13932_v9 = vpop.eup %7856  ;;  %v4770_v12 = vsub.f32 1.0, %v13841_v6  ;;  %7858 = vpow2.f32 %v13832_v23  ;;  %6794 = vmatpush.msrb.mxu1 %v6627_v16 }
 0x4d5   : > { %v13927_v45 = vmul.f32 %v13753_v44, %v17100_v41  ;;  %v4785_v52 = vsub.f32 1.0, %v4784_v55  ;;  %v13936_v31 = vadd.f32 1.0, %v4460_v0  ;;  %v5377_v32 = vand.u32 2147483647, %v12805_v24 }
 0x4d6   : > { %v5842_v15 = vadd.f32 -0.28449672, %v5778_v60  ;;  %v5651_v27 = vmul.f32 %v5587_v20, %v13909_v59  ;;  %v5387_v23 = vadd.f32 %v12951_v42, %v13076_v40  ;;  %v6310_v6 = vmul.f32 1.442695, %v6202_v22  ;;  %v17109_v20 = vld [vmem:[#allocation52_spill] sm:$0xff] }
 0x4d7   : > { %17101 = vst [vmem:[#allocation54_spill] sm:$0xff] %v13927_v45  ;;  %v6312_v55 = vmul.f32 1.442695, %v6203_v34  ;;  %v13950_v54 = vadd.f32 1.0, %v4461_v38  ;;  %v5376_v7 = vsel %vm13942_vm8, %v12869_v10, %v5372_v19  ;;  %v5219_v24 = vmul.f32 %v13917_v25, %v13858_v51  ;;  %v4276_v34 = vpop.f32.mrf.mxu0  ;;  %v17160_v45 = vld [vmem:[#allocation133_spill] sm:$0xff] }
 0x4d8   : > { %17102 = vst [vmem:[#allocation47_spill] sm:$0xff] %v13936_v31  ;;  %v5234_v40 = vmul.f32 %v13932_v9, %v13870_v21  ;;  %v5906_v22 = vmul.f32 %v5842_v15, %v13872_v29  ;;  %v5715_v33 = vadd.f32 1.4214138, %v5651_v27  ;;  %v6124_v10 = vsub.f32 0.0, %v13904_v36 }
 0x4d9   : > { %17105 = vst [vmem:[#allocation80_spill] sm:$0xff] %v13950_v54  ;;  %vm5378_vm14 = vcmp.eq.f32.partialorder %v5377_v32, 8.507059e+37  ;;  %v5391_v0 = vsel %vm13959_vm11, %v12951_v42, %v5387_v23  ;;  %v5392_v38 = vand.u32 2147483647, %v12860_v28  ;;  %7860 = vrcp.f32 %v13936_v31 }
 0x4da   : > { %v5970_v19 = vadd.f32 0.2548296, %v5906_v22  ;;  %v5779_v41 = vmul.f32 %v5715_v33, %v13909_v59  ;;  %v13976_v16 = vsel %vm5378_vm14, %v12879_v14, %v5376_v7  ;;  %v13978_v60 = vpop.eup %7858  ;;  %vm6482_vm0 = vcmp.lt.f32.partialorder %v17109_v20, 0.0  ;;  %v17113_v33 = vld [vmem:[#allocation44_spill] sm:$0xff] }
 0x4db   : > { %17108 = vst [vmem:[#allocation67_spill] sm:$0xff] %v13978_v60  ;;  %7862 = vrcp.f32 %v13950_v54  ;;  %v5572_v53 = vmul.f32 1.0614054, %v13976_v16  ;;  %vm5393_vm1 = vcmp.eq.f32.partialorder %v5392_v38, 8.507059e+37  ;;  %v13984_v42 = vadd.f32 %v4276_v34, %v12164_v4 }
 0x4dc   : > { %v6034_v28 = vmul.f32 %v5970_v19, %v13872_v29  ;;  %v5843_v15 = vadd.f32 -0.28449672, %v5779_v41  ;;  %v6125_v27 = vsub.f32 0.0, %v13912_v3  ;;  %v13989_v14 = vsel %vm5393_vm1, %v12945_v46, %v5391_v0 }
 0x4dd   : > { %17110 = vst [vmem:[#allocation39_spill] sm:$0xff] %v13984_v42  ;;  %v13992_v32 = vmul.f32 %v13826_v35, %v4770_v12  ;;  %v5636_v23 = vadd.f32 -1.4531521, %v5572_v53  ;;  %v5573_v7 = vmul.f32 1.0614054, %v13989_v14  ;;  %v13997_v22 = vmul.f32 %v13864_v57, %v4785_v52  ;;  %v17116_v52 = vld [vmem:[#allocation57_spill] sm:$0xff] }
 0x4de   : > { %v4426_v37 = vand.u32 2147483647, %v13984_v42  ;;  %v6354_v34 = vmul.f32 %v17113_v33, %v6034_v28  ;;  %v5907_v29 = vmul.f32 %v5843_v15, %v13909_v59  ;;  %v6188_v38 = vmul.f32 %v6124_v10, %v13904_v36 }
 0x4df   : > { %17111 = vst [vmem:[#allocation49_spill] sm:$0xff] %v13992_v32  ;;  %v5220_v19 = vsub.f32 1.0, %v5219_v24  ;;  %7864 = vpow2.f32 %v6310_v6  ;;  %v5700_v46 = vmul.f32 %v5636_v23, %v13976_v16  ;;  %v5637_v12 = vadd.f32 -1.4531521, %v5573_v7  ;;  %v14003_v0 = vpop.eup %7860  ;;  %v4305_v6 = vpop.f32.mrf.mxu1 }
 0x4e0   : > { %17112 = vst [vmem:[#allocation136_spill] sm:$0xff] %v13997_v22  ;;  %v5235_v41 = vsub.f32 1.0, %v5234_v40  ;;  %7866 = vpow2.f32 %v6312_v55  ;;  %v6418_v53 = vsub.f32 1.0, %v6354_v34  ;;  %v5971_v60 = vadd.f32 0.2548296, %v5907_v29  ;;  %v17117_v29 = vld [vmem:[#allocation55_spill] sm:$0xff] }
 0x4e1   : > { %17114 = vst [vmem:[#allocation46_spill] sm:$0xff] %v14003_v0  ;;  %v14005_v39 = vpop.eup %7862  ;;  %vm6483_vm2 = vcmp.lt.f32.partialorder %v17116_v52, 0.0  ;;  %v6189_v28 = vmul.f32 %v6125_v27, %v13912_v3  ;;  %v5764_v15 = vadd.f32 1.4214138, %v5700_v46  ;;  %v5701_v36 = vmul.f32 %v5637_v12, %v13989_v14 }
 0x4e2   : > { %17115 = vst [vmem:[#allocation126_spill] sm:$0xff] %v14005_v39  ;;  %v4490_v24 = vmul.f32 0.3275911, %v4426_v37  ;;  %vm5133_vm3 = vweird.f32 %v12672_v43  ;;  %v6546_v10 = vsub.f32 0.0, %v6418_v53  ;;  %v6035_v23 = vmul.f32 %v5971_v60, %v13909_v59 }
 0x4e3   : > { %v6282_v40 = vmul.f32 1.442695, %v6188_v38  ;;  %v6154_v55 = vsub.f32 0.0, %v4426_v37  ;;  %v14013_v7 = vmul.f32 %v13917_v25, %v5220_v19  ;;  %v5009_v33 = vmul.f32 %v14003_v0, %v13936_v31 }
 0x4e4   : > { %v5828_v3 = vmul.f32 %v5764_v15, %v13976_v16  ;;  %v5765_v27 = vadd.f32 1.4214138, %v5701_v36  ;;  %v6610_v34 = vsel %vm6482_vm0, %v6546_v10, %v6418_v53  ;;  %v6355_v46 = vmul.f32 %v17117_v29, %v6035_v23  ;;  %v14039_v10 = vld [vmem:[%s15359_s5] sm:$0x3]  ;;  %v17122_v23 = vld [vmem:[#allocation17_spill] sm:$0xff] }
 0x4e5   : > { %v5024_v12 = vmul.f32 %v14005_v39, %v13950_v54  ;;  %v14024_v59 = vadd.f32 %v4305_v6, %v12164_v4  ;;  %v14026_v60 = vpop.eup %7864  ;;  %v14029_v38 = vmul.f32 %v13932_v9, %v5235_v41  ;;  %6775 = vmatpush.msrb.mxu0 %v6610_v34  ;;  %v14032_v36 = vadd.f32 1.0, %v4490_v24  ;;  %v17123_v34 = vld [vmem:[#allocation118_spill] sm:$0xff]  ;;  %v17124_v29 = vld [vmem:[#allocation144_spill] sm:$0xff] }
 0x4e6   : > { %17119 = vst [vmem:[#allocation52_spill] sm:$0xff] %v14026_v60  ;;  %v5892_v19 = vadd.f32 -0.28449672, %v5828_v3  ;;  %v5829_v15 = vmul.f32 %v5765_v27, %v13989_v14  ;;  %v14034_v20 = vpop.eup %7866  ;;  %v6419_v53 = vsub.f32 1.0, %v6355_v46  ;;  %vm17121_vm4 = vcmask 261120   ;;  %v17159_v60 = vld [vmem:[#allocation19_spill] sm:$0xff] }
 0x4e7   : > { %17118 = vst [vmem:[#allocation59_spill] sm:$0xff] %v14024_v59  ;;  %7301 = vmatmul.msk.f32.vlgmr.msrb.gmra.mxu0 %vm17121_vm4, %v14039_v10  ;;  %7868 = vpow2.f32 %v6282_v40  ;;  %v6284_v41 = vmul.f32 1.442695, %v6189_v28  ;;  %v6218_v6 = vmul.f32 %v6154_v55, %v4426_v37  ;;  %vm5148_vm6 = vweird.f32 %v17122_v23  ;;  %v17125_v28 = vld [vmem:[#allocation83_spill] sm:$0xff]  ;;  %v17126_v55 = vld [vmem:[#allocation113_spill] sm:$0xff]  ;;  %vm17132_vm9 = vmmov %vm17121_vm4 }
 0x4e8   : > { %17120 = vst [vmem:[#allocation44_spill] sm:$0xff] %v14034_v20  ;;  %v5010_v3 = vsub.f32 1.0, %v5009_v33  ;;  %v5956_v24 = vmul.f32 %v5892_v19, %v13976_v16  ;;  %v5893_v27 = vadd.f32 -0.28449672, %v5829_v15  ;;  %v5132_v46 = vadd.f32 %v17124_v29, %v17123_v34 }
 0x4e9   : > { %v6547_v47 = vsub.f32 0.0, %v6419_v53  ;;  %v5025_v57 = vsub.f32 1.0, %v5024_v12  ;;  %v4427_v22 = vand.u32 2147483647, %v14024_v59  ;;  %vm5134_vm7 = vweird.f32 %v17124_v29 }
 0x4ea   : > { %v6020_v35 = vadd.f32 0.2548296, %v5956_v24  ;;  %v5957_v40 = vmul.f32 %v5893_v27, %v13989_v14  ;;  %7870 = vrcp.f32 %v14032_v36  ;;  %v5139_v37 = vand.u32 2147483648, %v12672_v43  ;;  %vm14066_vm5 = vmor %vm5133_vm3, %vm5134_vm7 }
 0x4eb   : > { %vm4893_vm12 = vweird.f32 %v17125_v28  ;;  %vm6532_vm10 = vcmp.lt.f32.partialorder %v17126_v55, 0.0  ;;  %v6611_v33 = vsel %vm6483_vm2, %v6547_v47, %v6419_v53  ;;  %v5469_v12 = vand.u32 2147483648, %v14032_v36  ;;  %v17131_v53 = vld [vmem:[#allocation69_spill] sm:$0xff] }
 0x4ec   : > { %v6342_v19 = vmul.f32 1.442695, %v6218_v6  ;;  %v5137_v15 = vand.u32 2147483647, %v12672_v43  ;;  %6795 = vmatpush.msrb.mxu1 %v6611_v33  ;;  %v14059_v24 = vmul.f32 %v14003_v0, %v5010_v3  ;;  %7872 = vpow2.f32 %v6284_v41  ;;  %v17134_v43 = vld [vmem:[#allocation151_spill] sm:$0xff]  ;;  %v17135_v6 = vld [vmem:[#allocation100_spill] sm:$0xff] }
 0x4ed   : > { %v6084_v27 = vmul.f32 %v6020_v35, %v13976_v16  ;;  %v6021_v34 = vadd.f32 0.2548296, %v5957_v40  ;;  %v14070_v47 = vpop.eup %7868  ;;  %vm6533_vm15 = vcmp.lt.f32.partialorder %v17131_v53, 0.0  ;;  %7302 = vmatmul.msk.f32.vlgmr.msrb.gmra.mxu1 %vm17132_vm9, %v14039_v10  ;;  %v14076_v41 = vmul.f32 %v14005_v39, %v5025_v57  ;;  %v17136_v40 = vld [vmem:[#allocation71_spill] sm:$0xff] }
 0x4ee   : > { %17127 = vst [vmem:[#allocation57_spill] sm:$0xff] %v14059_v24  ;;  %v4491_v35 = vmul.f32 0.3275911, %v4427_v22  ;;  %v5136_v16 = vsel %vm14066_vm5, %v17124_v29, %v5132_v46  ;;  %v5147_v3 = vadd.f32 %v17135_v6, %v17134_v43  ;;  %v5140_v32 = vor.u32 1.1754944e-38, %v5139_v37  ;;  %v17138_v46 = vld [vmem:[#allocation84_spill] sm:$0xff] }
 0x4ef   : > { %17130 = vst [vmem:[#allocation55_spill] sm:$0xff] %v14070_v47  ;;  %v6404_v33 = vmul.f32 %v17136_v40, %v6084_v27  ;;  %v6085_v47 = vmul.f32 %v6021_v34, %v13989_v14  ;;  %vm5149_vm13 = vweird.f32 %v17135_v6  ;;  %vm4908_vm8 = vweird.f32 %v17137_v1  ;;  %v17142_v34 = vld [vmem:[#allocation92_spill] sm:$0xff] }
 0x4f0   : > { %17133 = vst [vmem:[#allocation17_spill] sm:$0xff] %v14076_v41  ;;  %v14087_v0 = vor.u32 1.1754944e-38, %v5469_v12  ;;  %7874 = vpow2.f32 %v6342_v19  ;;  %v6155_v57 = vsub.f32 0.0, %v4427_v22  ;;  %vm5138_vm11 = vcmp.eq.f32.partialorder %v5137_v15, 8.507059e+37  ;;  %v14089_v39 = vpop.eup %7870  ;;  %vm14100_vm14 = vmor %vm5148_vm6, %vm5149_vm13  ;;  %v17141_v15 = vld [vmem:[#allocation140_spill] sm:$0xff]  ;;  %v17147_v12 = vld [vmem:[#allocation21_spill] sm:$0xff] }
 0x4f1   : > { %v6468_v29 = vsub.f32 1.0, %v6404_v33  ;;  %v6405_v52 = vmul.f32 %v17138_v46, %v6085_v47  ;;  %v14092_v43 = vsel %vm5138_vm11, %v5140_v32, %v5136_v16  ;;  %v5152_v27 = vand.u32 2147483647, %v17122_v23 }
 0x4f2   : > { %v14095_v14 = vadd.f32 1.0, %v4491_v35  ;;  %v5556_v37 = vmul.f32 1.0614054, %v14092_v43  ;;  %v5154_v19 = vand.u32 2147483648, %v17122_v23  ;;  %v4892_v40 = vadd.f32 %v17142_v34, %v17141_v15  ;;  %v14107_v47 = vpop.eup %7872 }
 0x4f3   : > { %17143 = vst [vmem:[#allocation118_spill] sm:$0xff] %v14107_v47  ;;  %v6596_v32 = vsub.f32 0.0, %v6468_v29  ;;  %v6469_v16 = vsub.f32 1.0, %v6405_v52  ;;  %v5151_v35 = vsel %vm14100_vm14, %v17135_v6, %v5147_v3  ;;  %vm4894_vm0 = vweird.f32 %v17142_v34 }
 0x4f4   : > { %v14115_v33 = vmul.f32 %v14089_v39, %v14032_v36  ;;  %v6219_v46 = vmul.f32 %v6155_v57, %v4427_v22  ;;  %v5620_v41 = vadd.f32 -1.4531521, %v5556_v37  ;;  %v5155_v23 = vor.u32 1.1754944e-38, %v5154_v19  ;;  %vm14121_vm2 = vmor %vm4893_vm12, %vm4894_vm0  ;;  %v17148_v19 = vld [vmem:[#allocation142_spill] sm:$0xff] }
 0x4f5   : > { %v6660_v15 = vsel %vm6532_vm10, %v6596_v32, %v6468_v29  ;;  %v6597_v24 = vsub.f32 0.0, %v6469_v16  ;;  %vm5153_vm1 = vcmp.eq.f32.partialorder %v5152_v27, 8.507059e+37  ;;  %v4897_v6 = vand.u32 2147483647, %v17125_v28 }
 0x4f6   : > { %v14126_v3 = vpop.eup %7874  ;;  %6812 = vmatpush.msrb.mxu2 %v6660_v15  ;;  %v5684_v22 = vmul.f32 %v5620_v41, %v14092_v43  ;;  %v14129_v57 = vsel %vm5153_vm1, %v5155_v23, %v5151_v35  ;;  %v4896_v55 = vsel %vm14121_vm2, %v17142_v34, %v4892_v40  ;;  %v4899_v29 = vand.u32 2147483648, %v17125_v28  ;;  %v4331_v15 = vpop.f32.mrf.mxu2 }
 0x4f7   : > { %17146 = vst [vmem:[#allocation144_spill] sm:$0xff] %v14126_v3  ;;  %v6661_v27 = vsel %vm6533_vm15, %v6597_v24, %v6469_v16  ;;  %v5557_v37 = vmul.f32 1.0614054, %v14129_v57  ;;  %v4907_v32 = vadd.f32 %v17148_v19, %v17147_v12  ;;  %vm4909_vm3 = vweird.f32 %v17148_v19  ;;  %v4360_v41 = vpop.f32.mrf.mxu3 }
 0x4f8   : > { %6832 = vmatpush.msrb.mxu3 %v6661_v27  ;;  %7876 = vrcp.f32 %v14095_v14  ;;  %v5748_v35 = vadd.f32 1.4214138, %v5684_v22  ;;  %v4900_v23 = vor.u32 1.1754944e-38, %v4899_v29  ;;  %v4912_v34 = vand.u32 2147483647, %v17137_v1  ;;  %vm14145_vm6 = vmor %vm4908_vm8, %vm4909_vm3 }
 0x4f9   : > { %v5621_v28 = vadd.f32 -1.4531521, %v5557_v37  ;;  %vm4898_vm4 = vcmp.eq.f32.partialorder %v4897_v6, 8.507059e+37  ;;  %v4914_v53 = vand.u32 2147483648, %v17137_v1  ;;  %v14151_v40 = vadd.f32 %v4331_v15, %v12189_v61 }
 0x4fa   : > { %v5812_v16 = vmul.f32 %v5748_v35, %v14092_v43  ;;  %v14154_v52 = vsel %vm4898_vm4, %v4900_v23, %v4896_v55  ;;  %v4911_v22 = vsel %vm14145_vm6, %v17148_v19, %v4907_v32  ;;  %v14160_v6 = vadd.f32 %v4360_v41, %v12189_v61  ;;  %v17153_v32 = vld [vmem:[#allocation139_spill] sm:$0xff] }
 0x4fb   : > { %17151 = vst [vmem:[#allocation83_spill] sm:$0xff] %v14151_v40  ;;  %v5685_v29 = vmul.f32 %v5621_v28, %v14129_v57  ;;  %v5540_v27 = vmul.f32 1.0614054, %v14154_v52  ;;  %v4915_v37 = vor.u32 1.1754944e-38, %v4914_v53  ;;  %v4412_v1 = vand.u32 2147483647, %v14151_v40 }
 0x4fc   : > { %17152 = vst [vmem:[#allocation113_spill] sm:$0xff] %v14160_v6  ;;  %v5460_v12 = vsub.f32 1.0, %v14115_v33  ;;  %v5876_v15 = vadd.f32 -0.28449672, %v5812_v16  ;;  %vm4913_vm7 = vcmp.eq.f32.partialorder %v4912_v34, 8.507059e+37  ;;  %vm4653_vm12 = vweird.f32 %v17153_v32  ;;  %v17155_v40 = vld [vmem:[#allocation153_spill] sm:$0xff] }
 0x4fd   : > { %v4413_v55 = vand.u32 2147483647, %v14160_v6  ;;  %v5749_v35 = vadd.f32 1.4214138, %v5685_v29  ;;  %v5604_v23 = vadd.f32 -1.4531521, %v5540_v27  ;;  %v14167_v24 = vsel %vm4913_vm7, %v4915_v37, %v4911_v22 }
 0x4fe   : > { %v4476_v19 = vmul.f32 0.3275911, %v4412_v1  ;;  %v14169_v61 = vpop.eup %7876  ;;  %v5940_v41 = vmul.f32 %v5876_v15, %v14092_v43  ;;  %v5541_v28 = vmul.f32 1.0614054, %v14167_v24  ;;  %v6140_v53 = vsub.f32 0.0, %v4412_v1 }
 0x4ff   : > { %v4477_v47 = vmul.f32 0.3275911, %v4413_v55  ;;  %v6344_v33 = vmul.f32 1.442695, %v6219_v46  ;;  %v5813_v34 = vmul.f32 %v5749_v35, %v14129_v57  ;;  %v5668_v16 = vmul.f32 %v5604_v23, %v14154_v52 }
 0x500   : > { %v14176_v29 = vadd.f32 1.0, %v4476_v19  ;;  %v6004_v22 = vadd.f32 0.2548296, %v5940_v41  ;;  %v5605_v27 = vadd.f32 -1.4531521, %v5541_v28  ;;  %v6204_v37 = vmul.f32 %v6140_v53, %v4412_v1 }
 0x501   : > { %v6141_v6 = vsub.f32 0.0, %v4413_v55  ;;  %vm6516_vm10 = vcmp.lt.f32.partialorder %v17155_v40, 0.0  ;;  %v5484_v54 = vand.u32 2147483648, %v14095_v14  ;;  %v5877_v15 = vadd.f32 -0.28449672, %v5813_v34 }
 0x502   : > { %17154 = vst [vmem:[#allocation69_spill] sm:$0xff] %v14176_v29  ;;  %v5732_v31 = vadd.f32 1.4214138, %v5668_v16  ;;  %v14180_v20 = vadd.f32 1.0, %v4477_v47  ;;  %v14183_v46 = vmul.f32 %v14089_v39, %v5460_v12  ;;  %v14187_v35 = vmul.f32 %v14169_v61, %v14095_v14  ;;  %v17157_v47 = vld [vmem:[#allocation147_spill] sm:$0xff] }
 0x503   : > { %v6068_v23 = vmul.f32 %v6004_v22, %v14092_v43  ;;  %v5669_v1 = vmul.f32 %v5605_v27, %v14167_v24  ;;  %v5941_v19 = vmul.f32 %v5877_v15, %v14129_v57  ;;  %7878 = vrcp.f32 %v14176_v29  ;;  %v17158_v16 = vld [vmem:[#allocation115_spill] sm:$0xff]  ;;  %v17161_v22 = vld [vmem:[#allocation30_spill] sm:$0xff] }
 0x504   : > { %17156 = vst [vmem:[#allocation151_spill] sm:$0xff] %v14180_v20  ;;  %v5796_v41 = vmul.f32 %v5732_v31, %v14154_v52  ;;  %v6314_v28 = vmul.f32 1.442695, %v6204_v37  ;;  %v6205_v12 = vmul.f32 %v6141_v6, %v4413_v55  ;;  %v4652_v44 = vadd.f32 %v17159_v60, %v17158_v16 }
 0x505   : > { %v6388_v53 = vmul.f32 %v17157_v47, %v6068_v23  ;;  %v5733_v34 = vadd.f32 1.4214138, %v5669_v1  ;;  %vm4668_vm5 = vweird.f32 %v17160_v45  ;;  %v6005_v59 = vadd.f32 0.2548296, %v5941_v19 }
 0x506   : > { %v5860_v43 = vadd.f32 -0.28449672, %v5796_v41  ;;  %7880 = vrcp.f32 %v14180_v20  ;;  %vm4654_vm15 = vweird.f32 %v17159_v60  ;;  %vm6517_vm9 = vcmp.lt.f32.partialorder %v17161_v22, 0.0 }
 0x507   : > { %v6452_v31 = vsub.f32 1.0, %v6388_v53  ;;  %v5797_v27 = vmul.f32 %v5733_v34, %v14167_v24  ;;  %v4657_v37 = vand.u32 2147483647, %v17153_v32  ;;  %v4659_v6 = vand.u32 2147483648, %v17153_v32  ;;  %vm14210_vm13 = vmor %vm4653_vm12, %vm4654_vm15  ;;  %v17165_v32 = vld [vmem:[#allocation51_spill] sm:$0xff] }
 0x508   : > { %v14204_v55 = vor.u32 1.1754944e-38, %v5484_v54  ;;  %7882 = vpow2.f32 %v6344_v33  ;;  %v6069_v15 = vmul.f32 %v6005_v59, %v14129_v57  ;;  %v5924_v23 = vmul.f32 %v5860_v43, %v14154_v52  ;;  %v17164_v59 = vld [vmem:[#allocation127_spill] sm:$0xff] }
 0x509   : > { %v6580_v19 = vsub.f32 0.0, %v6452_v31  ;;  %v5861_v41 = vadd.f32 -0.28449672, %v5797_v27  ;;  %v6316_v47 = vmul.f32 1.442695, %v6205_v12  ;;  %v4656_v53 = vsel %vm14210_vm13, %v17159_v60, %v4652_v44  ;;  %v14217_v54 = vpop.eup %7878 }
 0x50a   : > { %v6389_v57 = vmul.f32 %v17164_v59, %v6069_v15  ;;  %v5988_v34 = vadd.f32 0.2548296, %v5924_v23  ;;  %v4660_v16 = vor.u32 1.1754944e-38, %v4659_v6  ;;  %vm6500_vm8 = vcmp.lt.f32.partialorder %v17165_v32, 0.0  ;;  %v17167_v15 = vld [vmem:[#allocation61_spill] sm:$0xff]  ;;  %v17168_v23 = vld [vmem:[#allocation66_spill] sm:$0xff] }
 0x50b   : > { %v6644_v43 = vsel %vm6516_vm10, %v6580_v19, %v6452_v31  ;;  %v5925_v27 = vmul.f32 %v5861_v41, %v14167_v24  ;;  %7884 = vpow2.f32 %v6314_v28  ;;  %vm4658_vm11 = vcmp.eq.f32.partialorder %v4657_v37, 8.507059e+37  ;;  %v17169_v59 = vld [vmem:[#allocation135_spill] sm:$0xff]  ;;  %v17171_v37 = vld [vmem:[#allocation56_spill] sm:$0xff]  ;;  %v17172_v19 = vld [vmem:[#allocation114_spill] sm:$0xff] }
 0x50c   : > { %v14225_v12 = vpop.eup %7880  ;;  %6813 = vmatpush.msrb.mxu2 %v6644_v43  ;;  %v6453_v44 = vsub.f32 1.0, %v6389_v57  ;;  %v6052_v60 = vmul.f32 %v5988_v34, %v14154_v52  ;;  %v14228_v1 = vsel %vm4658_vm11, %v4660_v16, %v4656_v53  ;;  %v4667_v6 = vadd.f32 %v17168_v23, %v17167_v15  ;;  %v4334_v34 = vpop.f32.mrf.mxu2 }
 0x50d   : > { %17166 = vst [vmem:[#allocation100_spill] sm:$0xff] %v14225_v12  ;;  %vm5403_vm14 = vweird.f32 %v17169_v59  ;;  %vm5404_vm0 = vweird.f32 %v13456_v49  ;;  %v5989_v40 = vadd.f32 0.2548296, %v5925_v27  ;;  %7886 = vpow2.f32 %v6316_v47  ;;  %v4363_v16 = vpop.f32.mrf.mxu3 }
 0x50e   : > { %v5524_v28 = vmul.f32 1.0614054, %v14228_v1  ;;  %vm4669_vm1 = vweird.f32 %v17168_v23  ;;  %v14236_v31 = vpop.eup %7882  ;;  %vm6501_vm2 = vcmp.lt.f32.partialorder %v17171_v37, 0.0  ;;  %v6581_v52 = vsub.f32 0.0, %v6453_v44  ;;  %vm14293_vm10 = vmor %vm5403_vm14, %vm5404_vm0 }
 0x50f   : > { %17170 = vst [vmem:[#allocation71_spill] sm:$0xff] %v14236_v31  ;;  %v6372_v41 = vmul.f32 %v17172_v19, %v6052_v60  ;;  %v5249_v53 = vmul.f32 %v14217_v54, %v14176_v29  ;;  %v4672_v57 = vand.u32 2147483647, %v17160_v45  ;;  %v6053_v47 = vmul.f32 %v5989_v40, %v14167_v24  ;;  %vm14248_vm3 = vmor %vm4668_vm5, %vm4669_vm1  ;;  %v17175_v19 = vld [vmem:[#allocation14_spill] sm:$0xff]  ;;  %v17178_v29 = vld [vmem:[#allocation85_spill] sm:$0xff] }
 0x510   : > { %v5264_v43 = vmul.f32 %v14225_v12, %v14180_v20  ;;  %v5588_v27 = vadd.f32 -1.4531521, %v5524_v28  ;;  %v4674_v60 = vand.u32 2147483648, %v17160_v45  ;;  %vm5418_vm4 = vweird.f32 %v17175_v19 }
 0x511   : > { %vm5419_vm6 = vweird.f32 %v13496_v58  ;;  %v6645_v33 = vsel %vm6517_vm9, %v6581_v52, %v6453_v44  ;;  %v6436_v24 = vsub.f32 1.0, %v6372_v41  ;;  %v4671_v40 = vsel %vm14248_vm3, %v17168_v23, %v4667_v6  ;;  %v14263_v20 = vpop.eup %7884 }
 0x512   : > { %v14261_v28 = vadd.f32 %v4334_v34, %v12164_v4  ;;  %17177 = vst [vmem:[#allocation84_spill] sm:$0xff] %v14263_v20  ;;  %6833 = vmatpush.msrb.mxu3 %v6645_v33  ;;  %v6373_v45 = vmul.f32 %v17178_v29, %v6053_v47  ;;  %v5652_v31 = vmul.f32 %v5588_v27, %v14228_v1  ;;  %v4675_v3 = vor.u32 1.1754944e-38, %v4674_v60  ;;  %v17181_v29 = vld [vmem:[#allocation134_spill] sm:$0xff]  ;;  %vm14319_vm5 = vmor %vm5418_vm4, %vm5419_vm6 }
 0x513   : > { %v14268_v42 = vadd.f32 %v4363_v16, %v12164_v4  ;;  %v6564_v22 = vsub.f32 0.0, %v6436_v24  ;;  %v5250_v44 = vsub.f32 1.0, %v5249_v53  ;;  %vm4673_vm7 = vcmp.eq.f32.partialorder %v4672_v57, 8.507059e+37  ;;  %v14271_v23 = vpop.eup %7886 }
 0x514   : > { %17176 = vst [vmem:[#allocation124_spill] sm:$0xff] %v14261_v28  ;;  %v4428_v52 = vand.u32 2147483647, %v14261_v28  ;;  %v6437_v6 = vsub.f32 1.0, %v6373_v45  ;;  %v5716_v41 = vadd.f32 1.4214138, %v5652_v31  ;;  %v14273_v34 = vsel %vm4673_vm7, %v4675_v3, %v4671_v40 }
 0x515   : > { %17179 = vst [vmem:[#allocation140_spill] sm:$0xff] %v14268_v42  ;;  %v4429_v33 = vand.u32 2147483647, %v14268_v42  ;;  %vm5163_vm12 = vweird.f32 %v17181_v29  ;;  %v6628_v47 = vsel %vm6500_vm8, %v6564_v22, %v6436_v24  ;;  %v5525_v4 = vmul.f32 1.0614054, %v14273_v34 }
 0x516   : > { %17180 = vst [vmem:[#allocation92_spill] sm:$0xff] %v14271_v23  ;;  %v4492_v16 = vmul.f32 0.3275911, %v4428_v52  ;;  %v6156_v53 = vsub.f32 0.0, %v4428_v52  ;;  %6814 = vmatpush.msrb.mxu2 %v6628_v47  ;;  %v6565_v57 = vsub.f32 0.0, %v6437_v6  ;;  %v5780_v27 = vmul.f32 %v5716_v41, %v14228_v1  ;;  %v17190_v41 = vld [vmem:[#allocation103_spill] sm:$0xff] }
 0x517   : > { %v4493_v15 = vmul.f32 0.3275911, %v4429_v33  ;;  %v6157_v60 = vsub.f32 0.0, %v4429_v33  ;;  %v5265_v31 = vsub.f32 1.0, %v5264_v43  ;;  %v5589_v3 = vadd.f32 -1.4531521, %v5525_v4 }
 0x518   : > { %v14281_v40 = vadd.f32 1.0, %v4492_v16  ;;  %v6220_v45 = vmul.f32 %v6156_v53, %v4428_v52  ;;  %v6629_v23 = vsel %vm6501_vm2, %v6565_v57, %v6437_v6  ;;  %v5844_v32 = vadd.f32 -0.28449672, %v5780_v27 }
 0x519   : > { %v14285_v24 = vadd.f32 1.0, %v4493_v15  ;;  %v5402_v22 = vadd.f32 %v13456_v49, %v13545_v56  ;;  %6834 = vmatpush.msrb.mxu3 %v6629_v23  ;;  %v5653_v43 = vmul.f32 %v5589_v3, %v14273_v34  ;;  %v6221_v52 = vmul.f32 %v6157_v60, %v4429_v33  ;;  %v17188_v60 = vld [vmem:[#allocation116_spill] sm:$0xff] }
 0x51a   : > { %7888 = vrcp.f32 %v14281_v40  ;;  %v5499_v37 = vand.u32 2147483648, %v14281_v40  ;;  %v17184_v6 = vsub.f32 1.0, %v14187_v35  ;;  %v5908_v47 = vmul.f32 %v5844_v32, %v14228_v1 }
 0x51b   : > { %v6346_v4 = vmul.f32 1.442695, %v6220_v45  ;;  %7890 = vrcp.f32 %v14285_v24  ;;  %v14308_v16 = vmul.f32 %v14217_v54, %v5250_v44  ;;  %v14311_v23 = vmul.f32 %v14225_v12, %v5265_v31  ;;  %v17189_v31 = vld [vmem:[#allocation110_spill] sm:$0xff] }
 0x51c   : > { %v14303_v56 = vmul.f32 %v14169_v61, %v17184_v6  ;;  %v5717_v53 = vadd.f32 1.4214138, %v5653_v43  ;;  %v14313_v57 = vor.u32 1.1754944e-38, %v5499_v37  ;;  %v5972_v33 = vadd.f32 0.2548296, %v5908_v47  ;;  %v17192_v47 = vld [vmem:[#allocation11_spill] sm:$0xff] }
 0x51d   : > { %17185 = vst [vmem:[#allocation21_spill] sm:$0xff] %v14311_v23  ;;  %v5514_v27 = vand.u32 2147483648, %v14285_v24  ;;  %v5406_v44 = vsel %vm14293_vm10, %v13456_v49, %v5402_v22  ;;  %v5407_v15 = vand.u32 2147483647, %v17169_v59  ;;  %vm6484_vm15 = vcmp.lt.f32.partialorder %v17188_v60, 0.0  ;;  %v17191_v49 = vld [vmem:[#allocation89_spill] sm:$0xff] }
 0x51e   : > { %vm5178_vm9 = vweird.f32 %v17189_v31  ;;  %v5781_v3 = vmul.f32 %v5717_v53, %v14273_v34  ;;  %7892 = vpow2.f32 %v6346_v4  ;;  %v6348_v45 = vmul.f32 1.442695, %v6221_v52 }
 0x51f   : > { %v5417_v32 = vadd.f32 %v13496_v58, %v13572_v63  ;;  %v6036_v43 = vmul.f32 %v5972_v33, %v14228_v1  ;;  %vm5408_vm13 = vcmp.eq.f32.partialorder %v5407_v15, 8.507059e+37  ;;  %v5422_v37 = vand.u32 2147483647, %v17175_v19  ;;  %v17193_v1 = vld [vmem:[#allocation106_spill] sm:$0xff] }
 0x520   : > { %v5162_v22 = vadd.f32 %v17191_v49, %v17190_v41  ;;  %v14337_v59 = vpop.eup %7888  ;;  %v5845_v6 = vadd.f32 -0.28449672, %v5781_v3  ;;  %v14340_v20 = vsel %vm5408_vm13, %v17192_v47, %v5406_v44  ;;  %vm5164_vm8 = vweird.f32 %v17191_v49  ;;  %v17197_v41 = vld [vmem:[#allocation53_spill] sm:$0xff] }
 0x521   : > { %v5421_v52 = vsel %vm14319_vm5, %v13496_v58, %v5417_v32  ;;  %v14346_v63 = vpop.eup %7890  ;;  %v6356_v4 = vmul.f32 %v17193_v1, %v6036_v43  ;;  %v5489_v19 = vmul.f32 %v14337_v59, %v14281_v40  ;;  %v14351_v53 = vor.u32 1.1754944e-38, %v5514_v27  ;;  %vm14356_vm11 = vmor %vm5163_vm12, %vm5164_vm8 }
 0x522   : > { %v5574_v33 = vmul.f32 1.0614054, %v14340_v20  ;;  %v5909_v58 = vmul.f32 %v5845_v6, %v14273_v34  ;;  %v5504_v35 = vmul.f32 %v14346_v63, %v14285_v24  ;;  %7894 = vpow2.f32 %v6348_v45  ;;  %v17198_v45 = vld [vmem:[#allocation36_spill] sm:$0xff] }
 0x523   : > { %vm5423_vm14 = vcmp.eq.f32.partialorder %v5422_v37, 8.507059e+37  ;;  %v6420_v15 = vsub.f32 1.0, %v6356_v4  ;;  %v5490_v3 = vsub.f32 1.0, %v5489_v19  ;;  %vm4923_vm0 = vweird.f32 %v17197_v41 }
 0x524   : > { %v5638_v32 = vadd.f32 -1.4531521, %v5574_v33  ;;  %v14364_v27 = vsel %vm5423_vm14, %v13547_v2, %v5421_v52  ;;  %v14366_v43 = vpop.eup %7892  ;;  %v5973_v47 = vadd.f32 0.2548296, %v5909_v58  ;;  %v5505_v1 = vsub.f32 1.0, %v5504_v35 }
 0x525   : > { %17196 = vst [vmem:[#allocation142_spill] sm:$0xff] %v14366_v43  ;;  %v5575_v42 = vmul.f32 1.0614054, %v14364_v27  ;;  %v5166_v6 = vsel %vm14356_vm11, %v17191_v49, %v5162_v22  ;;  %vm6485_vm1 = vcmp.lt.f32.partialorder %v17198_v45, 0.0  ;;  %v6548_v37 = vsub.f32 0.0, %v6420_v15  ;;  %v17216_v45 = vld [vmem:[#allocation60_spill] sm:$0xff] }
 0x526   : > { %v14375_v4 = vmul.f32 %v14337_v59, %v5490_v3  ;;  %v5702_v2 = vmul.f32 %v5638_v32, %v14340_v20  ;;  %v5167_v52 = vand.u32 2147483647, %v17181_v29  ;;  %v6037_v19 = vmul.f32 %v5973_v47, %v14273_v34  ;;  %v17201_v3 = vld [vmem:[#allocation29_spill] sm:$0xff]  ;;  %v17202_v32 = vld [vmem:[#allocation143_spill] sm:$0xff]  ;;  %v17204_v34 = vld [vmem:[#allocation64_spill] sm:$0xff] }
 0x527   : > { %v14381_v33 = vmul.f32 %v14346_v63, %v5505_v1  ;;  %v5639_v58 = vadd.f32 -1.4531521, %v5575_v42  ;;  %v5169_v35 = vand.u32 2147483648, %v17181_v29  ;;  %v6612_v49 = vsel %vm6484_vm15, %v6548_v37, %v6420_v15  ;;  %v17205_v47 = vld [vmem:[#allocation79_spill] sm:$0xff] }
 0x528   : > { %v5766_v22 = vadd.f32 1.4214138, %v5702_v2  ;;  %vm14386_vm2 = vcmp.eq.f32.partialorder %v5167_v52, 8.507059e+37  ;;  %v5177_v43 = vadd.f32 %v17202_v32, %v17201_v3  ;;  %v14392_v28 = vpop.eup %7894  ;;  %vm4938_vm3 = vweird.f32 %v17204_v34  ;;  %6815 = vmatpush.msrb.mxu2 %v6612_v49  ;;  %v17209_v52 = vld [vmem:[#allocation107_spill] sm:$0xff] }
 0x529   : > { %17203 = vst [vmem:[#allocation139_spill] sm:$0xff] %v14392_v28  ;;  %v6357_v42 = vmul.f32 %v17205_v47, %v6037_v19  ;;  %v5703_v29 = vmul.f32 %v5639_v58, %v14364_v27  ;;  %v5170_v1 = vor.u32 1.1754944e-38, %v5169_v35  ;;  %vm5179_vm4 = vweird.f32 %v17202_v32  ;;  %v17210_v19 = vld [vmem:[#allocation26_spill] sm:$0xff] }
 0x52a   : > { %vm17206_vm6 = vcmask 261120   ;;  %v5830_v60 = vmul.f32 %v5766_v22, %v14340_v20  ;;  %vm14403_vm7 = vmor %vm5178_vm9, %vm5179_vm4  ;;  %v5182_v37 = vand.u32 2147483647, %v17189_v31  ;;  %v5184_v2 = vand.u32 2147483648, %v17189_v31 }
 0x52b   : > { %7303 = vmatmul.msk.f32.vlgmr.msrb.gmra.mxu2 %vm17206_vm6, %v14039_v10  ;;  %v4922_v58 = vadd.f32 %v17210_v19, %v17209_v52  ;;  %v6421_v35 = vsub.f32 1.0, %v6357_v42  ;;  %v5767_v49 = vadd.f32 1.4214138, %v5703_v29  ;;  %v14413_v3 = vsel %vm14386_vm2, %v5170_v1, %v5166_v6  ;;  %v17211_v29 = vld [vmem:[#allocation74_spill] sm:$0xff]  ;;  %vm17215_vm8 = vmmov %vm17206_vm6 }
 0x52c   : > { %v5181_v22 = vsel %vm14403_vm7, %v17202_v32, %v5177_v43  ;;  %v5894_v47 = vadd.f32 -0.28449672, %v5830_v60  ;;  %v5558_v28 = vmul.f32 1.0614054, %v14413_v3  ;;  %vm5183_vm12 = vcmp.eq.f32.partialorder %v5182_v37, 8.507059e+37  ;;  %v17220_v43 = vld [vmem:[#allocation15_spill] sm:$0xff] }
 0x52d   : > { %v5185_v12 = vor.u32 1.1754944e-38, %v5184_v2  ;;  %v6549_v23 = vsub.f32 0.0, %v6421_v35  ;;  %v5831_v31 = vmul.f32 %v5767_v49, %v14364_v27  ;;  %vm4924_vm10 = vweird.f32 %v17210_v19  ;;  %v17214_v49 = vld [vmem:[#allocation121_spill] sm:$0xff] }
 0x52e   : > { %v4927_v42 = vand.u32 2147483647, %v17197_v41  ;;  %vm4683_vm5 = vweird.f32 %v17211_v29  ;;  %v5958_v6 = vmul.f32 %v5894_v47, %v14340_v20  ;;  %v5622_v44 = vadd.f32 -1.4531521, %v5558_v28  ;;  %vm14428_vm15 = vmor %vm4923_vm0, %vm4924_vm10 }
 0x52f   : > { %v14424_v1 = vsel %vm5183_vm12, %v5185_v12, %v5181_v22  ;;  %v4929_v32 = vand.u32 2147483648, %v17197_v41  ;;  %v6613_v60 = vsel %vm6485_vm1, %v6549_v23, %v6421_v35  ;;  %v5895_v15 = vadd.f32 -0.28449672, %v5831_v31  ;;  %v17217_v35 = vld [vmem:[#allocation125_spill] sm:$0xff] }
 0x530   : > { %v5559_v37 = vmul.f32 1.0614054, %v14424_v1  ;;  %v4926_v28 = vsel %vm14428_vm15, %v17210_v19, %v4922_v58  ;;  %6835 = vmatpush.msrb.mxu3 %v6613_v60  ;;  %v6022_v12 = vadd.f32 0.2548296, %v5958_v6  ;;  %v5686_v2 = vmul.f32 %v5622_v44, %v14413_v3 }
 0x531   : > { %vm4928_vm9 = vcmp.eq.f32.partialorder %v4927_v42, 8.507059e+37  ;;  %v4930_v52 = vor.u32 1.1754944e-38, %v4929_v32  ;;  %vm6534_vm13 = vcmp.lt.f32.partialorder %v17214_v49, 0.0  ;;  %7304 = vmatmul.msk.f32.vlgmr.msrb.gmra.mxu3 %vm17215_vm8, %v14039_v10  ;;  %v5959_v23 = vmul.f32 %v5895_v15, %v14364_v27  ;;  %v17221_v32 = vld [vmem:[#allocation90_spill] sm:$0xff] }
 0x532   : > { %v5623_v41 = vadd.f32 -1.4531521, %v5559_v37  ;;  %v4937_v22 = vadd.f32 %v17217_v35, %v17216_v45  ;;  %vm4939_vm11 = vweird.f32 %v17217_v35  ;;  %v6086_v19 = vmul.f32 %v6022_v12, %v14340_v20  ;;  %v17230_v37 = vld [vmem:[#allocation150_spill] sm:$0xff] }
 0x533   : > { %v5750_v58 = vadd.f32 1.4214138, %v5686_v2  ;;  %v14448_v47 = vsel %vm4928_vm9, %v4930_v52, %v4926_v28  ;;  %vm14452_vm14 = vmor %vm4938_vm3, %vm4939_vm11  ;;  %v4942_v10 = vand.u32 2147483647, %v17204_v34  ;;  %v6023_v42 = vadd.f32 0.2548296, %v5959_v23 }
 0x534   : > { %v5687_v6 = vmul.f32 %v5623_v41, %v14424_v1  ;;  %v5542_v44 = vmul.f32 1.0614054, %v14448_v47  ;;  %v4941_v20 = vsel %vm14452_vm14, %v17217_v35, %v4937_v22  ;;  %vm4698_vm0 = vweird.f32 %v17220_v43  ;;  %v17224_v23 = vld [vmem:[#allocation76_spill] sm:$0xff]  ;;  %v17225_v41 = vld [vmem:[#allocation102_spill] sm:$0xff] }
 0x535   : > { %vm6535_vm1 = vcmp.lt.f32.partialorder %v17221_v32, 0.0  ;;  %v6406_v60 = vmul.f32 %v13526_v48, %v6086_v19  ;;  %v5814_v15 = vmul.f32 %v5750_v58, %v14413_v3  ;;  %vm14466_vm2 = vcmp.eq.f32.partialorder %v4942_v10, 8.507059e+37 }
 0x536   : > { %v4944_v28 = vand.u32 2147483648, %v17204_v34  ;;  %v6087_v12 = vmul.f32 %v6023_v42, %v14364_v27  ;;  %v5751_v2 = vadd.f32 1.4214138, %v5687_v6  ;;  %v5606_v52 = vadd.f32 -1.4531521, %v5542_v44 }
 0x537   : > { %v4682_v45 = vadd.f32 %v17225_v41, %v17224_v23  ;;  %vm5434_vm3 = vweird.f32 %v13597_v13  ;;  %v6470_v35 = vsub.f32 1.0, %v6406_v60  ;;  %v5878_v22 = vadd.f32 -0.28449672, %v5814_v15 }
 0x538   : > { %v4945_v48 = vor.u32 1.1754944e-38, %v4944_v28  ;;  %vm4684_vm4 = vweird.f32 %v17225_v41  ;;  %v6407_v19 = vmul.f32 %v13541_v50, %v6087_v12  ;;  %v5815_v58 = vmul.f32 %v5751_v2, %v14424_v1 }
 0x539   : > { %v5670_v34 = vmul.f32 %v5606_v52, %v14448_v47  ;;  %vm14481_vm6 = vmor %vm4683_vm5, %vm4684_vm4  ;;  %v4687_v31 = vand.u32 2147483647, %v17211_v29  ;;  %vm5433_vm7 = vweird.f32 %v13524_v62  ;;  %v6598_v10 = vsub.f32 0.0, %v6470_v35 }
 0x53a   : > { %v5942_v42 = vmul.f32 %v5878_v22, %v14413_v3  ;;  %v14490_v50 = vsel %vm14466_vm2, %v4945_v48, %v4941_v20  ;;  %v4686_v6 = vsel %vm14481_vm6, %v17225_v41, %v4682_v45  ;;  %v6471_v44 = vsub.f32 1.0, %v6407_v19  ;;  %v17231_v22 = vld [vmem:[#allocation152_spill] sm:$0xff]  ;;  %v17232_v48 = vld [vmem:[#allocation141_spill] sm:$0xff]  ;;  %vm14545_vm14 = vmor %vm5433_vm7, %vm5434_vm3 }
 0x53b   : > { %v5879_v60 = vadd.f32 -0.28449672, %v5815_v58  ;;  %v5734_v15 = vadd.f32 1.4214138, %v5670_v34  ;;  %vm14495_vm12 = vcmp.eq.f32.partialorder %v4687_v31, 8.507059e+37  ;;  %v6662_v12 = vsel %vm6534_vm13, %v6598_v10, %v6470_v35 }
 0x53c   : > { %v6006_v2 = vadd.f32 0.2548296, %v5942_v42  ;;  %v5543_v52 = vmul.f32 1.0614054, %v14490_v50  ;;  %v4689_v20 = vand.u32 2147483648, %v17211_v29  ;;  %vm6518_vm10 = vcmp.lt.f32.partialorder %v17230_v37, 0.0  ;;  %6852 = vmatpush.msra.mxu0 %v6662_v12 }
 0x53d   : > { %v6599_v23 = vsub.f32 0.0, %v6471_v44  ;;  %v5943_v41 = vmul.f32 %v5879_v60, %v14424_v1  ;;  %v5798_v45 = vmul.f32 %v5734_v15, %v14448_v47  ;;  %v4697_v19 = vadd.f32 %v17232_v48, %v17231_v22  ;;  %v17235_v42 = vld [vmem:[#allocation34_spill] sm:$0xff] }
 0x53e   : > { %vm5449_vm5 = vweird.f32 %v13613_v26  ;;  %v6070_v49 = vmul.f32 %v6006_v2, %v14413_v3  ;;  %v5607_v35 = vadd.f32 -1.4531521, %v5543_v52  ;;  %v4690_v58 = vor.u32 1.1754944e-38, %v4689_v20  ;;  %v17236_v3 = vld [vmem:[#allocation50_spill] sm:$0xff] }
 0x53f   : > { %vm4699_vm15 = vweird.f32 %v17232_v48  ;;  %v6663_v29 = vsel %vm6535_vm1, %v6599_v23, %v6471_v44  ;;  %v6007_v34 = vadd.f32 0.2548296, %v5943_v41  ;;  %v5862_v27 = vadd.f32 -0.28449672, %v5798_v45  ;;  %v17241_v45 = vld [vmem:[#allocation70_spill] sm:$0xff] }
 0x540   : > { %vm14515_vm9 = vmor %vm4698_vm0, %vm4699_vm15  ;;  %v4702_v10 = vand.u32 2147483647, %v17220_v43  ;;  %vm6519_vm13 = vcmp.lt.f32.partialorder %v17235_v42, 0.0  ;;  %vm5448_vm8 = vweird.f32 %v13533_v11  ;;  %6872 = vmatpush.msra.mxu1 %v6663_v29  ;;  %v6390_v60 = vmul.f32 %v17236_v3, %v6070_v49 }
 0x541   : > { %v5671_v32 = vmul.f32 %v5607_v35, %v14490_v50  ;;  %v14526_v44 = vsel %vm14495_vm12, %v4690_v58, %v4686_v6  ;;  %v4701_v15 = vsel %vm14515_vm9, %v17232_v48, %v4697_v19  ;;  %v6071_v12 = vmul.f32 %v6007_v34, %v14424_v1  ;;  %v17242_v35 = vld [vmem:[#allocation119_spill] sm:$0xff]  ;;  %vm14579_vm3 = vmor %vm5448_vm8, %vm5449_vm5 }
 0x542   : > { %v5926_v2 = vmul.f32 %v5862_v27, %v14448_v47  ;;  %v5526_v52 = vmul.f32 1.0614054, %v14526_v44  ;;  %vm14534_vm11 = vcmp.eq.f32.partialorder %v4702_v10, 8.507059e+37  ;;  %v6454_v23 = vsub.f32 1.0, %v6390_v60 }
 0x543   : > { %v5735_v41 = vadd.f32 1.4214138, %v5671_v32  ;;  %v4704_v28 = vand.u32 2147483648, %v17220_v43  ;;  %v5432_v6 = vadd.f32 %v13597_v13, %v13656_v8  ;;  %v6391_v22 = vmul.f32 %v17241_v45, %v6071_v12  ;;  %v17243_v32 = vld [vmem:[#allocation45_spill] sm:$0xff] }
 0x544   : > { %v5990_v48 = vadd.f32 0.2548296, %v5926_v2  ;;  %v5590_v19 = vadd.f32 -1.4531521, %v5526_v52  ;;  %v5437_v49 = vand.u32 2147483647, %v13524_v62  ;;  %vm5193_vm1 = vweird.f32 %v13449_v18 }
 0x545   : > { %vm6502_vm0 = vcmp.lt.f32.partialorder %v17242_v35, 0.0  ;;  %v6582_v43 = vsub.f32 0.0, %v6454_v23  ;;  %v5799_v58 = vmul.f32 %v5735_v41, %v14490_v50  ;;  %v4705_v8 = vor.u32 1.1754944e-38, %v4704_v28  ;;  %v17253_v35 = vld [vmem:[#allocation96_spill] sm:$0xff] }
 0x546   : > { %v5436_v29 = vsel %vm14545_vm14, %v13597_v13, %v5432_v6  ;;  %v6455_v34 = vsub.f32 1.0, %v6391_v22  ;;  %v6054_v27 = vmul.f32 %v5990_v48, %v14448_v47  ;;  %v5654_v31 = vmul.f32 %v5590_v19, %v14526_v44  ;;  %v17247_v19 = vld [vmem:[#allocation77_spill] sm:$0xff] }
 0x547   : > { %vm5438_vm2 = vcmp.eq.f32.partialorder %v5437_v49, 8.507059e+37  ;;  %v6646_v62 = vsel %vm6518_vm10, %v6582_v43, %v6454_v23  ;;  %v5863_v10 = vadd.f32 -0.28449672, %v5799_v58  ;;  %v14563_v3 = vsel %vm14534_vm11, %v4705_v8, %v4701_v15 }
 0x548   : > { %v14566_v60 = vsel %vm5438_vm2, %v13628_v30, %v5436_v29  ;;  %6853 = vmatpush.msra.mxu0 %v6646_v62  ;;  %v6583_v13 = vsub.f32 0.0, %v6455_v34  ;;  %v6374_v12 = vmul.f32 %v17243_v32, %v6054_v27  ;;  %v5718_v2 = vadd.f32 1.4214138, %v5654_v31  ;;  %v17248_v29 = vld [vmem:[#allocation23_spill] sm:$0xff] }
 0x549   : > { %v5527_v47 = vmul.f32 1.0614054, %v14563_v3  ;;  %v5927_v52 = vmul.f32 %v5863_v10, %v14490_v50  ;;  %v5576_v37 = vmul.f32 1.0614054, %v14566_v60  ;;  %v5447_v23 = vadd.f32 %v13613_v26, %v13674_v17  ;;  %v17250_v10 = vld [vmem:[#allocation94_spill] sm:$0xff] }
 0x54a   : > { %v5452_v15 = vand.u32 2147483647, %v13533_v11  ;;  %v6647_v20 = vsel %vm6519_vm13, %v6583_v13, %v6455_v34  ;;  %v6438_v41 = vsub.f32 1.0, %v6374_v12  ;;  %v5782_v28 = vmul.f32 %v5718_v2, %v14526_v44  ;;  %v17246_v11 = vld [vmem:[#allocation104_spill] sm:$0xff] }
 0x54b   : > { %v5591_v6 = vadd.f32 -1.4531521, %v5527_v47  ;;  %6873 = vmatpush.msra.mxu1 %v6647_v20  ;;  %v5991_v1 = vadd.f32 0.2548296, %v5927_v52  ;;  %v5640_v17 = vadd.f32 -1.4531521, %v5576_v37  ;;  %v5451_v45 = vsel %vm14579_vm3, %v13613_v26, %v5447_v23 }
 0x54c   : > { %vm5453_vm4 = vcmp.eq.f32.partialorder %v5452_v15, 8.507059e+37  ;;  %vm6503_vm6 = vcmp.lt.f32.partialorder %v17246_v11, 0.0  ;;  %vm5208_vm7 = vweird.f32 %v13461_v5  ;;  %v6566_v22 = vsub.f32 0.0, %v6438_v41  ;;  %v17249_v26 = vld [vmem:[#allocation86_spill] sm:$0xff]  ;;  %v17254_v15 = vld [vmem:[#allocation33_spill] sm:$0xff] }
 0x54d   : > { %v5846_v48 = vadd.f32 -0.28449672, %v5782_v28  ;;  %v5655_v42 = vmul.f32 %v5591_v6, %v14563_v3  ;;  %v14593_v49 = vsel %vm5453_vm4, %v17247_v19, %v5451_v45  ;;  %v6055_v43 = vmul.f32 %v5991_v1, %v14490_v50  ;;  %v17256_v45 = vld [vmem:[#allocation42_spill] sm:$0xff] }
 0x54e   : > { %v5704_v58 = vmul.f32 %v5640_v17, %v14566_v60  ;;  %v5577_v8 = vmul.f32 1.0614054, %v14593_v49  ;;  %v5192_v34 = vadd.f32 %v17249_v26, %v17248_v29  ;;  %v6630_v27 = vsel %vm6502_vm0, %v6566_v22, %v6438_v41  ;;  %v17255_v17 = vld [vmem:[#allocation128_spill] sm:$0xff] }
 0x54f   : > { %v5910_v31 = vmul.f32 %v5846_v48, %v14526_v44  ;;  %v5719_v62 = vadd.f32 1.4214138, %v5655_v42  ;;  %vm5194_vm12 = vweird.f32 %v17249_v26  ;;  %6854 = vmatpush.msra.mxu0 %v6630_v27  ;;  %v6375_v13 = vmul.f32 %v17250_v10, %v6055_v43 }
 0x550   : > { %v5768_v32 = vadd.f32 1.4214138, %v5704_v58  ;;  %v5641_v50 = vadd.f32 -1.4531521, %v5577_v8  ;;  %vm14607_vm10 = vmor %vm5193_vm1, %vm5194_vm12  ;;  %v5197_v2 = vand.u32 2147483647, %v13449_v18  ;;  %vm4953_vm5 = vweird.f32 %v17253_v35 }
 0x551   : > { %v5974_v47 = vadd.f32 0.2548296, %v5910_v31  ;;  %v5783_v52 = vmul.f32 %v5719_v62, %v14563_v3  ;;  %v5196_v37 = vsel %vm14607_vm10, %v17249_v26, %v5192_v34  ;;  %v5199_v23 = vand.u32 2147483648, %v13449_v18  ;;  %v17257_v18 = vld [vmem:[#allocation108_spill] sm:$0xff]  ;;  %v17260_v62 = vld [vmem:[#allocation78_spill] sm:$0xff] }
 0x552   : > { %vm6486_vm15 = vcmp.lt.f32.partialorder %v17254_v15, 0.0  ;;  %v6439_v30 = vsub.f32 1.0, %v6375_v13  ;;  %v5832_v20 = vmul.f32 %v5768_v32, %v14566_v60  ;;  %v5705_v41 = vmul.f32 %v5641_v50, %v14593_v49  ;;  %v17263_v50 = vld [vmem:[#allocation130_spill] sm:$0xff] }
 0x553   : > { %vm5198_vm9 = vcmp.eq.f32.partialorder %v5197_v2, 8.507059e+37  ;;  %v6038_v28 = vmul.f32 %v5974_v47, %v14526_v44  ;;  %v5847_v6 = vadd.f32 -0.28449672, %v5783_v52  ;;  %v5200_v1 = vor.u32 1.1754944e-38, %v5199_v23  ;;  %v17264_v52 = vld [vmem:[#allocation99_spill] sm:$0xff] }
 0x554   : > { %v5207_v22 = vadd.f32 %v17256_v45, %v17255_v17  ;;  %v6567_v48 = vsub.f32 0.0, %v6439_v30  ;;  %v5896_v42 = vadd.f32 -0.28449672, %v5832_v20  ;;  %v5769_v19 = vadd.f32 1.4214138, %v5705_v41 }
 0x555   : > { %vm5209_vm13 = vweird.f32 %v17256_v45  ;;  %v6358_v43 = vmul.f32 %v17257_v18, %v6038_v28  ;;  %v5911_v58 = vmul.f32 %v5847_v6, %v14563_v3  ;;  %v14627_v8 = vsel %vm5198_vm9, %v5200_v1, %v5196_v37  ;;  %v17265_v37 = vld [vmem:[#allocation32_spill] sm:$0xff]  ;;  %v17271_v18 = vld [vmem:[#allocation111_spill] sm:$0xff] }
 0x556   : > { %v5212_v29 = vand.u32 2147483647, %v13461_v5  ;;  %v6631_v44 = vsel %vm6503_vm6, %v6567_v48, %v6439_v30  ;;  %v5960_v26 = vmul.f32 %v5896_v42, %v14566_v60  ;;  %v5833_v34 = vmul.f32 %v5769_v19, %v14593_v49  ;;  %vm14637_vm8 = vmor %vm5208_vm7, %vm5209_vm13  ;;  %v17266_v30 = vld [vmem:[#allocation22_spill] sm:$0xff]  ;;  %v17269_v48 = vld [vmem:[#allocation101_spill] sm:$0xff] }
 0x557   : > { %v5560_v27 = vmul.f32 1.0614054, %v14627_v8  ;;  %vm4968_vm11 = vweird.f32 %v17260_v62  ;;  %6874 = vmatpush.msra.mxu1 %v6631_v44  ;;  %v6422_v10 = vsub.f32 1.0, %v6358_v43  ;;  %v5975_v13 = vadd.f32 0.2548296, %v5911_v58 }
 0x558   : > { %v5211_v11 = vsel %vm14637_vm8, %v17256_v45, %v5207_v22  ;;  %vm14645_vm14 = vcmp.eq.f32.partialorder %v5212_v29, 8.507059e+37  ;;  %vm6487_vm0 = vcmp.lt.f32.partialorder %v17263_v50, 0.0  ;;  %v6024_v12 = vadd.f32 0.2548296, %v5960_v26  ;;  %v17274_v26 = vld [vmem:[#allocation68_spill] sm:$0xff] }
 0x559   : > { %v5897_v2 = vadd.f32 -0.28449672, %v5833_v34  ;;  %v5624_v47 = vadd.f32 -1.4531521, %v5560_v27  ;;  %v4952_v23 = vadd.f32 %v17265_v37, %v17264_v52  ;;  %vm6536_vm1 = vcmp.lt.f32.partialorder %v17266_v30, 0.0 }
 0x55a   : > { %v6550_v20 = vsub.f32 0.0, %v6422_v10  ;;  %v6039_v41 = vmul.f32 %v5975_v13, %v14563_v3  ;;  %v5214_v28 = vand.u32 2147483648, %v13461_v5  ;;  %vm4954_vm2 = vweird.f32 %v17265_v37  ;;  %v17270_v3 = vld [vmem:[#allocation146_spill] sm:$0xff]  ;;  %v14682_v34 = vld [vmem:[%s15359_s5] sm:$0x3]  ;;  %v17277_v13 = vld [vmem:[#allocation123_spill] sm:$0xff] }
 0x55b   : > { %v6088_v6 = vmul.f32 %v6024_v12, %v14566_v60  ;;  %v5961_v1 = vmul.f32 %v5897_v2, %v14593_v49  ;;  %v5688_v17 = vmul.f32 %v5624_v47, %v14627_v8  ;;  %vm14661_vm3 = vmor %vm4953_vm5, %vm4954_vm2  ;;  %v4957_v22 = vand.u32 2147483647, %v17253_v35 }
 0x55c   : > { %vm4713_vm4 = vweird.f32 %v17269_v48  ;;  %v6614_v5 = vsel %vm6486_vm15, %v6550_v20, %v6422_v10  ;;  %v6359_v42 = vmul.f32 %v17270_v3, %v6039_v41  ;;  %v5215_v60 = vor.u32 1.1754944e-38, %v5214_v28  ;;  %v17276_v10 = vld [vmem:[#allocation9_spill] sm:$0xff]  ;;  %v17278_v41 = vld [vmem:[#allocation88_spill] sm:$0xff] }
 0x55d   : > { %v4956_v19 = vsel %vm14661_vm3, %v17265_v37, %v4952_v23  ;;  %6855 = vmatpush.msra.mxu0 %v6614_v5  ;;  %v6408_v43 = vmul.f32 %v17271_v18, %v6088_v6  ;;  %v6025_v58 = vadd.f32 0.2548296, %v5961_v1  ;;  %v5752_v29 = vadd.f32 1.4214138, %v5688_v17 }
 0x55e   : > { %vm14674_vm6 = vcmp.eq.f32.partialorder %v4957_v22, 8.507059e+37  ;;  %vm6537_vm7 = vcmp.lt.f32.partialorder %v17274_v26, 0.0  ;;  %v6423_v15 = vsub.f32 1.0, %v6359_v42  ;;  %vm17275_vm12 = vcmask 261120   ;;  %v17292_v26 = vld [vmem:[#allocation10_spill] sm:$0xff] }
 0x55f   : > { %7305 = vmatmul.msk.f32.vlgmr.msra.gmra.mxu0 %vm17275_vm12, %v14682_v34  ;;  %v14688_v27 = vsel %vm14645_vm14, %v5215_v60, %v5211_v11  ;;  %v4959_v31 = vand.u32 2147483648, %v17253_v35  ;;  %v4967_v12 = vadd.f32 %v17277_v13, %v17276_v10  ;;  %v6472_v2 = vsub.f32 1.0, %v6408_v43  ;;  %vm17284_vm8 = vmmov %vm17275_vm12  ;;  %v17285_v43 = vld [vmem:[#allocation62_spill] sm:$0xff] }
 0x560   : > { %v6089_v47 = vmul.f32 %v6025_v58, %v14593_v49  ;;  %v5816_v52 = vmul.f32 %v5752_v29, %v14627_v8  ;;  %v5561_v37 = vmul.f32 1.0614054, %v14688_v27  ;;  %v6551_v23 = vsub.f32 0.0, %v6423_v15  ;;  %v17281_v49 = vld [vmem:[#allocation149_spill] sm:$0xff] }
 0x561   : > { %v4960_v20 = vor.u32 1.1754944e-38, %v4959_v31  ;;  %vm4969_vm10 = vweird.f32 %v17277_v13  ;;  %v4972_v32 = vand.u32 2147483647, %v17260_v62  ;;  %v6600_v11 = vsub.f32 0.0, %v6472_v2  ;;  %v17286_v58 = vld [vmem:[#allocation129_spill] sm:$0xff] }
 0x562   : > { %v6409_v28 = vmul.f32 %v17278_v41, %v6089_v47  ;;  %v5880_v35 = vadd.f32 -0.28449672, %v5816_v52  ;;  %v5625_v6 = vadd.f32 -1.4531521, %v5561_v37  ;;  %vm14701_vm5 = vmor %vm4968_vm11, %vm4969_vm10  ;;  %vm4728_vm15 = vweird.f32 %v17281_v49  ;;  %v17290_v41 = vld [vmem:[#allocation117_spill] sm:$0xff] }
 0x563   : > { %v6615_v17 = vsel %vm6487_vm0, %v6551_v23, %v6423_v15  ;;  %v14710_v45 = vsel %vm14674_vm6, %v4960_v20, %v4956_v19  ;;  %v4971_v22 = vsel %vm14701_vm5, %v17277_v13, %v4967_v12  ;;  %vm14715_vm9 = vcmp.eq.f32.partialorder %v4972_v32, 8.507059e+37  ;;  %v17289_v13 = vld [vmem:[#allocation24_spill] sm:$0xff]  ;;  %v17295_v31 = vld [vmem:[#allocation137_spill] sm:$0xff] }
 0x564   : > { %6875 = vmatpush.msra.mxu1 %v6615_v17  ;;  %v6664_v3 = vsel %vm6536_vm1, %v6600_v11, %v6472_v2  ;;  %v6473_v42 = vsub.f32 1.0, %v6409_v28  ;;  %v5944_v50 = vmul.f32 %v5880_v35, %v14627_v8  ;;  %v5689_v60 = vmul.f32 %v5625_v6, %v14688_v27 }
 0x565   : > { %vm5464_vm13 = vweird.f32 %v14089_v39  ;;  %7306 = vmatmul.msk.f32.vlgmr.msra.gmra.mxu1 %vm17284_vm8, %v14682_v34  ;;  %6892 = vmatpush.msra.mxu2 %v6664_v3  ;;  %v5544_v19 = vmul.f32 1.0614054, %v14710_v45  ;;  %v4974_v18 = vand.u32 2147483648, %v17260_v62  ;;  %v4712_v29 = vadd.f32 %v17286_v58, %v17285_v43 }
 0x566   : > { %vm4714_vm11 = vweird.f32 %v17286_v58  ;;  %v6601_v30 = vsub.f32 0.0, %v6473_v42  ;;  %v6008_v44 = vadd.f32 0.2548296, %v5944_v50  ;;  %v5753_v15 = vadd.f32 1.4214138, %v5689_v60 }
 0x567   : > { %vm14733_vm14 = vmor %vm4713_vm4, %vm4714_vm11  ;;  %v4719_v10 = vand.u32 2147483648, %v17269_v48  ;;  %vm6520_vm0 = vcmp.lt.f32.partialorder %v17289_v13, 0.0  ;;  %vm5463_vm1 = vweird.f32 %v14032_v36  ;;  %v5608_v62 = vadd.f32 -1.4531521, %v5544_v19 }
 0x568   : > { %v4975_v12 = vor.u32 1.1754944e-38, %v4974_v18  ;;  %v4716_v2 = vsel %vm14733_vm14, %v17286_v58, %v4712_v29  ;;  %v4717_v47 = vand.u32 2147483647, %v17269_v48  ;;  %vm5479_vm2 = vweird.f32 %v14169_v61  ;;  %v17291_v48 = vld [vmem:[#allocation18_spill] sm:$0xff]  ;;  %vm14786_vm5 = vmor %vm5463_vm1, %vm5464_vm13 }
 0x569   : > { %v6665_v52 = vsel %vm6537_vm7, %v6601_v30, %v6473_v42  ;;  %v6072_v37 = vmul.f32 %v6008_v44, %v14627_v8  ;;  %v5817_v23 = vmul.f32 %v5753_v15, %v14688_v27  ;;  %v4720_v20 = vor.u32 1.1754944e-38, %v4719_v10 }
 0x56a   : > { %6912 = vmatpush.msra.mxu3 %v6665_v52  ;;  %v5672_v32 = vmul.f32 %v5608_v62, %v14710_v45  ;;  %v14752_v11 = vsel %vm14715_vm9, %v4975_v12, %v4971_v22  ;;  %vm4718_vm3 = vcmp.eq.f32.partialorder %v4717_v47, 8.507059e+37  ;;  %v4727_v28 = vadd.f32 %v17291_v48, %v17290_v41  ;;  %v17298_v41 = vld [vmem:[#allocation13_spill] sm:$0xff] }
 0x56b   : > { %vm5478_vm4 = vweird.f32 %v14095_v14  ;;  %v6392_v35 = vmul.f32 %v17292_v26, %v6072_v37  ;;  %v5881_v6 = vadd.f32 -0.28449672, %v5817_v23  ;;  %v5545_v8 = vmul.f32 1.0614054, %v14752_v11 }
 0x56c   : > { %v14759_v1 = vsel %vm4718_vm3, %v4720_v20, %v4716_v2  ;;  %v5736_v17 = vadd.f32 1.4214138, %v5672_v32  ;;  %vm4729_vm6 = vweird.f32 %v17291_v48  ;;  %v4732_v22 = vand.u32 2147483647, %v17281_v49  ;;  %vm14809_vm13 = vmor %vm5478_vm4, %vm5479_vm2  ;;  %v17304_v2 = vld [vmem:[#allocation109_spill] sm:$0xff] }
 0x56d   : > { %v5528_v3 = vmul.f32 1.0614054, %v14759_v1  ;;  %v6456_v5 = vsub.f32 1.0, %v6392_v35  ;;  %v5945_v42 = vmul.f32 %v5881_v6, %v14688_v27  ;;  %v5609_v50 = vadd.f32 -1.4531521, %v5545_v8  ;;  %vm14767_vm7 = vmor %vm4728_vm15, %vm4729_vm6  ;;  %v17301_v8 = vld [vmem:[#allocation122_spill] sm:$0xff] }
 0x56e   : > { %v4734_v19 = vand.u32 2147483648, %v17281_v49  ;;  %v5800_v18 = vmul.f32 %v5736_v17, %v14710_v45  ;;  %v4731_v58 = vsel %vm14767_vm7, %v17291_v48, %v4727_v28  ;;  %vm4733_vm12 = vcmp.eq.f32.partialorder %v4732_v22, 8.507059e+37  ;;  %v17311_v28 = vld [vmem:[#allocation105_spill] sm:$0xff] }
 0x56f   : > { %v5592_v43 = vadd.f32 -1.4531521, %v5528_v3  ;;  %v6584_v29 = vsub.f32 0.0, %v6456_v5  ;;  %v6009_v30 = vadd.f32 0.2548296, %v5945_v42  ;;  %v5673_v44 = vmul.f32 %v5609_v50, %v14752_v11 }
 0x570   : > { %v4735_v15 = vor.u32 1.1754944e-38, %v4734_v19  ;;  %vm6521_vm10 = vcmp.lt.f32.partialorder %v17295_v31, 0.0  ;;  %v5864_v10 = vadd.f32 -0.28449672, %v5800_v18  ;;  %v5462_v49 = vadd.f32 %v14089_v39, %v14183_v46 }
 0x571   : > { %v5656_v62 = vmul.f32 %v5592_v43, %v14759_v1  ;;  %v5467_v12 = vand.u32 2147483647, %v14032_v36  ;;  %v6648_v47 = vsel %vm6520_vm0, %v6584_v29, %v6456_v5  ;;  %v6073_v52 = vmul.f32 %v6009_v30, %v14688_v27 }
 0x572   : > { %v5737_v37 = vadd.f32 1.4214138, %v5673_v44  ;;  %v14793_v23 = vsel %vm4733_vm12, %v4735_v15, %v4731_v58  ;;  %6893 = vmatpush.msra.mxu2 %v6648_v47  ;;  %v5928_v46 = vmul.f32 %v5864_v10, %v14710_v45  ;;  %v5466_v36 = vsel %vm14786_vm5, %v14089_v39, %v5462_v49  ;;  %v17302_v58 = vld [vmem:[#allocation37_spill] sm:$0xff] }
 0x573   : > { %v5720_v20 = vadd.f32 1.4214138, %v5656_v62  ;;  %v5529_v32 = vmul.f32 1.0614054, %v14793_v23  ;;  %vm5223_vm15 = vweird.f32 %v13858_v51  ;;  %v6393_v13 = vmul.f32 %v17298_v41, %v6073_v52  ;;  %v17303_v10 = vld [vmem:[#allocation97_spill] sm:$0xff]  ;;  %v17308_v41 = vld [vmem:[#allocation38_spill] sm:$0xff] }
 0x574   : > { %v5801_v48 = vmul.f32 %v5737_v37, %v14752_v11  ;;  %vm5468_vm9 = vcmp.eq.f32.partialorder %v5467_v12, 8.507059e+37  ;;  %v5477_v27 = vadd.f32 %v14169_v61, %v14303_v56  ;;  %v5992_v26 = vadd.f32 0.2548296, %v5928_v46 }
 0x575   : > { %v5784_v39 = vmul.f32 %v5720_v20, %v14759_v1  ;;  %v5593_v35 = vadd.f32 -1.4531521, %v5529_v32  ;;  %v14815_v6 = vsel %vm5468_vm9, %v14087_v0, %v5466_v36  ;;  %vm6504_vm8 = vcmp.lt.f32.partialorder %v17301_v8, 0.0  ;;  %v17307_v36 = vld [vmem:[#allocation73_spill] sm:$0xff]  ;;  %v17312_v8 = vld [vmem:[#allocation35_spill] sm:$0xff] }
 0x576   : > { %v6457_v17 = vsub.f32 1.0, %v6393_v13  ;;  %v5865_v3 = vadd.f32 -0.28449672, %v5801_v48  ;;  %v5578_v56 = vmul.f32 1.0614054, %v14815_v6  ;;  %v5481_v22 = vsel %vm14809_vm13, %v14169_v61, %v5477_v27 }
 0x577   : > { %v6056_v5 = vmul.f32 %v5992_v26, %v14710_v45  ;;  %v5848_v42 = vadd.f32 -0.28449672, %v5784_v39  ;;  %v5657_v50 = vmul.f32 %v5593_v35, %v14793_v23  ;;  %v5482_v60 = vand.u32 2147483647, %v14095_v14 }
 0x578   : > { %v6585_v19 = vsub.f32 0.0, %v6457_v17  ;;  %v5929_v0 = vmul.f32 %v5865_v3, %v14752_v11  ;;  %v5642_v18 = vadd.f32 -1.4531521, %v5578_v56  ;;  %v5222_v43 = vadd.f32 %v13917_v25, %v14013_v7 }
 0x579   : > { %vm5238_vm11 = vweird.f32 %v13870_v21  ;;  %v6376_v29 = vmul.f32 %v17302_v58, %v6056_v5  ;;  %v5912_v61 = vmul.f32 %v5848_v42, %v14759_v1  ;;  %v5721_v30 = vadd.f32 1.4214138, %v5657_v50 }
 0x57a   : > { %vm5483_vm14 = vcmp.eq.f32.partialorder %v5482_v60, 8.507059e+37  ;;  %v6649_v45 = vsel %vm6521_vm10, %v6585_v19, %v6457_v17  ;;  %v5993_v44 = vadd.f32 0.2548296, %v5929_v0  ;;  %v5706_v14 = vmul.f32 %v5642_v18, %v14815_v6 }
 0x57b   : > { %v14835_v15 = vsel %vm5483_vm14, %v14204_v55, %v5481_v22  ;;  %vm6505_vm0 = vcmp.lt.f32.partialorder %v17303_v10, 0.0  ;;  %6913 = vmatpush.msra.mxu3 %v6649_v45  ;;  %v6440_v7 = vsub.f32 1.0, %v6376_v29  ;;  %v5976_v62 = vadd.f32 0.2548296, %v5912_v61  ;;  %v17315_v29 = vld [vmem:[#allocation40_spill] sm:$0xff] }
 0x57c   : > { %v5785_v49 = vmul.f32 %v5721_v30, %v14793_v23  ;;  %v5579_v12 = vmul.f32 1.0614054, %v14835_v15  ;;  %vm6488_vm1 = vcmp.lt.f32.partialorder %v17304_v2, 0.0  ;;  %v6057_v31 = vmul.f32 %v5993_v44, %v14752_v11 }
 0x57d   : > { %v5770_v47 = vadd.f32 1.4214138, %v5706_v14  ;;  %vm5224_vm2 = vweird.f32 %v13917_v25  ;;  %v5227_v52 = vand.u32 2147483647, %v13858_v51  ;;  %v6568_v55 = vsub.f32 0.0, %v6440_v7  ;;  %v17319_v14 = vld [vmem:[#allocation16_spill] sm:$0xff] }
 0x57e   : > { %v6040_v37 = vmul.f32 %v5976_v62, %v14759_v1  ;;  %v5849_v46 = vadd.f32 -0.28449672, %v5785_v49  ;;  %v5643_v20 = vadd.f32 -1.4531521, %v5579_v12  ;;  %vm14847_vm3 = vmor %vm5223_vm15, %vm5224_vm2  ;;  %vm4983_vm4 = vweird.f32 %v17307_v36 }
 0x57f   : > { %v6377_v11 = vmul.f32 %v17308_v41, %v6057_v31  ;;  %v5834_v13 = vmul.f32 %v5770_v47, %v14815_v6  ;;  %v5226_v48 = vsel %vm14847_vm3, %v13917_v25, %v5222_v43  ;;  %vm14857_vm6 = vcmp.eq.f32.partialorder %v5227_v52, 8.507059e+37  ;;  %v17320_v31 = vld [vmem:[#allocation31_spill] sm:$0xff] }
 0x580   : > { %v6632_v27 = vsel %vm6504_vm8, %v6568_v55, %v6440_v7  ;;  %v6360_v26 = vmul.f32 %v17311_v28, %v6040_v37  ;;  %v5913_v39 = vmul.f32 %v5849_v46, %v14793_v23  ;;  %v5707_v35 = vmul.f32 %v5643_v20, %v14835_v15  ;;  %v17321_v47 = vld [vmem:[#allocation27_spill] sm:$0xff]  ;;  %v17326_v20 = vld [vmem:[#allocation144_spill] sm:$0xff] }
 0x581   : > { %6894 = vmatpush.msra.mxu2 %v6632_v27  ;;  %v6441_v17 = vsub.f32 1.0, %v6377_v11  ;;  %v5898_v3 = vadd.f32 -0.28449672, %v5834_v13  ;;  %v5229_v56 = vand.u32 2147483648, %v13858_v51  ;;  %v5237_v25 = vadd.f32 %v13932_v9, %v14029_v38  ;;  %v17327_v28 = vld [vmem:[#allocation59_spill] sm:$0xff] }
 0x582   : > { %v6424_v22 = vsub.f32 1.0, %v6360_v26  ;;  %v5977_v5 = vadd.f32 0.2548296, %v5913_v39  ;;  %v5771_v42 = vadd.f32 1.4214138, %v5707_v35  ;;  %vm5239_vm7 = vweird.f32 %v13932_v9 }
 0x583   : > { %vm6489_vm12 = vcmp.lt.f32.partialorder %v17312_v8, 0.0  ;;  %v6569_v50 = vsub.f32 0.0, %v6441_v17  ;;  %v5962_v60 = vmul.f32 %v5898_v3, %v14815_v6  ;;  %v5230_v19 = vor.u32 1.1754944e-38, %v5229_v56  ;;  %vm14874_vm10 = vmor %vm5238_vm11, %vm5239_vm7  ;;  %v17329_v3 = vld [vmem:[#allocation131_spill] sm:$0xff] }
 0x584   : > { %v5242_v51 = vand.u32 2147483647, %v13870_v21  ;;  %v6552_v38 = vsub.f32 0.0, %v6424_v22  ;;  %v6041_v18 = vmul.f32 %v5977_v5, %v14793_v23  ;;  %v5835_v43 = vmul.f32 %v5771_v42, %v14835_v15  ;;  %v17318_v23 = vld [vmem:[#allocation39_spill] sm:$0xff] }
 0x585   : > { %v5241_v58 = vsel %vm14874_vm10, %v13932_v9, %v5237_v25  ;;  %vm4998_vm5 = vweird.f32 %v17315_v29  ;;  %v6633_v61 = vsel %vm6505_vm0, %v6569_v50, %v6441_v17  ;;  %v6026_v30 = vadd.f32 0.2548296, %v5962_v60  ;;  %v17328_v17 = vld [vmem:[#allocation54_spill] sm:$0xff]  ;;  %v17330_v42 = vld [vmem:[#allocation87_spill] sm:$0xff] }
 0x586   : > { %v14889_v45 = vsel %vm14857_vm6, %v5230_v19, %v5226_v48  ;;  %vm14891_vm15 = vcmp.eq.f32.partialorder %v5242_v51, 8.507059e+37  ;;  %vm6538_vm9 = vcmp.lt.f32.partialorder %v17318_v23, 0.0  ;;  %6914 = vmatpush.msra.mxu3 %v6633_v61  ;;  %v6616_v9 = vsel %vm6488_vm1, %v6552_v38, %v6424_v22  ;;  %v17332_v8 = vld [vmem:[#allocation71_spill] sm:$0xff] }
 0x587   : > { %v6361_v7 = vmul.f32 %v17319_v14, %v6041_v18  ;;  %v5899_v62 = vadd.f32 -0.28449672, %v5835_v43  ;;  %v5562_v10 = vmul.f32 1.0614054, %v14889_v45  ;;  %6895 = vmatpush.msra.mxu2 %v6616_v9  ;;  %v6090_v49 = vmul.f32 %v6026_v30, %v14815_v6  ;;  %v17325_v6 = vld [vmem:[#allocation41_spill] sm:$0xff] }
 0x588   : > { %v5244_v12 = vand.u32 2147483648, %v13870_v21  ;;  %v4982_v52 = vadd.f32 %v17321_v47, %v17320_v31  ;;  %vm4984_vm13 = vweird.f32 %v17321_v47  ;;  %vm17322_vm8 = vcmask 261120  }
 0x589   : > { %v6425_v55 = vsub.f32 1.0, %v6361_v7  ;;  %7307 = vmatmul.msk.f32.vlgmr.msra.gmra.mxu2 %vm17322_vm8, %v14682_v34  ;;  %v5963_v2 = vmul.f32 %v5899_v62, %v14835_v15  ;;  %v5626_v37 = vadd.f32 -1.4531521, %v5562_v10  ;;  %vm14910_vm11 = vmor %vm4983_vm4, %vm4984_vm13  ;;  %v4987_v21 = vand.u32 2147483647, %v17307_v36  ;;  %v17337_v62 = vld [vmem:[#allocation138_spill] sm:$0xff] }
 0x58a   : > { %vm4743_vm14 = vweird.f32 %v17325_v6  ;;  %v6410_v32 = vmul.f32 %v17326_v20, %v6090_v49  ;;  %v5245_v41 = vor.u32 1.1754944e-38, %v5244_v12  ;;  %v4986_v11 = vsel %vm14910_vm11, %v17321_v47, %v4982_v52  ;;  %vm17331_vm4 = vmmov %vm17322_vm8  ;;  %v17338_v10 = vld [vmem:[#allocation91_spill] sm:$0xff] }
 0x58b   : > { %v4989_v13 = vand.u32 2147483648, %v17307_v36  ;;  %v6553_v48 = vsub.f32 0.0, %v6425_v55  ;;  %v6027_v1 = vadd.f32 0.2548296, %v5963_v2  ;;  %v5690_v27 = vmul.f32 %v5626_v37, %v14889_v45 }
 0x58c   : > { %vm4988_vm0 = vcmp.eq.f32.partialorder %v4987_v21, 8.507059e+37  ;;  %vm6539_vm1 = vcmp.lt.f32.partialorder %v17327_v28, 0.0  ;;  %v6474_v26 = vsub.f32 1.0, %v6410_v32  ;;  %v14925_v39 = vsel %vm14891_vm15, %v5245_v41, %v5241_v58 }
 0x58d   : > { %v4990_v35 = vor.u32 1.1754944e-38, %v4989_v13  ;;  %v4997_v56 = vadd.f32 %v17329_v3, %v17328_v17  ;;  %v6617_v25 = vsel %vm6489_vm12, %v6553_v48, %v6425_v55  ;;  %v6091_v36 = vmul.f32 %v6027_v1, %v14835_v15  ;;  %v17343_v13 = vld [vmem:[#allocation25_spill] sm:$0xff] }
 0x58e   : > { %v5754_v22 = vadd.f32 1.4214138, %v5690_v27  ;;  %v5563_v5 = vmul.f32 1.0614054, %v14925_v39  ;;  %vm4758_vm2 = vweird.f32 %v17330_v42  ;;  %6915 = vmatpush.msra.mxu3 %v6617_v25  ;;  %v6602_v50 = vsub.f32 0.0, %v6474_v26  ;;  %v17344_v27 = vld [vmem:[#allocation112_spill] sm:$0xff] }
 0x58f   : > { %v14934_v60 = vsel %vm4988_vm0, %v4990_v35, %v4986_v11  ;;  %vm4999_vm3 = vweird.f32 %v17329_v3  ;;  %v5002_v19 = vand.u32 2147483647, %v17315_v29  ;;  %7308 = vmatmul.msk.f32.vlgmr.msra.gmra.mxu3 %vm17331_vm4, %v14682_v34  ;;  %v6411_v0 = vmul.f32 %v17332_v8, %v6091_v36 }
 0x590   : > { %v5818_v15 = vmul.f32 %v5754_v22, %v14889_v45  ;;  %v5627_v51 = vadd.f32 -1.4531521, %v5563_v5  ;;  %v5546_v38 = vmul.f32 1.0614054, %v14934_v60  ;;  %vm14945_vm6 = vmor %vm4998_vm5, %vm4999_vm3  ;;  %vm5494_vm7 = vweird.f32 %v14337_v59  ;;  %v17348_v5 = vld [vmem:[#allocation52_spill] sm:$0xff] }
 0x591   : > { %v6666_v43 = vsel %vm6538_vm9, %v6602_v50, %v6474_v26  ;;  %v5001_v58 = vsel %vm14945_vm6, %v17329_v3, %v4997_v56  ;;  %vm14955_vm12 = vcmp.eq.f32.partialorder %v5002_v19, 8.507059e+37  ;;  %v5004_v30 = vand.u32 2147483648, %v17315_v29  ;;  %v17345_v26 = vld [vmem:[#allocation95_spill] sm:$0xff] }
 0x592   : > { %6932 = vmatpush.msrb.mxu0 %v6666_v43  ;;  %v6475_v44 = vsub.f32 1.0, %v6411_v0  ;;  %v5882_v9 = vadd.f32 -0.28449672, %v5818_v15  ;;  %v5691_v14 = vmul.f32 %v5627_v51, %v14925_v39  ;;  %v5610_v7 = vadd.f32 -1.4531521, %v5546_v38 }
 0x593   : > { %vm5493_vm10 = vweird.f32 %v14281_v40  ;;  %v5005_v23 = vor.u32 1.1754944e-38, %v5004_v30  ;;  %v4742_v49 = vadd.f32 %v17338_v10, %v17337_v62  ;;  %vm4744_vm5 = vweird.f32 %v17338_v10  ;;  %v17351_v30 = vld [vmem:[#allocation28_spill] sm:$0xff] }
 0x594   : > { %v4747_v12 = vand.u32 2147483647, %v17325_v6  ;;  %v6603_v31 = vsub.f32 0.0, %v6475_v44  ;;  %v5946_v47 = vmul.f32 %v5882_v9, %v14889_v45  ;;  %v5755_v29 = vadd.f32 1.4214138, %v5691_v14  ;;  %vm14970_vm15 = vmor %vm4743_vm14, %vm4744_vm5 }
 0x595   : > { %v5674_v52 = vmul.f32 %v5610_v7, %v14934_v60  ;;  %vm5509_vm9 = vweird.f32 %v14346_v63  ;;  %v14977_v2 = vsel %vm14955_vm12, %v5005_v23, %v5001_v58  ;;  %v4746_v37 = vsel %vm14970_vm15, %v17338_v10, %v4742_v49 }
 0x596   : > { %vm14982_vm13 = vcmp.eq.f32.partialorder %v4747_v12, 8.507059e+37  ;;  %v4749_v21 = vand.u32 2147483648, %v17325_v6  ;;  %v6667_v20 = vsel %vm6539_vm1, %v6603_v31, %v6475_v44  ;;  %v6010_v32 = vadd.f32 0.2548296, %v5946_v47  ;;  %v17352_v44 = vld [vmem:[#allocation69_spill] sm:$0xff]  ;;  %v17353_v12 = vld [vmem:[#allocation75_spill] sm:$0xff] }
 0x597   : > { %v5819_v41 = vmul.f32 %v5755_v29, %v14925_v39  ;;  %v5738_v11 = vadd.f32 1.4214138, %v5674_v52  ;;  %vm6522_vm8 = vcmp.lt.f32.partialorder %v17343_v13, 0.0  ;;  %vm5508_vm11 = vweird.f32 %v14285_v24  ;;  %6952 = vmatpush.msrb.mxu1 %v6667_v20 }
 0x598   : > { %v5547_v48 = vmul.f32 1.0614054, %v14977_v2  ;;  %v4750_v1 = vor.u32 1.1754944e-38, %v4749_v21  ;;  %v4757_v35 = vadd.f32 %v17345_v26, %v17344_v27  ;;  %vm4759_vm14 = vweird.f32 %v17345_v26  ;;  %vm15047_vm12 = vmor %vm5508_vm11, %vm5509_vm9 }
 0x599   : > { %v6074_v6 = vmul.f32 %v6010_v32, %v14889_v45  ;;  %v5883_v28 = vadd.f32 -0.28449672, %v5819_v41  ;;  %v5802_v17 = vmul.f32 %v5738_v11, %v14934_v60  ;;  %vm15000_vm0 = vmor %vm4758_vm2, %vm4759_vm14  ;;  %v4762_v56 = vand.u32 2147483647, %v17330_v42  ;;  %v17357_v41 = vld [vmem:[#allocation93_spill] sm:$0xff] }
 0x59a   : > { %v5611_v25 = vadd.f32 -1.4531521, %v5547_v48  ;;  %v15007_v36 = vsel %vm14982_vm13, %v4750_v1, %v4746_v37  ;;  %v4761_v45 = vsel %vm15000_vm0, %v17345_v26, %v4757_v35  ;;  %v4764_v22 = vand.u32 2147483648, %v17330_v42  ;;  %vm15023_vm2 = vmor %vm5493_vm10, %vm5494_vm7  ;;  %v17362_v42 = vld [vmem:[#allocation148_spill] sm:$0xff] }
 0x59b   : > { %v6394_v50 = vmul.f32 %v17348_v5, %v6074_v6  ;;  %v5947_v19 = vmul.f32 %v5883_v28, %v14925_v39  ;;  %v5866_v8 = vadd.f32 -0.28449672, %v5802_v17  ;;  %v5530_v0 = vmul.f32 1.0614054, %v15007_v36  ;;  %v17358_v28 = vld [vmem:[#allocation151_spill] sm:$0xff] }
 0x59c   : > { %v5675_v15 = vmul.f32 %v5611_v25, %v14977_v2  ;;  %vm4763_vm1 = vcmp.eq.f32.partialorder %v4762_v56, 8.507059e+37  ;;  %v4765_v51 = vor.u32 1.1754944e-38, %v4764_v22  ;;  %v5492_v38 = vadd.f32 %v14337_v59, %v14375_v4  ;;  %v17359_v56 = vld [vmem:[#allocation58_spill] sm:$0xff] }
 0x59d   : > { %v6458_v18 = vsub.f32 1.0, %v6394_v50  ;;  %v6011_v43 = vadd.f32 0.2548296, %v5947_v19  ;;  %v5930_v58 = vmul.f32 %v5866_v8, %v14934_v60  ;;  %v5594_v61 = vadd.f32 -1.4531521, %v5530_v0 }
 0x59e   : > { %vm6523_vm3 = vcmp.lt.f32.partialorder %v17351_v30, 0.0  ;;  %vm5253_vm4 = vweird.f32 %v17352_v44  ;;  %v5739_v9 = vadd.f32 1.4214138, %v5675_v15  ;;  %v15030_v14 = vsel %vm4763_vm1, %v4765_v51, %v4761_v45 }
 0x59f   : > { %v5496_v4 = vsel %vm15023_vm2, %v14337_v59, %v5492_v38  ;;  %v5497_v7 = vand.u32 2147483647, %v14281_v40  ;;  %v6586_v23 = vsub.f32 0.0, %v6458_v18  ;;  %v6075_v62 = vmul.f32 %v6011_v43, %v14925_v39  ;;  %v17356_v39 = vld [vmem:[#allocation44_spill] sm:$0xff] }
 0x5a0   : > { %v5994_v10 = vadd.f32 0.2548296, %v5930_v58  ;;  %v5658_v49 = vmul.f32 %v5594_v61, %v15007_v36  ;;  %vm6506_vm6 = vcmp.lt.f32.partialorder %v17353_v12, 0.0  ;;  %v5803_v31 = vmul.f32 %v5739_v9, %v14977_v2  ;;  %v17367_v12 = vld [vmem:[#allocation72_spill] sm:$0xff] }
 0x5a1   : > { %v5531_v47 = vmul.f32 1.0614054, %v15030_v14  ;;  %vm5498_vm7 = vcmp.eq.f32.partialorder %v5497_v7, 8.507059e+37  ;;  %v5507_v29 = vadd.f32 %v14346_v63, %v14381_v33  ;;  %v6650_v59 = vsel %vm6522_vm8, %v6586_v23, %v6458_v18  ;;  %v17363_v18 = vld [vmem:[#allocation47_spill] sm:$0xff]  ;;  %v17366_v7 = vld [vmem:[#allocation100_spill] sm:$0xff] }
 0x5a2   : > { %v6395_v52 = vmul.f32 %v17356_v39, %v6075_v62  ;;  %v6058_v55 = vmul.f32 %v5994_v10, %v14934_v60  ;;  %v5722_v37 = vadd.f32 1.4214138, %v5658_v49  ;;  %6933 = vmatpush.msrb.mxu0 %v6650_v59  ;;  %v5867_v46 = vadd.f32 -0.28449672, %v5803_v31  ;;  %v17368_v39 = vld [vmem:[#allocation98_spill] sm:$0xff] }
 0x5a3   : > { %v5595_v21 = vadd.f32 -1.4531521, %v5531_v47  ;;  %v15056_v33 = vsel %vm5498_vm7, %v14313_v57, %v5496_v4  ;;  %v5511_v20 = vsel %vm15047_vm12, %v14346_v63, %v5507_v29  ;;  %v5512_v27 = vand.u32 2147483647, %v14285_v24  ;;  %v17365_v4 = vld [vmem:[#allocation21_spill] sm:$0xff] }
 0x5a4   : > { %v6459_v32 = vsub.f32 1.0, %v6395_v52  ;;  %v6378_v11 = vmul.f32 %v17357_v41, %v6058_v55  ;;  %v5786_v13 = vmul.f32 %v5722_v37, %v15007_v36  ;;  %v5580_v48 = vmul.f32 1.0614054, %v15056_v33 }
 0x5a5   : > { %v5931_v60 = vmul.f32 %v5867_v46, %v14977_v2  ;;  %v5659_v1 = vmul.f32 %v5595_v21, %v15030_v14  ;;  %v5252_v57 = vadd.f32 %v14217_v54, %v14308_v16  ;;  %vm5268_vm10 = vweird.f32 %v17358_v28  ;;  %v17395_v21 = vld [vmem:[#allocation49_spill] sm:$0xff] }
 0x5a6   : > { %v6587_v26 = vsub.f32 0.0, %v6459_v32  ;;  %v6442_v35 = vsub.f32 1.0, %v6378_v11  ;;  %v5850_v6 = vadd.f32 -0.28449672, %v5786_v13  ;;  %v5644_v63 = vadd.f32 -1.4531521, %v5580_v48 }
 0x5a7   : > { %v5995_v17 = vadd.f32 0.2548296, %v5931_v60  ;;  %v5723_v3 = vadd.f32 1.4214138, %v5659_v1  ;;  %vm5513_vm5 = vcmp.eq.f32.partialorder %v5512_v27, 8.507059e+37  ;;  %vm5254_vm15 = vweird.f32 %v14217_v54 }
 0x5a8   : > { %vm6507_vm9 = vcmp.lt.f32.partialorder %v17359_v56, 0.0  ;;  %v6651_v25 = vsel %vm6523_vm3, %v6587_v26, %v6459_v32  ;;  %v6570_v24 = vsub.f32 0.0, %v6442_v35  ;;  %v5914_v45 = vmul.f32 %v5850_v6, %v15007_v36  ;;  %vm15078_vm13 = vmor %vm5253_vm4, %vm5254_vm15  ;;  %v17375_v26 = vld [vmem:[#allocation82_spill] sm:$0xff]  ;;  %v17376_v6 = vld [vmem:[#allocation57_spill] sm:$0xff] }
 0x5a9   : > { %v5708_v16 = vmul.f32 %v5644_v63, %v15056_v33  ;;  %6953 = vmatpush.msrb.mxu1 %v6651_v25  ;;  %v6059_v5 = vmul.f32 %v5995_v17, %v14977_v2  ;;  %v5787_v50 = vmul.f32 %v5723_v3, %v15030_v14  ;;  %v15085_v19 = vsel %vm5513_vm5, %v14351_v53, %v5511_v20  ;;  %v17364_v2 = vld [vmem:[#allocation132_spill] sm:$0xff]  ;;  %v17377_v63 = vld [vmem:[#allocation46_spill] sm:$0xff] }
 0x5aa   : > { %v5256_v8 = vsel %vm15078_vm13, %v14217_v54, %v5252_v57  ;;  %v6634_v0 = vsel %vm6506_vm6, %v6570_v24, %v6442_v35  ;;  %v5978_v15 = vadd.f32 0.2548296, %v5914_v45  ;;  %v5581_v38 = vmul.f32 1.0614054, %v15085_v19  ;;  %v17371_v20 = vld [vmem:[#allocation80_spill] sm:$0xff] }
 0x5ab   : > { %v5772_v51 = vadd.f32 1.4214138, %v5708_v16  ;;  %vm6490_vm8 = vcmp.lt.f32.partialorder %v17362_v42, 0.0  ;;  %vm5013_vm11 = vweird.f32 %v17363_v18  ;;  %6934 = vmatpush.msrb.mxu0 %v6634_v0  ;;  %v6379_v43 = vmul.f32 %v17364_v2, %v6059_v5  ;;  %v17374_v57 = vld [vmem:[#allocation124_spill] sm:$0xff]  ;;  %v6717_v2 = vpop.f32.mrf.mxu1 }
 0x5ac   : > { %v5851_v53 = vadd.f32 -0.28449672, %v5787_v50  ;;  %v5257_v58 = vand.u32 2147483647, %v17352_v44  ;;  %v5259_v61 = vand.u32 2147483648, %v17352_v44  ;;  %v6042_v54 = vmul.f32 %v5978_v15, %v15007_v36  ;;  %v17382_v50 = vld [vmem:[#allocation142_spill] sm:$0xff] }
 0x5ad   : > { %v5836_v30 = vmul.f32 %v5772_v51, %v15056_v33  ;;  %v5645_v9 = vadd.f32 -1.4531521, %v5581_v38  ;;  %v5267_v23 = vadd.f32 %v17366_v7, %v17365_v4  ;;  %v6443_v62 = vsub.f32 1.0, %v6379_v43  ;;  %v17385_v43 = vld [vmem:[#allocation17_spill] sm:$0xff]  ;;  %v17387_v4 = vld [vmem:[#allocation140_spill] sm:$0xff] }
 0x5ae   : > { %v5915_v10 = vmul.f32 %v5851_v53, %v15030_v14  ;;  %vm5258_vm14 = vcmp.eq.f32.partialorder %v5257_v58, 8.507059e+37  ;;  %v5260_v49 = vor.u32 1.1754944e-38, %v5259_v61  ;;  %v6362_v31 = vmul.f32 %v17367_v12, %v6042_v54  ;;  %v17386_v53 = vld [vmem:[#allocation126_spill] sm:$0xff] }
 0x5af   : > { %v5900_v47 = vadd.f32 -0.28449672, %v5836_v30  ;;  %v5709_v29 = vmul.f32 %v5645_v9, %v15085_v19  ;;  %vm5269_vm0 = vweird.f32 %v17366_v7  ;;  %v6571_v44 = vsub.f32 0.0, %v6443_v62 }
 0x5b0   : > { %v5979_v36 = vadd.f32 0.2548296, %v5915_v10  ;;  %v15106_v40 = vsel %vm5258_vm14, %v5260_v49, %v5256_v8  ;;  %v5272_v59 = vand.u32 2147483647, %v17358_v28  ;;  %vm6491_vm1 = vcmp.lt.f32.partialorder %v17368_v39, 0.0  ;;  %vm15114_vm2 = vmor %vm5268_vm10, %vm5269_vm0  ;;  %v17394_v39 = vld [vmem:[#allocation139_spill] sm:$0xff] }
 0x5b1   : > { %v6426_v52 = vsub.f32 1.0, %v6362_v31  ;;  %v5964_v55 = vmul.f32 %v5900_v47, %v15056_v33  ;;  %v5773_v37 = vadd.f32 1.4214138, %v5709_v29  ;;  %v5564_v46 = vmul.f32 1.0614054, %v15106_v40  ;;  %v17390_v47 = vld [vmem:[#allocation48_spill] sm:$0xff]  ;;  %v6757_v31 = vpop.f32.mrf.mxu3 }
 0x5b2   : > { %vm5028_vm3 = vweird.f32 %v17371_v20  ;;  %v6635_v32 = vsel %vm6507_vm9, %v6571_v44, %v6443_v62  ;;  %v6043_v41 = vmul.f32 %v5979_v36, %v15030_v14  ;;  %v5271_v11 = vsel %vm15114_vm2, %v17366_v7, %v5267_v23 }
 0x5b3   : > { %vm15125_vm4 = vcmp.eq.f32.partialorder %v5272_v59, 8.507059e+37  ;;  %6954 = vmatpush.msrb.mxu1 %v6635_v32  ;;  %v6554_v48 = vsub.f32 0.0, %v6426_v52  ;;  %v6028_v60 = vadd.f32 0.2548296, %v5964_v55  ;;  %v5837_v1 = vmul.f32 %v5773_v37, %v15085_v19  ;;  %v17396_v32 = vld [vmem:[#allocation63_spill] sm:$0xff] }
 0x5b4   : > { %v5628_v27 = vadd.f32 -1.4531521, %v5564_v46  ;;  %vm6540_vm6 = vcmp.lt.f32.partialorder %v17374_v57, 0.0  ;;  %v6363_v35 = vmul.f32 %v17375_v26, %v6043_v41  ;;  %v5274_v14 = vand.u32 2147483648, %v17358_v28  ;;  %v17380_v28 = vld [vmem:[#allocation65_spill] sm:$0xff] }
 0x5b5   : > { %v5012_v17 = vadd.f32 %v17377_v63, %v17376_v6  ;;  %vm5014_vm7 = vweird.f32 %v17377_v63  ;;  %v6618_v3 = vsel %vm6490_vm8, %v6554_v48, %v6426_v52  ;;  %v6092_v56 = vmul.f32 %v6028_v60, %v15056_v33 }
 0x5b6   : > { %v5901_v25 = vadd.f32 -0.28449672, %v5837_v1  ;;  %v5692_v24 = vmul.f32 %v5628_v27, %v15106_v40  ;;  %vm15142_vm12 = vmor %vm5013_vm11, %vm5014_vm7  ;;  %vm4773_vm10 = vweird.f32 %v17380_v28  ;;  %6935 = vmatpush.msrb.mxu0 %v6618_v3  ;;  %v6427_v16 = vsub.f32 1.0, %v6363_v35 }
 0x5b7   : > { %v5275_v22 = vor.u32 1.1754944e-38, %v5274_v14  ;;  %v5016_v5 = vsel %vm15142_vm12, %v17377_v63, %v5012_v17  ;;  %v5017_v33 = vand.u32 2147483647, %v17363_v18  ;;  %vm17381_vm5 = vcmask 261120  }
 0x5b8   : > { %7309 = vmatmul.msk.f32.vlgmr.msrb.gmra.mxu0 %vm17381_vm5, %v14682_v34  ;;  %v6412_v8 = vmul.f32 %v17382_v50, %v6092_v56  ;;  %v5965_v0 = vmul.f32 %v5901_v25, %v15085_v19  ;;  %v5756_v15 = vadd.f32 1.4214138, %v5692_v24  ;;  %v5019_v51 = vand.u32 2147483648, %v17363_v18  ;;  %vm17391_vm14 = vmmov %vm17381_vm5  ;;  %v17399_v56 = vld [vmem:[#allocation136_spill] sm:$0xff] }
 0x5b9   : > { %v6555_v38 = vsub.f32 0.0, %v6427_v16  ;;  %v15158_v42 = vsel %vm15125_vm4, %v5275_v22, %v5271_v11  ;;  %vm15160_vm15 = vcmp.eq.f32.partialorder %v5017_v33, 8.507059e+37  ;;  %v5027_v58 = vadd.f32 %v17386_v53, %v17385_v43  ;;  %v17400_v25 = vld [vmem:[#allocation20_spill] sm:$0xff]  ;;  %v17404_v43 = vld [vmem:[#allocation83_spill] sm:$0xff] }
 0x5ba   : > { %v6476_v61 = vsub.f32 1.0, %v6412_v8  ;;  %v6029_v54 = vadd.f32 0.2548296, %v5965_v0  ;;  %v5820_v30 = vmul.f32 %v5756_v15, %v15106_v40  ;;  %v5565_v9 = vmul.f32 1.0614054, %v15158_v42 }
 0x5bb   : > { %vm6541_vm9 = vcmp.lt.f32.partialorder %v17387_v4, 0.0  ;;  %v6619_v18 = vsel %vm6491_vm1, %v6555_v38, %v6427_v16  ;;  %v5020_v7 = vor.u32 1.1754944e-38, %v5019_v51  ;;  %vm5029_vm13 = vweird.f32 %v17386_v53  ;;  %v17401_v16 = vld [vmem:[#allocation84_spill] sm:$0xff] }
 0x5bc   : > { %v5032_v23 = vand.u32 2147483647, %v17371_v20  ;;  %6955 = vmatpush.msrb.mxu1 %v6619_v18  ;;  %v6604_v62 = vsub.f32 0.0, %v6476_v61  ;;  %v6093_v10 = vmul.f32 %v6029_v54, %v15085_v19  ;;  %v5884_v49 = vadd.f32 -0.28449672, %v5820_v30  ;;  %vm15176_vm8 = vmor %vm5028_vm3, %vm5029_vm13  ;;  %v6737_v54 = vpop.f32.mrf.mxu2  ;;  %v15247_v30 = vpop.permute.xlu2 %6674 }
 0x5bd   : > { %v5629_v12 = vadd.f32 -1.4531521, %v5565_v9  ;;  %vm4788_vm11 = vweird.f32 %v17390_v47  ;;  %7310 = vmatmul.msk.f32.vlgmr.msrb.gmra.mxu1 %vm17391_vm14, %v14682_v34  ;;  %v15185_v29 = vsel %vm15160_vm15, %v5020_v7, %v5016_v5  ;;  %v5031_v19 = vsel %vm15176_vm8, %v17386_v53, %v5027_v58  ;;  %v17405_v7 = vld [vmem:[#allocation113_spill] sm:$0xff] }
 0x5be   : > { %vm15190_vm0 = vcmp.eq.f32.partialorder %v5032_v23, 8.507059e+37  ;;  %v5034_v36 = vand.u32 2147483648, %v17371_v20  ;;  %v6668_v59 = vsel %vm6540_vm6, %v6604_v62, %v6476_v61  ;;  %v6413_v52 = vmul.f32 %v17394_v39, %v6093_v10 }
 0x5bf   : > { %v5948_v34 = vmul.f32 %v5884_v49, %v15106_v40  ;;  %v5693_v55 = vmul.f32 %v5629_v12, %v15158_v42  ;;  %6972 = vmatpush.msrb.mxu2 %v6668_v59  ;;  %v5548_v37 = vmul.f32 1.0614054, %v15185_v29  ;;  %v4772_v41 = vadd.f32 %v17396_v32, %v17395_v21  ;;  %v6697_v49 = vpop.f32.mrf.mxu0 }
 0x5c0   : > { %v5035_v46 = vor.u32 1.1754944e-38, %v5034_v36  ;;  %vm4774_vm1 = vweird.f32 %v17396_v32  ;;  %v6477_v11 = vsub.f32 1.0, %v6413_v52  ;;  %v4779_v60 = vand.u32 2147483648, %v17380_v28 }
 0x5c1   : > { %v6012_v20 = vadd.f32 0.2548296, %v5948_v34  ;;  %v5757_v13 = vadd.f32 1.4214138, %v5693_v55  ;;  %vm15206_vm2 = vmor %vm4773_vm10, %vm4774_vm1  ;;  %v5612_v1 = vadd.f32 -1.4531521, %v5548_v37  ;;  %v4787_v24 = vadd.f32 %v17400_v25, %v17399_v56 }
 0x5c2   : > { %v15213_v27 = vsel %vm15190_vm0, %v5035_v46, %v5031_v19  ;;  %v4776_v57 = vsel %vm15206_vm2, %v17396_v32, %v4772_v41  ;;  %v4777_v26 = vand.u32 2147483647, %v17380_v28  ;;  %v6605_v35 = vsub.f32 0.0, %v6477_v11  ;;  %v17406_v55 = vld [vmem:[#allocation92_spill] sm:$0xff] }
 0x5c3   : > { %v6076_v14 = vmul.f32 %v6012_v20, %v15106_v40  ;;  %v5821_v6 = vmul.f32 %v5757_v13, %v15158_v42  ;;  %v5549_v63 = vmul.f32 1.0614054, %v15213_v27  ;;  %v5676_v17 = vmul.f32 %v5612_v1, %v15185_v29  ;;  %v6797_v1 = vpop.f32.mrf.mxu1 }
 0x5c4   : > { %vm4778_vm3 = vcmp.eq.f32.partialorder %v4777_v26, 8.507059e+37  ;;  %v4780_v3 = vor.u32 1.1754944e-38, %v4779_v60  ;;  %v6669_v45 = vsel %vm6541_vm9, %v6605_v35, %v6477_v11  ;;  %vm4789_vm4 = vweird.f32 %v17400_v25 }
 0x5c5   : > { %v6396_v22 = vmul.f32 %v17401_v16, %v6076_v14  ;;  %v5885_v28 = vadd.f32 -0.28449672, %v5821_v6  ;;  %v5613_v5 = vadd.f32 -1.4531521, %v5549_v63  ;;  %6992 = vmatpush.msrb.mxu3 %v6669_v45  ;;  %v5740_v40 = vadd.f32 1.4214138, %v5676_v17  ;;  %vm15237_vm6 = vmor %vm4788_vm11, %vm4789_vm4  ;;  %v6817_v6 = vpop.f32.mrf.mxu2 }
 0x5c6   : > { %v15228_v33 = vsel %vm4778_vm3, %v4780_v3, %v4776_v57  ;;  %v4792_v50 = vand.u32 2147483647, %v17390_v47  ;;  %vm6524_vm7 = vcmp.lt.f32.partialorder %v17404_v43, 0.0  ;;  %v4791_v58 = vsel %vm15237_vm6, %v17400_v25, %v4787_v24  ;;  %v17408_v25 = vld [vmem:[#allocation55_spill] sm:$0xff]  ;;  %v17411_v43 = vld [vmem:[#allocation118_spill] sm:$0xff] }
 0x5c7   : > { %v6460_v8 = vsub.f32 1.0, %v6396_v22  ;;  %v5949_v0 = vmul.f32 %v5885_v28, %v15158_v42  ;;  %v5677_v15 = vmul.f32 %v5613_v5, %v15213_v27  ;;  %v5532_v51 = vmul.f32 1.0614054, %v15228_v33  ;;  %v6777_v38 = vpop.f32.mrf.mxu0 }
 0x5c8   : > { %v5804_v53 = vmul.f32 %v5740_v40, %v15185_v29  ;;  %v4794_v61 = vand.u32 2147483648, %v17390_v47  ;;  %vm4793_vm12 = vcmp.eq.f32.partialorder %v4792_v50, 8.507059e+37  ;;  %vm6525_vm10 = vcmp.lt.f32.partialorder %v17405_v7, 0.0 }
 0x5c9   : > { %v6588_v9 = vsub.f32 0.0, %v6460_v8  ;;  %v6013_v4 = vadd.f32 0.2548296, %v5949_v0  ;;  %v5741_v18 = vadd.f32 1.4214138, %v5677_v15  ;;  %v6718_v12 = vadd.f32 %v6717_v2, %v15247_v30 }
 0x5ca   : > { %v5868_v23 = vadd.f32 -0.28449672, %v5804_v53  ;;  %v5596_v62 = vadd.f32 -1.4531521, %v5532_v51  ;;  %v4795_v10 = vor.u32 1.1754944e-38, %v4794_v61  ;;  %v6738_v36 = vadd.f32 %v6737_v54, %v15247_v30  ;;  %v17412_v54 = vld [vmem:[#allocation43_spill] sm:$0xff] }
 0x5cb   : > { %v6652_v19 = vsel %vm6524_vm7, %v6588_v9, %v6460_v8  ;;  %v6077_v47 = vmul.f32 %v6013_v4, %v15158_v42  ;;  %v5805_v44 = vmul.f32 %v5741_v18, %v15213_v27  ;;  %v7016_v34 = vrot.slane %v6718_v12, 6  ;;  %v17410_v8 = vld [vmem:[#allocation145_spill] sm:$0xff] }
 0x5cc   : > { %6973 = vmatpush.msrb.mxu2 %v6652_v19  ;;  %v5932_v59 = vmul.f32 %v5868_v23, %v15185_v29  ;;  %v5660_v39 = vmul.f32 %v5596_v62, %v15228_v33  ;;  %v15258_v52 = vsel %vm4793_vm12, %v4795_v10, %v4791_v58  ;;  %v6698_v32 = vadd.f32 %v6697_v49, %v15247_v30 }
 0x5cd   : > { %v6397_v37 = vmul.f32 %v17406_v55, %v6077_v47  ;;  %v5869_v46 = vadd.f32 -0.28449672, %v5805_v44  ;;  %v5533_v21 = vmul.f32 1.0614054, %v15258_v52  ;;  %v7017_v11 = vrot.slane %v6738_v36, 4  ;;  %v17414_v44 = vld [vmem:[#allocation81_spill] sm:$0xff] }
 0x5ce   : > { %v5996_v42 = vadd.f32 0.2548296, %v5932_v59  ;;  %v5724_v41 = vadd.f32 1.4214138, %v5660_v39  ;;  %v6758_v20 = vadd.f32 %v6757_v31, %v15247_v30  ;;  %vm7029_vm5 = vcmask 1045508   ;;  %v17415_v36 = vld [vmem:[#allocation67_spill] sm:$0xff] }
 0x5cf   : > { %v6461_v13 = vsub.f32 1.0, %v6397_v37  ;;  %v5933_v48 = vmul.f32 %v5869_v46, %v15213_v27  ;;  %v5597_v60 = vadd.f32 -1.4531521, %v5533_v21  ;;  %vm17407_vm15 = vcmask 1041408  }
 0x5d0   : > { %v6060_v57 = vmul.f32 %v5996_v42, %v15185_v29  ;;  %v5788_v26 = vmul.f32 %v5724_v41, %v15228_v33  ;;  %v7028_v35 = vsel %vm17407_vm15, %v6698_v32, %v7016_v34  ;;  %v7018_v14 = vrot.slane %v6758_v20, 2  ;;  %v6837_v29 = vpop.f32.mrf.mxu3  ;;  %vm17413_vm8 = vmmov %vm17407_vm15  ;;  %v17417_v32 = vld [vmem:[#allocation12_spill] sm:$0xff] }
 0x5d1   : > { %v6589_v63 = vsub.f32 0.0, %v6461_v13  ;;  %v5997_v17 = vadd.f32 0.2548296, %v5933_v48  ;;  %v5661_v3 = vmul.f32 %v5597_v60, %v15258_v52  ;;  %v6798_v56 = vadd.f32 %v6797_v1, %v15247_v30  ;;  %v7910_v20 = vld [vmem:[%s15359_s5] sm:$0x3]  ;;  %vm17421_vm4 = vmmov %vm17413_vm8 }
 0x5d2   : > { %v6380_v24 = vmul.f32 %v17408_v25, %v6060_v57  ;;  %v5852_v45 = vadd.f32 -0.28449672, %v5788_v26  ;;  %v7030_v16 = vsel %vm7029_vm5, %v7017_v11, %v7018_v14  ;;  %v6818_v22 = vadd.f32 %v6817_v6, %v15247_v30  ;;  %v17419_v48 = vld [vmem:[#allocation120_spill] sm:$0xff]  ;;  %vm17423_vm7 = vmmov %vm17421_vm4 }
 0x5d3   : > { %v6653_v28 = vsel %vm6525_vm10, %v6589_v63, %v6461_v13  ;;  %v6061_v5 = vmul.f32 %v5997_v17, %v15213_v27  ;;  %v5725_v40 = vadd.f32 1.4214138, %v5661_v3  ;;  %vm17409_vm9 = vcmask 1043456  }
 0x5d4   : > { %v7031_v50 = vsel %vm17409_vm9, %v7028_v35, %v7030_v16  ;;  %v6252_v0 = vmul.f32 1.442695, %v17410_v8  ;;  %6993 = vmatpush.msrb.mxu3 %v6653_v28  ;;  %v6444_v15 = vsub.f32 1.0, %v6380_v24  ;;  %v5916_v51 = vmul.f32 %v5852_v45, %v15228_v33  ;;  %vm17416_vm14 = vmmov %vm17409_vm9 }
 0x5d5   : > { %7045 = vst [vmem:[%s15280_s9] sm:$0xff] %v7031_v50  ;;  %v7019_v2 = vrot.slane %v6798_v56, 6  ;;  %v6381_v53 = vmul.f32 %v17411_v43, %v6061_v5  ;;  %v5789_v58 = vmul.f32 %v5725_v40, %v15258_v52  ;;  %v7020_v27 = vrot.slane %v6818_v22, 4  ;;  %vm17422_vm6 = vmmov %vm17409_vm9 }
 0x5d6   : > { %v6838_v61 = vadd.f32 %v6837_v29, %v15247_v30  ;;  %vm6508_vm13 = vcmp.lt.f32.partialorder %v17412_v54, 0.0  ;;  %v6572_v9 = vsub.f32 0.0, %v6444_v15  ;;  %v5980_v4 = vadd.f32 0.2548296, %v5916_v51  ;;  %vm17424_vm12 = vmmov %vm17422_vm6 }
 0x5d7   : > { %v6445_v18 = vsub.f32 1.0, %v6381_v53  ;;  %v5853_v7 = vadd.f32 -0.28449672, %v5789_v58  ;;  %v6778_v23 = vadd.f32 %v6777_v38, %v15247_v30  ;;  %7896 = vpow2.f32 %v6252_v0 }
 0x5d8   : > { %v7021_v62 = vrot.slane %v6838_v61, 2  ;;  %v6636_v10 = vsel %vm6508_vm13, %v6572_v9, %v6444_v15  ;;  %v6044_v49 = vmul.f32 %v5980_v4, %v15228_v33  ;;  %vm6509_vm11 = vcmp.lt.f32.partialorder %v17414_v44, 0.0 }
 0x5d9   : > { %6974 = vmatpush.msrb.mxu2 %v6636_v10  ;;  %v6573_v12 = vsub.f32 0.0, %v6445_v18  ;;  %v5917_v31 = vmul.f32 %v5853_v7, %v15258_v52  ;;  %v7032_v19 = vsel %vm17413_vm8, %v6778_v23, %v7019_v2  ;;  %vm6492_vm0 = vcmp.lt.f32.partialorder %v17417_v32, 0.0 }
 0x5da   : > { %v7033_v47 = vsel %vm7029_vm5, %v7020_v27, %v7021_v62  ;;  %v6364_v59 = vmul.f32 %v17415_v36, %v6044_v49  ;;  %vm17418_vm1 = vcmask 261120   ;;  %vm6493_vm2 = vcmp.lt.f32.partialorder %v17419_v48, 0.0 }
 0x5db   : > { %v7034_v39 = vsel %vm17416_vm14, %v7032_v19, %v7033_v47  ;;  %v6637_v34 = vsel %vm6509_vm11, %v6573_v12, %v6445_v18  ;;  %v5981_v55 = vadd.f32 0.2548296, %v5917_v31  ;;  %vm17420_vm3 = vmmov %vm17418_vm1 }
 0x5dc   : > { %7046 = vst [vmem:[%s15280_s9 + $0x8] sm:$0xff] %v7034_v39  ;;  %6994 = vmatpush.msrb.mxu3 %v6637_v34  ;;  %v6428_v37 = vsub.f32 1.0, %v6364_v59  ;;  %v6857_v35 = vpop.f32.mrf.mxu0 }
 0x5dd   : > { %v6045_v33 = vmul.f32 %v5981_v55, %v15258_v52  ;;  %v7897_v46 = vpop.eup %7896  ;;  %v6858_v3 = vadd.f32 %v6857_v35, %v15247_v30 }
 0x5de   : > { %v6556_v21 = vsub.f32 0.0, %v6428_v37 }
 0x5df   : > { %v6365_v42 = vmul.f32 %v7897_v46, %v6045_v33 }
 0x5e0   : > { %v6620_v41 = vsel %vm6492_vm0, %v6556_v21, %v6428_v37 }
 0x5e1   : > { %6975 = vmatpush.msrb.mxu2 %v6620_v41  ;;  %v6429_v11 = vsub.f32 1.0, %v6365_v42 }
 0x5e2   : > { %7311 = vmatmul.msk.f32.vlgmr.msrb.gmra.mxu2 %vm17418_vm1, %v7910_v20  ;;  %v6877_v52 = vpop.f32.mrf.mxu1 }
 0x5e3   : > { %v6557_v13 = vsub.f32 0.0, %v6429_v11  ;;  %v6878_v57 = vadd.f32 %v6877_v52, %v15247_v30 }
 0x5e5   : > { %v6621_v60 = vsel %vm6493_vm2, %v6557_v13, %v6429_v11  ;;  %v7022_v6 = vrot.slane %v6878_v57, 6 }
 0x5e6   : > { %6995 = vmatpush.msrb.mxu3 %v6621_v60 }
 0x5e7   : > { %7312 = vmatmul.msk.f32.vlgmr.msrb.gmra.mxu3 %vm17420_vm3, %v7910_v20  ;;  %v7035_v25 = vsel %vm17421_vm4, %v6858_v3, %v7022_v6 }
 0x60c   : > { %v6897_v1 = vpop.f32.mrf.mxu2 }
 0x60d   : > { %v6898_v26 = vadd.f32 %v6897_v1, %v15247_v30 }
 0x60f   : > { %v7023_v63 = vrot.slane %v6898_v26, 4 }
 0x612   : > { %v6917_v14 = vpop.f32.mrf.mxu3 }
 0x613   : > { %v6918_v17 = vadd.f32 %v6917_v14, %v15247_v30 }
 0x615   : > { %v7024_v56 = vrot.slane %v6918_v17, 2 }
 0x617   : > { %v7036_v24 = vsel %vm7029_vm5, %v7023_v63, %v7024_v56 }
 0x618   : > { %v7037_v45 = vsel %vm17422_vm6, %v7035_v25, %v7036_v24 }
 0x619   : > { %7047 = vst [vmem:[%s15280_s9 + $0x10] sm:$0xff] %v7037_v45 }
 0x635   : > { %v6937_v5 = vpop.f32.mrf.mxu0 }
 0x636   : > { %v6938_v15 = vadd.f32 %v6937_v5, %v15247_v30 }
 0x63a   : > { %v6957_v16 = vpop.f32.mrf.mxu1 }
 0x63b   : > { %v6958_v29 = vadd.f32 %v6957_v16, %v15247_v30 }
 0x63d   : > { %v7025_v50 = vrot.slane %v6958_v29, 6 }
 0x63f   : > { %v7038_v38 = vsel %vm17423_vm7, %v6938_v15, %v7025_v50 }
 0x665   : > { %v6977_v22 = vpop.f32.mrf.mxu2 }
 0x666   : > { %v6978_v28 = vadd.f32 %v6977_v22, %v15247_v30 }
 0x668   : > { %v7026_v8 = vrot.slane %v6978_v28, 4 }
 0x66a   : > { %v6997_v40 = vpop.f32.mrf.mxu3 }
 0x66b   : > { %v6998_v0 = vadd.f32 %v6997_v40, %v15247_v30 }
 0x66d   : > { %v7027_v51 = vrot.slane %v6998_v0, 2 }
 0x66f   : > { %v7039_v2 = vsel %vm7029_vm5, %v7026_v8, %v7027_v51 }
 0x670   : > { %v7040_v43 = vsel %vm17424_vm12, %v7038_v38, %v7039_v2 }
 0x671   : > { %7048 = vst [vmem:[%s15280_s9 + $0x18] sm:$0xff] %v7040_v43 }
 0x672   : > { %7968 = shalt.err (!%p7965_p4)
}
 0x673   : > { %7322 = dma.vmem_to_hbm [thread:$0]  (%p8100_p11), %s7064_s10, 512, %s7066_s22, %s7050_s28  }
 0x674 PF: > { %s7077_s15 = sand.u32 1, %s7995_s24   ;;  %p17425_p7 = scmp.ge.s32.totalorder %s8007_s27, 2 }
 0x675   : > { %s7078_s9 = scalar_lea.sflag [#allocation4], %s7077_s15 }
 0x676   : > { %p7329_p5 = pnand %p17425_p7, %p8104_p12 }
 0x678   : > { %p7330_p8 = pneg %p7329_p5 }
 0x67a   : > { %7990 = dma.done.wait (%p7330_p8), %s7078_s9, 512  }
 0x67b   : > { %7992 = vsyncadd (%p7330_p8), %s7078_s9, 4294966784  ;;  %s17426_s11 = sld [smem:[#allocation8_spill]]  ;;  %p20_p10 = scmp.ge.s32.totalorder %s8075_s30, 4  }
 0x67c   : > { %s17427_s24 = smov %s7999_s25  ;;  %s17428_s25 = smov %s8003_s26 }
 0x67d   : > { %s17430_s27 = smov %s8075_s30  ;;  %22 = sbr.rel (!%p20_p10) target bundleno = 5 (0x5), region = 112 }
 0x681   : > { %s17429_s26 = smov %s17426_s11 }
 0x682   :  { %7084 = vsyncpa [#allocation3], 1 }
 0x683   :  { %7086 = vsyncpa [#allocation3 + $0x1], 1 }
 0x684   :  { %7087 = vsyncpa [#allocation4], 1 }
 0x685   :  { %7089 = vsyncpa [#allocation4 + $0x1], 1 }

</bundles_post_ra>
